<compile_context>
chip_gen: v5e
topology: v5e:2x2
jax: 0.10.0
libtpu: 0.0.40
codegen_flags: <defaults>
</compile_context>

<pallas_src>
import functools

import numpy as np
import jax
import jax.numpy as jnp
from jax.experimental import pallas as pl
from jax.experimental.pallas import tpu as pltpu

_VMEM_LIMIT = 48 * 1024 * 1024          # explicit scoped-VMEM budget (all gens)
_TAP_FUSE_BYTES = 6 * 1024 * 1024       # max bf16 bytes for the fused-K slab


def _round_up(x, m):
    return ((x + m - 1) // m) * m


def _rpad(H, W):
    return _round_up((H + 3) * (W + 2), 128)


# ---------------------------------------------------------------------------
# Lane masks (host-side numpy constants; zero the wrap-around "garbage"
# columns so the kernel can write a valid P-layout border directly).
# ---------------------------------------------------------------------------
def _mask_std(H, W):
    wp = W + 2
    rows = H * wp
    p = np.arange(rows) + wp + 1                     # padded flat position
    valid = (p % wp >= 1) & (p % wp <= W) & (p // wp <= H)
    return valid.astype(np.float32).reshape(1, rows)


def _mask_down(Ho, Wo):
    wpo = Wo + 2
    rows = Ho * wpo
    t = np.arange(rows)
    return ((t % wpo) < Wo).astype(np.float32).reshape(1, rows)


# ---------------------------------------------------------------------------
# In-kernel helpers.
# ---------------------------------------------------------------------------
def _conv_stage(x_views, w_val, b_val, tap_offsets, rows, fuse_taps):
    """Direct conv as shifted-slab matmuls.  x_views: list of (Ci, Rpad) refs;
    w_val: (Co, T*sum(Ci)); returns f32 (Co, rows)."""
    ctot = sum(int(xv.shape[0]) for xv in x_views)
    if fuse_taps:
        # In-VMEM "im2col": one big contraction K = T*Ctot instead of T skinny
        # K=Ctot matmuls + T-1 full-tile f32 adds.
        parts = [xv[:, pl.ds(off, rows)] for off in tap_offsets for xv in x_views]
        kmat = parts[0] if len(parts) == 1 else jnp.concatenate(parts, axis=0)
        acc = jnp.dot(w_val, kmat, preferred_element_type=jnp.float32)
    else:
        acc = None
        for t, off in enumerate(tap_offsets):
            slabs = [xv[:, pl.ds(off, rows)] for xv in x_views]
            slab = slabs[0] if len(slabs) == 1 else jnp.concatenate(slabs, axis=0)
            part = jnp.dot(w_val[:, t * ctot:(t + 1) * ctot], slab,
                           preferred_element_type=jnp.float32)
            acc = part if acc is None else acc + part
    return acc + b_val


def _store_p(o_ref, data, lead, rows):
    """Write a full P-layout plane: lead zeros, masked data, trailing zeros."""
    co, rpad = o_ref.shape
    o_ref[:, 0:lead] = jnp.zeros((co, lead), o_ref.dtype)
    o_ref[:, lead:lead + rows] = data.astype(o_ref.dtype)
    o_ref[:, lead + rows:rpad] = jnp.zeros((co, rpad - lead - rows), o_ref.dtype)


# ---------------------------------------------------------------------------
# Kernel 1: generic fused conv (1..N P-layout inputs, bias+ReLU+mask epilogue,
# direct P-layout store or plain wide store).
# ---------------------------------------------------------------------------
def _conv_kernel(*refs, n_x, has_mask, tap_offsets, rows, relu, p_store, lead,
                 fuse_taps):
    x_refs = refs[:n_x]
    w_ref, b_ref = refs[n_x], refs[n_x + 1]
    mask_ref = refs[n_x + 2] if has_mask else None
    o_ref = refs[-1]

    acc = _conv_stage(x_refs, w_ref[...], b_ref[...], tap_offsets, rows,
                      fuse_taps)
    if relu:
        acc = jnp.maximum(acc, 0.0)
    if has_mask:
        acc = acc * mask_ref[...]
    if p_store:
        _store_p(o_ref, acc, lead, rows)
    else:
        o_ref[:, :] = acc.astype(o_ref.dtype)


def _conv_call(x_list, w_flat, b_col, *, tap_offsets, rows, relu, p_store,
               lead=0, rpad_out=0, mask=None):
    B = x_list[0].shape[0]
    co = w_flat.shape[0]
    ctot = sum(int(x.shape[1]) for x in x_list)
    fuse = len(tap_offsets) * ctot * rows * 2 <= _TAP_FUSE_BYTES

    kern = functools.partial(
        _conv_kernel, n_x=len(x_list), has_mask=mask is not None,
        tap_offsets=tuple(int(o) for o in tap_offsets), rows=int(rows),
        relu=relu, p_store=p_store, lead=int(lead), fuse_taps=fuse)

    in_specs = [pl.BlockSpec((None, int(x.shape[1]), int(x.shape[2])),
                             lambda b: (b, 0, 0)) for x in x_list]
    in_specs += [pl.BlockSpec(w_flat.shape, lambda b: (0, 0)),
                 pl.BlockSpec(b_col.shape, lambda b: (0, 0))]
    inputs = list(x_list) + [w_flat, b_col]
    if mask is not None:
        mask = jnp.asarray(mask)
        in_specs.append(pl.BlockSpec(mask.shape, lambda b: (0, 0)))
        inputs.append(mask)
    out_len = int(rpad_out) if p_store else int(rows)

    return pl.pallas_call(
        kern,
        out_shape=jax.ShapeDtypeStruct((B, co, out_len), jnp.bfloat16),
        grid=(B,),
        in_specs=in_specs,
        out_specs=pl.BlockSpec((None, co, out_len), lambda b: (b, 0, 0)),
        compiler_params=pltpu.CompilerParams(
            dimension_semantics=("parallel",),
            vmem_limit_bytes=_VMEM_LIMIT),
    )(*inputs)


# ---------------------------------------------------------------------------
# Kernel 2: whole EBlock/DBlock (num_res ResBlocks) in one pallas_call.
#   ResBlock: x = x + conv2(relu(conv1(x)));  all intermediates stay in VMEM.
# ---------------------------------------------------------------------------
def _block_kernel(x_ref, w_ref, b_ref, mask_ref, o_ref, a_ref, y_ref, *,
                  tap_offsets, rows, lead, num_res, fuse_taps):
    a_ref[...] = jnp.zeros_like(a_ref)           # running activation (borders 0)
    y_ref[...] = jnp.zeros_like(y_ref)           # ResBlock intermediate
    mask = mask_ref[...]
    for r in range(num_res):
        src = x_ref if r == 0 else a_ref
        h = _conv_stage([src], w_ref[2 * r, :, :], b_ref[2 * r, :, :],
                        tap_offsets, rows, fuse_taps)
        h = jnp.maximum(h, 0.0) * mask
        y_ref[:, lead:lead + rows] = h.astype(y_ref.dtype)

        out = _conv_stage([y_ref], w_ref[2 * r + 1, :, :], b_ref[2 * r + 1, :, :],
                          tap_offsets, rows, fuse_taps)
        out = out * mask + src[:, lead:lead + rows].astype(jnp.float32)
        if r == num_res - 1:
            _store_p(o_ref, out, lead, rows)      # direct P-layout output
        else:
            a_ref[:, lead:lead + rows] = out.astype(a_ref.dtype)


def run_block(xp, blk, H, W):
    B, C, rpad = xp.shape
    wp = W + 2
    rows = H * wp
    offs = tuple(di * wp + dj for di in range(3) for dj in range(3))
    mask = jnp.asarray(_mask_std(H, W))
    wb, bb = blk["w"], blk["b"]
    num_res = wb.shape[0] // 2
    fuse = 9 * C * rows * 2 <= _TAP_FUSE_BYTES

    kern = functools.partial(_block_kernel, tap_offsets=offs, rows=int(rows),
                             lead=int(W + 3), num_res=int(num_res),
                             fuse_taps=fuse)
    return pl.pallas_call(
        kern,
        out_shape=jax.ShapeDtypeStruct((B, C, rpad), jnp.bfloat16),
        grid=(B,),
        in_specs=[pl.BlockSpec((None, C, rpad), lambda b: (b, 0, 0)),
                  pl.BlockSpec(wb.shape, lambda b: (0, 0, 0)),
                  pl.BlockSpec(bb.shape, lambda b: (0, 0, 0)),
                  pl.BlockSpec(mask.shape, lambda b: (0, 0))],
        out_specs=pl.BlockSpec((None, C, rpad), lambda b: (b, 0, 0)),
        scratch_shapes=[pltpu.VMEM((C, rpad), jnp.bfloat16),
                        pltpu.VMEM((C, rpad), jnp.bfloat16)],
        compiler_params=pltpu.CompilerParams(
            dimension_semantics=("parallel",),
            vmem_limit_bytes=_VMEM_LIMIT),
    )(xp, wb, bb, mask)


# ---------------------------------------------------------------------------
# P-layout host glue (only at the network boundary / resolution changes).
# ---------------------------------------------------------------------------
def _to_p(x_nchw):
    B, C, H, W = x_nchw.shape
    x = jnp.pad(x_nchw, ((0, 0), (0, 0), (1, 2), (1, 1)))
    x = x.reshape(B, C, (H + 3) * (W + 2))
    x = jnp.pad(x, ((0, 0), (0, 0), (0, _rpad(H, W) - (H + 3) * (W + 2))))
    return x.astype(jnp.bfloat16)


def _from_p(xp, H, W):
    B, C, _ = xp.shape
    x = xp[:, :, :(H + 3) * (W + 2)].reshape(B, C, H + 3, W + 2)
    return x[:, :, 1:H + 1, 1:W + 1]


# ---------------------------------------------------------------------------
# Conv layer wrappers.
# ---------------------------------------------------------------------------
def conv3x3_p(x_list, w_flat, b_col, H, W):
    """3x3/s1/p1 + ReLU on one or more P-layout inputs (skip-concat fused)."""
    wp = W + 2
    offs = tuple(di * wp + dj for di in range(3) for dj in range(3))
    return _conv_call(x_list, w_flat, b_col, tap_offsets=offs, rows=H * wp,
                      relu=True, p_store=True, lead=W + 3,
                      rpad_out=_rpad(H, W), mask=_mask_std(H, W))


def conv_down_p(xp, w_flat, b_col, H, W):
    """3x3/s2/p1 + ReLU: space-to-depth -> stride-1 2x2 conv on 4C channels."""
    # TODO(synk): replace the XLA s2d with in-kernel stride-2 pl.ds tap reads.
    B, C, _ = xp.shape
    Ho, Wo = H // 2, W // 2
    wp, wpo = W + 2, Wo + 2
    x4 = xp[:, :, :(H + 3) * wp].reshape(B, C, H + 3, wp)[:, :, :H + 2, :]
    y = jnp.concatenate([x4[:, :, 0::2, 0::2], x4[:, :, 0::2, 1::2],
                         x4[:, :, 1::2, 0::2], x4[:, :, 1::2, 1::2]], axis=1)
    y = jnp.pad(y, ((0, 0), (0, 0), (0, 2), (0, 1)))
    y = y.reshape(B, 4 * C, (Ho + 3) * wpo)
    y = jnp.pad(y, ((0, 0), (0, 0), (0, _rpad(Ho, Wo) - (Ho + 3) * wpo)))
    offs = tuple(da * wpo + db for da in range(2) for db in range(2))
    out = _conv_call([y], w_flat, b_col, tap_offsets=offs, rows=Ho * wpo,
                     relu=True, p_store=True, lead=Wo + 3,
                     rpad_out=_rpad(Ho, Wo), mask=_mask_down(Ho, Wo))
    return out, Ho, Wo


def conv_up_p(xp, w_flat, b_col, H, W):
    """ConvTranspose2d(k=4,s=2,p=1) + ReLU: all 4 sub-pixel phases in ONE call
    (phase-stacked Co), then depth-to-space + P-pad in XLA."""
    # TODO(synk): emit the pixel shuffle via in-kernel strided/offset stores.
    B, _, _ = xp.shape
    wp = W + 2
    offs = tuple(u * wp + v for u in range(3) for v in range(3))
    co4 = w_flat.shape[0]
    co = co4 // 4
    wide = _conv_call([xp], w_flat, b_col, tap_offsets=offs, rows=H * wp,
                      relu=True, p_store=False)
    y = wide.reshape(B, 2, 2, co, H, wp)[:, :, :, :, :, :W]
    y = jnp.transpose(y, (0, 3, 4, 1, 5, 2)).reshape(B, co, 2 * H, 2 * W)
    return _to_p(y), 2 * H, 2 * W


# ---------------------------------------------------------------------------
# UNet forward.
# ---------------------------------------------------------------------------
def unet_forward(packed, x_nchw):
    B, Cin, H, W = x_nchw.shape
    fe = packed["feat_extract"]
    cin_pad = fe[0]["w"].shape[1] // 9
    x = jnp.pad(x_nchw, ((0, 0), (0, cin_pad - Cin), (0, 0), (0, 0)))
    xp = _to_p(x)

    # Feature Extract 0 + Encoder 0
    x_ = conv3x3_p([xp], fe[0]["w"], fe[0]["b"], H, W)
    res1 = run_block(x_, packed["Encoder"][0], H, W)
    # Down Sample 1 + Encoder 1
    z, H2, W2 = conv_down_p(res1, fe[1]["w"], fe[1]["b"], H, W)
    res2 = run_block(z, packed["Encoder"][1], H2, W2)
    # Down Sample 2 + Encoder 2
    z, H4, W4 = conv_down_p(res2, fe[2]["w"], fe[2]["b"], H2, W2)
    res3 = run_block(z, packed["Encoder"][2], H4, W4)
    deepz = res3
    # Up Sample 2 (+ skip res2 fused into the conv, no concat)
    z, _, _ = conv_up_p(res3, packed["up1"]["w"], packed["up1"]["b"], H4, W4)
    z = conv3x3_p([z, res2], fe[3]["w"], fe[3]["b"], H2, W2)
    z = run_block(z, packed["Decoder"][0], H2, W2)
    # Up Sample 1 (+ skip res1 fused into the conv, no concat)
    z, _, _ = conv_up_p(z, packed["up2"]["w"], packed["up2"]["b"], H2, W2)
    z = conv3x3_p([z, res1], fe[4]["w"], fe[4]["b"], H, W)
    z = run_block(z, packed["Decoder"][1], H, W)

    out = _from_p(z, H, W).astype(jnp.float32)
    dz = _from_p(deepz, H4, W4).astype(jnp.float32)
    return out, dz


# ---------------------------------------------------------------------------
# One-time weight packing (PyTorch layouts -> kernel-ready bf16 tap stacks).
# ---------------------------------------------------------------------------
def _pack_b(b):                                   # (Co,) -> (Co, 1) f32
    return b.reshape(-1, 1).astype(jnp.float32)


def _pack_w3_flat(w):                             # (Co,Ci,3,3) -> (Co, 9*Ci)
    co, ci = w.shape[0], w.shape[1]
    return jnp.transpose(w, (0, 2, 3, 1)).reshape(co, 9 * ci).astype(jnp.bfloat16)


def _pack_w3_s2_flat(w):                          # (Co,Ci,3,3) -> (Co, 4*4Ci)
    co, ci = w.shape[0], w.shape[1]
    w4 = jnp.pad(w, ((0, 0), (0, 0), (0, 1), (0, 1)))
    taps = []
    for da in range(2):
        for db in range(2):
            blocks = [w4[:, :, 2 * da + ri, 2 * db + rj]
                      for ri in range(2) for rj in range(2)]
            taps.append(jnp.concatenate(blocks, axis=1))
    return jnp.concatenate(taps, axis=1).astype(jnp.bfloat16)


def _pack_wT_flat(w):                             # (Ci,Co,4,4) -> (4*Co, 9*Ci)
    ci, co = w.shape[0], w.shape[1]
    P = ((3, 1), (2, 0))                          # phase/tap -> kernel index
    w9 = jnp.zeros((9, 4 * co, ci), jnp.float32)
    for ri in range(2):
        for rj in range(2):
            p = 2 * ri + rj
            for di in range(2):
                for dj in range(2):
                    t = 3 * (ri + di) + (rj + dj)
                    blk = jnp.transpose(w[:, :, P[ri][di], P[rj][dj]], (1, 0))
                    w9 = w9.at[t, p * co:(p + 1) * co, :].set(blk)
    return jnp.transpose(w9, (1, 0, 2)).reshape(4 * co, 9 * ci).astype(jnp.bfloat16)


def _pack_bT(b):                                  # (Co,) -> (4*Co, 1) f32
    return jnp.tile(b, 4).reshape(-1, 1).astype(jnp.float32)


def _pack_block(blk):
    ws, bs = [], []
    for p in blk:
        ws.append(_pack_w3_flat(p["w1"]))
        ws.append(_pack_w3_flat(p["w2"]))
        bs.append(_pack_b(p["b1"]))
        bs.append(_pack_b(p["b2"]))
    return {"w": jnp.stack(ws), "b": jnp.stack(bs)}


def pack_unet_params(params):
    fe = params["feat_extract"]
    in_ch = fe[0]["w"].shape[1]
    cin_pad = _round_up(in_ch, 8)
    w0 = jnp.pad(fe[0]["w"], ((0, 0), (0, cin_pad - in_ch), (0, 0), (0, 0)))
    packed_fe = [
        {"w": _pack_w3_flat(w0), "b": _pack_b(fe[0]["b"])},
        {"w": _pack_w3_s2_flat(fe[1]["w"]), "b": _pack_b(fe[1]["b"])},
        {"w": _pack_w3_s2_flat(fe[2]["w"]), "b": _pack_b(fe[2]["b"])},
        {"w": _pack_w3_flat(fe[3]["w"]), "b": _pack_b(fe[3]["b"])},
        {"w": _pack_w3_flat(fe[4]["w"]), "b": _pack_b(fe[4]["b"])},
    ]
    return {
        "feat_extract": packed_fe,
        "Encoder": [_pack_block(b) for b in params["Encoder"]],
        "Decoder": [_pack_block(b) for b in params["Decoder"]],
        "up1": {"w": _pack_wT_flat(params["up1"]["w"]),
                "b": _pack_bT(params["up1"]["b"])},
        "up2": {"w": _pack_wT_flat(params["up2"]["w"]),
                "b": _pack_bT(params["up2"]["b"])},
    }


# ---------------------------------------------------------------------------
# Deterministic parameter construction (PyTorch layouts).
# ---------------------------------------------------------------------------
def _conv_init(key, co, ci, kh, kw):
    k1, k2 = jax.random.split(key)
    fan_in = ci * kh * kw
    w = jax.random.normal(k1, (co, ci, kh, kw), jnp.float32) / jnp.sqrt(fan_in)
    b = 0.01 * jax.random.normal(k2, (co,), jnp.float32)
    return w, b


def _convT_init(key, ci, co, kh, kw):
    k1, k2 = jax.random.split(key)
    fan_in = ci * kh * kw
    w = jax.random.normal(k1, (ci, co, kh, kw), jnp.float32) / jnp.sqrt(fan_in)
    b = 0.01 * jax.random.normal(k2, (co,), jnp.float32)
    return w, b


def _resblock_init(key, ch):
    k1, k2 = jax.random.split(key)
    w1, b1 = _conv_init(k1, ch, ch, 3, 3)
    w2, b2 = _conv_init(k2, ch, ch, 3, 3)
    return {"w1": w1, "b1": b1, "w2": w2, "b2": b2}


def make_unet_params(key, in_ch=3, base_ch=16, num_res=2):
    keys = jax.random.split(key, 32)
    ki = iter(keys)
    C = base_ch
    fe_shapes = [(C, in_ch), (2 * C, C), (4 * C, 2 * C), (2 * C, 4 * C), (C, 2 * C)]
    feat_extract = []
    for co, ci in fe_shapes:
        w, b = _conv_init(next(ki), co, ci, 3, 3)
        feat_extract.append({"w": w, "b": b})
    enc = [[_resblock_init(next(ki), ch) for _ in range(num_res)]
           for ch in (C, 2 * C, 4 * C)]
    dec = [[_resblock_init(next(ki), ch) for _ in range(num_res)]
           for ch in (2 * C, C)]
    w_up1, b_up1 = _convT_init(next(ki), 4 * C, 2 * C, 4, 4)
    w_up2, b_up2 = _convT_init(next(ki), 2 * C, C, 4, 4)
    return {
        "feat_extract": feat_extract,
        "Encoder": enc,
        "Decoder": dec,
        "up1": {"w": w_up1, "b": b_up1},
        "up2": {"w": w_up2, "b": b_up2},
    }


if __name__ == "__main__":
    key = jax.random.PRNGKey(0)
    kp, kx = jax.random.split(key)
    in_ch, base_ch, num_res = 3, 16, 2
    params = make_unet_params(kp, in_ch=in_ch, base_ch=base_ch, num_res=num_res)
    packed = pack_unet_params(params)           # one-time weight pre-packing

    x = jax.random.normal(kx, (2, in_ch, 16, 16), jnp.float32)  # NCHW
    fwd = jax.jit(unet_forward)
    z, deepz = fwd(packed, x)
    z = jax.block_until_ready(z)
    deepz = jax.block_until_ready(deepz)

    assert z.shape == (2, base_ch, 16, 16), z.shape
    assert deepz.shape == (2, 4 * base_ch, 4, 4), deepz.shape
    print("KERNEL_OK")
</pallas_src>

<mosaic_0001>
module attributes {stable_mosaic.version = 11 : i64} {
  func.func @_conv_kernel(%arg0: i32, %arg1: memref<1x8x384xbf16, #tpu.memory_space<vmem>>, %arg2: memref<16x72xbf16, #tpu.memory_space<vmem>>, %arg3: memref<16x1xf32, #tpu.memory_space<vmem>>, %arg4: memref<1x288xf32, #tpu.memory_space<vmem>>, %arg5: memref<1x16x384xbf16, #tpu.memory_space<vmem>>) attributes {dimension_semantics = [#tpu.dimension_semantics<parallel>], iteration_bounds = array<i64: 2>, scalar_prefetch = 0 : i64, scratch_operands = 0 : i64, tpu.core_type = #tpu.core_type<tc>, window_params = [{transform_indices = @transform_0, window_bounds = array<i64: 1, 8, 384>}, {pipeline_mode = #tpu.pipeline_mode<synchronous>, transform_indices = @transform_1, window_bounds = array<i64: 16, 72>}, {pipeline_mode = #tpu.pipeline_mode<synchronous>, transform_indices = @transform_2, window_bounds = array<i64: 16, 1>}, {pipeline_mode = #tpu.pipeline_mode<synchronous>, transform_indices = @transform_3, window_bounds = array<i64: 1, 288>}, {transform_indices = @transform_4, window_bounds = array<i64: 1, 16, 384>}]} {
    %c0 = arith.constant 0 : index
    %c0_0 = arith.constant 0 : index
    %0 = vector.load %arg2[%c0, %c0_0] : memref<16x72xbf16, #tpu.memory_space<vmem>>, vector<16x72xbf16>
    %c0_1 = arith.constant 0 : index
    %c0_2 = arith.constant 0 : index
    %1 = vector.load %arg3[%c0_1, %c0_2] : memref<16x1xf32, #tpu.memory_space<vmem>>, vector<16x1xf32>
    %c0_3 = arith.constant 0 : index
    %c0_4 = arith.constant 0 : index
    %c0_5 = arith.constant 0 : index
    %2 = vector.load %arg1[%c0_3, %c0_4, %c0_5] : memref<1x8x384xbf16, #tpu.memory_space<vmem>>, vector<1x8x288xbf16>
    %3 = vector.shape_cast %2 : vector<1x8x288xbf16> to vector<8x288xbf16>
    %c0_6 = arith.constant 0 : index
    %c0_7 = arith.constant 0 : index
    %c1 = arith.constant 1 : index
    %4 = vector.load %arg1[%c0_6, %c0_7, %c1] : memref<1x8x384xbf16, #tpu.memory_space<vmem>>, vector<1x8x288xbf16>
    %5 = vector.shape_cast %4 : vector<1x8x288xbf16> to vector<8x288xbf16>
    %c0_8 = arith.constant 0 : index
    %c0_9 = arith.constant 0 : index
    %c2 = arith.constant 2 : index
    %6 = vector.load %arg1[%c0_8, %c0_9, %c2] : memref<1x8x384xbf16, #tpu.memory_space<vmem>>, vector<1x8x288xbf16>
    %7 = vector.shape_cast %6 : vector<1x8x288xbf16> to vector<8x288xbf16>
    %c0_10 = arith.constant 0 : index
    %c0_11 = arith.constant 0 : index
    %c18 = arith.constant 18 : index
    %8 = vector.load %arg1[%c0_10, %c0_11, %c18] : memref<1x8x384xbf16, #tpu.memory_space<vmem>>, vector<1x8x288xbf16>
    %9 = vector.shape_cast %8 : vector<1x8x288xbf16> to vector<8x288xbf16>
    %c0_12 = arith.constant 0 : index
    %c0_13 = arith.constant 0 : index
    %c19 = arith.constant 19 : index
    %10 = vector.load %arg1[%c0_12, %c0_13, %c19] : memref<1x8x384xbf16, #tpu.memory_space<vmem>>, vector<1x8x288xbf16>
    %11 = vector.shape_cast %10 : vector<1x8x288xbf16> to vector<8x288xbf16>
    %c0_14 = arith.constant 0 : index
    %c0_15 = arith.constant 0 : index
    %c20 = arith.constant 20 : index
    %12 = vector.load %arg1[%c0_14, %c0_15, %c20] : memref<1x8x384xbf16, #tpu.memory_space<vmem>>, vector<1x8x288xbf16>
    %13 = vector.shape_cast %12 : vector<1x8x288xbf16> to vector<8x288xbf16>
    %c0_16 = arith.constant 0 : index
    %c0_17 = arith.constant 0 : index
    %c36 = arith.constant 36 : index
    %14 = vector.load %arg1[%c0_16, %c0_17, %c36] : memref<1x8x384xbf16, #tpu.memory_space<vmem>>, vector<1x8x288xbf16>
    %15 = vector.shape_cast %14 : vector<1x8x288xbf16> to vector<8x288xbf16>
    %c0_18 = arith.constant 0 : index
    %c0_19 = arith.constant 0 : index
    %c37 = arith.constant 37 : index
    %16 = vector.load %arg1[%c0_18, %c0_19, %c37] : memref<1x8x384xbf16, #tpu.memory_space<vmem>>, vector<1x8x288xbf16>
    %17 = vector.shape_cast %16 : vector<1x8x288xbf16> to vector<8x288xbf16>
    %c0_20 = arith.constant 0 : index
    %c0_21 = arith.constant 0 : index
    %c38 = arith.constant 38 : index
    %18 = vector.load %arg1[%c0_20, %c0_21, %c38] : memref<1x8x384xbf16, #tpu.memory_space<vmem>>, vector<1x8x288xbf16>
    %19 = vector.shape_cast %18 : vector<1x8x288xbf16> to vector<8x288xbf16>
    %20 = tpu.concatenate %3, %5, %7, %9, %11, %13, %15, %17, %19 in 0 : vector<8x288xbf16>, vector<8x288xbf16>, vector<8x288xbf16>, vector<8x288xbf16>, vector<8x288xbf16>, vector<8x288xbf16>, vector<8x288xbf16>, vector<8x288xbf16>, vector<8x288xbf16> -> vector<72x288xbf16>
    %cst = arith.constant dense<0.000000e+00> : vector<16x288xf32>
    %21 = tpu.matmul %0, %20, %cst {dimension_numbers = #tpu.dot_dimension_numbers<[1], [0], [0], [1], [0, 0, 1, 1], [], []>} : vector<16x72xbf16>, vector<72x288xbf16>, vector<16x288xf32> -> vector<16x288xf32>
    %22 = vector.broadcast %1 : vector<16x1xf32> to vector<16x288xf32>
    %23 = arith.addf %21, %22 : vector<16x288xf32>
    %cst_22 = arith.constant 0.000000e+00 : f32
    %24 = vector.broadcast %cst_22 : f32 to vector<16x288xf32>
    %25 = arith.maximumf %23, %24 : vector<16x288xf32>
    %c0_23 = arith.constant 0 : index
    %c0_24 = arith.constant 0 : index
    %26 = vector.load %arg4[%c0_23, %c0_24] : memref<1x288xf32, #tpu.memory_space<vmem>>, vector<1x288xf32>
    %27 = vector.broadcast %26 : vector<1x288xf32> to vector<16x288xf32>
    %28 = arith.mulf %25, %27 : vector<16x288xf32>
    %cst_25 = arith.constant 0.000000e+00 : bf16
    %29 = vector.broadcast %cst_25 : bf16 to vector<16x19xbf16>
    %c0_26 = arith.constant 0 : index
    %c0_27 = arith.constant 0 : index
    %c0_28 = arith.constant 0 : index
    %30 = vector.load %arg5[%c0_26, %c0_27, %c0_28] : memref<1x16x384xbf16, #tpu.memory_space<vmem>>, vector<1x16x19xbf16>
    %31 = vector.shape_cast %30 : vector<1x16x19xbf16> to vector<16x19xbf16>
    %32 = vector.shape_cast %29 : vector<16x19xbf16> to vector<1x16x19xbf16>
    tpu.vector_store %arg5[%c0_26, %c0_27, %c0_28], %32 {strides = array<i32>} : memref<1x16x384xbf16, #tpu.memory_space<vmem>>, vector<1x16x19xbf16>,
    %33 = arith.truncf %28 : vector<16x288xf32> to vector<16x288xbf16>
    %c0_29 = arith.constant 0 : index
    %c0_30 = arith.constant 0 : index
    %c19_31 = arith.constant 19 : index
    %34 = vector.load %arg5[%c0_29, %c0_30, %c19_31] : memref<1x16x384xbf16, #tpu.memory_space<vmem>>, vector<1x16x288xbf16>
    %35 = vector.shape_cast %34 : vector<1x16x288xbf16> to vector<16x288xbf16>
    %36 = vector.shape_cast %33 : vector<16x288xbf16> to vector<1x16x288xbf16>
    tpu.vector_store %arg5[%c0_29, %c0_30, %c19_31], %36 {strides = array<i32>} : memref<1x16x384xbf16, #tpu.memory_space<vmem>>, vector<1x16x288xbf16>,
    %cst_32 = arith.constant 0.000000e+00 : bf16
    %37 = vector.broadcast %cst_32 : bf16 to vector<16x77xbf16>
    %c0_33 = arith.constant 0 : index
    %c0_34 = arith.constant 0 : index
    %c307 = arith.constant 307 : index
    %38 = vector.load %arg5[%c0_33, %c0_34, %c307] : memref<1x16x384xbf16, #tpu.memory_space<vmem>>, vector<1x16x77xbf16>
    %39 = vector.shape_cast %38 : vector<1x16x77xbf16> to vector<16x77xbf16>
    %40 = vector.shape_cast %37 : vector<16x77xbf16> to vector<1x16x77xbf16>
    tpu.vector_store %arg5[%c0_33, %c0_34, %c307], %40 {strides = array<i32>} : memref<1x16x384xbf16, #tpu.memory_space<vmem>>, vector<1x16x77xbf16>,
    return
  }
  func.func @transform_0(%arg0: i32) -> (i32, i32, i32) {
    %c0_i32 = arith.constant 0 : i32
    %c0_i32_0 = arith.constant 0 : i32
    %c0_i32_1 = arith.constant 0 : i32
    return %arg0, %c0_i32, %c0_i32_0 : i32, i32, i32
  }
  func.func @transform_1(%arg0: i32) -> (i32, i32) {
    %c0_i32 = arith.constant 0 : i32
    %c0_i32_0 = arith.constant 0 : i32
    %c0_i32_1 = arith.constant 0 : i32
    return %c0_i32, %c0_i32_0 : i32, i32
  }
  func.func @transform_2(%arg0: i32) -> (i32, i32) {
    %c0_i32 = arith.constant 0 : i32
    %c0_i32_0 = arith.constant 0 : i32
    %c0_i32_1 = arith.constant 0 : i32
    return %c0_i32, %c0_i32_0 : i32, i32
  }
  func.func @transform_3(%arg0: i32) -> (i32, i32) {
    %c0_i32 = arith.constant 0 : i32
    %c0_i32_0 = arith.constant 0 : i32
    %c0_i32_1 = arith.constant 0 : i32
    return %c0_i32, %c0_i32_0 : i32, i32
  }
  func.func @transform_4(%arg0: i32) -> (i32, i32, i32) {
    %c0_i32 = arith.constant 0 : i32
    %c0_i32_0 = arith.constant 0 : i32
    %c0_i32_1 = arith.constant 0 : i32
    return %arg0, %c0_i32, %c0_i32_0 : i32, i32, i32
  }
}

module attributes {stable_mosaic.version = 11 : i64} {
  func.func @_block_kernel(%arg0: i32, %arg1: memref<1x16x384xbf16, #tpu.memory_space<vmem>>, %arg2: memref<4x16x144xbf16, #tpu.memory_space<vmem>>, %arg3: memref<4x16x1xf32, #tpu.memory_space<vmem>>, %arg4: memref<1x288xf32, #tpu.memory_space<vmem>>, %arg5: memref<1x16x384xbf16, #tpu.memory_space<vmem>>, %arg6: memref<16x384xbf16, #tpu.memory_space<vmem>>, %arg7: memref<16x384xbf16, #tpu.memory_space<vmem>>) attributes {dimension_semantics = [#tpu.dimension_semantics<parallel>], iteration_bounds = array<i64: 2>, scalar_prefetch = 0 : i64, scratch_operands = 2 : i64, tpu.core_type = #tpu.core_type<tc>, window_params = [{transform_indices = @transform_0, window_bounds = array<i64: 1, 16, 384>}, {pipeline_mode = #tpu.pipeline_mode<synchronous>, transform_indices = @transform_1, window_bounds = array<i64: 4, 16, 144>}, {pipeline_mode = #tpu.pipeline_mode<synchronous>, transform_indices = @transform_2, window_bounds = array<i64: 4, 16, 1>}, {pipeline_mode = #tpu.pipeline_mode<synchronous>, transform_indices = @transform_3, window_bounds = array<i64: 1, 288>}, {transform_indices = @transform_4, window_bounds = array<i64: 1, 16, 384>}]} {
    %cst = arith.constant 0.000000e+00 : bf16
    %0 = vector.broadcast %cst : bf16 to vector<16x384xbf16>
    %c0 = arith.constant 0 : index
    %c0_0 = arith.constant 0 : index
    %1 = vector.load %arg6[%c0, %c0_0] : memref<16x384xbf16, #tpu.memory_space<vmem>>, vector<16x384xbf16>
    tpu.vector_store %arg6[%c0, %c0_0], %0 {strides = array<i32>} : memref<16x384xbf16, #tpu.memory_space<vmem>>, vector<16x384xbf16>,
    %cst_1 = arith.constant 0.000000e+00 : bf16
    %2 = vector.broadcast %cst_1 : bf16 to vector<16x384xbf16>
    %c0_2 = arith.constant 0 : index
    %c0_3 = arith.constant 0 : index
    %3 = vector.load %arg7[%c0_2, %c0_3] : memref<16x384xbf16, #tpu.memory_space<vmem>>, vector<16x384xbf16>
    tpu.vector_store %arg7[%c0_2, %c0_3], %2 {strides = array<i32>} : memref<16x384xbf16, #tpu.memory_space<vmem>>, vector<16x384xbf16>,
    %c0_4 = arith.constant 0 : index
    %c0_5 = arith.constant 0 : index
    %4 = vector.load %arg4[%c0_4, %c0_5] : memref<1x288xf32, #tpu.memory_space<vmem>>, vector<1x288xf32>
    %c0_6 = arith.constant 0 : index
    %c0_7 = arith.constant 0 : index
    %c0_8 = arith.constant 0 : index
    %5 = vector.load %arg2[%c0_6, %c0_7, %c0_8] : memref<4x16x144xbf16, #tpu.memory_space<vmem>>, vector<1x16x144xbf16>
    %6 = vector.shape_cast %5 : vector<1x16x144xbf16> to vector<16x144xbf16>
    %c0_9 = arith.constant 0 : index
    %c0_10 = arith.constant 0 : index
    %c0_11 = arith.constant 0 : index
    %7 = vector.load %arg3[%c0_9, %c0_10, %c0_11] : memref<4x16x1xf32, #tpu.memory_space<vmem>>, vector<1x16x1xf32>
    %8 = vector.shape_cast %7 : vector<1x16x1xf32> to vector<16x1xf32>
    %c0_12 = arith.constant 0 : index
    %c0_13 = arith.constant 0 : index
    %c0_14 = arith.constant 0 : index
    %9 = vector.load %arg1[%c0_12, %c0_13, %c0_14] : memref<1x16x384xbf16, #tpu.memory_space<vmem>>, vector<1x16x288xbf16>
    %10 = vector.shape_cast %9 : vector<1x16x288xbf16> to vector<16x288xbf16>
    %c0_15 = arith.constant 0 : index
    %c0_16 = arith.constant 0 : index
    %c1 = arith.constant 1 : index
    %11 = vector.load %arg1[%c0_15, %c0_16, %c1] : memref<1x16x384xbf16, #tpu.memory_space<vmem>>, vector<1x16x288xbf16>
    %12 = vector.shape_cast %11 : vector<1x16x288xbf16> to vector<16x288xbf16>
    %c0_17 = arith.constant 0 : index
    %c0_18 = arith.constant 0 : index
    %c2 = arith.constant 2 : index
    %13 = vector.load %arg1[%c0_17, %c0_18, %c2] : memref<1x16x384xbf16, #tpu.memory_space<vmem>>, vector<1x16x288xbf16>
    %14 = vector.shape_cast %13 : vector<1x16x288xbf16> to vector<16x288xbf16>
    %c0_19 = arith.constant 0 : index
    %c0_20 = arith.constant 0 : index
    %c18 = arith.constant 18 : index
    %15 = vector.load %arg1[%c0_19, %c0_20, %c18] : memref<1x16x384xbf16, #tpu.memory_space<vmem>>, vector<1x16x288xbf16>
    %16 = vector.shape_cast %15 : vector<1x16x288xbf16> to vector<16x288xbf16>
    %c0_21 = arith.constant 0 : index
    %c0_22 = arith.constant 0 : index
    %c19 = arith.constant 19 : index
    %17 = vector.load %arg1[%c0_21, %c0_22, %c19] : memref<1x16x384xbf16, #tpu.memory_space<vmem>>, vector<1x16x288xbf16>
    %18 = vector.shape_cast %17 : vector<1x16x288xbf16> to vector<16x288xbf16>
    %c0_23 = arith.constant 0 : index
    %c0_24 = arith.constant 0 : index
    %c20 = arith.constant 20 : index
    %19 = vector.load %arg1[%c0_23, %c0_24, %c20] : memref<1x16x384xbf16, #tpu.memory_space<vmem>>, vector<1x16x288xbf16>
    %20 = vector.shape_cast %19 : vector<1x16x288xbf16> to vector<16x288xbf16>
    %c0_25 = arith.constant 0 : index
    %c0_26 = arith.constant 0 : index
    %c36 = arith.constant 36 : index
    %21 = vector.load %arg1[%c0_25, %c0_26, %c36] : memref<1x16x384xbf16, #tpu.memory_space<vmem>>, vector<1x16x288xbf16>
    %22 = vector.shape_cast %21 : vector<1x16x288xbf16> to vector<16x288xbf16>
    %c0_27 = arith.constant 0 : index
    %c0_28 = arith.constant 0 : index
    %c37 = arith.constant 37 : index
    %23 = vector.load %arg1[%c0_27, %c0_28, %c37] : memref<1x16x384xbf16, #tpu.memory_space<vmem>>, vector<1x16x288xbf16>
    %24 = vector.shape_cast %23 : vector<1x16x288xbf16> to vector<16x288xbf16>
    %c0_29 = arith.constant 0 : index
    %c0_30 = arith.constant 0 : index
    %c38 = arith.constant 38 : index
    %25 = vector.load %arg1[%c0_29, %c0_30, %c38] : memref<1x16x384xbf16, #tpu.memory_space<vmem>>, vector<1x16x288xbf16>
    %26 = vector.shape_cast %25 : vector<1x16x288xbf16> to vector<16x288xbf16>
    %27 = tpu.concatenate %10, %12, %14, %16, %18, %20, %22, %24, %26 in 0 : vector<16x288xbf16>, vector<16x288xbf16>, vector<16x288xbf16>, vector<16x288xbf16>, vector<16x288xbf16>, vector<16x288xbf16>, vector<16x288xbf16>, vector<16x288xbf16>, vector<16x288xbf16> -> vector<144x288xbf16>
    %cst_31 = arith.constant dense<0.000000e+00> : vector<16x288xf32>
    %28 = tpu.matmul %6, %27, %cst_31 {dimension_numbers = #tpu.dot_dimension_numbers<[1], [0], [0], [1], [0, 0, 1, 1], [], []>} : vector<16x144xbf16>, vector<144x288xbf16>, vector<16x288xf32> -> vector<16x288xf32>
    %29 = vector.broadcast %8 : vector<16x1xf32> to vector<16x288xf32>
    %30 = arith.addf %28, %29 : vector<16x288xf32>
    %cst_32 = arith.constant 0.000000e+00 : f32
    %31 = vector.broadcast %cst_32 : f32 to vector<16x288xf32>
    %32 = arith.maximumf %30, %31 : vector<16x288xf32>
    %33 = vector.broadcast %4 : vector<1x288xf32> to vector<16x288xf32>
    %34 = arith.mulf %32, %33 : vector<16x288xf32>
    %35 = arith.truncf %34 : vector<16x288xf32> to vector<16x288xbf16>
    %c0_33 = arith.constant 0 : index
    %c19_34 = arith.constant 19 : index
    %36 = vector.load %arg7[%c0_33, %c19_34] : memref<16x384xbf16, #tpu.memory_space<vmem>>, vector<16x288xbf16>
    tpu.vector_store %arg7[%c0_33, %c19_34], %35 {strides = array<i32>} : memref<16x384xbf16, #tpu.memory_space<vmem>>, vector<16x288xbf16>,
    %c1_35 = arith.constant 1 : index
    %c0_36 = arith.constant 0 : index
    %c0_37 = arith.constant 0 : index
    %37 = vector.load %arg2[%c1_35, %c0_36, %c0_37] : memref<4x16x144xbf16, #tpu.memory_space<vmem>>, vector<1x16x144xbf16>
    %38 = vector.shape_cast %37 : vector<1x16x144xbf16> to vector<16x144xbf16>
    %c1_38 = arith.constant 1 : index
    %c0_39 = arith.constant 0 : index
    %c0_40 = arith.constant 0 : index
    %39 = vector.load %arg3[%c1_38, %c0_39, %c0_40] : memref<4x16x1xf32, #tpu.memory_space<vmem>>, vector<1x16x1xf32>
    %40 = vector.shape_cast %39 : vector<1x16x1xf32> to vector<16x1xf32>
    %c0_41 = arith.constant 0 : index
    %c0_42 = arith.constant 0 : index
    %41 = vector.load %arg7[%c0_41, %c0_42] : memref<16x384xbf16, #tpu.memory_space<vmem>>, vector<16x288xbf16>
    %c0_43 = arith.constant 0 : index
    %c1_44 = arith.constant 1 : index
    %42 = vector.load %arg7[%c0_43, %c1_44] : memref<16x384xbf16, #tpu.memory_space<vmem>>, vector<16x288xbf16>
    %c0_45 = arith.constant 0 : index
    %c2_46 = arith.constant 2 : index
    %43 = vector.load %arg7[%c0_45, %c2_46] : memref<16x384xbf16, #tpu.memory_space<vmem>>, vector<16x288xbf16>
    %c0_47 = arith.constant 0 : index
    %c18_48 = arith.constant 18 : index
    %44 = vector.load %arg7[%c0_47, %c18_48] : memref<16x384xbf16, #tpu.memory_space<vmem>>, vector<16x288xbf16>
    %c0_49 = arith.constant 0 : index
    %c19_50 = arith.constant 19 : index
    %45 = vector.load %arg7[%c0_49, %c19_50] : memref<16x384xbf16, #tpu.memory_space<vmem>>, vector<16x288xbf16>
    %c0_51 = arith.constant 0 : index
    %c20_52 = arith.constant 20 : index
    %46 = vector.load %arg7[%c0_51, %c20_52] : memref<16x384xbf16, #tpu.memory_space<vmem>>, vector<16x288xbf16>
    %c0_53 = arith.constant 0 : index
    %c36_54 = arith.constant 36 : index
    %47 = vector.load %arg7[%c0_53, %c36_54] : memref<16x384xbf16, #tpu.memory_space<vmem>>, vector<16x288xbf16>
    %c0_55 = arith.constant 0 : index
    %c37_56 = arith.constant 37 : index
    %48 = vector.load %arg7[%c0_55, %c37_56] : memref<16x384xbf16, #tpu.memory_space<vmem>>, vector<16x288xbf16>
    %c0_57 = arith.constant 0 : index
    %c38_58 = arith.constant 38 : index
    %49 = vector.load %arg7[%c0_57, %c38_58] : memref<16x384xbf16, #tpu.memory_space<vmem>>, vector<16x288xbf16>
    %50 = tpu.concatenate %41, %42, %43, %44, %45, %46, %47, %48, %49 in 0 : vector<16x288xbf16>, vector<16x288xbf16>, vector<16x288xbf16>, vector<16x288xbf16>, vector<16x288xbf16>, vector<16x288xbf16>, vector<16x288xbf16>, vector<16x288xbf16>, vector<16x288xbf16> -> vector<144x288xbf16>
    %cst_59 = arith.constant dense<0.000000e+00> : vector<16x288xf32>
    %51 = tpu.matmul %38, %50, %cst_59 {dimension_numbers = #tpu.dot_dimension_numbers<[1], [0], [0], [1], [0, 0, 1, 1], [], []>} : vector<16x144xbf16>, vector<144x288xbf16>, vector<16x288xf32> -> vector<16x288xf32>
    %52 = vector.broadcast %40 : vector<16x1xf32> to vector<16x288xf32>
    %53 = arith.addf %51, %52 : vector<16x288xf32>
    %54 = vector.broadcast %4 : vector<1x288xf32> to vector<16x288xf32>
    %55 = arith.mulf %53, %54 : vector<16x288xf32>
    %c0_60 = arith.constant 0 : index
    %c0_61 = arith.constant 0 : index
    %c19_62 = arith.constant 19 : index
    %56 = vector.load %arg1[%c0_60, %c0_61, %c19_62] : memref<1x16x384xbf16, #tpu.memory_space<vmem>>, vector<1x16x288xbf16>
    %57 = vector.shape_cast %56 : vector<1x16x288xbf16> to vector<16x288xbf16>
    %58 = arith.extf %57 : vector<16x288xbf16> to vector<16x288xf32>
    %59 = arith.addf %55, %58 : vector<16x288xf32>
    %60 = arith.truncf %59 : vector<16x288xf32> to vector<16x288xbf16>
    %c0_63 = arith.constant 0 : index
    %c19_64 = arith.constant 19 : index
    %61 = vector.load %arg6[%c0_63, %c19_64] : memref<16x384xbf16, #tpu.memory_space<vmem>>, vector<16x288xbf16>
    tpu.vector_store %arg6[%c0_63, %c19_64], %60 {strides = array<i32>} : memref<16x384xbf16, #tpu.memory_space<vmem>>, vector<16x288xbf16>,
    %c2_65 = arith.constant 2 : index
    %c0_66 = arith.constant 0 : index
    %c0_67 = arith.constant 0 : index
    %62 = vector.load %arg2[%c2_65, %c0_66, %c0_67] : memref<4x16x144xbf16, #tpu.memory_space<vmem>>, vector<1x16x144xbf16>
    %63 = vector.shape_cast %62 : vector<1x16x144xbf16> to vector<16x144xbf16>
    %c2_68 = arith.constant 2 : index
    %c0_69 = arith.constant 0 : index
    %c0_70 = arith.constant 0 : index
    %64 = vector.load %arg3[%c2_68, %c0_69, %c0_70] : memref<4x16x1xf32, #tpu.memory_space<vmem>>, vector<1x16x1xf32>
    %65 = vector.shape_cast %64 : vector<1x16x1xf32> to vector<16x1xf32>
    %c0_71 = arith.constant 0 : index
    %c0_72 = arith.constant 0 : index
    %66 = vector.load %arg6[%c0_71, %c0_72] : memref<16x384xbf16, #tpu.memory_space<vmem>>, vector<16x288xbf16>
    %c0_73 = arith.constant 0 : index
    %c1_74 = arith.constant 1 : index
    %67 = vector.load %arg6[%c0_73, %c1_74] : memref<16x384xbf16, #tpu.memory_space<vmem>>, vector<16x288xbf16>
    %c0_75 = arith.constant 0 : index
    %c2_76 = arith.constant 2 : index
    %68 = vector.load %arg6[%c0_75, %c2_76] : memref<16x384xbf16, #tpu.memory_space<vmem>>, vector<16x288xbf16>
    %c0_77 = arith.constant 0 : index
    %c18_78 = arith.constant 18 : index
    %69 = vector.load %arg6[%c0_77, %c18_78] : memref<16x384xbf16, #tpu.memory_space<vmem>>, vector<16x288xbf16>
    %c0_79 = arith.constant 0 : index
    %c19_80 = arith.constant 19 : index
    %70 = vector.load %arg6[%c0_79, %c19_80] : memref<16x384xbf16, #tpu.memory_space<vmem>>, vector<16x288xbf16>
    %c0_81 = arith.constant 0 : index
    %c20_82 = arith.constant 20 : index
    %71 = vector.load %arg6[%c0_81, %c20_82] : memref<16x384xbf16, #tpu.memory_space<vmem>>, vector<16x288xbf16>
    %c0_83 = arith.constant 0 : index
    %c36_84 = arith.constant 36 : index
    %72 = vector.load %arg6[%c0_83, %c36_84] : memref<16x384xbf16, #tpu.memory_space<vmem>>, vector<16x288xbf16>
    %c0_85 = arith.constant 0 : index
    %c37_86 = arith.constant 37 : index
    %73 = vector.load %arg6[%c0_85, %c37_86] : memref<16x384xbf16, #tpu.memory_space<vmem>>, vector<16x288xbf16>
    %c0_87 = arith.constant 0 : index
    %c38_88 = arith.constant 38 : index
    %74 = vector.load %arg6[%c0_87, %c38_88] : memref<16x384xbf16, #tpu.memory_space<vmem>>, vector<16x288xbf16>
    %75 = tpu.concatenate %66, %67, %68, %69, %70, %71, %72, %73, %74 in 0 : vector<16x288xbf16>, vector<16x288xbf16>, vector<16x288xbf16>, vector<16x288xbf16>, vector<16x288xbf16>, vector<16x288xbf16>, vector<16x288xbf16>, vector<16x288xbf16>, vector<16x288xbf16> -> vector<144x288xbf16>
    %cst_89 = arith.constant dense<0.000000e+00> : vector<16x288xf32>
    %76 = tpu.matmul %63, %75, %cst_89 {dimension_numbers = #tpu.dot_dimension_numbers<[1], [0], [0], [1], [0, 0, 1, 1], [], []>} : vector<16x144xbf16>, vector<144x288xbf16>, vector<16x288xf32> -> vector<16x288xf32>
    %77 = vector.broadcast %65 : vector<16x1xf32> to vector<16x288xf32>
    %78 = arith.addf %76, %77 : vector<16x288xf32>
    %cst_90 = arith.constant 0.000000e+00 : f32
    %79 = vector.broadcast %cst_90 : f32 to vector<16x288xf32>
    %80 = arith.maximumf %78, %79 : vector<16x288xf32>
    %81 = vector.broadcast %4 : vector<1x288xf32> to vector<16x288xf32>
    %82 = arith.mulf %80, %81 : vector<16x288xf32>
    %83 = arith.truncf %82 : vector<16x288xf32> to vector<16x288xbf16>
    %c0_91 = arith.constant 0 : index
    %c19_92 = arith.constant 19 : index
    %84 = vector.load %arg7[%c0_91, %c19_92] : memref<16x384xbf16, #tpu.memory_space<vmem>>, vector<16x288xbf16>
    tpu.vector_store %arg7[%c0_91, %c19_92], %83 {strides = array<i32>} : memref<16x384xbf16, #tpu.memory_space<vmem>>, vector<16x288xbf16>,
    %c3 = arith.constant 3 : index
    %c0_93 = arith.constant 0 : index
    %c0_94 = arith.constant 0 : index
    %85 = vector.load %arg2[%c3, %c0_93, %c0_94] : memref<4x16x144xbf16, #tpu.memory_space<vmem>>, vector<1x16x144xbf16>
    %86 = vector.shape_cast %85 : vector<1x16x144xbf16> to vector<16x144xbf16>
    %c3_95 = arith.constant 3 : index
    %c0_96 = arith.constant 0 : index
    %c0_97 = arith.constant 0 : index
    %87 = vector.load %arg3[%c3_95, %c0_96, %c0_97] : memref<4x16x1xf32, #tpu.memory_space<vmem>>, vector<1x16x1xf32>
    %88 = vector.shape_cast %87 : vector<1x16x1xf32> to vector<16x1xf32>
    %c0_98 = arith.constant 0 : index
    %c0_99 = arith.constant 0 : index
    %89 = vector.load %arg7[%c0_98, %c0_99] : memref<16x384xbf16, #tpu.memory_space<vmem>>, vector<16x288xbf16>
    %c0_100 = arith.constant 0 : index
    %c1_101 = arith.constant 1 : index
    %90 = vector.load %arg7[%c0_100, %c1_101] : memref<16x384xbf16, #tpu.memory_space<vmem>>, vector<16x288xbf16>
    %c0_102 = arith.constant 0 : index
    %c2_103 = arith.constant 2 : index
    %91 = vector.load %arg7[%c0_102, %c2_103] : memref<16x384xbf16, #tpu.memory_space<vmem>>, vector<16x288xbf16>
    %c0_104 = arith.constant 0 : index
    %c18_105 = arith.constant 18 : index
    %92 = vector.load %arg7[%c0_104, %c18_105] : memref<16x384xbf16, #tpu.memory_space<vmem>>, vector<16x288xbf16>
    %c0_106 = arith.constant 0 : index
    %c19_107 = arith.constant 19 : index
    %93 = vector.load %arg7[%c0_106, %c19_107] : memref<16x384xbf16, #tpu.memory_space<vmem>>, vector<16x288xbf16>
    %c0_108 = arith.constant 0 : index
    %c20_109 = arith.constant 20 : index
    %94 = vector.load %arg7[%c0_108, %c20_109] : memref<16x384xbf16, #tpu.memory_space<vmem>>, vector<16x288xbf16>
    %c0_110 = arith.constant 0 : index
    %c36_111 = arith.constant 36 : index
    %95 = vector.load %arg7[%c0_110, %c36_111] : memref<16x384xbf16, #tpu.memory_space<vmem>>, vector<16x288xbf16>
    %c0_112 = arith.constant 0 : index
    %c37_113 = arith.constant 37 : index
    %96 = vector.load %arg7[%c0_112, %c37_113] : memref<16x384xbf16, #tpu.memory_space<vmem>>, vector<16x288xbf16>
    %c0_114 = arith.constant 0 : index
    %c38_115 = arith.constant 38 : index
    %97 = vector.load %arg7[%c0_114, %c38_115] : memref<16x384xbf16, #tpu.memory_space<vmem>>, vector<16x288xbf16>
    %98 = tpu.concatenate %89, %90, %91, %92, %93, %94, %95, %96, %97 in 0 : vector<16x288xbf16>, vector<16x288xbf16>, vector<16x288xbf16>, vector<16x288xbf16>, vector<16x288xbf16>, vector<16x288xbf16>, vector<16x288xbf16>, vector<16x288xbf16>, vector<16x288xbf16> -> vector<144x288xbf16>
    %cst_116 = arith.constant dense<0.000000e+00> : vector<16x288xf32>
    %99 = tpu.matmul %86, %98, %cst_116 {dimension_numbers = #tpu.dot_dimension_numbers<[1], [0], [0], [1], [0, 0, 1, 1], [], []>} : vector<16x144xbf16>, vector<144x288xbf16>, vector<16x288xf32> -> vector<16x288xf32>
    %100 = vector.broadcast %88 : vector<16x1xf32> to vector<16x288xf32>
    %101 = arith.addf %99, %100 : vector<16x288xf32>
    %102 = vector.broadcast %4 : vector<1x288xf32> to vector<16x288xf32>
    %103 = arith.mulf %101, %102 : vector<16x288xf32>
    %c0_117 = arith.constant 0 : index
    %c19_118 = arith.constant 19 : index
    %104 = vector.load %arg6[%c0_117, %c19_118] : memref<16x384xbf16, #tpu.memory_space<vmem>>, vector<16x288xbf16>
    %105 = arith.extf %104 : vector<16x288xbf16> to vector<16x288xf32>
    %106 = arith.addf %103, %105 : vector<16x288xf32>
    %cst_119 = arith.constant 0.000000e+00 : bf16
    %107 = vector.broadcast %cst_119 : bf16 to vector<16x19xbf16>
    %c0_120 = arith.constant 0 : index
    %c0_121 = arith.constant 0 : index
    %c0_122 = arith.constant 0 : index
    %108 = vector.load %arg5[%c0_120, %c0_121, %c0_122] : memref<1x16x384xbf16, #tpu.memory_space<vmem>>, vector<1x16x19xbf16>
    %109 = vector.shape_cast %108 : vector<1x16x19xbf16> to vector<16x19xbf16>
    %110 = vector.shape_cast %107 : vector<16x19xbf16> to vector<1x16x19xbf16>
    tpu.vector_store %arg5[%c0_120, %c0_121, %c0_122], %110 {strides = array<i32>} : memref<1x16x384xbf16, #tpu.memory_space<vmem>>, vector<1x16x19xbf16>,
    %111 = arith.truncf %106 : vector<16x288xf32> to vector<16x288xbf16>
    %c0_123 = arith.constant 0 : index
    %c0_124 = arith.constant 0 : index
    %c19_125 = arith.constant 19 : index
    %112 = vector.load %arg5[%c0_123, %c0_124, %c19_125] : memref<1x16x384xbf16, #tpu.memory_space<vmem>>, vector<1x16x288xbf16>
    %113 = vector.shape_cast %112 : vector<1x16x288xbf16> to vector<16x288xbf16>
    %114 = vector.shape_cast %111 : vector<16x288xbf16> to vector<1x16x288xbf16>
    tpu.vector_store %arg5[%c0_123, %c0_124, %c19_125], %114 {strides = array<i32>} : memref<1x16x384xbf16, #tpu.memory_space<vmem>>, vector<1x16x288xbf16>,
    %cst_126 = arith.constant 0.000000e+00 : bf16
    %115 = vector.broadcast %cst_126 : bf16 to vector<16x77xbf16>
    %c0_127 = arith.constant 0 : index
    %c0_128 = arith.constant 0 : index
    %c307 = arith.constant 307 : index
    %116 = vector.load %arg5[%c0_127, %c0_128, %c307] : memref<1x16x384xbf16, #tpu.memory_space<vmem>>, vector<1x16x77xbf16>
    %117 = vector.shape_cast %116 : vector<1x16x77xbf16> to vector<16x77xbf16>
    %118 = vector.shape_cast %115 : vector<16x77xbf16> to vector<1x16x77xbf16>
    tpu.vector_store %arg5[%c0_127, %c0_128, %c307], %118 {strides = array<i32>} : memref<1x16x384xbf16, #tpu.memory_space<vmem>>, vector<1x16x77xbf16>,
    return
  }
  func.func @transform_0(%arg0: i32) -> (i32, i32, i32) {
    %c0_i32 = arith.constant 0 : i32
    %c0_i32_0 = arith.constant 0 : i32
    %c0_i32_1 = arith.constant 0 : i32
    return %arg0, %c0_i32, %c0_i32_0 : i32, i32, i32
  }
  func.func @transform_1(%arg0: i32) -> (i32, i32, i32) {
    %c0_i32 = arith.constant 0 : i32
    %c0_i32_0 = arith.constant 0 : i32
    %c0_i32_1 = arith.constant 0 : i32
    %c0_i32_2 = arith.constant 0 : i32
    return %c0_i32, %c0_i32_0, %c0_i32_1 : i32, i32, i32
  }
  func.func @transform_2(%arg0: i32) -> (i32, i32, i32) {
    %c0_i32 = arith.constant 0 : i32
    %c0_i32_0 = arith.constant 0 : i32
    %c0_i32_1 = arith.constant 0 : i32
    %c0_i32_2 = arith.constant 0 : i32
    return %c0_i32, %c0_i32_0, %c0_i32_1 : i32, i32, i32
  }
  func.func @transform_3(%arg0: i32) -> (i32, i32) {
    %c0_i32 = arith.constant 0 : i32
    %c0_i32_0 = arith.constant 0 : i32
    %c0_i32_1 = arith.constant 0 : i32
    return %c0_i32, %c0_i32_0 : i32, i32
  }
  func.func @transform_4(%arg0: i32) -> (i32, i32, i32) {
    %c0_i32 = arith.constant 0 : i32
    %c0_i32_0 = arith.constant 0 : i32
    %c0_i32_1 = arith.constant 0 : i32
    return %arg0, %c0_i32, %c0_i32_0 : i32, i32, i32
  }
}

module attributes {stable_mosaic.version = 11 : i64} {
  func.func @_conv_kernel(%arg0: i32, %arg1: memref<1x64x128xbf16, #tpu.memory_space<vmem>>, %arg2: memref<32x256xbf16, #tpu.memory_space<vmem>>, %arg3: memref<32x1xf32, #tpu.memory_space<vmem>>, %arg4: memref<1x80xf32, #tpu.memory_space<vmem>>, %arg5: memref<1x32x128xbf16, #tpu.memory_space<vmem>>) attributes {dimension_semantics = [#tpu.dimension_semantics<parallel>], iteration_bounds = array<i64: 2>, scalar_prefetch = 0 : i64, scratch_operands = 0 : i64, tpu.core_type = #tpu.core_type<tc>, window_params = [{transform_indices = @transform_0, window_bounds = array<i64: 1, 64, 128>}, {pipeline_mode = #tpu.pipeline_mode<synchronous>, transform_indices = @transform_1, window_bounds = array<i64: 32, 256>}, {pipeline_mode = #tpu.pipeline_mode<synchronous>, transform_indices = @transform_2, window_bounds = array<i64: 32, 1>}, {pipeline_mode = #tpu.pipeline_mode<synchronous>, transform_indices = @transform_3, window_bounds = array<i64: 1, 80>}, {transform_indices = @transform_4, window_bounds = array<i64: 1, 32, 128>}]} {
    %c0 = arith.constant 0 : index
    %c0_0 = arith.constant 0 : index
    %0 = vector.load %arg2[%c0, %c0_0] : memref<32x256xbf16, #tpu.memory_space<vmem>>, vector<32x256xbf16>
    %c0_1 = arith.constant 0 : index
    %c0_2 = arith.constant 0 : index
    %1 = vector.load %arg3[%c0_1, %c0_2] : memref<32x1xf32, #tpu.memory_space<vmem>>, vector<32x1xf32>
    %c0_3 = arith.constant 0 : index
    %c0_4 = arith.constant 0 : index
    %c0_5 = arith.constant 0 : index
    %2 = vector.load %arg1[%c0_3, %c0_4, %c0_5] : memref<1x64x128xbf16, #tpu.memory_space<vmem>>, vector<1x64x80xbf16>
    %3 = vector.shape_cast %2 : vector<1x64x80xbf16> to vector<64x80xbf16>
    %c0_6 = arith.constant 0 : index
    %c0_7 = arith.constant 0 : index
    %c1 = arith.constant 1 : index
    %4 = vector.load %arg1[%c0_6, %c0_7, %c1] : memref<1x64x128xbf16, #tpu.memory_space<vmem>>, vector<1x64x80xbf16>
    %5 = vector.shape_cast %4 : vector<1x64x80xbf16> to vector<64x80xbf16>
    %c0_8 = arith.constant 0 : index
    %c0_9 = arith.constant 0 : index
    %c10 = arith.constant 10 : index
    %6 = vector.load %arg1[%c0_8, %c0_9, %c10] : memref<1x64x128xbf16, #tpu.memory_space<vmem>>, vector<1x64x80xbf16>
    %7 = vector.shape_cast %6 : vector<1x64x80xbf16> to vector<64x80xbf16>
    %c0_10 = arith.constant 0 : index
    %c0_11 = arith.constant 0 : index
    %c11 = arith.constant 11 : index
    %8 = vector.load %arg1[%c0_10, %c0_11, %c11] : memref<1x64x128xbf16, #tpu.memory_space<vmem>>, vector<1x64x80xbf16>
    %9 = vector.shape_cast %8 : vector<1x64x80xbf16> to vector<64x80xbf16>
    %10 = tpu.concatenate %3, %5, %7, %9 in 0 : vector<64x80xbf16>, vector<64x80xbf16>, vector<64x80xbf16>, vector<64x80xbf16> -> vector<256x80xbf16>
    %cst = arith.constant dense<0.000000e+00> : vector<32x80xf32>
    %11 = tpu.matmul %0, %10, %cst {dimension_numbers = #tpu.dot_dimension_numbers<[1], [0], [0], [1], [0, 0, 1, 1], [], []>} : vector<32x256xbf16>, vector<256x80xbf16>, vector<32x80xf32> -> vector<32x80xf32>
    %12 = vector.broadcast %1 : vector<32x1xf32> to vector<32x80xf32>
    %13 = arith.addf %11, %12 : vector<32x80xf32>
    %cst_12 = arith.constant 0.000000e+00 : f32
    %14 = vector.broadcast %cst_12 : f32 to vector<32x80xf32>
    %15 = arith.maximumf %13, %14 : vector<32x80xf32>
    %c0_13 = arith.constant 0 : index
    %c0_14 = arith.constant 0 : index
    %16 = vector.load %arg4[%c0_13, %c0_14] : memref<1x80xf32, #tpu.memory_space<vmem>>, vector<1x80xf32>
    %17 = vector.broadcast %16 : vector<1x80xf32> to vector<32x80xf32>
    %18 = arith.mulf %15, %17 : vector<32x80xf32>
    %cst_15 = arith.constant 0.000000e+00 : bf16
    %19 = vector.broadcast %cst_15 : bf16 to vector<32x11xbf16>
    %c0_16 = arith.constant 0 : index
    %c0_17 = arith.constant 0 : index
    %c0_18 = arith.constant 0 : index
    %20 = vector.load %arg5[%c0_16, %c0_17, %c0_18] : memref<1x32x128xbf16, #tpu.memory_space<vmem>>, vector<1x32x11xbf16>
    %21 = vector.shape_cast %20 : vector<1x32x11xbf16> to vector<32x11xbf16>
    %22 = vector.shape_cast %19 : vector<32x11xbf16> to vector<1x32x11xbf16>
    tpu.vector_store %arg5[%c0_16, %c0_17, %c0_18], %22 {strides = array<i32>} : memref<1x32x128xbf16, #tpu.memory_space<vmem>>, vector<1x32x11xbf16>,
    %23 = arith.truncf %18 : vector<32x80xf32> to vector<32x80xbf16>
    %c0_19 = arith.constant 0 : index
    %c0_20 = arith.constant 0 : index
    %c11_21 = arith.constant 11 : index
    %24 = vector.load %arg5[%c0_19, %c0_20, %c11_21] : memref<1x32x128xbf16, #tpu.memory_space<vmem>>, vector<1x32x80xbf16>
    %25 = vector.shape_cast %24 : vector<1x32x80xbf16> to vector<32x80xbf16>
    %26 = vector.shape_cast %23 : vector<32x80xbf16> to vector<1x32x80xbf16>
    tpu.vector_store %arg5[%c0_19, %c0_20, %c11_21], %26 {strides = array<i32>} : memref<1x32x128xbf16, #tpu.memory_space<vmem>>, vector<1x32x80xbf16>,
    %cst_22 = arith.constant 0.000000e+00 : bf16
    %27 = vector.broadcast %cst_22 : bf16 to vector<32x37xbf16>
    %c0_23 = arith.constant 0 : index
    %c0_24 = arith.constant 0 : index
    %c91 = arith.constant 91 : index
    %28 = vector.load %arg5[%c0_23, %c0_24, %c91] : memref<1x32x128xbf16, #tpu.memory_space<vmem>>, vector<1x32x37xbf16>
    %29 = vector.shape_cast %28 : vector<1x32x37xbf16> to vector<32x37xbf16>
    %30 = vector.shape_cast %27 : vector<32x37xbf16> to vector<1x32x37xbf16>
    tpu.vector_store %arg5[%c0_23, %c0_24, %c91], %30 {strides = array<i32>} : memref<1x32x128xbf16, #tpu.memory_space<vmem>>, vector<1x32x37xbf16>,
    return
  }
  func.func @transform_0(%arg0: i32) -> (i32, i32, i32) {
    %c0_i32 = arith.constant 0 : i32
    %c0_i32_0 = arith.constant 0 : i32
    %c0_i32_1 = arith.constant 0 : i32
    return %arg0, %c0_i32, %c0_i32_0 : i32, i32, i32
  }
  func.func @transform_1(%arg0: i32) -> (i32, i32) {
    %c0_i32 = arith.constant 0 : i32
    %c0_i32_0 = arith.constant 0 : i32
    %c0_i32_1 = arith.constant 0 : i32
    return %c0_i32, %c0_i32_0 : i32, i32
  }
  func.func @transform_2(%arg0: i32) -> (i32, i32) {
    %c0_i32 = arith.constant 0 : i32
    %c0_i32_0 = arith.constant 0 : i32
    %c0_i32_1 = arith.constant 0 : i32
    return %c0_i32, %c0_i32_0 : i32, i32
  }
  func.func @transform_3(%arg0: i32) -> (i32, i32) {
    %c0_i32 = arith.constant 0 : i32
    %c0_i32_0 = arith.constant 0 : i32
    %c0_i32_1 = arith.constant 0 : i32
    return %c0_i32, %c0_i32_0 : i32, i32
  }
  func.func @transform_4(%arg0: i32) -> (i32, i32, i32) {
    %c0_i32 = arith.constant 0 : i32
    %c0_i32_0 = arith.constant 0 : i32
    %c0_i32_1 = arith.constant 0 : i32
    return %arg0, %c0_i32, %c0_i32_0 : i32, i32, i32
  }
}

module attributes {stable_mosaic.version = 11 : i64} {
  func.func @_block_kernel(%arg0: i32, %arg1: memref<1x32x128xbf16, #tpu.memory_space<vmem>>, %arg2: memref<4x32x288xbf16, #tpu.memory_space<vmem>>, %arg3: memref<4x32x1xf32, #tpu.memory_space<vmem>>, %arg4: memref<1x80xf32, #tpu.memory_space<vmem>>, %arg5: memref<1x32x128xbf16, #tpu.memory_space<vmem>>, %arg6: memref<32x128xbf16, #tpu.memory_space<vmem>>, %arg7: memref<32x128xbf16, #tpu.memory_space<vmem>>) attributes {dimension_semantics = [#tpu.dimension_semantics<parallel>], iteration_bounds = array<i64: 2>, scalar_prefetch = 0 : i64, scratch_operands = 2 : i64, tpu.core_type = #tpu.core_type<tc>, window_params = [{transform_indices = @transform_0, window_bounds = array<i64: 1, 32, 128>}, {pipeline_mode = #tpu.pipeline_mode<synchronous>, transform_indices = @transform_1, window_bounds = array<i64: 4, 32, 288>}, {pipeline_mode = #tpu.pipeline_mode<synchronous>, transform_indices = @transform_2, window_bounds = array<i64: 4, 32, 1>}, {pipeline_mode = #tpu.pipeline_mode<synchronous>, transform_indices = @transform_3, window_bounds = array<i64: 1, 80>}, {transform_indices = @transform_4, window_bounds = array<i64: 1, 32, 128>}]} {
    %cst = arith.constant 0.000000e+00 : bf16
    %0 = vector.broadcast %cst : bf16 to vector<32x128xbf16>
    %c0 = arith.constant 0 : index
    %c0_0 = arith.constant 0 : index
    %1 = vector.load %arg6[%c0, %c0_0] : memref<32x128xbf16, #tpu.memory_space<vmem>>, vector<32x128xbf16>
    tpu.vector_store %arg6[%c0, %c0_0], %0 {strides = array<i32>} : memref<32x128xbf16, #tpu.memory_space<vmem>>, vector<32x128xbf16>,
    %cst_1 = arith.constant 0.000000e+00 : bf16
    %2 = vector.broadcast %cst_1 : bf16 to vector<32x128xbf16>
    %c0_2 = arith.constant 0 : index
    %c0_3 = arith.constant 0 : index
    %3 = vector.load %arg7[%c0_2, %c0_3] : memref<32x128xbf16, #tpu.memory_space<vmem>>, vector<32x128xbf16>
    tpu.vector_store %arg7[%c0_2, %c0_3], %2 {strides = array<i32>} : memref<32x128xbf16, #tpu.memory_space<vmem>>, vector<32x128xbf16>,
    %c0_4 = arith.constant 0 : index
    %c0_5 = arith.constant 0 : index
    %4 = vector.load %arg4[%c0_4, %c0_5] : memref<1x80xf32, #tpu.memory_space<vmem>>, vector<1x80xf32>
    %c0_6 = arith.constant 0 : index
    %c0_7 = arith.constant 0 : index
    %c0_8 = arith.constant 0 : index
    %5 = vector.load %arg2[%c0_6, %c0_7, %c0_8] : memref<4x32x288xbf16, #tpu.memory_space<vmem>>, vector<1x32x288xbf16>
    %6 = vector.shape_cast %5 : vector<1x32x288xbf16> to vector<32x288xbf16>
    %c0_9 = arith.constant 0 : index
    %c0_10 = arith.constant 0 : index
    %c0_11 = arith.constant 0 : index
    %7 = vector.load %arg3[%c0_9, %c0_10, %c0_11] : memref<4x32x1xf32, #tpu.memory_space<vmem>>, vector<1x32x1xf32>
    %8 = vector.shape_cast %7 : vector<1x32x1xf32> to vector<32x1xf32>
    %c0_12 = arith.constant 0 : index
    %c0_13 = arith.constant 0 : index
    %c0_14 = arith.constant 0 : index
    %9 = vector.load %arg1[%c0_12, %c0_13, %c0_14] : memref<1x32x128xbf16, #tpu.memory_space<vmem>>, vector<1x32x80xbf16>
    %10 = vector.shape_cast %9 : vector<1x32x80xbf16> to vector<32x80xbf16>
    %c0_15 = arith.constant 0 : index
    %c0_16 = arith.constant 0 : index
    %c1 = arith.constant 1 : index
    %11 = vector.load %arg1[%c0_15, %c0_16, %c1] : memref<1x32x128xbf16, #tpu.memory_space<vmem>>, vector<1x32x80xbf16>
    %12 = vector.shape_cast %11 : vector<1x32x80xbf16> to vector<32x80xbf16>
    %c0_17 = arith.constant 0 : index
    %c0_18 = arith.constant 0 : index
    %c2 = arith.constant 2 : index
    %13 = vector.load %arg1[%c0_17, %c0_18, %c2] : memref<1x32x128xbf16, #tpu.memory_space<vmem>>, vector<1x32x80xbf16>
    %14 = vector.shape_cast %13 : vector<1x32x80xbf16> to vector<32x80xbf16>
    %c0_19 = arith.constant 0 : index
    %c0_20 = arith.constant 0 : index
    %c10 = arith.constant 10 : index
    %15 = vector.load %arg1[%c0_19, %c0_20, %c10] : memref<1x32x128xbf16, #tpu.memory_space<vmem>>, vector<1x32x80xbf16>
    %16 = vector.shape_cast %15 : vector<1x32x80xbf16> to vector<32x80xbf16>
    %c0_21 = arith.constant 0 : index
    %c0_22 = arith.constant 0 : index
    %c11 = arith.constant 11 : index
    %17 = vector.load %arg1[%c0_21, %c0_22, %c11] : memref<1x32x128xbf16, #tpu.memory_space<vmem>>, vector<1x32x80xbf16>
    %18 = vector.shape_cast %17 : vector<1x32x80xbf16> to vector<32x80xbf16>
    %c0_23 = arith.constant 0 : index
    %c0_24 = arith.constant 0 : index
    %c12 = arith.constant 12 : index
    %19 = vector.load %arg1[%c0_23, %c0_24, %c12] : memref<1x32x128xbf16, #tpu.memory_space<vmem>>, vector<1x32x80xbf16>
    %20 = vector.shape_cast %19 : vector<1x32x80xbf16> to vector<32x80xbf16>
    %c0_25 = arith.constant 0 : index
    %c0_26 = arith.constant 0 : index
    %c20 = arith.constant 20 : index
    %21 = vector.load %arg1[%c0_25, %c0_26, %c20] : memref<1x32x128xbf16, #tpu.memory_space<vmem>>, vector<1x32x80xbf16>
    %22 = vector.shape_cast %21 : vector<1x32x80xbf16> to vector<32x80xbf16>
    %c0_27 = arith.constant 0 : index
    %c0_28 = arith.constant 0 : index
    %c21 = arith.constant 21 : index
    %23 = vector.load %arg1[%c0_27, %c0_28, %c21] : memref<1x32x128xbf16, #tpu.memory_space<vmem>>, vector<1x32x80xbf16>
    %24 = vector.shape_cast %23 : vector<1x32x80xbf16> to vector<32x80xbf16>
    %c0_29 = arith.constant 0 : index
    %c0_30 = arith.constant 0 : index
    %c22 = arith.constant 22 : index
    %25 = vector.load %arg1[%c0_29, %c0_30, %c22] : memref<1x32x128xbf16, #tpu.memory_space<vmem>>, vector<1x32x80xbf16>
    %26 = vector.shape_cast %25 : vector<1x32x80xbf16> to vector<32x80xbf16>
    %27 = tpu.concatenate %10, %12, %14, %16, %18, %20, %22, %24, %26 in 0 : vector<32x80xbf16>, vector<32x80xbf16>, vector<32x80xbf16>, vector<32x80xbf16>, vector<32x80xbf16>, vector<32x80xbf16>, vector<32x80xbf16>, vector<32x80xbf16>, vector<32x80xbf16> -> vector<288x80xbf16>
    %cst_31 = arith.constant dense<0.000000e+00> : vector<32x80xf32>
    %28 = tpu.matmul %6, %27, %cst_31 {dimension_numbers = #tpu.dot_dimension_numbers<[1], [0], [0], [1], [0, 0, 1, 1], [], []>} : vector<32x288xbf16>, vector<288x80xbf16>, vector<32x80xf32> -> vector<32x80xf32>
    %29 = vector.broadcast %8 : vector<32x1xf32> to vector<32x80xf32>
    %30 = arith.addf %28, %29 : vector<32x80xf32>
    %cst_32 = arith.constant 0.000000e+00 : f32
    %31 = vector.broadcast %cst_32 : f32 to vector<32x80xf32>
    %32 = arith.maximumf %30, %31 : vector<32x80xf32>
    %33 = vector.broadcast %4 : vector<1x80xf32> to vector<32x80xf32>
    %34 = arith.mulf %32, %33 : vector<32x80xf32>
    %35 = arith.truncf %34 : vector<32x80xf32> to vector<32x80xbf16>
    %c0_33 = arith.constant 0 : index
    %c11_34 = arith.constant 11 : index
    %36 = vector.load %arg7[%c0_33, %c11_34] : memref<32x128xbf16, #tpu.memory_space<vmem>>, vector<32x80xbf16>
    tpu.vector_store %arg7[%c0_33, %c11_34], %35 {strides = array<i32>} : memref<32x128xbf16, #tpu.memory_space<vmem>>, vector<32x80xbf16>,
    %c1_35 = arith.constant 1 : index
    %c0_36 = arith.constant 0 : index
    %c0_37 = arith.constant 0 : index
    %37 = vector.load %arg2[%c1_35, %c0_36, %c0_37] : memref<4x32x288xbf16, #tpu.memory_space<vmem>>, vector<1x32x288xbf16>
    %38 = vector.shape_cast %37 : vector<1x32x288xbf16> to vector<32x288xbf16>
    %c1_38 = arith.constant 1 : index
    %c0_39 = arith.constant 0 : index
    %c0_40 = arith.constant 0 : index
    %39 = vector.load %arg3[%c1_38, %c0_39, %c0_40] : memref<4x32x1xf32, #tpu.memory_space<vmem>>, vector<1x32x1xf32>
    %40 = vector.shape_cast %39 : vector<1x32x1xf32> to vector<32x1xf32>
    %c0_41 = arith.constant 0 : index
    %c0_42 = arith.constant 0 : index
    %41 = vector.load %arg7[%c0_41, %c0_42] : memref<32x128xbf16, #tpu.memory_space<vmem>>, vector<32x80xbf16>
    %c0_43 = arith.constant 0 : index
    %c1_44 = arith.constant 1 : index
    %42 = vector.load %arg7[%c0_43, %c1_44] : memref<32x128xbf16, #tpu.memory_space<vmem>>, vector<32x80xbf16>
    %c0_45 = arith.constant 0 : index
    %c2_46 = arith.constant 2 : index
    %43 = vector.load %arg7[%c0_45, %c2_46] : memref<32x128xbf16, #tpu.memory_space<vmem>>, vector<32x80xbf16>
    %c0_47 = arith.constant 0 : index
    %c10_48 = arith.constant 10 : index
    %44 = vector.load %arg7[%c0_47, %c10_48] : memref<32x128xbf16, #tpu.memory_space<vmem>>, vector<32x80xbf16>
    %c0_49 = arith.constant 0 : index
    %c11_50 = arith.constant 11 : index
    %45 = vector.load %arg7[%c0_49, %c11_50] : memref<32x128xbf16, #tpu.memory_space<vmem>>, vector<32x80xbf16>
    %c0_51 = arith.constant 0 : index
    %c12_52 = arith.constant 12 : index
    %46 = vector.load %arg7[%c0_51, %c12_52] : memref<32x128xbf16, #tpu.memory_space<vmem>>, vector<32x80xbf16>
    %c0_53 = arith.constant 0 : index
    %c20_54 = arith.constant 20 : index
    %47 = vector.load %arg7[%c0_53, %c20_54] : memref<32x128xbf16, #tpu.memory_space<vmem>>, vector<32x80xbf16>
    %c0_55 = arith.constant 0 : index
    %c21_56 = arith.constant 21 : index
    %48 = vector.load %arg7[%c0_55, %c21_56] : memref<32x128xbf16, #tpu.memory_space<vmem>>, vector<32x80xbf16>
    %c0_57 = arith.constant 0 : index
    %c22_58 = arith.constant 22 : index
    %49 = vector.load %arg7[%c0_57, %c22_58] : memref<32x128xbf16, #tpu.memory_space<vmem>>, vector<32x80xbf16>
    %50 = tpu.concatenate %41, %42, %43, %44, %45, %46, %47, %48, %49 in 0 : vector<32x80xbf16>, vector<32x80xbf16>, vector<32x80xbf16>, vector<32x80xbf16>, vector<32x80xbf16>, vector<32x80xbf16>, vector<32x80xbf16>, vector<32x80xbf16>, vector<32x80xbf16> -> vector<288x80xbf16>
    %cst_59 = arith.constant dense<0.000000e+00> : vector<32x80xf32>
    %51 = tpu.matmul %38, %50, %cst_59 {dimension_numbers = #tpu.dot_dimension_numbers<[1], [0], [0], [1], [0, 0, 1, 1], [], []>} : vector<32x288xbf16>, vector<288x80xbf16>, vector<32x80xf32> -> vector<32x80xf32>
    %52 = vector.broadcast %40 : vector<32x1xf32> to vector<32x80xf32>
    %53 = arith.addf %51, %52 : vector<32x80xf32>
    %54 = vector.broadcast %4 : vector<1x80xf32> to vector<32x80xf32>
    %55 = arith.mulf %53, %54 : vector<32x80xf32>
    %c0_60 = arith.constant 0 : index
    %c0_61 = arith.constant 0 : index
    %c11_62 = arith.constant 11 : index
    %56 = vector.load %arg1[%c0_60, %c0_61, %c11_62] : memref<1x32x128xbf16, #tpu.memory_space<vmem>>, vector<1x32x80xbf16>
    %57 = vector.shape_cast %56 : vector<1x32x80xbf16> to vector<32x80xbf16>
    %58 = arith.extf %57 : vector<32x80xbf16> to vector<32x80xf32>
    %59 = arith.addf %55, %58 : vector<32x80xf32>
    %60 = arith.truncf %59 : vector<32x80xf32> to vector<32x80xbf16>
    %c0_63 = arith.constant 0 : index
    %c11_64 = arith.constant 11 : index
    %61 = vector.load %arg6[%c0_63, %c11_64] : memref<32x128xbf16, #tpu.memory_space<vmem>>, vector<32x80xbf16>
    tpu.vector_store %arg6[%c0_63, %c11_64], %60 {strides = array<i32>} : memref<32x128xbf16, #tpu.memory_space<vmem>>, vector<32x80xbf16>,
    %c2_65 = arith.constant 2 : index
    %c0_66 = arith.constant 0 : index
    %c0_67 = arith.constant 0 : index
    %62 = vector.load %arg2[%c2_65, %c0_66, %c0_67] : memref<4x32x288xbf16, #tpu.memory_space<vmem>>, vector<1x32x288xbf16>
    %63 = vector.shape_cast %62 : vector<1x32x288xbf16> to vector<32x288xbf16>
    %c2_68 = arith.constant 2 : index
    %c0_69 = arith.constant 0 : index
    %c0_70 = arith.constant 0 : index
    %64 = vector.load %arg3[%c2_68, %c0_69, %c0_70] : memref<4x32x1xf32, #tpu.memory_space<vmem>>, vector<1x32x1xf32>
    %65 = vector.shape_cast %64 : vector<1x32x1xf32> to vector<32x1xf32>
    %c0_71 = arith.constant 0 : index
    %c0_72 = arith.constant 0 : index
    %66 = vector.load %arg6[%c0_71, %c0_72] : memref<32x128xbf16, #tpu.memory_space<vmem>>, vector<32x80xbf16>
    %c0_73 = arith.constant 0 : index
    %c1_74 = arith.constant 1 : index
    %67 = vector.load %arg6[%c0_73, %c1_74] : memref<32x128xbf16, #tpu.memory_space<vmem>>, vector<32x80xbf16>
    %c0_75 = arith.constant 0 : index
    %c2_76 = arith.constant 2 : index
    %68 = vector.load %arg6[%c0_75, %c2_76] : memref<32x128xbf16, #tpu.memory_space<vmem>>, vector<32x80xbf16>
    %c0_77 = arith.constant 0 : index
    %c10_78 = arith.constant 10 : index
    %69 = vector.load %arg6[%c0_77, %c10_78] : memref<32x128xbf16, #tpu.memory_space<vmem>>, vector<32x80xbf16>
    %c0_79 = arith.constant 0 : index
    %c11_80 = arith.constant 11 : index
    %70 = vector.load %arg6[%c0_79, %c11_80] : memref<32x128xbf16, #tpu.memory_space<vmem>>, vector<32x80xbf16>
    %c0_81 = arith.constant 0 : index
    %c12_82 = arith.constant 12 : index
    %71 = vector.load %arg6[%c0_81, %c12_82] : memref<32x128xbf16, #tpu.memory_space<vmem>>, vector<32x80xbf16>
    %c0_83 = arith.constant 0 : index
    %c20_84 = arith.constant 20 : index
    %72 = vector.load %arg6[%c0_83, %c20_84] : memref<32x128xbf16, #tpu.memory_space<vmem>>, vector<32x80xbf16>
    %c0_85 = arith.constant 0 : index
    %c21_86 = arith.constant 21 : index
    %73 = vector.load %arg6[%c0_85, %c21_86] : memref<32x128xbf16, #tpu.memory_space<vmem>>, vector<32x80xbf16>
    %c0_87 = arith.constant 0 : index
    %c22_88 = arith.constant 22 : index
    %74 = vector.load %arg6[%c0_87, %c22_88] : memref<32x128xbf16, #tpu.memory_space<vmem>>, vector<32x80xbf16>
    %75 = tpu.concatenate %66, %67, %68, %69, %70, %71, %72, %73, %74 in 0 : vector<32x80xbf16>, vector<32x80xbf16>, vector<32x80xbf16>, vector<32x80xbf16>, vector<32x80xbf16>, vector<32x80xbf16>, vector<32x80xbf16>, vector<32x80xbf16>, vector<32x80xbf16> -> vector<288x80xbf16>
    %cst_89 = arith.constant dense<0.000000e+00> : vector<32x80xf32>
    %76 = tpu.matmul %63, %75, %cst_89 {dimension_numbers = #tpu.dot_dimension_numbers<[1], [0], [0], [1], [0, 0, 1, 1], [], []>} : vector<32x288xbf16>, vector<288x80xbf16>, vector<32x80xf32> -> vector<32x80xf32>
    %77 = vector.broadcast %65 : vector<32x1xf32> to vector<32x80xf32>
    %78 = arith.addf %76, %77 : vector<32x80xf32>
    %cst_90 = arith.constant 0.000000e+00 : f32
    %79 = vector.broadcast %cst_90 : f32 to vector<32x80xf32>
    %80 = arith.maximumf %78, %79 : vector<32x80xf32>
    %81 = vector.broadcast %4 : vector<1x80xf32> to vector<32x80xf32>
    %82 = arith.mulf %80, %81 : vector<32x80xf32>
    %83 = arith.truncf %82 : vector<32x80xf32> to vector<32x80xbf16>
    %c0_91 = arith.constant 0 : index
    %c11_92 = arith.constant 11 : index
    %84 = vector.load %arg7[%c0_91, %c11_92] : memref<32x128xbf16, #tpu.memory_space<vmem>>, vector<32x80xbf16>
    tpu.vector_store %arg7[%c0_91, %c11_92], %83 {strides = array<i32>} : memref<32x128xbf16, #tpu.memory_space<vmem>>, vector<32x80xbf16>,
    %c3 = arith.constant 3 : index
    %c0_93 = arith.constant 0 : index
    %c0_94 = arith.constant 0 : index
    %85 = vector.load %arg2[%c3, %c0_93, %c0_94] : memref<4x32x288xbf16, #tpu.memory_space<vmem>>, vector<1x32x288xbf16>
    %86 = vector.shape_cast %85 : vector<1x32x288xbf16> to vector<32x288xbf16>
    %c3_95 = arith.constant 3 : index
    %c0_96 = arith.constant 0 : index
    %c0_97 = arith.constant 0 : index
    %87 = vector.load %arg3[%c3_95, %c0_96, %c0_97] : memref<4x32x1xf32, #tpu.memory_space<vmem>>, vector<1x32x1xf32>
    %88 = vector.shape_cast %87 : vector<1x32x1xf32> to vector<32x1xf32>
    %c0_98 = arith.constant 0 : index
    %c0_99 = arith.constant 0 : index
    %89 = vector.load %arg7[%c0_98, %c0_99] : memref<32x128xbf16, #tpu.memory_space<vmem>>, vector<32x80xbf16>
    %c0_100 = arith.constant 0 : index
    %c1_101 = arith.constant 1 : index
    %90 = vector.load %arg7[%c0_100, %c1_101] : memref<32x128xbf16, #tpu.memory_space<vmem>>, vector<32x80xbf16>
    %c0_102 = arith.constant 0 : index
    %c2_103 = arith.constant 2 : index
    %91 = vector.load %arg7[%c0_102, %c2_103] : memref<32x128xbf16, #tpu.memory_space<vmem>>, vector<32x80xbf16>
    %c0_104 = arith.constant 0 : index
    %c10_105 = arith.constant 10 : index
    %92 = vector.load %arg7[%c0_104, %c10_105] : memref<32x128xbf16, #tpu.memory_space<vmem>>, vector<32x80xbf16>
    %c0_106 = arith.constant 0 : index
    %c11_107 = arith.constant 11 : index
    %93 = vector.load %arg7[%c0_106, %c11_107] : memref<32x128xbf16, #tpu.memory_space<vmem>>, vector<32x80xbf16>
    %c0_108 = arith.constant 0 : index
    %c12_109 = arith.constant 12 : index
    %94 = vector.load %arg7[%c0_108, %c12_109] : memref<32x128xbf16, #tpu.memory_space<vmem>>, vector<32x80xbf16>
    %c0_110 = arith.constant 0 : index
    %c20_111 = arith.constant 20 : index
    %95 = vector.load %arg7[%c0_110, %c20_111] : memref<32x128xbf16, #tpu.memory_space<vmem>>, vector<32x80xbf16>
    %c0_112 = arith.constant 0 : index
    %c21_113 = arith.constant 21 : index
    %96 = vector.load %arg7[%c0_112, %c21_113] : memref<32x128xbf16, #tpu.memory_space<vmem>>, vector<32x80xbf16>
    %c0_114 = arith.constant 0 : index
    %c22_115 = arith.constant 22 : index
    %97 = vector.load %arg7[%c0_114, %c22_115] : memref<32x128xbf16, #tpu.memory_space<vmem>>, vector<32x80xbf16>
    %98 = tpu.concatenate %89, %90, %91, %92, %93, %94, %95, %96, %97 in 0 : vector<32x80xbf16>, vector<32x80xbf16>, vector<32x80xbf16>, vector<32x80xbf16>, vector<32x80xbf16>, vector<32x80xbf16>, vector<32x80xbf16>, vector<32x80xbf16>, vector<32x80xbf16> -> vector<288x80xbf16>
    %cst_116 = arith.constant dense<0.000000e+00> : vector<32x80xf32>
    %99 = tpu.matmul %86, %98, %cst_116 {dimension_numbers = #tpu.dot_dimension_numbers<[1], [0], [0], [1], [0, 0, 1, 1], [], []>} : vector<32x288xbf16>, vector<288x80xbf16>, vector<32x80xf32> -> vector<32x80xf32>
    %100 = vector.broadcast %88 : vector<32x1xf32> to vector<32x80xf32>
    %101 = arith.addf %99, %100 : vector<32x80xf32>
    %102 = vector.broadcast %4 : vector<1x80xf32> to vector<32x80xf32>
    %103 = arith.mulf %101, %102 : vector<32x80xf32>
    %c0_117 = arith.constant 0 : index
    %c11_118 = arith.constant 11 : index
    %104 = vector.load %arg6[%c0_117, %c11_118] : memref<32x128xbf16, #tpu.memory_space<vmem>>, vector<32x80xbf16>
    %105 = arith.extf %104 : vector<32x80xbf16> to vector<32x80xf32>
    %106 = arith.addf %103, %105 : vector<32x80xf32>
    %cst_119 = arith.constant 0.000000e+00 : bf16
    %107 = vector.broadcast %cst_119 : bf16 to vector<32x11xbf16>
    %c0_120 = arith.constant 0 : index
    %c0_121 = arith.constant 0 : index
    %c0_122 = arith.constant 0 : index
    %108 = vector.load %arg5[%c0_120, %c0_121, %c0_122] : memref<1x32x128xbf16, #tpu.memory_space<vmem>>, vector<1x32x11xbf16>
    %109 = vector.shape_cast %108 : vector<1x32x11xbf16> to vector<32x11xbf16>
    %110 = vector.shape_cast %107 : vector<32x11xbf16> to vector<1x32x11xbf16>
    tpu.vector_store %arg5[%c0_120, %c0_121, %c0_122], %110 {strides = array<i32>} : memref<1x32x128xbf16, #tpu.memory_space<vmem>>, vector<1x32x11xbf16>,
    %111 = arith.truncf %106 : vector<32x80xf32> to vector<32x80xbf16>
    %c0_123 = arith.constant 0 : index
    %c0_124 = arith.constant 0 : index
    %c11_125 = arith.constant 11 : index
    %112 = vector.load %arg5[%c0_123, %c0_124, %c11_125] : memref<1x32x128xbf16, #tpu.memory_space<vmem>>, vector<1x32x80xbf16>
    %113 = vector.shape_cast %112 : vector<1x32x80xbf16> to vector<32x80xbf16>
    %114 = vector.shape_cast %111 : vector<32x80xbf16> to vector<1x32x80xbf16>
    tpu.vector_store %arg5[%c0_123, %c0_124, %c11_125], %114 {strides = array<i32>} : memref<1x32x128xbf16, #tpu.memory_space<vmem>>, vector<1x32x80xbf16>,
    %cst_126 = arith.constant 0.000000e+00 : bf16
    %115 = vector.broadcast %cst_126 : bf16 to vector<32x37xbf16>
    %c0_127 = arith.constant 0 : index
    %c0_128 = arith.constant 0 : index
    %c91 = arith.constant 91 : index
    %116 = vector.load %arg5[%c0_127, %c0_128, %c91] : memref<1x32x128xbf16, #tpu.memory_space<vmem>>, vector<1x32x37xbf16>
    %117 = vector.shape_cast %116 : vector<1x32x37xbf16> to vector<32x37xbf16>
    %118 = vector.shape_cast %115 : vector<32x37xbf16> to vector<1x32x37xbf16>
    tpu.vector_store %arg5[%c0_127, %c0_128, %c91], %118 {strides = array<i32>} : memref<1x32x128xbf16, #tpu.memory_space<vmem>>, vector<1x32x37xbf16>,
    return
  }
  func.func @transform_0(%arg0: i32) -> (i32, i32, i32) {
    %c0_i32 = arith.constant 0 : i32
    %c0_i32_0 = arith.constant 0 : i32
    %c0_i32_1 = arith.constant 0 : i32
    return %arg0, %c0_i32, %c0_i32_0 : i32, i32, i32
  }
  func.func @transform_1(%arg0: i32) -> (i32, i32, i32) {
    %c0_i32 = arith.constant 0 : i32
    %c0_i32_0 = arith.constant 0 : i32
    %c0_i32_1 = arith.constant 0 : i32
    %c0_i32_2 = arith.constant 0 : i32
    return %c0_i32, %c0_i32_0, %c0_i32_1 : i32, i32, i32
  }
  func.func @transform_2(%arg0: i32) -> (i32, i32, i32) {
    %c0_i32 = arith.constant 0 : i32
    %c0_i32_0 = arith.constant 0 : i32
    %c0_i32_1 = arith.constant 0 : i32
    %c0_i32_2 = arith.constant 0 : i32
    return %c0_i32, %c0_i32_0, %c0_i32_1 : i32, i32, i32
  }
  func.func @transform_3(%arg0: i32) -> (i32, i32) {
    %c0_i32 = arith.constant 0 : i32
    %c0_i32_0 = arith.constant 0 : i32
    %c0_i32_1 = arith.constant 0 : i32
    return %c0_i32, %c0_i32_0 : i32, i32
  }
  func.func @transform_4(%arg0: i32) -> (i32, i32, i32) {
    %c0_i32 = arith.constant 0 : i32
    %c0_i32_0 = arith.constant 0 : i32
    %c0_i32_1 = arith.constant 0 : i32
    return %arg0, %c0_i32, %c0_i32_0 : i32, i32, i32
  }
}

module attributes {stable_mosaic.version = 11 : i64} {
  func.func @_conv_kernel(%arg0: i32, %arg1: memref<1x128x128xbf16, #tpu.memory_space<vmem>>, %arg2: memref<64x512xbf16, #tpu.memory_space<vmem>>, %arg3: memref<64x1xf32, #tpu.memory_space<vmem>>, %arg4: memref<1x24xf32, #tpu.memory_space<vmem>>, %arg5: memref<1x64x128xbf16, #tpu.memory_space<vmem>>) attributes {dimension_semantics = [#tpu.dimension_semantics<parallel>], iteration_bounds = array<i64: 2>, scalar_prefetch = 0 : i64, scratch_operands = 0 : i64, tpu.core_type = #tpu.core_type<tc>, window_params = [{transform_indices = @transform_0, window_bounds = array<i64: 1, 128, 128>}, {pipeline_mode = #tpu.pipeline_mode<synchronous>, transform_indices = @transform_1, window_bounds = array<i64: 64, 512>}, {pipeline_mode = #tpu.pipeline_mode<synchronous>, transform_indices = @transform_2, window_bounds = array<i64: 64, 1>}, {pipeline_mode = #tpu.pipeline_mode<synchronous>, transform_indices = @transform_3, window_bounds = array<i64: 1, 24>}, {transform_indices = @transform_4, window_bounds = array<i64: 1, 64, 128>}]} {
    %c0 = arith.constant 0 : index
    %c0_0 = arith.constant 0 : index
    %0 = vector.load %arg2[%c0, %c0_0] : memref<64x512xbf16, #tpu.memory_space<vmem>>, vector<64x512xbf16>
    %c0_1 = arith.constant 0 : index
    %c0_2 = arith.constant 0 : index
    %1 = vector.load %arg3[%c0_1, %c0_2] : memref<64x1xf32, #tpu.memory_space<vmem>>, vector<64x1xf32>
    %c0_3 = arith.constant 0 : index
    %c0_4 = arith.constant 0 : index
    %c0_5 = arith.constant 0 : index
    %2 = vector.load %arg1[%c0_3, %c0_4, %c0_5] : memref<1x128x128xbf16, #tpu.memory_space<vmem>>, vector<1x128x24xbf16>
    %3 = vector.shape_cast %2 : vector<1x128x24xbf16> to vector<128x24xbf16>
    %c0_6 = arith.constant 0 : index
    %c0_7 = arith.constant 0 : index
    %c1 = arith.constant 1 : index
    %4 = vector.load %arg1[%c0_6, %c0_7, %c1] : memref<1x128x128xbf16, #tpu.memory_space<vmem>>, vector<1x128x24xbf16>
    %5 = vector.shape_cast %4 : vector<1x128x24xbf16> to vector<128x24xbf16>
    %c0_8 = arith.constant 0 : index
    %c0_9 = arith.constant 0 : index
    %c6 = arith.constant 6 : index
    %6 = vector.load %arg1[%c0_8, %c0_9, %c6] : memref<1x128x128xbf16, #tpu.memory_space<vmem>>, vector<1x128x24xbf16>
    %7 = vector.shape_cast %6 : vector<1x128x24xbf16> to vector<128x24xbf16>
    %c0_10 = arith.constant 0 : index
    %c0_11 = arith.constant 0 : index
    %c7 = arith.constant 7 : index
    %8 = vector.load %arg1[%c0_10, %c0_11, %c7] : memref<1x128x128xbf16, #tpu.memory_space<vmem>>, vector<1x128x24xbf16>
    %9 = vector.shape_cast %8 : vector<1x128x24xbf16> to vector<128x24xbf16>
    %10 = tpu.concatenate %3, %5, %7, %9 in 0 : vector<128x24xbf16>, vector<128x24xbf16>, vector<128x24xbf16>, vector<128x24xbf16> -> vector<512x24xbf16>
    %cst = arith.constant dense<0.000000e+00> : vector<64x24xf32>
    %11 = tpu.matmul %0, %10, %cst {dimension_numbers = #tpu.dot_dimension_numbers<[1], [0], [0], [1], [0, 0, 1, 1], [], []>} : vector<64x512xbf16>, vector<512x24xbf16>, vector<64x24xf32> -> vector<64x24xf32>
    %12 = vector.broadcast %1 : vector<64x1xf32> to vector<64x24xf32>
    %13 = arith.addf %11, %12 : vector<64x24xf32>
    %cst_12 = arith.constant 0.000000e+00 : f32
    %14 = vector.broadcast %cst_12 : f32 to vector<64x24xf32>
    %15 = arith.maximumf %13, %14 : vector<64x24xf32>
    %c0_13 = arith.constant 0 : index
    %c0_14 = arith.constant 0 : index
    %16 = vector.load %arg4[%c0_13, %c0_14] : memref<1x24xf32, #tpu.memory_space<vmem>>, vector<1x24xf32>
    %17 = vector.broadcast %16 : vector<1x24xf32> to vector<64x24xf32>
    %18 = arith.mulf %15, %17 : vector<64x24xf32>
    %cst_15 = arith.constant 0.000000e+00 : bf16
    %19 = vector.broadcast %cst_15 : bf16 to vector<64x7xbf16>
    %c0_16 = arith.constant 0 : index
    %c0_17 = arith.constant 0 : index
    %c0_18 = arith.constant 0 : index
    %20 = vector.load %arg5[%c0_16, %c0_17, %c0_18] : memref<1x64x128xbf16, #tpu.memory_space<vmem>>, vector<1x64x7xbf16>
    %21 = vector.shape_cast %20 : vector<1x64x7xbf16> to vector<64x7xbf16>
    %22 = vector.shape_cast %19 : vector<64x7xbf16> to vector<1x64x7xbf16>
    tpu.vector_store %arg5[%c0_16, %c0_17, %c0_18], %22 {strides = array<i32>} : memref<1x64x128xbf16, #tpu.memory_space<vmem>>, vector<1x64x7xbf16>,
    %23 = arith.truncf %18 : vector<64x24xf32> to vector<64x24xbf16>
    %c0_19 = arith.constant 0 : index
    %c0_20 = arith.constant 0 : index
    %c7_21 = arith.constant 7 : index
    %24 = vector.load %arg5[%c0_19, %c0_20, %c7_21] : memref<1x64x128xbf16, #tpu.memory_space<vmem>>, vector<1x64x24xbf16>
    %25 = vector.shape_cast %24 : vector<1x64x24xbf16> to vector<64x24xbf16>
    %26 = vector.shape_cast %23 : vector<64x24xbf16> to vector<1x64x24xbf16>
    tpu.vector_store %arg5[%c0_19, %c0_20, %c7_21], %26 {strides = array<i32>} : memref<1x64x128xbf16, #tpu.memory_space<vmem>>, vector<1x64x24xbf16>,
    %cst_22 = arith.constant 0.000000e+00 : bf16
    %27 = vector.broadcast %cst_22 : bf16 to vector<64x97xbf16>
    %c0_23 = arith.constant 0 : index
    %c0_24 = arith.constant 0 : index
    %c31 = arith.constant 31 : index
    %28 = vector.load %arg5[%c0_23, %c0_24, %c31] : memref<1x64x128xbf16, #tpu.memory_space<vmem>>, vector<1x64x97xbf16>
    %29 = vector.shape_cast %28 : vector<1x64x97xbf16> to vector<64x97xbf16>
    %30 = vector.shape_cast %27 : vector<64x97xbf16> to vector<1x64x97xbf16>
    tpu.vector_store %arg5[%c0_23, %c0_24, %c31], %30 {strides = array<i32>} : memref<1x64x128xbf16, #tpu.memory_space<vmem>>, vector<1x64x97xbf16>,
    return
  }
  func.func @transform_0(%arg0: i32) -> (i32, i32, i32) {
    %c0_i32 = arith.constant 0 : i32
    %c0_i32_0 = arith.constant 0 : i32
    %c0_i32_1 = arith.constant 0 : i32
    return %arg0, %c0_i32, %c0_i32_0 : i32, i32, i32
  }
  func.func @transform_1(%arg0: i32) -> (i32, i32) {
    %c0_i32 = arith.constant 0 : i32
    %c0_i32_0 = arith.constant 0 : i32
    %c0_i32_1 = arith.constant 0 : i32
    return %c0_i32, %c0_i32_0 : i32, i32
  }
  func.func @transform_2(%arg0: i32) -> (i32, i32) {
    %c0_i32 = arith.constant 0 : i32
    %c0_i32_0 = arith.constant 0 : i32
    %c0_i32_1 = arith.constant 0 : i32
    return %c0_i32, %c0_i32_0 : i32, i32
  }
  func.func @transform_3(%arg0: i32) -> (i32, i32) {
    %c0_i32 = arith.constant 0 : i32
    %c0_i32_0 = arith.constant 0 : i32
    %c0_i32_1 = arith.constant 0 : i32
    return %c0_i32, %c0_i32_0 : i32, i32
  }
  func.func @transform_4(%arg0: i32) -> (i32, i32, i32) {
    %c0_i32 = arith.constant 0 : i32
    %c0_i32_0 = arith.constant 0 : i32
    %c0_i32_1 = arith.constant 0 : i32
    return %arg0, %c0_i32, %c0_i32_0 : i32, i32, i32
  }
}

module attributes {stable_mosaic.version = 11 : i64} {
  func.func @_conv_kernel(%arg0: i32, %arg1: memref<1x64x128xbf16, #tpu.memory_space<vmem>>, %arg2: memref<128x576xbf16, #tpu.memory_space<vmem>>, %arg3: memref<128x1xf32, #tpu.memory_space<vmem>>, %arg4: memref<1x128x24xbf16, #tpu.memory_space<vmem>>) attributes {dimension_semantics = [#tpu.dimension_semantics<parallel>], iteration_bounds = array<i64: 2>, scalar_prefetch = 0 : i64, scratch_operands = 0 : i64, tpu.core_type = #tpu.core_type<tc>, window_params = [{transform_indices = @transform_0, window_bounds = array<i64: 1, 64, 128>}, {pipeline_mode = #tpu.pipeline_mode<synchronous>, transform_indices = @transform_1, window_bounds = array<i64: 128, 576>}, {pipeline_mode = #tpu.pipeline_mode<synchronous>, transform_indices = @transform_2, window_bounds = array<i64: 128, 1>}, {transform_indices = @transform_3, window_bounds = array<i64: 1, 128, 24>}]} {
    %c0 = arith.constant 0 : index
    %c0_0 = arith.constant 0 : index
    %0 = vector.load %arg2[%c0, %c0_0] : memref<128x576xbf16, #tpu.memory_space<vmem>>, vector<128x576xbf16>
    %c0_1 = arith.constant 0 : index
    %c0_2 = arith.constant 0 : index
    %1 = vector.load %arg3[%c0_1, %c0_2] : memref<128x1xf32, #tpu.memory_space<vmem>>, vector<128x1xf32>
    %c0_3 = arith.constant 0 : index
    %c0_4 = arith.constant 0 : index
    %c0_5 = arith.constant 0 : index
    %2 = vector.load %arg1[%c0_3, %c0_4, %c0_5] : memref<1x64x128xbf16, #tpu.memory_space<vmem>>, vector<1x64x24xbf16>
    %3 = vector.shape_cast %2 : vector<1x64x24xbf16> to vector<64x24xbf16>
    %c0_6 = arith.constant 0 : index
    %c0_7 = arith.constant 0 : index
    %c1 = arith.constant 1 : index
    %4 = vector.load %arg1[%c0_6, %c0_7, %c1] : memref<1x64x128xbf16, #tpu.memory_space<vmem>>, vector<1x64x24xbf16>
    %5 = vector.shape_cast %4 : vector<1x64x24xbf16> to vector<64x24xbf16>
    %c0_8 = arith.constant 0 : index
    %c0_9 = arith.constant 0 : index
    %c2 = arith.constant 2 : index
    %6 = vector.load %arg1[%c0_8, %c0_9, %c2] : memref<1x64x128xbf16, #tpu.memory_space<vmem>>, vector<1x64x24xbf16>
    %7 = vector.shape_cast %6 : vector<1x64x24xbf16> to vector<64x24xbf16>
    %c0_10 = arith.constant 0 : index
    %c0_11 = arith.constant 0 : index
    %c6 = arith.constant 6 : index
    %8 = vector.load %arg1[%c0_10, %c0_11, %c6] : memref<1x64x128xbf16, #tpu.memory_space<vmem>>, vector<1x64x24xbf16>
    %9 = vector.shape_cast %8 : vector<1x64x24xbf16> to vector<64x24xbf16>
    %c0_12 = arith.constant 0 : index
    %c0_13 = arith.constant 0 : index
    %c7 = arith.constant 7 : index
    %10 = vector.load %arg1[%c0_12, %c0_13, %c7] : memref<1x64x128xbf16, #tpu.memory_space<vmem>>, vector<1x64x24xbf16>
    %11 = vector.shape_cast %10 : vector<1x64x24xbf16> to vector<64x24xbf16>
    %c0_14 = arith.constant 0 : index
    %c0_15 = arith.constant 0 : index
    %c8 = arith.constant 8 : index
    %12 = vector.load %arg1[%c0_14, %c0_15, %c8] : memref<1x64x128xbf16, #tpu.memory_space<vmem>>, vector<1x64x24xbf16>
    %13 = vector.shape_cast %12 : vector<1x64x24xbf16> to vector<64x24xbf16>
    %c0_16 = arith.constant 0 : index
    %c0_17 = arith.constant 0 : index
    %c12 = arith.constant 12 : index
    %14 = vector.load %arg1[%c0_16, %c0_17, %c12] : memref<1x64x128xbf16, #tpu.memory_space<vmem>>, vector<1x64x24xbf16>
    %15 = vector.shape_cast %14 : vector<1x64x24xbf16> to vector<64x24xbf16>
    %c0_18 = arith.constant 0 : index
    %c0_19 = arith.constant 0 : index
    %c13 = arith.constant 13 : index
    %16 = vector.load %arg1[%c0_18, %c0_19, %c13] : memref<1x64x128xbf16, #tpu.memory_space<vmem>>, vector<1x64x24xbf16>
    %17 = vector.shape_cast %16 : vector<1x64x24xbf16> to vector<64x24xbf16>
    %c0_20 = arith.constant 0 : index
    %c0_21 = arith.constant 0 : index
    %c14 = arith.constant 14 : index
    %18 = vector.load %arg1[%c0_20, %c0_21, %c14] : memref<1x64x128xbf16, #tpu.memory_space<vmem>>, vector<1x64x24xbf16>
    %19 = vector.shape_cast %18 : vector<1x64x24xbf16> to vector<64x24xbf16>
    %20 = tpu.concatenate %3, %5, %7, %9, %11, %13, %15, %17, %19 in 0 : vector<64x24xbf16>, vector<64x24xbf16>, vector<64x24xbf16>, vector<64x24xbf16>, vector<64x24xbf16>, vector<64x24xbf16>, vector<64x24xbf16>, vector<64x24xbf16>, vector<64x24xbf16> -> vector<576x24xbf16>
    %cst = arith.constant dense<0.000000e+00> : vector<128x24xf32>
    %21 = tpu.matmul %0, %20, %cst {dimension_numbers = #tpu.dot_dimension_numbers<[1], [0], [0], [1], [0, 0, 1, 1], [], []>} : vector<128x576xbf16>, vector<576x24xbf16>, vector<128x24xf32> -> vector<128x24xf32>
    %22 = vector.broadcast %1 : vector<128x1xf32> to vector<128x24xf32>
    %23 = arith.addf %21, %22 : vector<128x24xf32>
    %cst_22 = arith.constant 0.000000e+00 : f32
    %24 = vector.broadcast %cst_22 : f32 to vector<128x24xf32>
    %25 = arith.maximumf %23, %24 : vector<128x24xf32>
    %26 = arith.truncf %25 : vector<128x24xf32> to vector<128x24xbf16>
    %c0_23 = arith.constant 0 : index
    %c0_24 = arith.constant 0 : index
    %c0_25 = arith.constant 0 : index
    %27 = vector.load %arg4[%c0_23, %c0_24, %c0_25] : memref<1x128x24xbf16, #tpu.memory_space<vmem>>, vector<1x128x24xbf16>
    %28 = vector.shape_cast %27 : vector<1x128x24xbf16> to vector<128x24xbf16>
    %29 = vector.shape_cast %26 : vector<128x24xbf16> to vector<1x128x24xbf16>
    tpu.vector_store %arg4[%c0_23, %c0_24, %c0_25], %29 {strides = array<i32>} : memref<1x128x24xbf16, #tpu.memory_space<vmem>>, vector<1x128x24xbf16>,
    return
  }
  func.func @transform_0(%arg0: i32) -> (i32, i32, i32) {
    %c0_i32 = arith.constant 0 : i32
    %c0_i32_0 = arith.constant 0 : i32
    %c0_i32_1 = arith.constant 0 : i32
    return %arg0, %c0_i32, %c0_i32_0 : i32, i32, i32
  }
  func.func @transform_1(%arg0: i32) -> (i32, i32) {
    %c0_i32 = arith.constant 0 : i32
    %c0_i32_0 = arith.constant 0 : i32
    %c0_i32_1 = arith.constant 0 : i32
    return %c0_i32, %c0_i32_0 : i32, i32
  }
  func.func @transform_2(%arg0: i32) -> (i32, i32) {
    %c0_i32 = arith.constant 0 : i32
    %c0_i32_0 = arith.constant 0 : i32
    %c0_i32_1 = arith.constant 0 : i32
    return %c0_i32, %c0_i32_0 : i32, i32
  }
  func.func @transform_3(%arg0: i32) -> (i32, i32, i32) {
    %c0_i32 = arith.constant 0 : i32
    %c0_i32_0 = arith.constant 0 : i32
    %c0_i32_1 = arith.constant 0 : i32
    return %arg0, %c0_i32, %c0_i32_0 : i32, i32, i32
  }
}

module attributes {stable_mosaic.version = 11 : i64} {
  func.func @_block_kernel(%arg0: i32, %arg1: memref<1x64x128xbf16, #tpu.memory_space<vmem>>, %arg2: memref<4x64x576xbf16, #tpu.memory_space<vmem>>, %arg3: memref<4x64x1xf32, #tpu.memory_space<vmem>>, %arg4: memref<1x24xf32, #tpu.memory_space<vmem>>, %arg5: memref<1x64x128xbf16, #tpu.memory_space<vmem>>, %arg6: memref<64x128xbf16, #tpu.memory_space<vmem>>, %arg7: memref<64x128xbf16, #tpu.memory_space<vmem>>) attributes {dimension_semantics = [#tpu.dimension_semantics<parallel>], iteration_bounds = array<i64: 2>, scalar_prefetch = 0 : i64, scratch_operands = 2 : i64, tpu.core_type = #tpu.core_type<tc>, window_params = [{transform_indices = @transform_0, window_bounds = array<i64: 1, 64, 128>}, {pipeline_mode = #tpu.pipeline_mode<synchronous>, transform_indices = @transform_1, window_bounds = array<i64: 4, 64, 576>}, {pipeline_mode = #tpu.pipeline_mode<synchronous>, transform_indices = @transform_2, window_bounds = array<i64: 4, 64, 1>}, {pipeline_mode = #tpu.pipeline_mode<synchronous>, transform_indices = @transform_3, window_bounds = array<i64: 1, 24>}, {transform_indices = @transform_4, window_bounds = array<i64: 1, 64, 128>}]} {
    %cst = arith.constant 0.000000e+00 : bf16
    %0 = vector.broadcast %cst : bf16 to vector<64x128xbf16>
    %c0 = arith.constant 0 : index
    %c0_0 = arith.constant 0 : index
    %1 = vector.load %arg6[%c0, %c0_0] : memref<64x128xbf16, #tpu.memory_space<vmem>>, vector<64x128xbf16>
    tpu.vector_store %arg6[%c0, %c0_0], %0 {strides = array<i32>} : memref<64x128xbf16, #tpu.memory_space<vmem>>, vector<64x128xbf16>,
    %cst_1 = arith.constant 0.000000e+00 : bf16
    %2 = vector.broadcast %cst_1 : bf16 to vector<64x128xbf16>
    %c0_2 = arith.constant 0 : index
    %c0_3 = arith.constant 0 : index
    %3 = vector.load %arg7[%c0_2, %c0_3] : memref<64x128xbf16, #tpu.memory_space<vmem>>, vector<64x128xbf16>
    tpu.vector_store %arg7[%c0_2, %c0_3], %2 {strides = array<i32>} : memref<64x128xbf16, #tpu.memory_space<vmem>>, vector<64x128xbf16>,
    %c0_4 = arith.constant 0 : index
    %c0_5 = arith.constant 0 : index
    %4 = vector.load %arg4[%c0_4, %c0_5] : memref<1x24xf32, #tpu.memory_space<vmem>>, vector<1x24xf32>
    %c0_6 = arith.constant 0 : index
    %c0_7 = arith.constant 0 : index
    %c0_8 = arith.constant 0 : index
    %5 = vector.load %arg2[%c0_6, %c0_7, %c0_8] : memref<4x64x576xbf16, #tpu.memory_space<vmem>>, vector<1x64x576xbf16>
    %6 = vector.shape_cast %5 : vector<1x64x576xbf16> to vector<64x576xbf16>
    %c0_9 = arith.constant 0 : index
    %c0_10 = arith.constant 0 : index
    %c0_11 = arith.constant 0 : index
    %7 = vector.load %arg3[%c0_9, %c0_10, %c0_11] : memref<4x64x1xf32, #tpu.memory_space<vmem>>, vector<1x64x1xf32>
    %8 = vector.shape_cast %7 : vector<1x64x1xf32> to vector<64x1xf32>
    %c0_12 = arith.constant 0 : index
    %c0_13 = arith.constant 0 : index
    %c0_14 = arith.constant 0 : index
    %9 = vector.load %arg1[%c0_12, %c0_13, %c0_14] : memref<1x64x128xbf16, #tpu.memory_space<vmem>>, vector<1x64x24xbf16>
    %10 = vector.shape_cast %9 : vector<1x64x24xbf16> to vector<64x24xbf16>
    %c0_15 = arith.constant 0 : index
    %c0_16 = arith.constant 0 : index
    %c1 = arith.constant 1 : index
    %11 = vector.load %arg1[%c0_15, %c0_16, %c1] : memref<1x64x128xbf16, #tpu.memory_space<vmem>>, vector<1x64x24xbf16>
    %12 = vector.shape_cast %11 : vector<1x64x24xbf16> to vector<64x24xbf16>
    %c0_17 = arith.constant 0 : index
    %c0_18 = arith.constant 0 : index
    %c2 = arith.constant 2 : index
    %13 = vector.load %arg1[%c0_17, %c0_18, %c2] : memref<1x64x128xbf16, #tpu.memory_space<vmem>>, vector<1x64x24xbf16>
    %14 = vector.shape_cast %13 : vector<1x64x24xbf16> to vector<64x24xbf16>
    %c0_19 = arith.constant 0 : index
    %c0_20 = arith.constant 0 : index
    %c6 = arith.constant 6 : index
    %15 = vector.load %arg1[%c0_19, %c0_20, %c6] : memref<1x64x128xbf16, #tpu.memory_space<vmem>>, vector<1x64x24xbf16>
    %16 = vector.shape_cast %15 : vector<1x64x24xbf16> to vector<64x24xbf16>
    %c0_21 = arith.constant 0 : index
    %c0_22 = arith.constant 0 : index
    %c7 = arith.constant 7 : index
    %17 = vector.load %arg1[%c0_21, %c0_22, %c7] : memref<1x64x128xbf16, #tpu.memory_space<vmem>>, vector<1x64x24xbf16>
    %18 = vector.shape_cast %17 : vector<1x64x24xbf16> to vector<64x24xbf16>
    %c0_23 = arith.constant 0 : index
    %c0_24 = arith.constant 0 : index
    %c8 = arith.constant 8 : index
    %19 = vector.load %arg1[%c0_23, %c0_24, %c8] : memref<1x64x128xbf16, #tpu.memory_space<vmem>>, vector<1x64x24xbf16>
    %20 = vector.shape_cast %19 : vector<1x64x24xbf16> to vector<64x24xbf16>
    %c0_25 = arith.constant 0 : index
    %c0_26 = arith.constant 0 : index
    %c12 = arith.constant 12 : index
    %21 = vector.load %arg1[%c0_25, %c0_26, %c12] : memref<1x64x128xbf16, #tpu.memory_space<vmem>>, vector<1x64x24xbf16>
    %22 = vector.shape_cast %21 : vector<1x64x24xbf16> to vector<64x24xbf16>
    %c0_27 = arith.constant 0 : index
    %c0_28 = arith.constant 0 : index
    %c13 = arith.constant 13 : index
    %23 = vector.load %arg1[%c0_27, %c0_28, %c13] : memref<1x64x128xbf16, #tpu.memory_space<vmem>>, vector<1x64x24xbf16>
    %24 = vector.shape_cast %23 : vector<1x64x24xbf16> to vector<64x24xbf16>
    %c0_29 = arith.constant 0 : index
    %c0_30 = arith.constant 0 : index
    %c14 = arith.constant 14 : index
    %25 = vector.load %arg1[%c0_29, %c0_30, %c14] : memref<1x64x128xbf16, #tpu.memory_space<vmem>>, vector<1x64x24xbf16>
    %26 = vector.shape_cast %25 : vector<1x64x24xbf16> to vector<64x24xbf16>
    %27 = tpu.concatenate %10, %12, %14, %16, %18, %20, %22, %24, %26 in 0 : vector<64x24xbf16>, vector<64x24xbf16>, vector<64x24xbf16>, vector<64x24xbf16>, vector<64x24xbf16>, vector<64x24xbf16>, vector<64x24xbf16>, vector<64x24xbf16>, vector<64x24xbf16> -> vector<576x24xbf16>
    %cst_31 = arith.constant dense<0.000000e+00> : vector<64x24xf32>
    %28 = tpu.matmul %6, %27, %cst_31 {dimension_numbers = #tpu.dot_dimension_numbers<[1], [0], [0], [1], [0, 0, 1, 1], [], []>} : vector<64x576xbf16>, vector<576x24xbf16>, vector<64x24xf32> -> vector<64x24xf32>
    %29 = vector.broadcast %8 : vector<64x1xf32> to vector<64x24xf32>
    %30 = arith.addf %28, %29 : vector<64x24xf32>
    %cst_32 = arith.constant 0.000000e+00 : f32
    %31 = vector.broadcast %cst_32 : f32 to vector<64x24xf32>
    %32 = arith.maximumf %30, %31 : vector<64x24xf32>
    %33 = vector.broadcast %4 : vector<1x24xf32> to vector<64x24xf32>
    %34 = arith.mulf %32, %33 : vector<64x24xf32>
    %35 = arith.truncf %34 : vector<64x24xf32> to vector<64x24xbf16>
    %c0_33 = arith.constant 0 : index
    %c7_34 = arith.constant 7 : index
    %36 = vector.load %arg7[%c0_33, %c7_34] : memref<64x128xbf16, #tpu.memory_space<vmem>>, vector<64x24xbf16>
    tpu.vector_store %arg7[%c0_33, %c7_34], %35 {strides = array<i32>} : memref<64x128xbf16, #tpu.memory_space<vmem>>, vector<64x24xbf16>,
    %c1_35 = arith.constant 1 : index
    %c0_36 = arith.constant 0 : index
    %c0_37 = arith.constant 0 : index
    %37 = vector.load %arg2[%c1_35, %c0_36, %c0_37] : memref<4x64x576xbf16, #tpu.memory_space<vmem>>, vector<1x64x576xbf16>
    %38 = vector.shape_cast %37 : vector<1x64x576xbf16> to vector<64x576xbf16>
    %c1_38 = arith.constant 1 : index
    %c0_39 = arith.constant 0 : index
    %c0_40 = arith.constant 0 : index
    %39 = vector.load %arg3[%c1_38, %c0_39, %c0_40] : memref<4x64x1xf32, #tpu.memory_space<vmem>>, vector<1x64x1xf32>
    %40 = vector.shape_cast %39 : vector<1x64x1xf32> to vector<64x1xf32>
    %c0_41 = arith.constant 0 : index
    %c0_42 = arith.constant 0 : index
    %41 = vector.load %arg7[%c0_41, %c0_42] : memref<64x128xbf16, #tpu.memory_space<vmem>>, vector<64x24xbf16>
    %c0_43 = arith.constant 0 : index
    %c1_44 = arith.constant 1 : index
    %42 = vector.load %arg7[%c0_43, %c1_44] : memref<64x128xbf16, #tpu.memory_space<vmem>>, vector<64x24xbf16>
    %c0_45 = arith.constant 0 : index
    %c2_46 = arith.constant 2 : index
    %43 = vector.load %arg7[%c0_45, %c2_46] : memref<64x128xbf16, #tpu.memory_space<vmem>>, vector<64x24xbf16>
    %c0_47 = arith.constant 0 : index
    %c6_48 = arith.constant 6 : index
    %44 = vector.load %arg7[%c0_47, %c6_48] : memref<64x128xbf16, #tpu.memory_space<vmem>>, vector<64x24xbf16>
    %c0_49 = arith.constant 0 : index
    %c7_50 = arith.constant 7 : index
    %45 = vector.load %arg7[%c0_49, %c7_50] : memref<64x128xbf16, #tpu.memory_space<vmem>>, vector<64x24xbf16>
    %c0_51 = arith.constant 0 : index
    %c8_52 = arith.constant 8 : index
    %46 = vector.load %arg7[%c0_51, %c8_52] : memref<64x128xbf16, #tpu.memory_space<vmem>>, vector<64x24xbf16>
    %c0_53 = arith.constant 0 : index
    %c12_54 = arith.constant 12 : index
    %47 = vector.load %arg7[%c0_53, %c12_54] : memref<64x128xbf16, #tpu.memory_space<vmem>>, vector<64x24xbf16>
    %c0_55 = arith.constant 0 : index
    %c13_56 = arith.constant 13 : index
    %48 = vector.load %arg7[%c0_55, %c13_56] : memref<64x128xbf16, #tpu.memory_space<vmem>>, vector<64x24xbf16>
    %c0_57 = arith.constant 0 : index
    %c14_58 = arith.constant 14 : index
    %49 = vector.load %arg7[%c0_57, %c14_58] : memref<64x128xbf16, #tpu.memory_space<vmem>>, vector<64x24xbf16>
    %50 = tpu.concatenate %41, %42, %43, %44, %45, %46, %47, %48, %49 in 0 : vector<64x24xbf16>, vector<64x24xbf16>, vector<64x24xbf16>, vector<64x24xbf16>, vector<64x24xbf16>, vector<64x24xbf16>, vector<64x24xbf16>, vector<64x24xbf16>, vector<64x24xbf16> -> vector<576x24xbf16>
    %cst_59 = arith.constant dense<0.000000e+00> : vector<64x24xf32>
    %51 = tpu.matmul %38, %50, %cst_59 {dimension_numbers = #tpu.dot_dimension_numbers<[1], [0], [0], [1], [0, 0, 1, 1], [], []>} : vector<64x576xbf16>, vector<576x24xbf16>, vector<64x24xf32> -> vector<64x24xf32>
    %52 = vector.broadcast %40 : vector<64x1xf32> to vector<64x24xf32>
    %53 = arith.addf %51, %52 : vector<64x24xf32>
    %54 = vector.broadcast %4 : vector<1x24xf32> to vector<64x24xf32>
    %55 = arith.mulf %53, %54 : vector<64x24xf32>
    %c0_60 = arith.constant 0 : index
    %c0_61 = arith.constant 0 : index
    %c7_62 = arith.constant 7 : index
    %56 = vector.load %arg1[%c0_60, %c0_61, %c7_62] : memref<1x64x128xbf16, #tpu.memory_space<vmem>>, vector<1x64x24xbf16>
    %57 = vector.shape_cast %56 : vector<1x64x24xbf16> to vector<64x24xbf16>
    %58 = arith.extf %57 : vector<64x24xbf16> to vector<64x24xf32>
    %59 = arith.addf %55, %58 : vector<64x24xf32>
    %60 = arith.truncf %59 : vector<64x24xf32> to vector<64x24xbf16>
    %c0_63 = arith.constant 0 : index
    %c7_64 = arith.constant 7 : index
    %61 = vector.load %arg6[%c0_63, %c7_64] : memref<64x128xbf16, #tpu.memory_space<vmem>>, vector<64x24xbf16>
    tpu.vector_store %arg6[%c0_63, %c7_64], %60 {strides = array<i32>} : memref<64x128xbf16, #tpu.memory_space<vmem>>, vector<64x24xbf16>,
    %c2_65 = arith.constant 2 : index
    %c0_66 = arith.constant 0 : index
    %c0_67 = arith.constant 0 : index
    %62 = vector.load %arg2[%c2_65, %c0_66, %c0_67] : memref<4x64x576xbf16, #tpu.memory_space<vmem>>, vector<1x64x576xbf16>
    %63 = vector.shape_cast %62 : vector<1x64x576xbf16> to vector<64x576xbf16>
    %c2_68 = arith.constant 2 : index
    %c0_69 = arith.constant 0 : index
    %c0_70 = arith.constant 0 : index
    %64 = vector.load %arg3[%c2_68, %c0_69, %c0_70] : memref<4x64x1xf32, #tpu.memory_space<vmem>>, vector<1x64x1xf32>
    %65 = vector.shape_cast %64 : vector<1x64x1xf32> to vector<64x1xf32>
    %c0_71 = arith.constant 0 : index
    %c0_72 = arith.constant 0 : index
    %66 = vector.load %arg6[%c0_71, %c0_72] : memref<64x128xbf16, #tpu.memory_space<vmem>>, vector<64x24xbf16>
    %c0_73 = arith.constant 0 : index
    %c1_74 = arith.constant 1 : index
    %67 = vector.load %arg6[%c0_73, %c1_74] : memref<64x128xbf16, #tpu.memory_space<vmem>>, vector<64x24xbf16>
    %c0_75 = arith.constant 0 : index
    %c2_76 = arith.constant 2 : index
    %68 = vector.load %arg6[%c0_75, %c2_76] : memref<64x128xbf16, #tpu.memory_space<vmem>>, vector<64x24xbf16>
    %c0_77 = arith.constant 0 : index
    %c6_78 = arith.constant 6 : index
    %69 = vector.load %arg6[%c0_77, %c6_78] : memref<64x128xbf16, #tpu.memory_space<vmem>>, vector<64x24xbf16>
    %c0_79 = arith.constant 0 : index
    %c7_80 = arith.constant 7 : index
    %70 = vector.load %arg6[%c0_79, %c7_80] : memref<64x128xbf16, #tpu.memory_space<vmem>>, vector<64x24xbf16>
    %c0_81 = arith.constant 0 : index
    %c8_82 = arith.constant 8 : index
    %71 = vector.load %arg6[%c0_81, %c8_82] : memref<64x128xbf16, #tpu.memory_space<vmem>>, vector<64x24xbf16>
    %c0_83 = arith.constant 0 : index
    %c12_84 = arith.constant 12 : index
    %72 = vector.load %arg6[%c0_83, %c12_84] : memref<64x128xbf16, #tpu.memory_space<vmem>>, vector<64x24xbf16>
    %c0_85 = arith.constant 0 : index
    %c13_86 = arith.constant 13 : index
    %73 = vector.load %arg6[%c0_85, %c13_86] : memref<64x128xbf16, #tpu.memory_space<vmem>>, vector<64x24xbf16>
    %c0_87 = arith.constant 0 : index
    %c14_88 = arith.constant 14 : index
    %74 = vector.load %arg6[%c0_87, %c14_88] : memref<64x128xbf16, #tpu.memory_space<vmem>>, vector<64x24xbf16>
    %75 = tpu.concatenate %66, %67, %68, %69, %70, %71, %72, %73, %74 in 0 : vector<64x24xbf16>, vector<64x24xbf16>, vector<64x24xbf16>, vector<64x24xbf16>, vector<64x24xbf16>, vector<64x24xbf16>, vector<64x24xbf16>, vector<64x24xbf16>, vector<64x24xbf16> -> vector<576x24xbf16>
    %cst_89 = arith.constant dense<0.000000e+00> : vector<64x24xf32>
    %76 = tpu.matmul %63, %75, %cst_89 {dimension_numbers = #tpu.dot_dimension_numbers<[1], [0], [0], [1], [0, 0, 1, 1], [], []>} : vector<64x576xbf16>, vector<576x24xbf16>, vector<64x24xf32> -> vector<64x24xf32>
    %77 = vector.broadcast %65 : vector<64x1xf32> to vector<64x24xf32>
    %78 = arith.addf %76, %77 : vector<64x24xf32>
    %cst_90 = arith.constant 0.000000e+00 : f32
    %79 = vector.broadcast %cst_90 : f32 to vector<64x24xf32>
    %80 = arith.maximumf %78, %79 : vector<64x24xf32>
    %81 = vector.broadcast %4 : vector<1x24xf32> to vector<64x24xf32>
    %82 = arith.mulf %80, %81 : vector<64x24xf32>
    %83 = arith.truncf %82 : vector<64x24xf32> to vector<64x24xbf16>
    %c0_91 = arith.constant 0 : index
    %c7_92 = arith.constant 7 : index
    %84 = vector.load %arg7[%c0_91, %c7_92] : memref<64x128xbf16, #tpu.memory_space<vmem>>, vector<64x24xbf16>
    tpu.vector_store %arg7[%c0_91, %c7_92], %83 {strides = array<i32>} : memref<64x128xbf16, #tpu.memory_space<vmem>>, vector<64x24xbf16>,
    %c3 = arith.constant 3 : index
    %c0_93 = arith.constant 0 : index
    %c0_94 = arith.constant 0 : index
    %85 = vector.load %arg2[%c3, %c0_93, %c0_94] : memref<4x64x576xbf16, #tpu.memory_space<vmem>>, vector<1x64x576xbf16>
    %86 = vector.shape_cast %85 : vector<1x64x576xbf16> to vector<64x576xbf16>
    %c3_95 = arith.constant 3 : index
    %c0_96 = arith.constant 0 : index
    %c0_97 = arith.constant 0 : index
    %87 = vector.load %arg3[%c3_95, %c0_96, %c0_97] : memref<4x64x1xf32, #tpu.memory_space<vmem>>, vector<1x64x1xf32>
    %88 = vector.shape_cast %87 : vector<1x64x1xf32> to vector<64x1xf32>
    %c0_98 = arith.constant 0 : index
    %c0_99 = arith.constant 0 : index
    %89 = vector.load %arg7[%c0_98, %c0_99] : memref<64x128xbf16, #tpu.memory_space<vmem>>, vector<64x24xbf16>
    %c0_100 = arith.constant 0 : index
    %c1_101 = arith.constant 1 : index
    %90 = vector.load %arg7[%c0_100, %c1_101] : memref<64x128xbf16, #tpu.memory_space<vmem>>, vector<64x24xbf16>
    %c0_102 = arith.constant 0 : index
    %c2_103 = arith.constant 2 : index
    %91 = vector.load %arg7[%c0_102, %c2_103] : memref<64x128xbf16, #tpu.memory_space<vmem>>, vector<64x24xbf16>
    %c0_104 = arith.constant 0 : index
    %c6_105 = arith.constant 6 : index
    %92 = vector.load %arg7[%c0_104, %c6_105] : memref<64x128xbf16, #tpu.memory_space<vmem>>, vector<64x24xbf16>
    %c0_106 = arith.constant 0 : index
    %c7_107 = arith.constant 7 : index
    %93 = vector.load %arg7[%c0_106, %c7_107] : memref<64x128xbf16, #tpu.memory_space<vmem>>, vector<64x24xbf16>
    %c0_108 = arith.constant 0 : index
    %c8_109 = arith.constant 8 : index
    %94 = vector.load %arg7[%c0_108, %c8_109] : memref<64x128xbf16, #tpu.memory_space<vmem>>, vector<64x24xbf16>
    %c0_110 = arith.constant 0 : index
    %c12_111 = arith.constant 12 : index
    %95 = vector.load %arg7[%c0_110, %c12_111] : memref<64x128xbf16, #tpu.memory_space<vmem>>, vector<64x24xbf16>
    %c0_112 = arith.constant 0 : index
    %c13_113 = arith.constant 13 : index
    %96 = vector.load %arg7[%c0_112, %c13_113] : memref<64x128xbf16, #tpu.memory_space<vmem>>, vector<64x24xbf16>
    %c0_114 = arith.constant 0 : index
    %c14_115 = arith.constant 14 : index
    %97 = vector.load %arg7[%c0_114, %c14_115] : memref<64x128xbf16, #tpu.memory_space<vmem>>, vector<64x24xbf16>
    %98 = tpu.concatenate %89, %90, %91, %92, %93, %94, %95, %96, %97 in 0 : vector<64x24xbf16>, vector<64x24xbf16>, vector<64x24xbf16>, vector<64x24xbf16>, vector<64x24xbf16>, vector<64x24xbf16>, vector<64x24xbf16>, vector<64x24xbf16>, vector<64x24xbf16> -> vector<576x24xbf16>
    %cst_116 = arith.constant dense<0.000000e+00> : vector<64x24xf32>
    %99 = tpu.matmul %86, %98, %cst_116 {dimension_numbers = #tpu.dot_dimension_numbers<[1], [0], [0], [1], [0, 0, 1, 1], [], []>} : vector<64x576xbf16>, vector<576x24xbf16>, vector<64x24xf32> -> vector<64x24xf32>
    %100 = vector.broadcast %88 : vector<64x1xf32> to vector<64x24xf32>
    %101 = arith.addf %99, %100 : vector<64x24xf32>
    %102 = vector.broadcast %4 : vector<1x24xf32> to vector<64x24xf32>
    %103 = arith.mulf %101, %102 : vector<64x24xf32>
    %c0_117 = arith.constant 0 : index
    %c7_118 = arith.constant 7 : index
    %104 = vector.load %arg6[%c0_117, %c7_118] : memref<64x128xbf16, #tpu.memory_space<vmem>>, vector<64x24xbf16>
    %105 = arith.extf %104 : vector<64x24xbf16> to vector<64x24xf32>
    %106 = arith.addf %103, %105 : vector<64x24xf32>
    %cst_119 = arith.constant 0.000000e+00 : bf16
    %107 = vector.broadcast %cst_119 : bf16 to vector<64x7xbf16>
    %c0_120 = arith.constant 0 : index
    %c0_121 = arith.constant 0 : index
    %c0_122 = arith.constant 0 : index
    %108 = vector.load %arg5[%c0_120, %c0_121, %c0_122] : memref<1x64x128xbf16, #tpu.memory_space<vmem>>, vector<1x64x7xbf16>
    %109 = vector.shape_cast %108 : vector<1x64x7xbf16> to vector<64x7xbf16>
    %110 = vector.shape_cast %107 : vector<64x7xbf16> to vector<1x64x7xbf16>
    tpu.vector_store %arg5[%c0_120, %c0_121, %c0_122], %110 {strides = array<i32>} : memref<1x64x128xbf16, #tpu.memory_space<vmem>>, vector<1x64x7xbf16>,
    %111 = arith.truncf %106 : vector<64x24xf32> to vector<64x24xbf16>
    %c0_123 = arith.constant 0 : index
    %c0_124 = arith.constant 0 : index
    %c7_125 = arith.constant 7 : index
    %112 = vector.load %arg5[%c0_123, %c0_124, %c7_125] : memref<1x64x128xbf16, #tpu.memory_space<vmem>>, vector<1x64x24xbf16>
    %113 = vector.shape_cast %112 : vector<1x64x24xbf16> to vector<64x24xbf16>
    %114 = vector.shape_cast %111 : vector<64x24xbf16> to vector<1x64x24xbf16>
    tpu.vector_store %arg5[%c0_123, %c0_124, %c7_125], %114 {strides = array<i32>} : memref<1x64x128xbf16, #tpu.memory_space<vmem>>, vector<1x64x24xbf16>,
    %cst_126 = arith.constant 0.000000e+00 : bf16
    %115 = vector.broadcast %cst_126 : bf16 to vector<64x97xbf16>
    %c0_127 = arith.constant 0 : index
    %c0_128 = arith.constant 0 : index
    %c31 = arith.constant 31 : index
    %116 = vector.load %arg5[%c0_127, %c0_128, %c31] : memref<1x64x128xbf16, #tpu.memory_space<vmem>>, vector<1x64x97xbf16>
    %117 = vector.shape_cast %116 : vector<1x64x97xbf16> to vector<64x97xbf16>
    %118 = vector.shape_cast %115 : vector<64x97xbf16> to vector<1x64x97xbf16>
    tpu.vector_store %arg5[%c0_127, %c0_128, %c31], %118 {strides = array<i32>} : memref<1x64x128xbf16, #tpu.memory_space<vmem>>, vector<1x64x97xbf16>,
    return
  }
  func.func @transform_0(%arg0: i32) -> (i32, i32, i32) {
    %c0_i32 = arith.constant 0 : i32
    %c0_i32_0 = arith.constant 0 : i32
    %c0_i32_1 = arith.constant 0 : i32
    return %arg0, %c0_i32, %c0_i32_0 : i32, i32, i32
  }
  func.func @transform_1(%arg0: i32) -> (i32, i32, i32) {
    %c0_i32 = arith.constant 0 : i32
    %c0_i32_0 = arith.constant 0 : i32
    %c0_i32_1 = arith.constant 0 : i32
    %c0_i32_2 = arith.constant 0 : i32
    return %c0_i32, %c0_i32_0, %c0_i32_1 : i32, i32, i32
  }
  func.func @transform_2(%arg0: i32) -> (i32, i32, i32) {
    %c0_i32 = arith.constant 0 : i32
    %c0_i32_0 = arith.constant 0 : i32
    %c0_i32_1 = arith.constant 0 : i32
    %c0_i32_2 = arith.constant 0 : i32
    return %c0_i32, %c0_i32_0, %c0_i32_1 : i32, i32, i32
  }
  func.func @transform_3(%arg0: i32) -> (i32, i32) {
    %c0_i32 = arith.constant 0 : i32
    %c0_i32_0 = arith.constant 0 : i32
    %c0_i32_1 = arith.constant 0 : i32
    return %c0_i32, %c0_i32_0 : i32, i32
  }
  func.func @transform_4(%arg0: i32) -> (i32, i32, i32) {
    %c0_i32 = arith.constant 0 : i32
    %c0_i32_0 = arith.constant 0 : i32
    %c0_i32_1 = arith.constant 0 : i32
    return %arg0, %c0_i32, %c0_i32_0 : i32, i32, i32
  }
}

module attributes {stable_mosaic.version = 11 : i64} {
  func.func @_conv_kernel(%arg0: i32, %arg1: memref<1x32x128xbf16, #tpu.memory_space<vmem>>, %arg2: memref<1x32x128xbf16, #tpu.memory_space<vmem>>, %arg3: memref<32x576xbf16, #tpu.memory_space<vmem>>, %arg4: memref<32x1xf32, #tpu.memory_space<vmem>>, %arg5: memref<1x80xf32, #tpu.memory_space<vmem>>, %arg6: memref<1x32x128xbf16, #tpu.memory_space<vmem>>) attributes {dimension_semantics = [#tpu.dimension_semantics<parallel>], iteration_bounds = array<i64: 2>, scalar_prefetch = 0 : i64, scratch_operands = 0 : i64, tpu.core_type = #tpu.core_type<tc>, window_params = [{transform_indices = @transform_0, window_bounds = array<i64: 1, 32, 128>}, {transform_indices = @transform_1, window_bounds = array<i64: 1, 32, 128>}, {pipeline_mode = #tpu.pipeline_mode<synchronous>, transform_indices = @transform_2, window_bounds = array<i64: 32, 576>}, {pipeline_mode = #tpu.pipeline_mode<synchronous>, transform_indices = @transform_3, window_bounds = array<i64: 32, 1>}, {pipeline_mode = #tpu.pipeline_mode<synchronous>, transform_indices = @transform_4, window_bounds = array<i64: 1, 80>}, {transform_indices = @transform_5, window_bounds = array<i64: 1, 32, 128>}]} {
    %c0 = arith.constant 0 : index
    %c0_0 = arith.constant 0 : index
    %0 = vector.load %arg3[%c0, %c0_0] : memref<32x576xbf16, #tpu.memory_space<vmem>>, vector<32x576xbf16>
    %c0_1 = arith.constant 0 : index
    %c0_2 = arith.constant 0 : index
    %1 = vector.load %arg4[%c0_1, %c0_2] : memref<32x1xf32, #tpu.memory_space<vmem>>, vector<32x1xf32>
    %c0_3 = arith.constant 0 : index
    %c0_4 = arith.constant 0 : index
    %c0_5 = arith.constant 0 : index
    %2 = vector.load %arg1[%c0_3, %c0_4, %c0_5] : memref<1x32x128xbf16, #tpu.memory_space<vmem>>, vector<1x32x80xbf16>
    %3 = vector.shape_cast %2 : vector<1x32x80xbf16> to vector<32x80xbf16>
    %c0_6 = arith.constant 0 : index
    %c0_7 = arith.constant 0 : index
    %c0_8 = arith.constant 0 : index
    %4 = vector.load %arg2[%c0_6, %c0_7, %c0_8] : memref<1x32x128xbf16, #tpu.memory_space<vmem>>, vector<1x32x80xbf16>
    %5 = vector.shape_cast %4 : vector<1x32x80xbf16> to vector<32x80xbf16>
    %c0_9 = arith.constant 0 : index
    %c0_10 = arith.constant 0 : index
    %c1 = arith.constant 1 : index
    %6 = vector.load %arg1[%c0_9, %c0_10, %c1] : memref<1x32x128xbf16, #tpu.memory_space<vmem>>, vector<1x32x80xbf16>
    %7 = vector.shape_cast %6 : vector<1x32x80xbf16> to vector<32x80xbf16>
    %c0_11 = arith.constant 0 : index
    %c0_12 = arith.constant 0 : index
    %c1_13 = arith.constant 1 : index
    %8 = vector.load %arg2[%c0_11, %c0_12, %c1_13] : memref<1x32x128xbf16, #tpu.memory_space<vmem>>, vector<1x32x80xbf16>
    %9 = vector.shape_cast %8 : vector<1x32x80xbf16> to vector<32x80xbf16>
    %c0_14 = arith.constant 0 : index
    %c0_15 = arith.constant 0 : index
    %c2 = arith.constant 2 : index
    %10 = vector.load %arg1[%c0_14, %c0_15, %c2] : memref<1x32x128xbf16, #tpu.memory_space<vmem>>, vector<1x32x80xbf16>
    %11 = vector.shape_cast %10 : vector<1x32x80xbf16> to vector<32x80xbf16>
    %c0_16 = arith.constant 0 : index
    %c0_17 = arith.constant 0 : index
    %c2_18 = arith.constant 2 : index
    %12 = vector.load %arg2[%c0_16, %c0_17, %c2_18] : memref<1x32x128xbf16, #tpu.memory_space<vmem>>, vector<1x32x80xbf16>
    %13 = vector.shape_cast %12 : vector<1x32x80xbf16> to vector<32x80xbf16>
    %c0_19 = arith.constant 0 : index
    %c0_20 = arith.constant 0 : index
    %c10 = arith.constant 10 : index
    %14 = vector.load %arg1[%c0_19, %c0_20, %c10] : memref<1x32x128xbf16, #tpu.memory_space<vmem>>, vector<1x32x80xbf16>
    %15 = vector.shape_cast %14 : vector<1x32x80xbf16> to vector<32x80xbf16>
    %c0_21 = arith.constant 0 : index
    %c0_22 = arith.constant 0 : index
    %c10_23 = arith.constant 10 : index
    %16 = vector.load %arg2[%c0_21, %c0_22, %c10_23] : memref<1x32x128xbf16, #tpu.memory_space<vmem>>, vector<1x32x80xbf16>
    %17 = vector.shape_cast %16 : vector<1x32x80xbf16> to vector<32x80xbf16>
    %c0_24 = arith.constant 0 : index
    %c0_25 = arith.constant 0 : index
    %c11 = arith.constant 11 : index
    %18 = vector.load %arg1[%c0_24, %c0_25, %c11] : memref<1x32x128xbf16, #tpu.memory_space<vmem>>, vector<1x32x80xbf16>
    %19 = vector.shape_cast %18 : vector<1x32x80xbf16> to vector<32x80xbf16>
    %c0_26 = arith.constant 0 : index
    %c0_27 = arith.constant 0 : index
    %c11_28 = arith.constant 11 : index
    %20 = vector.load %arg2[%c0_26, %c0_27, %c11_28] : memref<1x32x128xbf16, #tpu.memory_space<vmem>>, vector<1x32x80xbf16>
    %21 = vector.shape_cast %20 : vector<1x32x80xbf16> to vector<32x80xbf16>
    %c0_29 = arith.constant 0 : index
    %c0_30 = arith.constant 0 : index
    %c12 = arith.constant 12 : index
    %22 = vector.load %arg1[%c0_29, %c0_30, %c12] : memref<1x32x128xbf16, #tpu.memory_space<vmem>>, vector<1x32x80xbf16>
    %23 = vector.shape_cast %22 : vector<1x32x80xbf16> to vector<32x80xbf16>
    %c0_31 = arith.constant 0 : index
    %c0_32 = arith.constant 0 : index
    %c12_33 = arith.constant 12 : index
    %24 = vector.load %arg2[%c0_31, %c0_32, %c12_33] : memref<1x32x128xbf16, #tpu.memory_space<vmem>>, vector<1x32x80xbf16>
    %25 = vector.shape_cast %24 : vector<1x32x80xbf16> to vector<32x80xbf16>
    %c0_34 = arith.constant 0 : index
    %c0_35 = arith.constant 0 : index
    %c20 = arith.constant 20 : index
    %26 = vector.load %arg1[%c0_34, %c0_35, %c20] : memref<1x32x128xbf16, #tpu.memory_space<vmem>>, vector<1x32x80xbf16>
    %27 = vector.shape_cast %26 : vector<1x32x80xbf16> to vector<32x80xbf16>
    %c0_36 = arith.constant 0 : index
    %c0_37 = arith.constant 0 : index
    %c20_38 = arith.constant 20 : index
    %28 = vector.load %arg2[%c0_36, %c0_37, %c20_38] : memref<1x32x128xbf16, #tpu.memory_space<vmem>>, vector<1x32x80xbf16>
    %29 = vector.shape_cast %28 : vector<1x32x80xbf16> to vector<32x80xbf16>
    %c0_39 = arith.constant 0 : index
    %c0_40 = arith.constant 0 : index
    %c21 = arith.constant 21 : index
    %30 = vector.load %arg1[%c0_39, %c0_40, %c21] : memref<1x32x128xbf16, #tpu.memory_space<vmem>>, vector<1x32x80xbf16>
    %31 = vector.shape_cast %30 : vector<1x32x80xbf16> to vector<32x80xbf16>
    %c0_41 = arith.constant 0 : index
    %c0_42 = arith.constant 0 : index
    %c21_43 = arith.constant 21 : index
    %32 = vector.load %arg2[%c0_41, %c0_42, %c21_43] : memref<1x32x128xbf16, #tpu.memory_space<vmem>>, vector<1x32x80xbf16>
    %33 = vector.shape_cast %32 : vector<1x32x80xbf16> to vector<32x80xbf16>
    %c0_44 = arith.constant 0 : index
    %c0_45 = arith.constant 0 : index
    %c22 = arith.constant 22 : index
    %34 = vector.load %arg1[%c0_44, %c0_45, %c22] : memref<1x32x128xbf16, #tpu.memory_space<vmem>>, vector<1x32x80xbf16>
    %35 = vector.shape_cast %34 : vector<1x32x80xbf16> to vector<32x80xbf16>
    %c0_46 = arith.constant 0 : index
    %c0_47 = arith.constant 0 : index
    %c22_48 = arith.constant 22 : index
    %36 = vector.load %arg2[%c0_46, %c0_47, %c22_48] : memref<1x32x128xbf16, #tpu.memory_space<vmem>>, vector<1x32x80xbf16>
    %37 = vector.shape_cast %36 : vector<1x32x80xbf16> to vector<32x80xbf16>
    %38 = tpu.concatenate %3, %5, %7, %9, %11, %13, %15, %17, %19, %21, %23, %25, %27, %29, %31, %33 in 0 : vector<32x80xbf16>, vector<32x80xbf16>, vector<32x80xbf16>, vector<32x80xbf16>, vector<32x80xbf16>, vector<32x80xbf16>, vector<32x80xbf16>, vector<32x80xbf16>, vector<32x80xbf16>, vector<32x80xbf16>, vector<32x80xbf16>, vector<32x80xbf16>, vector<32x80xbf16>, vector<32x80xbf16>, vector<32x80xbf16>, vector<32x80xbf16> -> vector<512x80xbf16>
    %39 = tpu.concatenate %35, %37 in 0 : vector<32x80xbf16>, vector<32x80xbf16> -> vector<64x80xbf16>
    %40 = tpu.concatenate %38, %39 in 0 : vector<512x80xbf16>, vector<64x80xbf16> -> vector<576x80xbf16>
    %cst = arith.constant dense<0.000000e+00> : vector<32x80xf32>
    %41 = tpu.matmul %0, %40, %cst {dimension_numbers = #tpu.dot_dimension_numbers<[1], [0], [0], [1], [0, 0, 1, 1], [], []>} : vector<32x576xbf16>, vector<576x80xbf16>, vector<32x80xf32> -> vector<32x80xf32>
    %42 = vector.broadcast %1 : vector<32x1xf32> to vector<32x80xf32>
    %43 = arith.addf %41, %42 : vector<32x80xf32>
    %cst_49 = arith.constant 0.000000e+00 : f32
    %44 = vector.broadcast %cst_49 : f32 to vector<32x80xf32>
    %45 = arith.maximumf %43, %44 : vector<32x80xf32>
    %c0_50 = arith.constant 0 : index
    %c0_51 = arith.constant 0 : index
    %46 = vector.load %arg5[%c0_50, %c0_51] : memref<1x80xf32, #tpu.memory_space<vmem>>, vector<1x80xf32>
    %47 = vector.broadcast %46 : vector<1x80xf32> to vector<32x80xf32>
    %48 = arith.mulf %45, %47 : vector<32x80xf32>
    %cst_52 = arith.constant 0.000000e+00 : bf16
    %49 = vector.broadcast %cst_52 : bf16 to vector<32x11xbf16>
    %c0_53 = arith.constant 0 : index
    %c0_54 = arith.constant 0 : index
    %c0_55 = arith.constant 0 : index
    %50 = vector.load %arg6[%c0_53, %c0_54, %c0_55] : memref<1x32x128xbf16, #tpu.memory_space<vmem>>, vector<1x32x11xbf16>
    %51 = vector.shape_cast %50 : vector<1x32x11xbf16> to vector<32x11xbf16>
    %52 = vector.shape_cast %49 : vector<32x11xbf16> to vector<1x32x11xbf16>
    tpu.vector_store %arg6[%c0_53, %c0_54, %c0_55], %52 {strides = array<i32>} : memref<1x32x128xbf16, #tpu.memory_space<vmem>>, vector<1x32x11xbf16>,
    %53 = arith.truncf %48 : vector<32x80xf32> to vector<32x80xbf16>
    %c0_56 = arith.constant 0 : index
    %c0_57 = arith.constant 0 : index
    %c11_58 = arith.constant 11 : index
    %54 = vector.load %arg6[%c0_56, %c0_57, %c11_58] : memref<1x32x128xbf16, #tpu.memory_space<vmem>>, vector<1x32x80xbf16>
    %55 = vector.shape_cast %54 : vector<1x32x80xbf16> to vector<32x80xbf16>
    %56 = vector.shape_cast %53 : vector<32x80xbf16> to vector<1x32x80xbf16>
    tpu.vector_store %arg6[%c0_56, %c0_57, %c11_58], %56 {strides = array<i32>} : memref<1x32x128xbf16, #tpu.memory_space<vmem>>, vector<1x32x80xbf16>,
    %cst_59 = arith.constant 0.000000e+00 : bf16
    %57 = vector.broadcast %cst_59 : bf16 to vector<32x37xbf16>
    %c0_60 = arith.constant 0 : index
    %c0_61 = arith.constant 0 : index
    %c91 = arith.constant 91 : index
    %58 = vector.load %arg6[%c0_60, %c0_61, %c91] : memref<1x32x128xbf16, #tpu.memory_space<vmem>>, vector<1x32x37xbf16>
    %59 = vector.shape_cast %58 : vector<1x32x37xbf16> to vector<32x37xbf16>
    %60 = vector.shape_cast %57 : vector<32x37xbf16> to vector<1x32x37xbf16>
    tpu.vector_store %arg6[%c0_60, %c0_61, %c91], %60 {strides = array<i32>} : memref<1x32x128xbf16, #tpu.memory_space<vmem>>, vector<1x32x37xbf16>,
    return
  }
  func.func @transform_0(%arg0: i32) -> (i32, i32, i32) {
    %c0_i32 = arith.constant 0 : i32
    %c0_i32_0 = arith.constant 0 : i32
    %c0_i32_1 = arith.constant 0 : i32
    return %arg0, %c0_i32, %c0_i32_0 : i32, i32, i32
  }
  func.func @transform_1(%arg0: i32) -> (i32, i32, i32) {
    %c0_i32 = arith.constant 0 : i32
    %c0_i32_0 = arith.constant 0 : i32
    %c0_i32_1 = arith.constant 0 : i32
    return %arg0, %c0_i32, %c0_i32_0 : i32, i32, i32
  }
  func.func @transform_2(%arg0: i32) -> (i32, i32) {
    %c0_i32 = arith.constant 0 : i32
    %c0_i32_0 = arith.constant 0 : i32
    %c0_i32_1 = arith.constant 0 : i32
    return %c0_i32, %c0_i32_0 : i32, i32
  }
  func.func @transform_3(%arg0: i32) -> (i32, i32) {
    %c0_i32 = arith.constant 0 : i32
    %c0_i32_0 = arith.constant 0 : i32
    %c0_i32_1 = arith.constant 0 : i32
    return %c0_i32, %c0_i32_0 : i32, i32
  }
  func.func @transform_4(%arg0: i32) -> (i32, i32) {
    %c0_i32 = arith.constant 0 : i32
    %c0_i32_0 = arith.constant 0 : i32
    %c0_i32_1 = arith.constant 0 : i32
    return %c0_i32, %c0_i32_0 : i32, i32
  }
  func.func @transform_5(%arg0: i32) -> (i32, i32, i32) {
    %c0_i32 = arith.constant 0 : i32
    %c0_i32_0 = arith.constant 0 : i32
    %c0_i32_1 = arith.constant 0 : i32
    return %arg0, %c0_i32, %c0_i32_0 : i32, i32, i32
  }
}

module attributes {stable_mosaic.version = 11 : i64} {
  func.func @_conv_kernel(%arg0: i32, %arg1: memref<1x32x128xbf16, #tpu.memory_space<vmem>>, %arg2: memref<64x288xbf16, #tpu.memory_space<vmem>>, %arg3: memref<64x1xf32, #tpu.memory_space<vmem>>, %arg4: memref<1x64x80xbf16, #tpu.memory_space<vmem>>) attributes {dimension_semantics = [#tpu.dimension_semantics<parallel>], iteration_bounds = array<i64: 2>, scalar_prefetch = 0 : i64, scratch_operands = 0 : i64, tpu.core_type = #tpu.core_type<tc>, window_params = [{transform_indices = @transform_0, window_bounds = array<i64: 1, 32, 128>}, {pipeline_mode = #tpu.pipeline_mode<synchronous>, transform_indices = @transform_1, window_bounds = array<i64: 64, 288>}, {pipeline_mode = #tpu.pipeline_mode<synchronous>, transform_indices = @transform_2, window_bounds = array<i64: 64, 1>}, {transform_indices = @transform_3, window_bounds = array<i64: 1, 64, 80>}]} {
    %c0 = arith.constant 0 : index
    %c0_0 = arith.constant 0 : index
    %0 = vector.load %arg2[%c0, %c0_0] : memref<64x288xbf16, #tpu.memory_space<vmem>>, vector<64x288xbf16>
    %c0_1 = arith.constant 0 : index
    %c0_2 = arith.constant 0 : index
    %1 = vector.load %arg3[%c0_1, %c0_2] : memref<64x1xf32, #tpu.memory_space<vmem>>, vector<64x1xf32>
    %c0_3 = arith.constant 0 : index
    %c0_4 = arith.constant 0 : index
    %c0_5 = arith.constant 0 : index
    %2 = vector.load %arg1[%c0_3, %c0_4, %c0_5] : memref<1x32x128xbf16, #tpu.memory_space<vmem>>, vector<1x32x80xbf16>
    %3 = vector.shape_cast %2 : vector<1x32x80xbf16> to vector<32x80xbf16>
    %c0_6 = arith.constant 0 : index
    %c0_7 = arith.constant 0 : index
    %c1 = arith.constant 1 : index
    %4 = vector.load %arg1[%c0_6, %c0_7, %c1] : memref<1x32x128xbf16, #tpu.memory_space<vmem>>, vector<1x32x80xbf16>
    %5 = vector.shape_cast %4 : vector<1x32x80xbf16> to vector<32x80xbf16>
    %c0_8 = arith.constant 0 : index
    %c0_9 = arith.constant 0 : index
    %c2 = arith.constant 2 : index
    %6 = vector.load %arg1[%c0_8, %c0_9, %c2] : memref<1x32x128xbf16, #tpu.memory_space<vmem>>, vector<1x32x80xbf16>
    %7 = vector.shape_cast %6 : vector<1x32x80xbf16> to vector<32x80xbf16>
    %c0_10 = arith.constant 0 : index
    %c0_11 = arith.constant 0 : index
    %c10 = arith.constant 10 : index
    %8 = vector.load %arg1[%c0_10, %c0_11, %c10] : memref<1x32x128xbf16, #tpu.memory_space<vmem>>, vector<1x32x80xbf16>
    %9 = vector.shape_cast %8 : vector<1x32x80xbf16> to vector<32x80xbf16>
    %c0_12 = arith.constant 0 : index
    %c0_13 = arith.constant 0 : index
    %c11 = arith.constant 11 : index
    %10 = vector.load %arg1[%c0_12, %c0_13, %c11] : memref<1x32x128xbf16, #tpu.memory_space<vmem>>, vector<1x32x80xbf16>
    %11 = vector.shape_cast %10 : vector<1x32x80xbf16> to vector<32x80xbf16>
    %c0_14 = arith.constant 0 : index
    %c0_15 = arith.constant 0 : index
    %c12 = arith.constant 12 : index
    %12 = vector.load %arg1[%c0_14, %c0_15, %c12] : memref<1x32x128xbf16, #tpu.memory_space<vmem>>, vector<1x32x80xbf16>
    %13 = vector.shape_cast %12 : vector<1x32x80xbf16> to vector<32x80xbf16>
    %c0_16 = arith.constant 0 : index
    %c0_17 = arith.constant 0 : index
    %c20 = arith.constant 20 : index
    %14 = vector.load %arg1[%c0_16, %c0_17, %c20] : memref<1x32x128xbf16, #tpu.memory_space<vmem>>, vector<1x32x80xbf16>
    %15 = vector.shape_cast %14 : vector<1x32x80xbf16> to vector<32x80xbf16>
    %c0_18 = arith.constant 0 : index
    %c0_19 = arith.constant 0 : index
    %c21 = arith.constant 21 : index
    %16 = vector.load %arg1[%c0_18, %c0_19, %c21] : memref<1x32x128xbf16, #tpu.memory_space<vmem>>, vector<1x32x80xbf16>
    %17 = vector.shape_cast %16 : vector<1x32x80xbf16> to vector<32x80xbf16>
    %c0_20 = arith.constant 0 : index
    %c0_21 = arith.constant 0 : index
    %c22 = arith.constant 22 : index
    %18 = vector.load %arg1[%c0_20, %c0_21, %c22] : memref<1x32x128xbf16, #tpu.memory_space<vmem>>, vector<1x32x80xbf16>
    %19 = vector.shape_cast %18 : vector<1x32x80xbf16> to vector<32x80xbf16>
    %20 = tpu.concatenate %3, %5, %7, %9, %11, %13, %15, %17, %19 in 0 : vector<32x80xbf16>, vector<32x80xbf16>, vector<32x80xbf16>, vector<32x80xbf16>, vector<32x80xbf16>, vector<32x80xbf16>, vector<32x80xbf16>, vector<32x80xbf16>, vector<32x80xbf16> -> vector<288x80xbf16>
    %cst = arith.constant dense<0.000000e+00> : vector<64x80xf32>
    %21 = tpu.matmul %0, %20, %cst {dimension_numbers = #tpu.dot_dimension_numbers<[1], [0], [0], [1], [0, 0, 1, 1], [], []>} : vector<64x288xbf16>, vector<288x80xbf16>, vector<64x80xf32> -> vector<64x80xf32>
    %22 = vector.broadcast %1 : vector<64x1xf32> to vector<64x80xf32>
    %23 = arith.addf %21, %22 : vector<64x80xf32>
    %cst_22 = arith.constant 0.000000e+00 : f32
    %24 = vector.broadcast %cst_22 : f32 to vector<64x80xf32>
    %25 = arith.maximumf %23, %24 : vector<64x80xf32>
    %26 = arith.truncf %25 : vector<64x80xf32> to vector<64x80xbf16>
    %c0_23 = arith.constant 0 : index
    %c0_24 = arith.constant 0 : index
    %c0_25 = arith.constant 0 : index
    %27 = vector.load %arg4[%c0_23, %c0_24, %c0_25] : memref<1x64x80xbf16, #tpu.memory_space<vmem>>, vector<1x64x80xbf16>
    %28 = vector.shape_cast %27 : vector<1x64x80xbf16> to vector<64x80xbf16>
    %29 = vector.shape_cast %26 : vector<64x80xbf16> to vector<1x64x80xbf16>
    tpu.vector_store %arg4[%c0_23, %c0_24, %c0_25], %29 {strides = array<i32>} : memref<1x64x80xbf16, #tpu.memory_space<vmem>>, vector<1x64x80xbf16>,
    return
  }
  func.func @transform_0(%arg0: i32) -> (i32, i32, i32) {
    %c0_i32 = arith.constant 0 : i32
    %c0_i32_0 = arith.constant 0 : i32
    %c0_i32_1 = arith.constant 0 : i32
    return %arg0, %c0_i32, %c0_i32_0 : i32, i32, i32
  }
  func.func @transform_1(%arg0: i32) -> (i32, i32) {
    %c0_i32 = arith.constant 0 : i32
    %c0_i32_0 = arith.constant 0 : i32
    %c0_i32_1 = arith.constant 0 : i32
    return %c0_i32, %c0_i32_0 : i32, i32
  }
  func.func @transform_2(%arg0: i32) -> (i32, i32) {
    %c0_i32 = arith.constant 0 : i32
    %c0_i32_0 = arith.constant 0 : i32
    %c0_i32_1 = arith.constant 0 : i32
    return %c0_i32, %c0_i32_0 : i32, i32
  }
  func.func @transform_3(%arg0: i32) -> (i32, i32, i32) {
    %c0_i32 = arith.constant 0 : i32
    %c0_i32_0 = arith.constant 0 : i32
    %c0_i32_1 = arith.constant 0 : i32
    return %arg0, %c0_i32, %c0_i32_0 : i32, i32, i32
  }
}

module attributes {stable_mosaic.version = 11 : i64} {
  func.func @_conv_kernel(%arg0: i32, %arg1: memref<1x16x384xbf16, #tpu.memory_space<vmem>>, %arg2: memref<1x16x384xbf16, #tpu.memory_space<vmem>>, %arg3: memref<16x288xbf16, #tpu.memory_space<vmem>>, %arg4: memref<16x1xf32, #tpu.memory_space<vmem>>, %arg5: memref<1x288xf32, #tpu.memory_space<vmem>>, %arg6: memref<1x16x384xbf16, #tpu.memory_space<vmem>>) attributes {dimension_semantics = [#tpu.dimension_semantics<parallel>], iteration_bounds = array<i64: 2>, scalar_prefetch = 0 : i64, scratch_operands = 0 : i64, tpu.core_type = #tpu.core_type<tc>, window_params = [{transform_indices = @transform_0, window_bounds = array<i64: 1, 16, 384>}, {transform_indices = @transform_1, window_bounds = array<i64: 1, 16, 384>}, {pipeline_mode = #tpu.pipeline_mode<synchronous>, transform_indices = @transform_2, window_bounds = array<i64: 16, 288>}, {pipeline_mode = #tpu.pipeline_mode<synchronous>, transform_indices = @transform_3, window_bounds = array<i64: 16, 1>}, {pipeline_mode = #tpu.pipeline_mode<synchronous>, transform_indices = @transform_4, window_bounds = array<i64: 1, 288>}, {transform_indices = @transform_5, window_bounds = array<i64: 1, 16, 384>}]} {
    %c0 = arith.constant 0 : index
    %c0_0 = arith.constant 0 : index
    %0 = vector.load %arg3[%c0, %c0_0] : memref<16x288xbf16, #tpu.memory_space<vmem>>, vector<16x288xbf16>
    %c0_1 = arith.constant 0 : index
    %c0_2 = arith.constant 0 : index
    %1 = vector.load %arg4[%c0_1, %c0_2] : memref<16x1xf32, #tpu.memory_space<vmem>>, vector<16x1xf32>
    %c0_3 = arith.constant 0 : index
    %c0_4 = arith.constant 0 : index
    %c0_5 = arith.constant 0 : index
    %2 = vector.load %arg1[%c0_3, %c0_4, %c0_5] : memref<1x16x384xbf16, #tpu.memory_space<vmem>>, vector<1x16x288xbf16>
    %3 = vector.shape_cast %2 : vector<1x16x288xbf16> to vector<16x288xbf16>
    %c0_6 = arith.constant 0 : index
    %c0_7 = arith.constant 0 : index
    %c0_8 = arith.constant 0 : index
    %4 = vector.load %arg2[%c0_6, %c0_7, %c0_8] : memref<1x16x384xbf16, #tpu.memory_space<vmem>>, vector<1x16x288xbf16>
    %5 = vector.shape_cast %4 : vector<1x16x288xbf16> to vector<16x288xbf16>
    %c0_9 = arith.constant 0 : index
    %c0_10 = arith.constant 0 : index
    %c1 = arith.constant 1 : index
    %6 = vector.load %arg1[%c0_9, %c0_10, %c1] : memref<1x16x384xbf16, #tpu.memory_space<vmem>>, vector<1x16x288xbf16>
    %7 = vector.shape_cast %6 : vector<1x16x288xbf16> to vector<16x288xbf16>
    %c0_11 = arith.constant 0 : index
    %c0_12 = arith.constant 0 : index
    %c1_13 = arith.constant 1 : index
    %8 = vector.load %arg2[%c0_11, %c0_12, %c1_13] : memref<1x16x384xbf16, #tpu.memory_space<vmem>>, vector<1x16x288xbf16>
    %9 = vector.shape_cast %8 : vector<1x16x288xbf16> to vector<16x288xbf16>
    %c0_14 = arith.constant 0 : index
    %c0_15 = arith.constant 0 : index
    %c2 = arith.constant 2 : index
    %10 = vector.load %arg1[%c0_14, %c0_15, %c2] : memref<1x16x384xbf16, #tpu.memory_space<vmem>>, vector<1x16x288xbf16>
    %11 = vector.shape_cast %10 : vector<1x16x288xbf16> to vector<16x288xbf16>
    %c0_16 = arith.constant 0 : index
    %c0_17 = arith.constant 0 : index
    %c2_18 = arith.constant 2 : index
    %12 = vector.load %arg2[%c0_16, %c0_17, %c2_18] : memref<1x16x384xbf16, #tpu.memory_space<vmem>>, vector<1x16x288xbf16>
    %13 = vector.shape_cast %12 : vector<1x16x288xbf16> to vector<16x288xbf16>
    %c0_19 = arith.constant 0 : index
    %c0_20 = arith.constant 0 : index
    %c18 = arith.constant 18 : index
    %14 = vector.load %arg1[%c0_19, %c0_20, %c18] : memref<1x16x384xbf16, #tpu.memory_space<vmem>>, vector<1x16x288xbf16>
    %15 = vector.shape_cast %14 : vector<1x16x288xbf16> to vector<16x288xbf16>
    %c0_21 = arith.constant 0 : index
    %c0_22 = arith.constant 0 : index
    %c18_23 = arith.constant 18 : index
    %16 = vector.load %arg2[%c0_21, %c0_22, %c18_23] : memref<1x16x384xbf16, #tpu.memory_space<vmem>>, vector<1x16x288xbf16>
    %17 = vector.shape_cast %16 : vector<1x16x288xbf16> to vector<16x288xbf16>
    %c0_24 = arith.constant 0 : index
    %c0_25 = arith.constant 0 : index
    %c19 = arith.constant 19 : index
    %18 = vector.load %arg1[%c0_24, %c0_25, %c19] : memref<1x16x384xbf16, #tpu.memory_space<vmem>>, vector<1x16x288xbf16>
    %19 = vector.shape_cast %18 : vector<1x16x288xbf16> to vector<16x288xbf16>
    %c0_26 = arith.constant 0 : index
    %c0_27 = arith.constant 0 : index
    %c19_28 = arith.constant 19 : index
    %20 = vector.load %arg2[%c0_26, %c0_27, %c19_28] : memref<1x16x384xbf16, #tpu.memory_space<vmem>>, vector<1x16x288xbf16>
    %21 = vector.shape_cast %20 : vector<1x16x288xbf16> to vector<16x288xbf16>
    %c0_29 = arith.constant 0 : index
    %c0_30 = arith.constant 0 : index
    %c20 = arith.constant 20 : index
    %22 = vector.load %arg1[%c0_29, %c0_30, %c20] : memref<1x16x384xbf16, #tpu.memory_space<vmem>>, vector<1x16x288xbf16>
    %23 = vector.shape_cast %22 : vector<1x16x288xbf16> to vector<16x288xbf16>
    %c0_31 = arith.constant 0 : index
    %c0_32 = arith.constant 0 : index
    %c20_33 = arith.constant 20 : index
    %24 = vector.load %arg2[%c0_31, %c0_32, %c20_33] : memref<1x16x384xbf16, #tpu.memory_space<vmem>>, vector<1x16x288xbf16>
    %25 = vector.shape_cast %24 : vector<1x16x288xbf16> to vector<16x288xbf16>
    %c0_34 = arith.constant 0 : index
    %c0_35 = arith.constant 0 : index
    %c36 = arith.constant 36 : index
    %26 = vector.load %arg1[%c0_34, %c0_35, %c36] : memref<1x16x384xbf16, #tpu.memory_space<vmem>>, vector<1x16x288xbf16>
    %27 = vector.shape_cast %26 : vector<1x16x288xbf16> to vector<16x288xbf16>
    %c0_36 = arith.constant 0 : index
    %c0_37 = arith.constant 0 : index
    %c36_38 = arith.constant 36 : index
    %28 = vector.load %arg2[%c0_36, %c0_37, %c36_38] : memref<1x16x384xbf16, #tpu.memory_space<vmem>>, vector<1x16x288xbf16>
    %29 = vector.shape_cast %28 : vector<1x16x288xbf16> to vector<16x288xbf16>
    %c0_39 = arith.constant 0 : index
    %c0_40 = arith.constant 0 : index
    %c37 = arith.constant 37 : index
    %30 = vector.load %arg1[%c0_39, %c0_40, %c37] : memref<1x16x384xbf16, #tpu.memory_space<vmem>>, vector<1x16x288xbf16>
    %31 = vector.shape_cast %30 : vector<1x16x288xbf16> to vector<16x288xbf16>
    %c0_41 = arith.constant 0 : index
    %c0_42 = arith.constant 0 : index
    %c37_43 = arith.constant 37 : index
    %32 = vector.load %arg2[%c0_41, %c0_42, %c37_43] : memref<1x16x384xbf16, #tpu.memory_space<vmem>>, vector<1x16x288xbf16>
    %33 = vector.shape_cast %32 : vector<1x16x288xbf16> to vector<16x288xbf16>
    %c0_44 = arith.constant 0 : index
    %c0_45 = arith.constant 0 : index
    %c38 = arith.constant 38 : index
    %34 = vector.load %arg1[%c0_44, %c0_45, %c38] : memref<1x16x384xbf16, #tpu.memory_space<vmem>>, vector<1x16x288xbf16>
    %35 = vector.shape_cast %34 : vector<1x16x288xbf16> to vector<16x288xbf16>
    %c0_46 = arith.constant 0 : index
    %c0_47 = arith.constant 0 : index
    %c38_48 = arith.constant 38 : index
    %36 = vector.load %arg2[%c0_46, %c0_47, %c38_48] : memref<1x16x384xbf16, #tpu.memory_space<vmem>>, vector<1x16x288xbf16>
    %37 = vector.shape_cast %36 : vector<1x16x288xbf16> to vector<16x288xbf16>
    %38 = tpu.concatenate %3, %5, %7, %9, %11, %13, %15, %17, %19, %21, %23, %25, %27, %29, %31, %33 in 0 : vector<16x288xbf16>, vector<16x288xbf16>, vector<16x288xbf16>, vector<16x288xbf16>, vector<16x288xbf16>, vector<16x288xbf16>, vector<16x288xbf16>, vector<16x288xbf16>, vector<16x288xbf16>, vector<16x288xbf16>, vector<16x288xbf16>, vector<16x288xbf16>, vector<16x288xbf16>, vector<16x288xbf16>, vector<16x288xbf16>, vector<16x288xbf16> -> vector<256x288xbf16>
    %39 = tpu.concatenate %35, %37 in 0 : vector<16x288xbf16>, vector<16x288xbf16> -> vector<32x288xbf16>
    %40 = tpu.concatenate %38, %39 in 0 : vector<256x288xbf16>, vector<32x288xbf16> -> vector<288x288xbf16>
    %cst = arith.constant dense<0.000000e+00> : vector<16x288xf32>
    %41 = tpu.matmul %0, %40, %cst {dimension_numbers = #tpu.dot_dimension_numbers<[1], [0], [0], [1], [0, 0, 1, 1], [], []>} : vector<16x288xbf16>, vector<288x288xbf16>, vector<16x288xf32> -> vector<16x288xf32>
    %42 = vector.broadcast %1 : vector<16x1xf32> to vector<16x288xf32>
    %43 = arith.addf %41, %42 : vector<16x288xf32>
    %cst_49 = arith.constant 0.000000e+00 : f32
    %44 = vector.broadcast %cst_49 : f32 to vector<16x288xf32>
    %45 = arith.maximumf %43, %44 : vector<16x288xf32>
    %c0_50 = arith.constant 0 : index
    %c0_51 = arith.constant 0 : index
    %46 = vector.load %arg5[%c0_50, %c0_51] : memref<1x288xf32, #tpu.memory_space<vmem>>, vector<1x288xf32>
    %47 = vector.broadcast %46 : vector<1x288xf32> to vector<16x288xf32>
    %48 = arith.mulf %45, %47 : vector<16x288xf32>
    %cst_52 = arith.constant 0.000000e+00 : bf16
    %49 = vector.broadcast %cst_52 : bf16 to vector<16x19xbf16>
    %c0_53 = arith.constant 0 : index
    %c0_54 = arith.constant 0 : index
    %c0_55 = arith.constant 0 : index
    %50 = vector.load %arg6[%c0_53, %c0_54, %c0_55] : memref<1x16x384xbf16, #tpu.memory_space<vmem>>, vector<1x16x19xbf16>
    %51 = vector.shape_cast %50 : vector<1x16x19xbf16> to vector<16x19xbf16>
    %52 = vector.shape_cast %49 : vector<16x19xbf16> to vector<1x16x19xbf16>
    tpu.vector_store %arg6[%c0_53, %c0_54, %c0_55], %52 {strides = array<i32>} : memref<1x16x384xbf16, #tpu.memory_space<vmem>>, vector<1x16x19xbf16>,
    %53 = arith.truncf %48 : vector<16x288xf32> to vector<16x288xbf16>
    %c0_56 = arith.constant 0 : index
    %c0_57 = arith.constant 0 : index
    %c19_58 = arith.constant 19 : index
    %54 = vector.load %arg6[%c0_56, %c0_57, %c19_58] : memref<1x16x384xbf16, #tpu.memory_space<vmem>>, vector<1x16x288xbf16>
    %55 = vector.shape_cast %54 : vector<1x16x288xbf16> to vector<16x288xbf16>
    %56 = vector.shape_cast %53 : vector<16x288xbf16> to vector<1x16x288xbf16>
    tpu.vector_store %arg6[%c0_56, %c0_57, %c19_58], %56 {strides = array<i32>} : memref<1x16x384xbf16, #tpu.memory_space<vmem>>, vector<1x16x288xbf16>,
    %cst_59 = arith.constant 0.000000e+00 : bf16
    %57 = vector.broadcast %cst_59 : bf16 to vector<16x77xbf16>
    %c0_60 = arith.constant 0 : index
    %c0_61 = arith.constant 0 : index
    %c307 = arith.constant 307 : index
    %58 = vector.load %arg6[%c0_60, %c0_61, %c307] : memref<1x16x384xbf16, #tpu.memory_space<vmem>>, vector<1x16x77xbf16>
    %59 = vector.shape_cast %58 : vector<1x16x77xbf16> to vector<16x77xbf16>
    %60 = vector.shape_cast %57 : vector<16x77xbf16> to vector<1x16x77xbf16>
    tpu.vector_store %arg6[%c0_60, %c0_61, %c307], %60 {strides = array<i32>} : memref<1x16x384xbf16, #tpu.memory_space<vmem>>, vector<1x16x77xbf16>,
    return
  }
  func.func @transform_0(%arg0: i32) -> (i32, i32, i32) {
    %c0_i32 = arith.constant 0 : i32
    %c0_i32_0 = arith.constant 0 : i32
    %c0_i32_1 = arith.constant 0 : i32
    return %arg0, %c0_i32, %c0_i32_0 : i32, i32, i32
  }
  func.func @transform_1(%arg0: i32) -> (i32, i32, i32) {
    %c0_i32 = arith.constant 0 : i32
    %c0_i32_0 = arith.constant 0 : i32
    %c0_i32_1 = arith.constant 0 : i32
    return %arg0, %c0_i32, %c0_i32_0 : i32, i32, i32
  }
  func.func @transform_2(%arg0: i32) -> (i32, i32) {
    %c0_i32 = arith.constant 0 : i32
    %c0_i32_0 = arith.constant 0 : i32
    %c0_i32_1 = arith.constant 0 : i32
    return %c0_i32, %c0_i32_0 : i32, i32
  }
  func.func @transform_3(%arg0: i32) -> (i32, i32) {
    %c0_i32 = arith.constant 0 : i32
    %c0_i32_0 = arith.constant 0 : i32
    %c0_i32_1 = arith.constant 0 : i32
    return %c0_i32, %c0_i32_0 : i32, i32
  }
  func.func @transform_4(%arg0: i32) -> (i32, i32) {
    %c0_i32 = arith.constant 0 : i32
    %c0_i32_0 = arith.constant 0 : i32
    %c0_i32_1 = arith.constant 0 : i32
    return %c0_i32, %c0_i32_0 : i32, i32
  }
  func.func @transform_5(%arg0: i32) -> (i32, i32, i32) {
    %c0_i32 = arith.constant 0 : i32
    %c0_i32_0 = arith.constant 0 : i32
    %c0_i32_1 = arith.constant 0 : i32
    return %arg0, %c0_i32, %c0_i32_0 : i32, i32, i32
  }
}

</mosaic_0001>

<bundles_post_ra>
// kernel: unet_forward.12
= control target key start
LH: loop header
LB: loop body
LE: loop exit
PB: predicated region body
PF: predicated region fallthrough
CT: control target
= control target key end

     0   :  { %s602_s15 = smov 0   ;;  %s703_s0 = inlined_call_operand.vmem [shape: bf16[2,8,384], index: 0, kind: input, shape index: {}]   ;;  %s704_s1 = inlined_call_operand.vmem [shape: bf16[16,72], index: 1, kind: input, shape index: {}]   ;;  %s705_s2 = inlined_call_operand.vmem [shape: f32[16,1], index: 2, kind: input, shape index: {}]   ;;  %s706_s3 = inlined_call_operand.vmem [shape: f32[1,288], index: 3, kind: input, shape index: {}]   ;;  %s707_s4 = inlined_call_operand.vmem [shape: bf16[2,16,384], index: 4, kind: output, shape index: {}]  }
   0x1 LB: > { %s520_s16 = sadd.s32 4294967295, %s565_s15   ;;  %p524_p0 = scmp.ge.s32.totalorder %s565_s15, 1  ;;  %s565_s15 = sphi %s602_s15, %s14_s15  }
   0x2   : > { %p162_p1 = scmp.lt.s32.totalorder %s565_s15, 3 }
   0x4   : > { %p163_p2 = pnand %p524_p0, %p162_p1 }
   0x5   : > { %p188_p3 = scmp.lt.s32.totalorder (!%p163_p2), %s520_s16, 1  ;;  %s567_s21 = smov (!%p163_p2), 90  }
   0x6   : > { %166 = sbr.rel (%p163_p2) target bundleno = 461 (0x1cd), region = 36  ;;  %s568_s22 = smov (!%p163_p2), 91  }
   0x7   : > { %s569_s23 = smov (!%p163_p2), 92   ;;  %s570_s24 = smov (!%p163_p2), 108  }
   0x8   : > { %s571_s25 = smov (!%p163_p2), 109   ;;  %s572_s26 = smov (!%p163_p2), 110  }
   0x9   : > { %s573_s27 = smov (!%p163_p2), 126   ;;  %s574_s28 = smov (!%p163_p2), 127  }
   0xb   : > { %s709_s16 = smov (!%p188_p3, %s520_s16), 1  ;;  %vm285_vm0 = vcmask 1043456   ;;  %vm282_vm1 = vcmask 736256   ;;  %vm273_vm2 = vcmask 744448   ;;  %vm264_vm3 = vcmask 752640   ;;  %v201_v34 = vld [vmem:[%s705_s2] sm:$0xff] }
   0xc   : > { %s537_s17 = smul.u32 12, %s709_s16  ;;  %vm255_vm4 = vcmask 883712   ;;  %vm246_vm5 = vcmask 891904   ;;  %v202_v35 = vld [vmem:[%s705_s2 + $0x8] sm:$0xff]  ;;  %v575_v36 = vmov 0   ;;  %vm237_vm6 = vcmask 900096  }
   0xd   : > { %557 = vset.pattern.permute.xlu0 %v575_v36  ;;  %558 = vset.pattern.permute.xlu1 %v575_v36  ;;  %vm228_vm7 = vcmask 1031168   ;;  %vm219_vm8 = vcmask 1039360   ;;  %vm349_vm9 = vcmask 588800   ;;  %s538_s9 = smul.u32 24, %s709_s16  ;;  %vm424_vm10 = vcmask 150528   ;;  %s576_s16 = smov 19  }
   0xe   : > { %s192_s20 = scalar_lea.vmem %s703_s0, %s537_s17  ;;  %vm454_vm11 = vcmask 1043608   ;;  %vm455_vm12 = vcmask 1047556   ;;  %vm445_vm13 = vcmask 154624   ;;  %vm458_vm15 = vcmask 412672  }
   0xf   : > { %v204_v0 = vld [vmem:[%s192_s20 + $0x8] sm:$0xf]  ;;  %v203_v1 = vld [vmem:[%s192_s20] sm:$0xff]  ;;  %s679_s12 = scalar_lea.vmem %s707_s4, %s538_s9  ;;  %vm456_vm14 = vmor %vm455_vm12, %vm454_vm11 }
  0x10   : > { %v209_v2 = vunpack.c.l.b16 %v204_v0  ;;  %v208_v3 = vunpack.c.h.b16 %v203_v1  ;;  %v207_v6 = vunpack.c.l.b16 %v203_v1  ;;  %v536_v0 = vld [vmem:[%s704_s1] sm:$0xff]  ;;  %425 = vst.msk [vmem:[%s679_s12] sm:$0xf] %vm424_vm10, %v575_v36 }
  0x11   : > { %426 = vst.msk [vmem:[%s679_s12 + $0xc] sm:$0xf] %vm424_vm10, %v575_v36 }
  0x12   : > { %v616_v4 = vpack.c.b16 %v209_v2, %v209_v2  ;;  %v618_v5 = vpack.c.b16 %v208_v3, %v208_v3  ;;  %v623_v7 = vpack.c.b16 %v207_v6, %v207_v6 }
  0x14   : > { %280 = vrot.lane.b32.xlu0 %v616_v4, %s567_s21  ;;  %278 = vrot.lane.b32.xlu1 %v618_v5, %s567_s21 }
  0x15   : > { %271 = vrot.lane.b32.xlu2 %v616_v4, %s568_s22 }
  0x1c   : > { %262 = vrot.lane.b32.xlu1 %v616_v4, %s569_s23  ;;  %276 = vrot.lane.b32.xlu0 %v623_v7, %s567_s21 }
  0x1d   : > { %258 = vrot.lane.b32.xlu2 %v623_v7, %s569_s23 }
  0x24   : > { %267 = vrot.lane.b32.xlu1 %v623_v7, %s568_s22  ;;  %260 = vrot.lane.b32.xlu0 %v618_v5, %s569_s23 }
  0x25   : > { %269 = vrot.lane.b32.xlu2 %v618_v5, %s568_s22 }
  0x2c   : > { %253 = vrot.lane.b32.xlu1 %v616_v4, %s570_s24  ;;  %244 = vrot.lane.b32.xlu0 %v616_v4, %s571_s25 }
  0x2d   : > { %240 = vrot.lane.b32.xlu2 %v623_v7, %s571_s25 }
  0x34   : > { %249 = vrot.lane.b32.xlu1 %v623_v7, %s570_s24  ;;  %242 = vrot.lane.b32.xlu0 %v618_v5, %s571_s25 }
  0x35   : > { %251 = vrot.lane.b32.xlu2 %v618_v5, %s570_s24 }
  0x3c   : > { %235 = vrot.lane.b32.xlu1 %v616_v4, %s572_s26  ;;  %226 = vrot.lane.b32.xlu0 %v616_v4, %s573_s27 }
  0x3d   : > { %222 = vrot.lane.b32.xlu2 %v623_v7, %s573_s27 }
  0x44   : > { %231 = vrot.lane.b32.xlu1 %v623_v7, %s572_s26  ;;  %224 = vrot.lane.b32.xlu0 %v618_v5, %s573_s27 }
  0x45   : > { %233 = vrot.lane.b32.xlu2 %v618_v5, %s572_s26 }
  0x4c   : > { %213 = vrot.lane.b32.xlu1 %v623_v7, %s574_s28  ;;  %217 = vrot.lane.b32.xlu0 %v616_v4, %s574_s28 }
  0x4d   : > { %215 = vrot.lane.b32.xlu2 %v618_v5, %s574_s28 }
  0x54   : > { %336 = vperm.xlu0 %557, %v201_v34   ;;  %341 = vperm.xlu1 %558, %v202_v35  }
  0x6f   : > { %v272_v8 = vpop.permute.xlu2 %271 }
  0x77   : > { %v259_v9 = vpop.permute.xlu2 %258 }
  0x7f   : > { %v270_v15 = vpop.permute.xlu2 %269 }
  0x80   : > { %v275_v24 = vsel %vm273_vm2, %v270_v15, %v272_v8 }
  0x86   : > { %v281_v10 = vpop.permute.xlu0 %280  ;;  %v279_v11 = vpop.permute.xlu1 %278 }
  0x87   : > { %v360_v12 = vsel %vm285_vm0, %v281_v10, 0  ;;  %v284_v13 = vsel %vm282_vm1, %v279_v11, %v281_v10  ;;  %v241_v21 = vpop.permute.xlu2 %240 }
  0x88   : > { %393 = vmatpush.bf16.msra.mxu2 %v360_v12  ;;  %v357_v14 = vsel %vm285_vm0, %v284_v13, 0 }
  0x89   : > { %379 = vmatpush.bf16.msra.mxu1 %v357_v14 }
  0x8e   : > { %v263_v16 = vpop.permute.xlu1 %262  ;;  %v277_v17 = vpop.permute.xlu0 %276 }
  0x8f   : > { %v332_v18 = vsel %vm285_vm0, %v263_v16, %v272_v8  ;;  %v283_v19 = vsel %vm282_vm1, %v277_v17, %v279_v11  ;;  %v252_v33 = vpop.permute.xlu2 %251 }
  0x90   : > { %394 = vmatpush.bf16.msra.mxu2 %v332_v18  ;;  %v354_v20 = vsel %vm285_vm0, %v283_v19, 0 }
  0x91   : > { %365 = vmatpush.bf16.msra.mxu0 %v354_v20 }
  0x96   : > { %v268_v22 = vpop.permute.xlu1 %267  ;;  %v261_v23 = vpop.permute.xlu0 %260 }
  0x97   : > { %v274_v25 = vsel %vm273_vm2, %v268_v22, %v270_v15  ;;  %v265_v26 = vsel %vm264_vm3, %v259_v9, %v261_v23  ;;  %v266_v27 = vsel %vm264_vm3, %v261_v23, %v263_v16  ;;  %v223_v45 = vpop.permute.xlu2 %222 }
  0x98   : > { %v324_v28 = vsel %vm285_vm0, %v265_v26, %v274_v25  ;;  %v328_v29 = vsel %vm285_vm0, %v266_v27, %v275_v24 }
  0x99   : > { %366 = vmatpush.bf16.msra.mxu0 %v324_v28  ;;  %380 = vmatpush.bf16.msra.mxu1 %v328_v29 }
  0x9e   : > { %v254_v30 = vpop.permute.xlu1 %253  ;;  %v245_v31 = vpop.permute.xlu0 %244 }
  0x9f   : > { %v320_v32 = vsel %vm285_vm0, %v245_v31, %v254_v30  ;;  %v257_v39 = vsel %vm255_vm4, %v252_v33, %v254_v30  ;;  %v234_v49 = vpop.permute.xlu2 %233 }
  0xa0   : > { %395 = vmatpush.bf16.msra.mxu2 %v320_v32 }
  0xa6   : > { %v250_v37 = vpop.permute.xlu1 %249  ;;  %v243_v38 = vpop.permute.xlu0 %242 }
  0xa7   : > { %v256_v40 = vsel %vm255_vm4, %v250_v37, %v252_v33  ;;  %v247_v41 = vsel %vm246_vm5, %v241_v21, %v243_v38  ;;  %v248_v42 = vsel %vm246_vm5, %v243_v38, %v245_v31  ;;  %v216_v58 = vpop.permute.xlu2 %215 }
  0xa8   : > { %v312_v43 = vsel %vm285_vm0, %v247_v41, %v256_v40  ;;  %v316_v44 = vsel %vm285_vm0, %v248_v42, %v257_v39 }
  0xa9   : > { %367 = vmatpush.bf16.msra.mxu0 %v312_v43  ;;  %381 = vmatpush.bf16.msra.mxu1 %v316_v44 }
  0xae   : > { %v236_v46 = vpop.permute.xlu1 %235  ;;  %v227_v47 = vpop.permute.xlu0 %226 }
  0xaf   : > { %v308_v48 = vsel %vm285_vm0, %v227_v47, %v236_v46  ;;  %v239_v52 = vsel %vm237_vm6, %v234_v49, %v236_v46 }
  0xb0   : > { %396 = vmatpush.bf16.msra.mxu2 %v308_v48 }
  0xb6   : > { %v232_v50 = vpop.permute.xlu1 %231  ;;  %v225_v51 = vpop.permute.xlu0 %224 }
  0xb7   : > { %v238_v53 = vsel %vm237_vm6, %v232_v50, %v234_v49  ;;  %v229_v54 = vsel %vm228_vm7, %v223_v45, %v225_v51  ;;  %v230_v55 = vsel %vm228_vm7, %v225_v51, %v227_v47 }
  0xb8   : > { %v300_v56 = vsel %vm285_vm0, %v229_v54, %v238_v53  ;;  %v304_v57 = vsel %vm285_vm0, %v230_v55, %v239_v52 }
  0xb9   : > { %368 = vmatpush.bf16.msra.mxu0 %v300_v56  ;;  %382 = vmatpush.bf16.msra.mxu1 %v304_v57 }
  0xbe   : > { %v214_v59 = vpop.permute.xlu1 %213  ;;  %v218_v60 = vpop.permute.xlu0 %217 }
  0xbf   : > { %v220_v61 = vsel %vm219_vm8, %v214_v59, %v216_v58  ;;  %v221_v62 = vsel %vm219_vm8, %v216_v58, %v218_v60  ;;  %v296_v63 = vsel %vm285_vm0, %v616_v4, %v218_v60  ;;  %v410_v4 = vld [vmem:[%s706_s3] sm:$0x7] }
  0xc0   : > { %397 = vmatpush.bf16.msra.mxu2 %v296_v63  ;;  %v288_v1 = vsel %vm285_vm0, %v623_v7, %v220_v61  ;;  %v292_v2 = vsel %vm285_vm0, %v618_v5, %v221_v62  ;;  %v412_v9 = vperm.slane %v410_v4, 0  ;;  %v413_v10 = vperm.slane %v410_v4, 1 }
  0xc1   : > { %369 = vmatpush.bf16.msra.mxu0 %v288_v1  ;;  %383 = vmatpush.bf16.msra.mxu1 %v292_v2  ;;  %v414_v18 = vperm.slane %v410_v4, 2  ;;  %vm462_vm0 = vcmask 1043864  }
  0xc3   : > { %533 = vmatmul.msk.bf16.vlgmr.msra.gmra.mxu2 %vm349_vm9, %v536_v0 }
  0xc4   : > { %531 = vmatmul.msk.bf16.vlgmr.msra.gmra.mxu0 %vm349_vm9, %v536_v0  ;;  %532 = vmatmul.msk.bf16.vlgmr.msra.gmra.mxu1 %vm349_vm9, %v536_v0 }
  0xc6   : > { %v337_v3 = vpop.permute.xlu0 %336  ;;  %v342_v17 = vpop.permute.xlu1 %341 }
 0x141   : > { %v371_v5 = vpop.f32.mrf.mxu0  ;;  %v385_v6 = vpop.f32.mrf.mxu1 }
 0x142   : > { %v372_v7 = vadd.f32 %v371_v5, %v337_v3  ;;  %v386_v8 = vadd.f32 %v385_v6, %v337_v3 }
 0x144   : > { %v404_v11 = vmax.f32 %v372_v7, 0.0  ;;  %v405_v12 = vmax.f32 %v386_v8, 0.0 }
 0x146   : > { %v399_v13 = vpop.f32.mrf.mxu2  ;;  %v418_v14 = vmul.f32 %v412_v9, %v404_v11  ;;  %v419_v15 = vmul.f32 %v413_v10, %v405_v12 }
 0x147   : > { %v400_v16 = vadd.f32 %v399_v13, %v337_v3 }
 0x148   : > { %v427_v19 = vpack.c.bf16 %v419_v15, %v418_v14 }
 0x149   : > { %v406_v20 = vmax.f32 %v400_v16, 0.0  ;;  %v373_v21 = vpop.f32.mrf.mxu0  ;;  %v387_v22 = vpop.f32.mrf.mxu1 }
 0x14a   : > { %v374_v23 = vadd.f32 %v373_v21, %v342_v17  ;;  %v388_v24 = vadd.f32 %v387_v22, %v342_v17  ;;  %435 = vrot.lane.b32.xlu2 %v427_v19, %s576_s16 }
 0x14b   : > { %v420_v25 = vmul.f32 %v414_v18, %v406_v20 }
 0x14c   : > { %v407_v26 = vmax.f32 %v374_v23, 0.0  ;;  %v408_v27 = vmax.f32 %v388_v24, 0.0 }
 0x14d   : > { %v428_v32 = vpack.c.bf16 %v420_v25, %v420_v25 }
 0x14e   : > { %v421_v28 = vmul.f32 %v412_v9, %v407_v26  ;;  %v422_v29 = vmul.f32 %v413_v10, %v408_v27  ;;  %v401_v30 = vpop.f32.mrf.mxu2 }
 0x14f   : > { %v402_v31 = vadd.f32 %v401_v30, %v342_v17 }
 0x150   : > { %v429_v33 = vpack.c.bf16 %v422_v29, %v421_v28 }
 0x151   : > { %v409_v34 = vmax.f32 %v402_v31, 0.0 }
 0x152   : > { %439 = vrot.lane.b32.xlu1 %v429_v33, %s576_s16  ;;  %437 = vrot.lane.b32.xlu2 %v428_v32, %s576_s16 }
 0x153   : > { %v423_v35 = vmul.f32 %v414_v18, %v409_v34 }
 0x155   : > { %v430_v37 = vpack.c.bf16 %v423_v35, %v423_v35 }
 0x157   : > { %441 = vrot.lane.b32.xlu0 %v430_v37, %s576_s16 }
 0x1a4   : > { %v436_v38 = vpop.permute.xlu2 %435 }
 0x1a5   : > { %v443_v39 = vrot.slane %v436_v38, 4 }
 0x1a7   : > { %v446_v40 = vsel %vm445_vm13, %v443_v39, %v436_v38 }
 0x1a8   : > { %457 = vst.msk [vmem:[%s679_s12] sm:$0xff] %vm456_vm14, %v446_v40 }
 0x1ac   : > { %v438_v41 = vpop.permute.xlu2 %437 }
 0x1ad   : > { %v447_v42 = vsel %vm445_vm13, %v443_v39, %v438_v41 }
 0x1ae   : > { %459 = vst.msk [vmem:[%s679_s12 + $0x8] sm:$0xf] %vm458_vm15, %v447_v42 }
 0x1af   : > { %463 = vst.msk [vmem:[%s679_s12 + $0x8] sm:$0xf] %vm462_vm0, %v575_v36 }
 0x1c4   : > { %v440_v43 = vpop.permute.xlu1 %439 }
 0x1c5   : > { %v444_v44 = vrot.slane %v440_v43, 4 }
 0x1c7   : > { %v448_v45 = vsel %vm445_vm13, %v444_v44, %v440_v43 }
 0x1c8   : > { %460 = vst.msk [vmem:[%s679_s12 + $0xc] sm:$0xff] %vm456_vm14, %v448_v45 }
 0x1c9   : > { %v442_v46 = vpop.permute.xlu0 %441 }
 0x1ca   : > { %v449_v47 = vsel %vm445_vm13, %v444_v44, %v442_v46 }
 0x1cb   : > { %461 = vst.msk [vmem:[%s679_s12 + $0x14] sm:$0xf] %vm458_vm15, %v449_v47 }
 0x1cc   : > { %464 = vst.msk [vmem:[%s679_s12 + $0x14] sm:$0xf] %vm462_vm0, %v575_v36 }
 0x1cd PF: > { %s14_s15 = sadd.s32 1, %s565_s15  }
 0x1ce   : > { %p11_p4 = scmp.ge.s32.totalorder %s14_s15, 4  }
 0x1d0   :  { %13 = sbr.rel (!%p11_p4) target bundleno = 1 (0x1), region = 66 }

// kernel: unet_forward.13
= control target key start
LH: loop header
LB: loop body
LE: loop exit
PB: predicated region body
PF: predicated region fallthrough
CT: control target
= control target key end

     0   :  { %s1641_s15 = smov 0   ;;  %s2214_s0 = inlined_call_operand.vmem [shape: bf16[2,16,384], index: 0, kind: input, shape index: {}]   ;;  %s2215_s1 = inlined_call_operand.vmem [shape: bf16[4,16,144], index: 1, kind: input, shape index: {}]   ;;  %s2216_s2 = inlined_call_operand.vmem [shape: f32[4,16,1], index: 2, kind: input, shape index: {}]   ;;  %s2217_s3 = inlined_call_operand.vmem [shape: f32[1,288], index: 3, kind: input, shape index: {}]   ;;  %s2218_s4 = inlined_call_operand.vmem [shape: bf16[2,16,384], index: 4, kind: output, shape index: {}]  }
   0x1 LB: > { %s1413_s16 = sadd.s32 4294967295, %s1604_s15   ;;  %p1417_p0 = scmp.ge.s32.totalorder %s1604_s15, 1  ;;  %s1604_s15 = sphi %s1641_s15, %s14_s15  }
   0x2   : > { %p162_p1 = scmp.lt.s32.totalorder %s1604_s15, 3 }
   0x4   : > { %p163_p2 = pnand %p1417_p0, %p162_p1 }
   0x5   : > { %p188_p3 = scmp.lt.s32.totalorder (!%p163_p2), %s1413_s16, 1  ;;  %s1606_s21 = smov (!%p163_p2), 92  }
   0x6   : > { %166 = sbr.rel (%p163_p2) target bundleno = 1857 (0x741), region = 36  ;;  %s1607_s22 = smov (!%p163_p2), 91  }
   0x7   : > { %s1608_s23 = smov (!%p163_p2), 108   ;;  %s1609_s24 = smov (!%p163_p2), 109  }
   0x8   : > { %s1610_s25 = smov (!%p163_p2), 90   ;;  %s1611_s26 = smov (!%p163_p2), 110  }
   0x9   : > { %s1612_s27 = smov (!%p163_p2), 126   ;;  %s1613_s28 = smov (!%p163_p2), 127  }
   0xa   : > { %s1615_s29 = smov (!%p163_p2), 19  }
   0xb   : > { %s2222_s16 = smov (!%p188_p3, %s1413_s16), 1  ;;  %vm310_vm0 = vcmask 744448   ;;  %vm298_vm1 = vcmask 752640   ;;  %vm322_vm2 = vcmask 736256   ;;  %v1526_v21 = vld [vmem:[%s2215_s1 + $0x4] sm:$0xf] }
   0xc   : > { %s1546_s17 = smul.u32 24, %s2222_s16  ;;  %v1436_v22 = vld [vmem:[%s2215_s1 + $0x8] sm:$0xf0]  ;;  %vm347_vm3 = vcmask 130048   ;;  %vm286_vm4 = vcmask 883712   ;;  %vm274_vm5 = vcmask 891904  }
   0xd   : > { %v1728_v26 = vor.u32 %v1526_v21, %v1436_v22  ;;  %v210_v35 = vld [vmem:[%s2216_s2] sm:$0xff]  ;;  %v211_v36 = vld [vmem:[%s2216_s2 + $0x8] sm:$0xff]  ;;  %v1614_v38 = vmov 0   ;;  %vm262_vm6 = vcmask 900096   ;;  %vm250_vm7 = vcmask 1031168  }
   0xe   : > { %s1657_s20 = scalar_lea.vmem %s2214_s0, %s1546_s17  ;;  %1565 = vset.pattern.permute.xlu0 %v1614_v38  ;;  %199 = vst [vmem:[#allocation2] sm:$0xff] %v1614_v38  ;;  %1566 = vset.pattern.permute.xlu1 %v1614_v38  ;;  %vm238_vm8 = vcmask 1039360   ;;  %v1434_v54 = vld [vmem:[%s2215_s1] sm:$0xf]  ;;  %v1527_v55 = vld [vmem:[%s2215_s1 + $0x4] sm:$0xf0]  ;;  %s2177_s6 = scalar_lea.vmem %s2218_s4, %s1546_s17 }
   0xf   : > { %v1528_v0 = vld [vmem:[%s1657_s20 + $0x4] sm:$0xf]  ;;  %v1424_v1 = vld [vmem:[%s1657_s20 + $0xc] sm:$0xf0]  ;;  %v1422_v3 = vld [vmem:[%s1657_s20] sm:$0xf]  ;;  %1567 = vset.pattern.permute.xlu2 %v1614_v38  ;;  %v1435_v57 = vor.u32 %v1527_v55, %v1434_v54 }
  0x10   : > { %v1661_v2 = vor.u32 %v1528_v0, %v1424_v1  ;;  %v1529_v4 = vld [vmem:[%s1657_s20 + $0x8] sm:$0xf0]  ;;  %v1430_v6 = vld [vmem:[%s1657_s20 + $0x8] sm:$0xf]  ;;  %v1530_v7 = vld [vmem:[%s1657_s20 + $0x10] sm:$0xf0] }
  0x11   : > { %v1665_v5 = vor.u32 %v1529_v4, %v1422_v3  ;;  %v1675_v8 = vor.u32 %v1530_v7, %v1430_v6  ;;  %200 = vst [vmem:[#allocation2 + $0x8] sm:$0xf] %v1614_v38  ;;  %vm481_vm9 = vcmask 1043608   ;;  %vm482_vm10 = vcmask 1047556  }
  0x12   : > { %294 = vrot.lane.b32.xlu1 %v1661_v2, %s1606_s21  ;;  %306 = vrot.lane.b32.xlu0 %v1661_v2, %s1607_s22  ;;  %201 = vst [vmem:[#allocation2 + $0xc] sm:$0xff] %v1614_v38  ;;  %vm472_vm11 = vcmask 154624   ;;  %vm1794_vm12 = vmor %vm482_vm10, %vm481_vm9  ;;  %vm485_vm13 = vcmask 412672   ;;  %vm1322_vm14 = vcmask 150528   ;;  %vm1355_vm15 = vcmask 1043864  }
  0x13   : > { %304 = vrot.lane.b32.xlu2 %v1665_v5, %s1607_s22  ;;  %202 = vst [vmem:[#allocation2 + $0x14] sm:$0xf] %v1614_v38 }
  0x14   : > { %203 = vst [vmem:[#allocation3] sm:$0xff] %v1614_v38 }
  0x15   : > { %204 = vst [vmem:[#allocation3 + $0x8] sm:$0xf] %v1614_v38 }
  0x16   : > { %205 = vst [vmem:[#allocation3 + $0xc] sm:$0xff] %v1614_v38 }
  0x17   : > { %206 = vst [vmem:[#allocation3 + $0x14] sm:$0xf] %v1614_v38 }
  0x18   : > { %1323 = vst.msk [vmem:[%s2177_s6] sm:$0xf] %vm1322_vm14, %v1614_v38 }
  0x19   : > { %1324 = vst.msk [vmem:[%s2177_s6 + $0xc] sm:$0xf] %vm1322_vm14, %v1614_v38 }
  0x1a   : > { %296 = vrot.lane.b32.xlu1 %v1675_v8, %s1606_s21  ;;  %308 = vrot.lane.b32.xlu0 %v1675_v8, %s1607_s22 }
  0x1b   : > { %282 = vrot.lane.b32.xlu2 %v1661_v2, %s1608_s23 }
  0x22   : > { %292 = vrot.lane.b32.xlu1 %v1665_v5, %s1606_s21  ;;  %284 = vrot.lane.b32.xlu0 %v1675_v8, %s1608_s23 }
  0x23   : > { %270 = vrot.lane.b32.xlu2 %v1661_v2, %s1609_s24 }
  0x2a   : > { %316 = vrot.lane.b32.xlu1 %v1665_v5, %s1610_s25  ;;  %272 = vrot.lane.b32.xlu0 %v1675_v8, %s1609_s24 }
  0x2b   : > { %318 = vrot.lane.b32.xlu2 %v1661_v2, %s1610_s25 }
  0x32   : > { %258 = vrot.lane.b32.xlu1 %v1661_v2, %s1611_s26  ;;  %280 = vrot.lane.b32.xlu0 %v1665_v5, %s1608_s23 }
  0x33   : > { %260 = vrot.lane.b32.xlu2 %v1675_v8, %s1611_s26 }
  0x3a   : > { %268 = vrot.lane.b32.xlu1 %v1665_v5, %s1609_s24  ;;  %320 = vrot.lane.b32.xlu0 %v1675_v8, %s1610_s25 }
  0x3b   : > { %246 = vrot.lane.b32.xlu2 %v1661_v2, %s1612_s27 }
  0x42   : > { %256 = vrot.lane.b32.xlu1 %v1665_v5, %s1611_s26  ;;  %248 = vrot.lane.b32.xlu0 %v1675_v8, %s1612_s27 }
  0x43   : > { %234 = vrot.lane.b32.xlu2 %v1661_v2, %s1613_s28 }
  0x4a   : > { %244 = vrot.lane.b32.xlu1 %v1665_v5, %s1612_s27  ;;  %236 = vrot.lane.b32.xlu0 %v1675_v8, %s1613_s28 }
  0x4b   : > { %232 = vrot.lane.b32.xlu2 %v1665_v5, %s1613_s28 }
  0x52   : > { %330 = vperm.xlu0 %1565, %v210_v35   ;;  %335 = vperm.xlu1 %1566, %v211_v36  }
  0x6d   : > { %v305_v9 = vpop.permute.xlu2 %304 }
  0x75   : > { %v283_v10 = vpop.permute.xlu2 %282 }
  0x7d   : > { %v271_v14 = vpop.permute.xlu2 %270 }
  0x84   : > { %v295_v11 = vpop.permute.xlu1 %294  ;;  %v307_v12 = vpop.permute.xlu0 %306 }
  0x85   : > { %v311_v13 = vsel %vm310_vm0, %v305_v9, %v307_v12  ;;  %v319_v20 = vpop.permute.xlu2 %318 }
  0x86   : > { %351 = vmatpush.bf16.msra.mxu0 %v311_v13 }
  0x8c   : > { %v297_v15 = vpop.permute.xlu1 %296  ;;  %v309_v16 = vpop.permute.xlu0 %308 }
  0x8d   : > { %407 = vmatpush.bf16.msra.mxu1 %v309_v16  ;;  %v312_v27 = vsel %vm310_vm0, %v307_v12, %v309_v16  ;;  %v261_v28 = vpop.permute.xlu2 %260  ;;  %v300_v29 = vsel %vm298_vm1, %v295_v11, %v297_v15 }
  0x91   : > { %408 = vmatpush.bf16.msra.mxu1 %v297_v15 }
  0x94   : > { %v293_v17 = vpop.permute.xlu1 %292  ;;  %v285_v18 = vpop.permute.xlu0 %284 }
  0x95   : > { %409 = vmatpush.bf16.msra.mxu1 %v285_v18  ;;  %v299_v19 = vsel %vm298_vm1, %v293_v17, %v295_v11  ;;  %v288_v33 = vsel %vm286_vm4, %v283_v10, %v285_v18  ;;  %v247_v34 = vpop.permute.xlu2 %246 }
  0x96   : > { %352 = vmatpush.bf16.msra.mxu0 %v299_v19 }
  0x9c   : > { %v317_v23 = vpop.permute.xlu1 %316  ;;  %v273_v24 = vpop.permute.xlu0 %272 }
  0x9d   : > { %410 = vmatpush.bf16.msra.mxu1 %v273_v24  ;;  %v323_v25 = vsel %vm322_vm2, %v317_v23, %v319_v20  ;;  %v276_v37 = vsel %vm274_vm5, %v271_v14, %v273_v24  ;;  %v235_v44 = vpop.permute.xlu2 %234 }
  0x9e   : > { %372 = vmatpush.bf16.msra.mxu2 %v323_v25 }
  0xa1   : > { %411 = vmatpush.bf16.msra.mxu1 %v261_v28  ;;  %1440 = vmatmul.msk.bf16.vlgmr.msra.gmra.mxu2 %vm347_vm3, %v1728_v26 }
  0xa2   : > { %379 = vmatpush.bf16.msrb.mxu2 %v312_v27 }
  0xa4   : > { %v259_v30 = vpop.permute.xlu1 %258  ;;  %v281_v31 = vpop.permute.xlu0 %280 }
  0xa5   : > { %v287_v32 = vsel %vm286_vm4, %v281_v31, %v283_v10  ;;  %v264_v43 = vsel %vm262_vm6, %v259_v30, %v261_v28  ;;  %v233_v53 = vpop.permute.xlu2 %232 }
  0xa6   : > { %380 = vmatpush.bf16.msrb.mxu2 %v300_v29  ;;  %353 = vmatpush.bf16.msra.mxu0 %v287_v32  ;;  %v239_v56 = vsel %vm238_vm8, %v233_v53, %v235_v44 }
  0xaa   : > { %381 = vmatpush.bf16.msrb.mxu2 %v288_v33 }
  0xac   : > { %v269_v39 = vpop.permute.xlu1 %268  ;;  %v321_v40 = vpop.permute.xlu0 %320 }
  0xad   : > { %v275_v41 = vsel %vm274_vm5, %v269_v39, %v271_v14  ;;  %v324_v42 = vsel %vm322_vm2, %v319_v20, %v321_v40 }
  0xae   : > { %382 = vmatpush.bf16.msrb.mxu2 %v276_v37  ;;  %354 = vmatpush.bf16.msra.mxu0 %v275_v41 }
  0xaf   : > { %400 = vmatpush.bf16.msra.mxu3 %v324_v42 }
  0xb2   : > { %383 = vmatpush.bf16.msrb.mxu2 %v264_v43  ;;  %1441 = vmatmul.msk.bf16.vlgmr.msra.gmra.mxu3 %vm347_vm3, %v1728_v26 }
  0xb3   : > { %428 = vmatpush.bf16.msrb.mxu3 %v321_v40 }
  0xb4   : > { %v257_v45 = vpop.permute.xlu1 %256  ;;  %v249_v46 = vpop.permute.xlu0 %248 }
  0xb5   : > { %412 = vmatpush.bf16.msra.mxu1 %v249_v46  ;;  %v263_v47 = vsel %vm262_vm6, %v257_v45, %v259_v30  ;;  %v252_v48 = vsel %vm250_vm7, %v247_v34, %v249_v46 }
  0xb6   : > { %355 = vmatpush.bf16.msra.mxu0 %v263_v47  ;;  %384 = vmatpush.bf16.msrb.mxu2 %v252_v48 }
  0xbc   : > { %v245_v49 = vpop.permute.xlu1 %244  ;;  %v237_v50 = vpop.permute.xlu0 %236 }
  0xbd   : > { %413 = vmatpush.bf16.msra.mxu1 %v237_v50  ;;  %v251_v51 = vsel %vm250_vm7, %v245_v49, %v247_v34  ;;  %v240_v52 = vsel %vm238_vm8, %v235_v44, %v237_v50 }
  0xbe   : > { %356 = vmatpush.bf16.msra.mxu0 %v251_v51  ;;  %385 = vmatpush.bf16.msrb.mxu2 %v240_v52 }
  0xc1   : > { %414 = vmatpush.bf16.msra.mxu1 %v1675_v8 }
  0xc2   : > { %1442 = vmatmul.msk.bf16.vlgmr.msrb.gmra.mxu3 %vm347_vm3, %v1728_v26  ;;  %357 = vmatpush.bf16.msra.mxu0 %v239_v56 }
  0xc3   : > { %386 = vmatpush.bf16.msrb.mxu2 %v1661_v2  ;;  %v207_v2 = vld [vmem:[%s2217_s3] sm:$0x7] }
  0xc4   : > { %415 = vmatmul.bf16.vlgmr.msra.gmra.mxu1 %v1435_v57  ;;  %v331_v63 = vpop.permute.xlu0 %330  ;;  %v336_v6 = vpop.permute.xlu1 %335  ;;  %v1778_v14 = vperm.slane %v207_v2, 1  ;;  %v1780_v15 = vperm.slane %v207_v2, 0  ;;  %v1782_v18 = vperm.slane %v207_v2, 2 }
  0xc6   : > { %387 = vmatmul.bf16.vlgmr.msrb.gmra.mxu2 %v1435_v57  ;;  %358 = vmatpush.bf16.msra.mxu0 %v1665_v5 }
  0xc9   : > { %359 = vmatmul.bf16.vlgmr.msra.gmra.mxu0 %v1435_v57 }
 0x124   : > { %v374_v59 = vpop.f32.mrf.mxu2 }
 0x12c   : > { %v376_v61 = vpop.f32.mrf.mxu2 }
 0x135   : > { %v402_v58 = vpop.f32.mrf.mxu3 }
 0x13d   : > { %v404_v60 = vpop.f32.mrf.mxu3 }
 0x141   : > { %v416_v62 = vpop.f32.mrf.mxu1 }
 0x142   : > { %v417_v3 = vadd.f32 %v416_v62, %v331_v63 }
 0x145   : > { %v430_v0 = vpop.f32.mrf.mxu3 }
 0x146   : > { %v360_v1 = vpop.f32.mrf.mxu0  ;;  %v431_v10 = vadd.f32 %v430_v0, %v417_v3 }
 0x147   : > { %v361_v4 = vadd.f32 %v360_v1, %v331_v63 }
 0x148   : > { %v437_v20 = vmax.f32 %v431_v10, 0.0 }
 0x149   : > { %v388_v7 = vpop.f32.mrf.mxu2  ;;  %v375_v8 = vadd.f32 %v374_v59, %v361_v4  ;;  %v418_v5 = vpop.f32.mrf.mxu1 }
 0x14a   : > { %v389_v9 = vadd.f32 %v388_v7, %v331_v63  ;;  %v419_v11 = vadd.f32 %v418_v5, %v336_v6  ;;  %v450_v31 = vmul.f32 %v1782_v18, %v437_v20 }
 0x14b   : > { %v435_v12 = vmax.f32 %v375_v8, 0.0 }
 0x14c   : > { %v403_v13 = vadd.f32 %v402_v58, %v389_v9  ;;  %v455_v36 = vpack.c.bf16 %v450_v31, %v450_v31  ;;  %v717_v31 = vld [vmem:[%s1657_s20 + $0xc] sm:$0xff] }
 0x14d   : > { %v432_v16 = vpop.f32.mrf.mxu3  ;;  %v448_v25 = vmul.f32 %v1780_v15, %v435_v12 }
 0x14e   : > { %v436_v17 = vmax.f32 %v403_v13, 0.0  ;;  %v433_v19 = vadd.f32 %v432_v16, %v419_v11  ;;  %v362_v21 = vpop.f32.mrf.mxu0 }
 0x14f   : > { %v363_v23 = vadd.f32 %v362_v21, %v336_v6 }
 0x150   : > { %v449_v22 = vmul.f32 %v1778_v14, %v436_v17  ;;  %v440_v24 = vmax.f32 %v433_v19, 0.0 }
 0x151   : > { %v390_v26 = vpop.f32.mrf.mxu2  ;;  %v377_v27 = vadd.f32 %v376_v61, %v363_v23  ;;  %v1445_v61 = vld [vmem:[%s2216_s2 + $0x10] sm:$0xff] }
 0x152   : > { %v391_v28 = vadd.f32 %v390_v26, %v336_v6  ;;  %v453_v29 = vmul.f32 %v1782_v18, %v440_v24  ;;  %v454_v30 = vpack.c.bf16 %v449_v22, %v448_v25 }
 0x153   : > { %v438_v32 = vmax.f32 %v377_v27, 0.0 }
 0x154   : > { %v405_v33 = vadd.f32 %v404_v60, %v391_v28  ;;  %v457_v34 = vpack.c.bf16 %v453_v29, %v453_v29  ;;  %462 = vrot.lane.b32.xlu2 %v454_v30, %s1615_s29  ;;  %v716_v30 = vld [vmem:[%s1657_s20 + $0x8] sm:$0xf] }
 0x155   : > { %v451_v37 = vmul.f32 %v1780_v15, %v438_v32  ;;  %v715_v32 = vld [vmem:[%s1657_s20] sm:$0xff] }
 0x156   : > { %v439_v35 = vmax.f32 %v405_v33, 0.0  ;;  %468 = vrot.lane.b32.xlu0 %v457_v34, %s1615_s29  ;;  %v721_v34 = vunpack.c.l.bf16 %v716_v30 }
 0x158   : > { %v452_v39 = vmul.f32 %v1778_v14, %v439_v35  ;;  %v722_v35 = vunpack.c.l.bf16 %v717_v31 }
 0x15a   : > { %v456_v40 = vpack.c.bf16 %v452_v39, %v451_v37  ;;  %v720_v37 = vunpack.c.h.bf16 %v715_v32  ;;  %v1573_v39 = vpack.i.bf16 %v722_v35, %v721_v34 }
 0x15c   : > { %466 = vrot.lane.b32.xlu1 %v456_v40, %s1615_s29  ;;  %464 = vrot.lane.b32.xlu2 %v455_v36, %s1615_s29  ;;  %v719_v36 = vunpack.c.l.bf16 %v715_v32 }
 0x15e   : > { %v1568_v40 = vpack.i.bf16 %v720_v37, %v719_v36 }
 0x1ae   : > { %v463_v41 = vpop.permute.xlu2 %462 }
 0x1af   : > { %v470_v43 = vrot.slane %v463_v41, 4 }
 0x1b1   : > { %v473_v44 = vsel %vm472_vm11, %v470_v43, %v463_v41 }
 0x1b2   : > { %484 = vst.msk [vmem:[#allocation3] sm:$0xff] %vm1794_vm12, %v473_v44 }
 0x1b6   : > { %v465_v45 = vpop.permute.xlu2 %464 }
 0x1b7   : > { %v474_v46 = vsel %vm472_vm11, %v470_v43, %v465_v45 }
 0x1b8   : > { %486 = vst.msk [vmem:[#allocation3 + $0x8] sm:$0xf] %vm485_vm13, %v474_v46 }
 0x1b9   : > { %v1533_v52 = vld [vmem:[#allocation3 + $0x4] sm:$0xf]  ;;  %v1449_v53 = vld [vmem:[#allocation3] sm:$0xf] }
 0x1bf   : > { %v1457_v56 = vld [vmem:[#allocation3 + $0x8] sm:$0xf] }
 0x1c8   : > { %v469_v49 = vpop.permute.xlu0 %468 }
 0x1ce   : > { %v467_v47 = vpop.permute.xlu1 %466 }
 0x1cf   : > { %v471_v48 = vrot.slane %v467_v47, 4 }
 0x1d1   : > { %v475_v50 = vsel %vm472_vm11, %v471_v48, %v467_v47  ;;  %v476_v51 = vsel %vm472_vm11, %v471_v48, %v469_v49  ;;  %v1461_v47 = vld [vmem:[%s2215_s1 + $0x10] sm:$0xf]  ;;  %v1532_v48 = vld [vmem:[%s2215_s1 + $0x14] sm:$0xf0] }
 0x1d2   : > { %487 = vst.msk [vmem:[#allocation3 + $0xc] sm:$0xff] %vm1794_vm12, %v475_v50  ;;  %v1462_v49 = vor.u32 %v1532_v48, %v1461_v47  ;;  %v1531_v50 = vld [vmem:[%s2215_s1 + $0x14] sm:$0xf] }
 0x1d3   : > { %488 = vst.msk [vmem:[#allocation3 + $0x14] sm:$0xf] %vm485_vm13, %v476_v51  ;;  %v1463_v51 = vld [vmem:[%s2215_s1 + $0x18] sm:$0xf0] }
 0x1d9   : > { %v1451_v54 = vld [vmem:[#allocation3 + $0xc] sm:$0xf0]  ;;  %v1534_v55 = vld [vmem:[#allocation3 + $0x8] sm:$0xf0] }
 0x1da   : > { %v1535_v57 = vld [vmem:[#allocation3 + $0x10] sm:$0xf0]  ;;  %v1808_v58 = vor.u32 %v1534_v55, %v1449_v53  ;;  %v1810_v59 = vor.u32 %v1533_v52, %v1451_v54 }
 0x1db   : > { %v1812_v60 = vor.u32 %v1535_v57, %v1457_v56  ;;  %v1466_v56 = vor.u32 %v1531_v50, %v1463_v51 }
 0x1dc   : > { %581 = vrot.lane.b32.xlu1 %v1808_v58, %s1607_s22  ;;  %583 = vrot.lane.b32.xlu2 %v1810_v59, %s1607_s22 }
 0x1dd   : > { %585 = vrot.lane.b32.xlu0 %v1812_v60, %s1607_s22 }
 0x1e4   : > { %570 = vrot.lane.b32.xlu1 %v1808_v58, %s1606_s21  ;;  %572 = vrot.lane.b32.xlu2 %v1810_v59, %s1606_s21 }
 0x1e5   : > { %574 = vrot.lane.b32.xlu0 %v1812_v60, %s1606_s21 }
 0x1ec   : > { %559 = vrot.lane.b32.xlu1 %v1808_v58, %s1608_s23  ;;  %561 = vrot.lane.b32.xlu2 %v1810_v59, %s1608_s23 }
 0x1ed   : > { %563 = vrot.lane.b32.xlu0 %v1812_v60, %s1608_s23 }
 0x1f4   : > { %548 = vrot.lane.b32.xlu1 %v1808_v58, %s1609_s24  ;;  %550 = vrot.lane.b32.xlu2 %v1810_v59, %s1609_s24 }
 0x1f5   : > { %552 = vrot.lane.b32.xlu0 %v1812_v60, %s1609_s24 }
 0x1fc   : > { %537 = vrot.lane.b32.xlu1 %v1808_v58, %s1611_s26  ;;  %539 = vrot.lane.b32.xlu2 %v1810_v59, %s1611_s26 }
 0x1fd   : > { %541 = vrot.lane.b32.xlu0 %v1812_v60, %s1611_s26 }
 0x204   : > { %526 = vrot.lane.b32.xlu1 %v1808_v58, %s1612_s27  ;;  %528 = vrot.lane.b32.xlu2 %v1810_v59, %s1612_s27 }
 0x205   : > { %530 = vrot.lane.b32.xlu0 %v1812_v60, %s1612_s27 }
 0x20c   : > { %515 = vrot.lane.b32.xlu1 %v1808_v58, %s1613_s28  ;;  %517 = vrot.lane.b32.xlu2 %v1810_v59, %s1613_s28 }
 0x20d   : > { %519 = vrot.lane.b32.xlu0 %v1812_v60, %s1613_s28 }
 0x214   : > { %592 = vrot.lane.b32.xlu1 %v1808_v58, %s1610_s25  ;;  %594 = vrot.lane.b32.xlu2 %v1810_v59, %s1610_s25 }
 0x215   : > { %596 = vrot.lane.b32.xlu0 %v1812_v60, %s1610_s25 }
 0x21c   : > { %605 = vperm.xlu1 %1566, %v1445_v61   ;;  %v718_v61 = vld [vmem:[%s1657_s20 + $0x14] sm:$0xf] }
 0x21d   : > { %1569 = vrot.lane.b32.xlu0 %v1568_v40, %s1609_s24 }
 0x224   : > { %1574 = vrot.lane.b32.xlu1 %v1573_v39, %s1609_s24 }
 0x236   : > { %v584_v62 = vpop.permute.xlu2 %583 }
 0x23e   : > { %v573_v63 = vpop.permute.xlu2 %572 }
 0x246   : > { %v562_v6 = vpop.permute.xlu2 %561 }
 0x24e   : > { %v582_v0 = vpop.permute.xlu1 %581  ;;  %v551_v5 = vpop.permute.xlu2 %550 }
 0x24f   : > { %v587_v1 = vsel %vm310_vm0, %v582_v0, %v584_v62  ;;  %v1866_v3 = vpop.permute.xlu0 %585 }
 0x250   : > { %v588_v4 = vsel %vm310_vm0, %v584_v62, %v1866_v3  ;;  %625 = vmatpush.bf16.msra.mxu3 %v587_v1  ;;  %v724_v62 = vunpack.c.l.bf16 %v718_v61 }
 0x251   : > { %653 = vmatpush.bf16.msra.mxu2 %v588_v4 }
 0x256   : > { %v571_v2 = vpop.permute.xlu1 %570  ;;  %v540_v20 = vpop.permute.xlu2 %539 }
 0x257   : > { %v1870_v7 = vpop.permute.xlu0 %574  ;;  %v576_v8 = vsel %vm298_vm1, %v571_v2, %v573_v63 }
 0x258   : > { %626 = vmatpush.bf16.msra.mxu3 %v576_v8  ;;  %v577_v9 = vsel %vm298_vm1, %v573_v63, %v1870_v7 }
 0x259   : > { %654 = vmatpush.bf16.msra.mxu2 %v577_v9 }
 0x25e   : > { %v560_v10 = vpop.permute.xlu1 %559  ;;  %v529_v26 = vpop.permute.xlu2 %528 }
 0x25f   : > { %v1875_v11 = vpop.permute.xlu0 %563  ;;  %v565_v12 = vsel %vm286_vm4, %v560_v10, %v562_v6 }
 0x260   : > { %627 = vmatpush.bf16.msra.mxu3 %v565_v12  ;;  %v566_v13 = vsel %vm286_vm4, %v562_v6, %v1875_v11 }
 0x261   : > { %655 = vmatpush.bf16.msra.mxu2 %v566_v13 }
 0x266   : > { %v549_v16 = vpop.permute.xlu1 %548  ;;  %v518_v41 = vpop.permute.xlu2 %517 }
 0x267   : > { %v1880_v17 = vpop.permute.xlu0 %552  ;;  %v554_v19 = vsel %vm274_vm5, %v549_v16, %v551_v5 }
 0x268   : > { %628 = vmatpush.bf16.msra.mxu3 %v554_v19  ;;  %v555_v21 = vsel %vm274_vm5, %v551_v5, %v1880_v17 }
 0x269   : > { %656 = vmatpush.bf16.msra.mxu2 %v555_v21 }
 0x26e   : > { %v538_v22 = vpop.permute.xlu1 %537  ;;  %v595_v52 = vpop.permute.xlu2 %594 }
 0x26f   : > { %v542_v23 = vpop.permute.xlu0 %541  ;;  %v543_v24 = vsel %vm262_vm6, %v538_v22, %v540_v20 }
 0x270   : > { %629 = vmatpush.bf16.msra.mxu3 %v543_v24  ;;  %v544_v25 = vsel %vm262_vm6, %v540_v20, %v542_v23 }
 0x271   : > { %657 = vmatpush.bf16.msra.mxu2 %v544_v25 }
 0x276   : > { %v527_v27 = vpop.permute.xlu1 %526 }
 0x277   : > { %v531_v28 = vpop.permute.xlu0 %530  ;;  %v532_v29 = vsel %vm250_vm7, %v527_v27, %v529_v26 }
 0x278   : > { %630 = vmatpush.bf16.msra.mxu3 %v532_v29  ;;  %v533_v33 = vsel %vm250_vm7, %v529_v26, %v531_v28 }
 0x279   : > { %658 = vmatpush.bf16.msra.mxu2 %v533_v33 }
 0x27e   : > { %v516_v43 = vpop.permute.xlu1 %515 }
 0x27f   : > { %v520_v44 = vpop.permute.xlu0 %519  ;;  %v521_v45 = vsel %vm238_vm8, %v516_v43, %v518_v41 }
 0x280   : > { %631 = vmatpush.bf16.msra.mxu3 %v521_v45  ;;  %v522_v46 = vsel %vm238_vm8, %v518_v41, %v520_v44 }
 0x281   : > { %659 = vmatpush.bf16.msra.mxu2 %v522_v46 }
 0x284   : > { %632 = vmatpush.bf16.msra.mxu3 %v1808_v58  ;;  %v1446_v58 = vld [vmem:[%s2216_s2 + $0x18] sm:$0xff] }
 0x285   : > { %660 = vmatpush.bf16.msra.mxu2 %v1810_v59  ;;  %610 = vperm.xlu2 %1567, %v1446_v58   ;;  %v723_v59 = vunpack.c.h.bf16 %v717_v31 }
 0x286   : > { %v593_v53 = vpop.permute.xlu1 %592 }
 0x287   : > { %v597_v54 = vpop.permute.xlu0 %596  ;;  %633 = vmatmul.bf16.vlgmr.msra.gmra.mxu3 %v1462_v49  ;;  %v598_v55 = vsel %vm322_vm2, %v593_v53, %v595_v52  ;;  %v1578_v63 = vpack.i.bf16 %v724_v62, %v723_v59 }
 0x288   : > { %661 = vmatmul.bf16.vlgmr.msra.gmra.mxu2 %v1462_v49  ;;  %646 = vmatpush.bf16.msrb.mxu0 %v598_v55  ;;  %v599_v57 = vsel %vm322_vm2, %v595_v52, %v597_v54 }
 0x289   : > { %674 = vmatpush.bf16.msrb.mxu1 %v599_v57 }
 0x28b   : > { %1467 = vmatmul.msk.bf16.vlgmr.msrb.gmra.mxu0 %vm347_vm3, %v1466_v56 }
 0x28c   : > { %681 = vmatpush.bf16.msra.mxu0 %v1866_v3  ;;  %1468 = vmatmul.msk.bf16.vlgmr.msrb.gmra.mxu1 %vm347_vm3, %v1466_v56 }
 0x28d   : > { %702 = vmatpush.bf16.msra.mxu1 %v597_v54  ;;  %1579 = vrot.lane.b32.xlu2 %v1578_v63, %s1609_s24 }
 0x28e   : > { %v606_v0 = vpop.permute.xlu1 %605 }
 0x28f   : > { %v1570_v3 = vpop.permute.xlu0 %1569 }
 0x290   : > { %682 = vmatpush.bf16.msra.mxu0 %v1870_v7  ;;  %v1572_v7 = vunpack.i.h.bf16 %v1570_v3  ;;  %v1571_v8 = vunpack.i.l.bf16 %v1570_v3 }
 0x294   : > { %683 = vmatpush.bf16.msra.mxu0 %v1875_v11 }
 0x296   : > { %v1575_v4 = vpop.permute.xlu1 %1574 }
 0x297   : > { %v1576_v11 = vunpack.i.l.bf16 %v1575_v4 }
 0x298   : > { %684 = vmatpush.bf16.msra.mxu0 %v1880_v17  ;;  %v744_v17 = vsel %vm274_vm5, %v1571_v8, %v1572_v7 }
 0x299   : > { %v745_v19 = vsel %vm274_vm5, %v1572_v7, %v1576_v11 }
 0x29c   : > { %685 = vmatpush.bf16.msra.mxu0 %v542_v23  ;;  %1469 = vmatmul.msk.bf16.vlgmr.msra.gmra.mxu1 %vm347_vm3, %v1466_v56  ;;  %v1577_v23 = vunpack.i.h.bf16 %v1575_v4 }
 0x2a0   : > { %686 = vmatpush.bf16.msra.mxu0 %v531_v28 }
 0x2a4   : > { %687 = vmatpush.bf16.msra.mxu0 %v520_v44 }
 0x2a8   : > { %688 = vmatpush.bf16.msra.mxu0 %v1812_v60 }
 0x2ab   : > { %689 = vmatmul.bf16.vlgmr.msra.gmra.mxu0 %v1462_v49 }
 0x2df   : > { %v611_v1 = vpop.permute.xlu2 %610 }
 0x2e7   : > { %v1580_v20 = vpop.permute.xlu2 %1579 }
 0x2e8   : > { %v1581_v25 = vunpack.i.l.bf16 %v1580_v20  ;;  %v1582_v29 = vunpack.i.h.bf16 %v1580_v20 }
 0x2ea   : > { %v746_v36 = vsel %vm274_vm5, %v1577_v23, %v1581_v25  ;;  %v747_v39 = vsel %vm274_vm5, %v1581_v25, %v1582_v29 }
 0x308   : > { %v648_v6 = vpop.f32.mrf.mxu0 }
 0x309   : > { %v676_v9 = vpop.f32.mrf.mxu1 }
 0x30a   : > { %v634_v2 = vpop.f32.mrf.mxu3 }
 0x30b   : > { %v635_v5 = vadd.f32 %v634_v2, %v606_v0  ;;  %v662_v10 = vpop.f32.mrf.mxu2 }
 0x30c   : > { %v663_v12 = vadd.f32 %v662_v10, %v606_v0 }
 0x30d   : > { %v649_v13 = vadd.f32 %v648_v6, %v635_v5 }
 0x30e   : > { %v677_v16 = vadd.f32 %v676_v9, %v663_v12 }
 0x30f   : > { %v709_v60 = vmul.f32 %v649_v13, %v1780_v15 }
 0x310   : > { %v710_v21 = vmul.f32 %v677_v16, %v1778_v14  ;;  %v650_v30 = vpop.f32.mrf.mxu0 }
 0x311   : > { %v754_v22 = vadd.f32 %v744_v17, %v709_v60  ;;  %v678_v33 = vpop.f32.mrf.mxu1  ;;  %v1472_v17 = vld [vmem:[%s2216_s2 + $0x20] sm:$0xff]  ;;  %v1473_v60 = vld [vmem:[%s2216_s2 + $0x28] sm:$0xff] }
 0x312   : > { %v636_v24 = vpop.f32.mrf.mxu3  ;;  %v755_v26 = vadd.f32 %v745_v19, %v710_v21 }
 0x313   : > { %v637_v27 = vadd.f32 %v636_v24, %v611_v1  ;;  %v664_v28 = vpop.f32.mrf.mxu2 }
 0x314   : > { %v665_v31 = vadd.f32 %v664_v28, %v611_v1  ;;  %v760_v32 = vpack.c.bf16 %v755_v26, %v754_v22 }
 0x315   : > { %v651_v34 = vadd.f32 %v650_v30, %v637_v27 }
 0x316   : > { %v679_v35 = vadd.f32 %v678_v33, %v665_v31  ;;  %768 = vrot.lane.b32.xlu0 %v760_v32, %s1615_s29 }
 0x317   : > { %v712_v37 = vmul.f32 %v651_v34, %v1780_v15 }
 0x318   : > { %v713_v40 = vmul.f32 %v679_v35, %v1778_v14 }
 0x319   : > { %v757_v41 = vadd.f32 %v746_v36, %v712_v37  ;;  %v704_v45 = vpop.f32.mrf.mxu1 }
 0x31a   : > { %v758_v43 = vadd.f32 %v747_v39, %v713_v40 }
 0x31c   : > { %v762_v44 = vpack.c.bf16 %v758_v43, %v757_v41 }
 0x31e   : > { %772 = vrot.lane.b32.xlu1 %v762_v44, %s1615_s29 }
 0x321   : > { %v706_v54 = vpop.f32.mrf.mxu1 }
 0x328   : > { %v690_v46 = vpop.f32.mrf.mxu0 }
 0x329   : > { %v691_v47 = vadd.f32 %v690_v46, %v606_v0 }
 0x32b   : > { %v705_v48 = vadd.f32 %v704_v45, %v691_v47 }
 0x32d   : > { %v711_v49 = vmul.f32 %v705_v48, %v1782_v18  ;;  %v1488_v48 = vld [vmem:[%s2215_s1 + $0x20] sm:$0xf] }
 0x32f   : > { %v756_v50 = vadd.f32 %v1576_v11, %v711_v49  ;;  %v1537_v49 = vld [vmem:[%s2215_s1 + $0x24] sm:$0xf0] }
 0x330   : > { %v692_v51 = vpop.f32.mrf.mxu0 }
 0x331   : > { %v693_v52 = vadd.f32 %v692_v51, %v611_v1  ;;  %v761_v53 = vpack.c.bf16 %v756_v50, %v756_v50  ;;  %v1489_v50 = vor.u32 %v1537_v49, %v1488_v48  ;;  %v1536_v51 = vld [vmem:[%s2215_s1 + $0x24] sm:$0xf] }
 0x333   : > { %v707_v55 = vadd.f32 %v706_v54, %v693_v52  ;;  %770 = vrot.lane.b32.xlu2 %v761_v53, %s1615_s29  ;;  %v1490_v52 = vld [vmem:[%s2215_s1 + $0x28] sm:$0xf0] }
 0x335   : > { %v714_v56 = vmul.f32 %v707_v55, %v1782_v18 }
 0x337   : > { %v759_v57 = vadd.f32 %v1582_v29, %v714_v56 }
 0x339   : > { %v763_v58 = vpack.c.bf16 %v759_v57, %v759_v57 }
 0x33b   : > { %774 = vrot.lane.b32.xlu0 %v763_v58, %s1615_s29  ;;  %v1493_v58 = vor.u32 %v1536_v51, %v1490_v52 }
 0x388   : > { %v769_v61 = vpop.permute.xlu0 %768 }
 0x389   : > { %v776_v59 = vrot.slane %v769_v61, 4 }
 0x38b   : > { %v778_v63 = vsel %vm472_vm11, %v776_v59, %v769_v61 }
 0x38c   : > { %786 = vst.msk [vmem:[#allocation2] sm:$0xff] %vm1794_vm12, %v778_v63 }
 0x38d   : > { %v771_v62 = vpop.permute.xlu2 %770 }
 0x38e   : > { %v779_v0 = vsel %vm472_vm11, %v776_v59, %v771_v62 }
 0x38f   : > { %787 = vst.msk [vmem:[#allocation2 + $0x8] sm:$0xf] %vm485_vm13, %v779_v0 }
 0x390   : > { %v773_v1 = vpop.permute.xlu1 %772 }
 0x391   : > { %v777_v3 = vrot.slane %v773_v1, 4 }
 0x393   : > { %v780_v4 = vsel %vm472_vm11, %v777_v3, %v773_v1  ;;  %v1538_v6 = vld [vmem:[#allocation2 + $0x4] sm:$0xf]  ;;  %v1476_v2 = vld [vmem:[#allocation2] sm:$0xf] }
 0x394   : > { %788 = vst.msk [vmem:[#allocation2 + $0xc] sm:$0xff] %vm1794_vm12, %v780_v4 }
 0x396   : > { %v1484_v12 = vld [vmem:[#allocation2 + $0x8] sm:$0xf] }
 0x39b   : > { %v1478_v7 = vld [vmem:[#allocation2 + $0xc] sm:$0xf0]  ;;  %v1539_v8 = vld [vmem:[#allocation2 + $0x8] sm:$0xf0] }
 0x39c   : > { %v1947_v9 = vor.u32 %v1539_v8, %v1476_v2  ;;  %v1949_v5 = vor.u32 %v1538_v6, %v1478_v7 }
 0x39e   : > { %871 = vrot.lane.b32.xlu0 %v1947_v9, %s1606_s21  ;;  %882 = vrot.lane.b32.xlu1 %v1947_v9, %s1607_s22 }
 0x39f   : > { %884 = vrot.lane.b32.xlu2 %v1949_v5, %s1607_s22 }
 0x3a6   : > { %862 = vrot.lane.b32.xlu0 %v1949_v5, %s1608_s23  ;;  %873 = vrot.lane.b32.xlu1 %v1949_v5, %s1606_s21 }
 0x3a7   : > { %860 = vrot.lane.b32.xlu2 %v1947_v9, %s1608_s23 }
 0x3ad   : > { %v775_v10 = vpop.permute.xlu0 %774 }
 0x3ae   : > { %v781_v11 = vsel %vm472_vm11, %v777_v3, %v775_v10  ;;  %849 = vrot.lane.b32.xlu1 %v1947_v9, %s1609_s24 }
 0x3af   : > { %789 = vst.msk [vmem:[#allocation2 + $0x14] sm:$0xf] %vm485_vm13, %v781_v11  ;;  %851 = vrot.lane.b32.xlu2 %v1949_v5, %s1609_s24 }
 0x3b6   : > { %v1540_v13 = vld [vmem:[#allocation2 + $0x10] sm:$0xf0]  ;;  %838 = vrot.lane.b32.xlu1 %v1947_v9, %s1611_s26 }
 0x3b7   : > { %v1969_v16 = vor.u32 %v1540_v13, %v1484_v12  ;;  %840 = vrot.lane.b32.xlu2 %v1949_v5, %s1611_s26 }
 0x3b9   : > { %886 = vrot.lane.b32.xlu0 %v1969_v16, %s1607_s22 }
 0x3be   : > { %827 = vrot.lane.b32.xlu1 %v1947_v9, %s1612_s27 }
 0x3bf   : > { %829 = vrot.lane.b32.xlu2 %v1949_v5, %s1612_s27 }
 0x3c1   : > { %875 = vrot.lane.b32.xlu0 %v1969_v16, %s1606_s21 }
 0x3c6   : > { %816 = vrot.lane.b32.xlu1 %v1947_v9, %s1613_s28 }
 0x3c7   : > { %818 = vrot.lane.b32.xlu2 %v1949_v5, %s1613_s28 }
 0x3c9   : > { %864 = vrot.lane.b32.xlu0 %v1969_v16, %s1608_s23 }
 0x3ce   : > { %893 = vrot.lane.b32.xlu1 %v1947_v9, %s1610_s25 }
 0x3cf   : > { %895 = vrot.lane.b32.xlu2 %v1949_v5, %s1610_s25 }
 0x3d1   : > { %853 = vrot.lane.b32.xlu0 %v1969_v16, %s1609_s24 }
 0x3d6   : > { %831 = vrot.lane.b32.xlu1 %v1969_v16, %s1612_s27 }
 0x3d7   : > { %820 = vrot.lane.b32.xlu2 %v1969_v16, %s1613_s28 }
 0x3d9   : > { %842 = vrot.lane.b32.xlu0 %v1969_v16, %s1611_s26 }
 0x3de   : > { %906 = vperm.xlu1 %1566, %v1472_v17  }
 0x3df   : > { %911 = vperm.xlu2 %1567, %v1473_v60  }
 0x3e1   : > { %897 = vrot.lane.b32.xlu0 %v1969_v16, %s1610_s25 }
 0x3f9   : > { %v885_v19 = vpop.permute.xlu2 %884 }
 0x401   : > { %v861_v20 = vpop.permute.xlu2 %860 }
 0x409   : > { %v852_v24 = vpop.permute.xlu2 %851 }
 0x410   : > { %v883_v21 = vpop.permute.xlu1 %882  ;;  %v872_v22 = vpop.permute.xlu0 %871 }
 0x411   : > { %v888_v23 = vsel %vm310_vm0, %v883_v21, %v885_v19  ;;  %v841_v30 = vpop.permute.xlu2 %840 }
 0x412   : > { %926 = vmatpush.bf16.msrb.mxu3 %v888_v23 }
 0x418   : > { %v874_v25 = vpop.permute.xlu1 %873  ;;  %v863_v27 = vpop.permute.xlu0 %862 }
 0x419   : > { %v877_v26 = vsel %vm298_vm1, %v872_v22, %v874_v25  ;;  %v866_v28 = vsel %vm286_vm4, %v861_v20, %v863_v27  ;;  %v830_v36 = vpop.permute.xlu2 %829 }
 0x41a   : > { %927 = vmatpush.bf16.msrb.mxu3 %v877_v26 }
 0x41e   : > { %928 = vmatpush.bf16.msrb.mxu3 %v866_v28 }
 0x420   : > { %v850_v29 = vpop.permute.xlu1 %849 }
 0x421   : > { %v855_v31 = vsel %vm274_vm5, %v850_v29, %v852_v24  ;;  %v819_v43 = vpop.permute.xlu2 %818 }
 0x422   : > { %929 = vmatpush.bf16.msrb.mxu3 %v855_v31 }
 0x428   : > { %v839_v32 = vpop.permute.xlu1 %838 }
 0x429   : > { %v844_v35 = vsel %vm262_vm6, %v839_v32, %v841_v30  ;;  %v896_v53 = vpop.permute.xlu2 %895 }
 0x42a   : > { %930 = vmatpush.bf16.msrb.mxu3 %v844_v35 }
 0x42b   : > { %v887_v33 = vpop.permute.xlu0 %886 }
 0x42c   : > { %v889_v34 = vsel %vm310_vm0, %v885_v19, %v887_v33 }
 0x42d   : > { %954 = vmatpush.bf16.msrb.mxu1 %v889_v34 }
 0x430   : > { %v828_v37 = vpop.permute.xlu1 %827 }
 0x431   : > { %v833_v40 = vsel %vm250_vm7, %v828_v37, %v830_v36  ;;  %v821_v0 = vpop.permute.xlu2 %820 }
 0x432   : > { %931 = vmatpush.bf16.msrb.mxu3 %v833_v40  ;;  %v823_v4 = vsel %vm238_vm8, %v819_v43, %v821_v0 }
 0x433   : > { %v876_v39 = vpop.permute.xlu0 %875 }
 0x434   : > { %v878_v41 = vsel %vm298_vm1, %v874_v25, %v876_v39 }
 0x435   : > { %955 = vmatpush.bf16.msrb.mxu1 %v878_v41 }
 0x438   : > { %v817_v44 = vpop.permute.xlu1 %816 }
 0x439   : > { %v822_v46 = vsel %vm238_vm8, %v817_v44, %v819_v43  ;;  %v912_v19 = vpop.permute.xlu2 %911 }
 0x43a   : > { %932 = vmatpush.bf16.msrb.mxu3 %v822_v46 }
 0x43b   : > { %v865_v45 = vpop.permute.xlu0 %864 }
 0x43c   : > { %v867_v47 = vsel %vm286_vm4, %v863_v27, %v865_v45 }
 0x43d   : > { %956 = vmatpush.bf16.msrb.mxu1 %v867_v47 }
 0x43e   : > { %933 = vmatpush.bf16.msrb.mxu3 %v1947_v9 }
 0x440   : > { %v894_v54 = vpop.permute.xlu1 %893 }
 0x441   : > { %v899_v56 = vsel %vm322_vm2, %v894_v54, %v896_v53  ;;  %934 = vmatmul.bf16.vlgmr.msrb.gmra.mxu3 %v1489_v50 }
 0x442   : > { %947 = vmatpush.bf16.msrb.mxu2 %v899_v56 }
 0x443   : > { %v854_v55 = vpop.permute.xlu0 %853 }
 0x444   : > { %v856_v57 = vsel %vm274_vm5, %v852_v24, %v854_v55 }
 0x445   : > { %957 = vmatpush.bf16.msrb.mxu1 %v856_v57  ;;  %1494 = vmatmul.msk.bf16.vlgmr.msrb.gmra.mxu2 %vm347_vm3, %v1493_v58 }
 0x446   : > { %982 = vmatpush.bf16.msra.mxu2 %v887_v33 }
 0x448   : > { %v832_v62 = vpop.permute.xlu1 %831 }
 0x449   : > { %v834_v63 = vsel %vm250_vm7, %v830_v36, %v832_v62 }
 0x44a   : > { %983 = vmatpush.bf16.msra.mxu2 %v876_v39 }
 0x44b   : > { %v843_v61 = vpop.permute.xlu0 %842 }
 0x44c   : > { %v845_v59 = vsel %vm262_vm6, %v841_v30, %v843_v61 }
 0x44d   : > { %958 = vmatpush.bf16.msrb.mxu1 %v845_v59 }
 0x44e   : > { %984 = vmatpush.bf16.msra.mxu2 %v865_v45 }
 0x450   : > { %v907_v7 = vpop.permute.xlu1 %906 }
 0x451   : > { %959 = vmatpush.bf16.msrb.mxu1 %v834_v63 }
 0x452   : > { %985 = vmatpush.bf16.msra.mxu2 %v854_v55 }
 0x453   : > { %v898_v1 = vpop.permute.xlu0 %897 }
 0x454   : > { %v900_v3 = vsel %vm322_vm2, %v896_v53, %v898_v1  ;;  %1003 = vmatpush.bf16.msra.mxu3 %v898_v1 }
 0x455   : > { %960 = vmatpush.bf16.msrb.mxu1 %v823_v4  ;;  %975 = vmatpush.bf16.msrb.mxu0 %v900_v3 }
 0x456   : > { %986 = vmatpush.bf16.msra.mxu2 %v843_v61 }
 0x457   : > { %1496 = vmatmul.msk.bf16.vlgmr.msra.gmra.mxu3 %vm347_vm3, %v1493_v58 }
 0x458   : > { %1495 = vmatmul.msk.bf16.vlgmr.msrb.gmra.mxu0 %vm347_vm3, %v1493_v58 }
 0x459   : > { %961 = vmatpush.bf16.msrb.mxu1 %v1949_v5 }
 0x45a   : > { %987 = vmatpush.bf16.msra.mxu2 %v832_v62 }
 0x45c   : > { %962 = vmatmul.bf16.vlgmr.msrb.gmra.mxu1 %v1489_v50 }
 0x45e   : > { %988 = vmatpush.bf16.msra.mxu2 %v821_v0 }
 0x462   : > { %989 = vmatpush.bf16.msra.mxu2 %v1969_v16 }
 0x465   : > { %990 = vmatmul.bf16.vlgmr.msra.gmra.mxu2 %v1489_v50 }
 0x4c4   : > { %v935_v6 = vpop.f32.mrf.mxu3 }
 0x4c5   : > { %v936_v8 = vadd.f32 %v935_v6, %v907_v7 }
 0x4c8   : > { %v949_v2 = vpop.f32.mrf.mxu2 }
 0x4c9   : > { %v950_v9 = vadd.f32 %v949_v2, %v936_v8 }
 0x4cb   : > { %v1010_v17 = vmax.f32 %v950_v9, 0.0 }
 0x4cc   : > { %v937_v13 = vpop.f32.mrf.mxu3 }
 0x4cd   : > { %v938_v5 = vadd.f32 %v937_v13, %v912_v19  ;;  %v1016_v22 = vmul.f32 %v1010_v17, %v1780_v15  ;;  %v1279_v13 = vld [vmem:[#allocation2 + $0x8] sm:$0xf]  ;;  %v1500_v17 = vld [vmem:[%s2216_s2 + $0x38] sm:$0xff] }
 0x4d0   : > { %v951_v20 = vpop.f32.mrf.mxu2 }
 0x4d1   : > { %v952_v23 = vadd.f32 %v951_v20, %v938_v5  ;;  %v1281_v20 = vld [vmem:[#allocation2 + $0x14] sm:$0xf] }
 0x4d3   : > { %v1013_v28 = vmax.f32 %v952_v23, 0.0 }
 0x4d5   : > { %v977_v10 = vpop.f32.mrf.mxu0  ;;  %v1019_v32 = vmul.f32 %v1013_v28, %v1780_v15 }
 0x4d9   : > { %v963_v11 = vpop.f32.mrf.mxu1 }
 0x4da   : > { %v964_v12 = vadd.f32 %v963_v11, %v907_v7  ;;  %v1005_v31 = vpop.f32.mrf.mxu3 }
 0x4dc   : > { %v978_v60 = vadd.f32 %v977_v10, %v964_v12  ;;  %v1499_v10 = vld [vmem:[%s2216_s2 + $0x30] sm:$0xff] }
 0x4dd   : > { %v979_v27 = vpop.f32.mrf.mxu0  ;;  %v1280_v12 = vld [vmem:[#allocation2 + $0xc] sm:$0xff] }
 0x4de   : > { %v1011_v21 = vmax.f32 %v978_v60, 0.0  ;;  %v1285_v60 = vunpack.c.l.bf16 %v1280_v12 }
 0x4e0   : > { %v1017_v16 = vmul.f32 %v1011_v21, %v1778_v14  ;;  %v1287_v21 = vunpack.c.l.bf16 %v1281_v20 }
 0x4e1   : > { %v965_v24 = vpop.f32.mrf.mxu1 }
 0x4e2   : > { %v966_v25 = vadd.f32 %v965_v24, %v912_v19  ;;  %v1022_v26 = vpack.c.bf16 %v1017_v16, %v1016_v22  ;;  %v1007_v43 = vpop.f32.mrf.mxu3  ;;  %v1286_v22 = vunpack.c.h.bf16 %v1280_v12 }
 0x4e4   : > { %v980_v29 = vadd.f32 %v979_v27, %v966_v25  ;;  %1030 = vrot.lane.b32.xlu0 %v1022_v26, %s1615_s29  ;;  %v1593_v23 = vpack.i.bf16 %v1287_v21, %v1286_v22 }
 0x4e6   : > { %v1014_v30 = vmax.f32 %v980_v29, 0.0 }
 0x4e8   : > { %v1020_v33 = vmul.f32 %v1014_v30, %v1778_v14  ;;  %v991_v34 = vpop.f32.mrf.mxu2 }
 0x4e9   : > { %v992_v35 = vadd.f32 %v991_v34, %v907_v7  ;;  %v1278_v7 = vld [vmem:[#allocation2] sm:$0xff] }
 0x4ea   : > { %v1024_v36 = vpack.c.bf16 %v1020_v33, %v1019_v32  ;;  %v1282_v8 = vunpack.c.l.bf16 %v1278_v7  ;;  %v1283_v9 = vunpack.c.h.bf16 %v1278_v7 }
 0x4eb   : > { %v1006_v37 = vadd.f32 %v1005_v31, %v992_v35 }
 0x4ec   : > { %1034 = vrot.lane.b32.xlu1 %v1024_v36, %s1615_s29  ;;  %v1583_v11 = vpack.i.bf16 %v1283_v9, %v1282_v8 }
 0x4ed   : > { %v1012_v39 = vmax.f32 %v1006_v37, 0.0 }
 0x4ef   : > { %v1018_v40 = vmul.f32 %v1012_v39, %v1782_v18 }
 0x4f0   : > { %v993_v41 = vpop.f32.mrf.mxu2 }
 0x4f1   : > { %v1023_v44 = vpack.c.bf16 %v1018_v40, %v1018_v40  ;;  %v994_v45 = vadd.f32 %v993_v41, %v912_v19  ;;  %v1284_v19 = vunpack.c.l.bf16 %v1279_v13 }
 0x4f3   : > { %v1008_v46 = vadd.f32 %v1007_v43, %v994_v45  ;;  %1032 = vrot.lane.b32.xlu2 %v1023_v44, %s1615_s29  ;;  %v1588_v5 = vpack.i.bf16 %v1285_v60, %v1284_v19 }
 0x4f5   : > { %v1015_v47 = vmax.f32 %v1008_v46, 0.0 }
 0x4f7   : > { %v1021_v48 = vmul.f32 %v1015_v47, %v1782_v18 }
 0x4f9   : > { %v1025_v49 = vpack.c.bf16 %v1021_v48, %v1021_v48 }
 0x4fb   : > { %1036 = vrot.lane.b32.xlu0 %v1025_v49, %s1615_s29 }
 0x54d   : > { %v1033_v52 = vpop.permute.xlu2 %1032 }
 0x556   : > { %v1031_v50 = vpop.permute.xlu0 %1030 }
 0x557   : > { %v1038_v51 = vrot.slane %v1031_v50, 4 }
 0x559   : > { %v1040_v53 = vsel %vm472_vm11, %v1038_v51, %v1031_v50  ;;  %v1041_v54 = vsel %vm472_vm11, %v1038_v51, %v1033_v52 }
 0x55a   : > { %1048 = vst.msk [vmem:[#allocation3] sm:$0xff] %vm1794_vm12, %v1040_v53 }
 0x55b   : > { %1049 = vst.msk [vmem:[#allocation3 + $0x8] sm:$0xf] %vm485_vm13, %v1041_v54 }
 0x55e   : > { %v1035_v55 = vpop.permute.xlu1 %1034 }
 0x55f   : > { %v1039_v56 = vrot.slane %v1035_v55, 4 }
 0x561   : > { %v1042_v57 = vsel %vm472_vm11, %v1039_v56, %v1035_v55  ;;  %v1543_v58 = vld [vmem:[#allocation3 + $0x4] sm:$0xf]  ;;  %v1503_v61 = vld [vmem:[#allocation3] sm:$0xf] }
 0x562   : > { %1050 = vst.msk [vmem:[#allocation3 + $0xc] sm:$0xff] %vm1794_vm12, %v1042_v57  ;;  %v1511_v4 = vld [vmem:[#allocation3 + $0x8] sm:$0xf] }
 0x569   : > { %v1505_v59 = vld [vmem:[#allocation3 + $0xc] sm:$0xf0]  ;;  %v1544_v62 = vld [vmem:[#allocation3 + $0x8] sm:$0xf0] }
 0x56a   : > { %v2061_v63 = vor.u32 %v1544_v62, %v1503_v61  ;;  %v2063_v0 = vor.u32 %v1543_v58, %v1505_v59  ;;  %v1515_v62 = vld [vmem:[%s2215_s1 + $0x30] sm:$0xf] }
 0x56c   : > { %1133 = vrot.lane.b32.xlu0 %v2061_v63, %s1606_s21  ;;  %1144 = vrot.lane.b32.xlu1 %v2061_v63, %s1607_s22 }
 0x56d   : > { %1146 = vrot.lane.b32.xlu2 %v2063_v0, %s1607_s22  ;;  %v1037_v1 = vpop.permute.xlu0 %1036 }
 0x56e   : > { %v1043_v3 = vsel %vm472_vm11, %v1039_v56, %v1037_v1  ;;  %v1542_v1 = vld [vmem:[%s2215_s1 + $0x34] sm:$0xf0] }
 0x56f   : > { %1051 = vst.msk [vmem:[#allocation3 + $0x14] sm:$0xf] %vm485_vm13, %v1043_v3  ;;  %v1516_v3 = vor.u32 %v1542_v1, %v1515_v62 }
 0x574   : > { %1122 = vrot.lane.b32.xlu0 %v2061_v63, %s1608_s23  ;;  %1135 = vrot.lane.b32.xlu1 %v2063_v0, %s1606_s21 }
 0x576   : > { %v1545_v6 = vld [vmem:[#allocation3 + $0x10] sm:$0xf0] }
 0x577   : > { %v2077_v2 = vor.u32 %v1545_v6, %v1511_v4  ;;  %v1541_v4 = vld [vmem:[%s2215_s1 + $0x34] sm:$0xf]  ;;  %v1517_v6 = vld [vmem:[%s2215_s1 + $0x38] sm:$0xf0] }
 0x579   : > { %1148 = vrot.lane.b32.xlu2 %v2077_v2, %s1607_s22 }
 0x57c   : > { %1111 = vrot.lane.b32.xlu0 %v2061_v63, %s1609_s24  ;;  %1124 = vrot.lane.b32.xlu1 %v2063_v0, %s1608_s23 }
 0x581   : > { %1137 = vrot.lane.b32.xlu2 %v2077_v2, %s1606_s21 }
 0x584   : > { %1100 = vrot.lane.b32.xlu0 %v2061_v63, %s1611_s26  ;;  %1113 = vrot.lane.b32.xlu1 %v2063_v0, %s1609_s24 }
 0x589   : > { %1126 = vrot.lane.b32.xlu2 %v2077_v2, %s1608_s23 }
 0x58c   : > { %1089 = vrot.lane.b32.xlu0 %v2061_v63, %s1612_s27  ;;  %1102 = vrot.lane.b32.xlu1 %v2063_v0, %s1611_s26 }
 0x591   : > { %1115 = vrot.lane.b32.xlu2 %v2077_v2, %s1609_s24 }
 0x594   : > { %1078 = vrot.lane.b32.xlu0 %v2061_v63, %s1613_s28  ;;  %1091 = vrot.lane.b32.xlu1 %v2063_v0, %s1612_s27 }
 0x599   : > { %1104 = vrot.lane.b32.xlu2 %v2077_v2, %s1611_s26 }
 0x59c   : > { %1155 = vrot.lane.b32.xlu0 %v2061_v63, %s1610_s25  ;;  %1080 = vrot.lane.b32.xlu1 %v2063_v0, %s1613_s28 }
 0x5a1   : > { %1093 = vrot.lane.b32.xlu2 %v2077_v2, %s1612_s27 }
 0x5a4   : > { %1157 = vrot.lane.b32.xlu1 %v2063_v0, %s1610_s25  ;;  %1159 = vrot.lane.b32.xlu0 %v2077_v2, %s1610_s25 }
 0x5a9   : > { %1082 = vrot.lane.b32.xlu2 %v2077_v2, %s1613_s28 }
 0x5ac   : > { %1168 = vperm.xlu1 %1566, %v1499_v10   ;;  %1584 = vrot.lane.b32.xlu0 %v1583_v11, %s1609_s24  ;;  %v1520_v11 = vor.u32 %v1541_v4, %v1517_v6 }
 0x5b1   : > { %1173 = vperm.xlu2 %1567, %v1500_v17  }
 0x5b4   : > { %1589 = vrot.lane.b32.xlu1 %v1588_v5, %s1609_s24 }
 0x5b9   : > { %1594 = vrot.lane.b32.xlu2 %v1593_v23, %s1609_s24 }
 0x5c7   : > { %v1147_v16 = vpop.permute.xlu2 %1146 }
 0x5d3   : > { %v2126_v24 = vpop.permute.xlu2 %1148 }
 0x5d4   : > { %v1151_v25 = vsel %vm310_vm0, %v1147_v16, %v2126_v24 }
 0x5d5   : > { %1216 = vmatpush.bf16.msrb.mxu3 %v1151_v25 }
 0x5db   : > { %v2130_v26 = vpop.permute.xlu2 %1137 }
 0x5de   : > { %v1145_v27 = vpop.permute.xlu1 %1144  ;;  %v1134_v28 = vpop.permute.xlu0 %1133 }
 0x5df   : > { %v1150_v29 = vsel %vm310_vm0, %v1145_v27, %v1147_v16 }
 0x5e0   : > { %1188 = vmatpush.bf16.msra.mxu0 %v1150_v29 }
 0x5e3   : > { %v1127_v30 = vpop.permute.xlu2 %1126 }
 0x5e6   : > { %v1136_v31 = vpop.permute.xlu1 %1135  ;;  %v1123_v32 = vpop.permute.xlu0 %1122 }
 0x5e7   : > { %v1139_v33 = vsel %vm298_vm1, %v1134_v28, %v1136_v31  ;;  %v1140_v34 = vsel %vm298_vm1, %v1136_v31, %v2130_v26 }
 0x5e8   : > { %1189 = vmatpush.bf16.msra.mxu0 %v1139_v33  ;;  %1217 = vmatpush.bf16.msrb.mxu3 %v1140_v34 }
 0x5eb   : > { %v1116_v37 = vpop.permute.xlu2 %1115 }
 0x5ee   : > { %v1125_v35 = vpop.permute.xlu1 %1124  ;;  %v1112_v36 = vpop.permute.xlu0 %1111 }
 0x5ef   : > { %v1128_v39 = vsel %vm286_vm4, %v1123_v32, %v1125_v35  ;;  %v1129_v40 = vsel %vm286_vm4, %v1125_v35, %v1127_v30 }
 0x5f0   : > { %1190 = vmatpush.bf16.msra.mxu0 %v1128_v39  ;;  %1218 = vmatpush.bf16.msrb.mxu3 %v1129_v40 }
 0x5f3   : > { %v1105_v46 = vpop.permute.xlu2 %1104 }
 0x5f6   : > { %v1114_v41 = vpop.permute.xlu1 %1113  ;;  %v1101_v43 = vpop.permute.xlu0 %1100 }
 0x5f7   : > { %v1117_v44 = vsel %vm274_vm5, %v1112_v36, %v1114_v41  ;;  %v1118_v45 = vsel %vm274_vm5, %v1114_v41, %v1116_v37 }
 0x5f8   : > { %1191 = vmatpush.bf16.msra.mxu0 %v1117_v44  ;;  %1219 = vmatpush.bf16.msrb.mxu3 %v1118_v45 }
 0x5fb   : > { %v1094_v51 = vpop.permute.xlu2 %1093 }
 0x5fe   : > { %v1103_v47 = vpop.permute.xlu1 %1102  ;;  %v1090_v48 = vpop.permute.xlu0 %1089 }
 0x5ff   : > { %v1106_v49 = vsel %vm262_vm6, %v1101_v43, %v1103_v47  ;;  %v1107_v50 = vsel %vm262_vm6, %v1103_v47, %v1105_v46 }
 0x600   : > { %1192 = vmatpush.bf16.msra.mxu0 %v1106_v49  ;;  %1220 = vmatpush.bf16.msrb.mxu3 %v1107_v50 }
 0x603   : > { %v1083_v56 = vpop.permute.xlu2 %1082 }
 0x606   : > { %v1092_v52 = vpop.permute.xlu1 %1091  ;;  %v1079_v53 = vpop.permute.xlu0 %1078 }
 0x607   : > { %v1095_v54 = vsel %vm250_vm7, %v1090_v48, %v1092_v52  ;;  %v1096_v55 = vsel %vm250_vm7, %v1092_v52, %v1094_v51 }
 0x608   : > { %1193 = vmatpush.bf16.msra.mxu0 %v1095_v54  ;;  %1221 = vmatpush.bf16.msrb.mxu3 %v1096_v55 }
 0x60b   : > { %v1174_v13 = vpop.permute.xlu2 %1173 }
 0x60e   : > { %v1081_v57 = vpop.permute.xlu1 %1080  ;;  %v1156_v58 = vpop.permute.xlu0 %1155 }
 0x60f   : > { %v1084_v61 = vsel %vm238_vm8, %v1079_v53, %v1081_v57  ;;  %v1085_v59 = vsel %vm238_vm8, %v1081_v57, %v1083_v56 }
 0x610   : > { %1194 = vmatpush.bf16.msra.mxu0 %v1084_v61  ;;  %1222 = vmatpush.bf16.msrb.mxu3 %v1085_v59 }
 0x613   : > { %v1595_v33 = vpop.permute.xlu2 %1594 }
 0x614   : > { %1195 = vmatpush.bf16.msra.mxu0 %v2061_v63  ;;  %1223 = vmatpush.bf16.msrb.mxu3 %v2063_v0  ;;  %v1597_v40 = vunpack.i.h.bf16 %v1595_v33  ;;  %v1596_v41 = vunpack.i.l.bf16 %v1595_v33 }
 0x616   : > { %v1158_v7 = vpop.permute.xlu1 %1157  ;;  %v1160_v8 = vpop.permute.xlu0 %1159  ;;  %v1309_v49 = vsel %vm274_vm5, %v1596_v41, %v1597_v40 }
 0x617   : > { %v1161_v9 = vsel %vm322_vm2, %v1156_v58, %v1158_v7  ;;  %v1162_v10 = vsel %vm322_vm2, %v1158_v7, %v1160_v8  ;;  %1196 = vmatmul.bf16.vlgmr.msra.gmra.mxu0 %v1516_v3  ;;  %1224 = vmatmul.bf16.vlgmr.msrb.gmra.mxu3 %v1516_v3 }
 0x618   : > { %1265 = vmatpush.bf16.msrb.mxu0 %v1160_v8  ;;  %1209 = vmatpush.bf16.msra.mxu1 %v1161_v9 }
 0x619   : > { %1237 = vmatpush.bf16.msrb.mxu2 %v1162_v10 }
 0x61b   : > { %1521 = vmatmul.msk.bf16.vlgmr.msra.gmra.mxu1 %vm347_vm3, %v1520_v11 }
 0x61c   : > { %1244 = vmatpush.bf16.msrb.mxu1 %v2126_v24  ;;  %1522 = vmatmul.msk.bf16.vlgmr.msrb.gmra.mxu2 %vm347_vm3, %v1520_v11 }
 0x61e   : > { %v1169_v63 = vpop.permute.xlu1 %1168  ;;  %v1585_v19 = vpop.permute.xlu0 %1584 }
 0x61f   : > { %v1587_v22 = vunpack.i.h.bf16 %v1585_v19  ;;  %v1586_v23 = vunpack.i.l.bf16 %v1585_v19 }
 0x620   : > { %1245 = vmatpush.bf16.msrb.mxu1 %v2130_v26 }
 0x624   : > { %1246 = vmatpush.bf16.msrb.mxu1 %v1127_v30  ;;  %v1306_v30 = vsel %vm274_vm5, %v1586_v23, %v1587_v22 }
 0x626   : > { %v1590_v20 = vpop.permute.xlu1 %1589 }
 0x627   : > { %1523 = vmatmul.msk.bf16.vlgmr.msrb.gmra.mxu0 %vm347_vm3, %v1520_v11  ;;  %v1591_v16 = vunpack.i.l.bf16 %v1590_v20  ;;  %v1592_v43 = vunpack.i.h.bf16 %v1590_v20 }
 0x628   : > { %1247 = vmatpush.bf16.msrb.mxu1 %v1116_v37 }
 0x629   : > { %v1307_v31 = vsel %vm274_vm5, %v1587_v22, %v1591_v16  ;;  %v1308_v48 = vsel %vm274_vm5, %v1592_v43, %v1596_v41 }
 0x62c   : > { %1248 = vmatpush.bf16.msrb.mxu1 %v1105_v46 }
 0x630   : > { %1249 = vmatpush.bf16.msrb.mxu1 %v1094_v51 }
 0x634   : > { %1250 = vmatpush.bf16.msrb.mxu1 %v1083_v56 }
 0x638   : > { %1251 = vmatpush.bf16.msrb.mxu1 %v2077_v2 }
 0x63b   : > { %1252 = vmatmul.bf16.vlgmr.msrb.gmra.mxu1 %v1516_v3 }
 0x694   : > { %v1197_v0 = vpop.f32.mrf.mxu0 }
 0x695   : > { %v1198_v17 = vadd.f32 %v1197_v0, %v1169_v63 }
 0x698   : > { %v1211_v12 = vpop.f32.mrf.mxu1 }
 0x699   : > { %v1212_v5 = vadd.f32 %v1211_v12, %v1198_v17 }
 0x69a   : > { %v1225_v60 = vpop.f32.mrf.mxu3 }
 0x69b   : > { %v1226_v21 = vadd.f32 %v1225_v60, %v1169_v63  ;;  %v1272_v26 = vmul.f32 %v1212_v5, %v1780_v15 }
 0x69c   : > { %v1199_v24 = vpop.f32.mrf.mxu0 }
 0x69d   : > { %v1200_v28 = vadd.f32 %v1199_v24, %v1174_v13  ;;  %v1316_v34 = vadd.f32 %v1306_v30, %v1272_v26 }
 0x69f   : > { %v1239_v25 = vpop.f32.mrf.mxu2 }
 0x6a0   : > { %v1240_v2 = vadd.f32 %v1239_v25, %v1226_v21  ;;  %v1213_v27 = vpop.f32.mrf.mxu1 }
 0x6a1   : > { %v1214_v36 = vadd.f32 %v1213_v27, %v1200_v28 }
 0x6a2   : > { %v1273_v29 = vmul.f32 %v1240_v2, %v1778_v14  ;;  %v1227_v32 = vpop.f32.mrf.mxu3 }
 0x6a3   : > { %v1228_v37 = vadd.f32 %v1227_v32, %v1174_v13  ;;  %v1275_v45 = vmul.f32 %v1214_v36, %v1780_v15 }
 0x6a4   : > { %v1317_v35 = vadd.f32 %v1307_v31, %v1273_v29  ;;  %v1267_v15 = vpop.f32.mrf.mxu0 }
 0x6a5   : > { %v1319_v50 = vadd.f32 %v1308_v48, %v1275_v45 }
 0x6a6   : > { %v1325_v39 = vpack.c.bf16 %v1317_v35, %v1316_v34 }
 0x6a7   : > { %v1241_v44 = vpop.f32.mrf.mxu2 }
 0x6a8   : > { %v1242_v46 = vadd.f32 %v1241_v44, %v1228_v37  ;;  %1333 = vrot.lane.b32.xlu0 %v1325_v39, %s1615_s29 }
 0x6aa   : > { %v1276_v47 = vmul.f32 %v1242_v46, %v1778_v14 }
 0x6ac   : > { %v1320_v51 = vadd.f32 %v1309_v49, %v1276_v47  ;;  %v1269_v59 = vpop.f32.mrf.mxu0 }
 0x6ae   : > { %v1327_v52 = vpack.c.bf16 %v1320_v51, %v1319_v50 }
 0x6b0   : > { %1337 = vrot.lane.b32.xlu1 %v1327_v52, %s1615_s29 }
 0x6b8   : > { %v1253_v53 = vpop.f32.mrf.mxu1 }
 0x6b9   : > { %v1254_v54 = vadd.f32 %v1253_v53, %v1169_v63 }
 0x6bb   : > { %v1268_v55 = vadd.f32 %v1267_v15, %v1254_v54 }
 0x6bd   : > { %v1274_v56 = vmul.f32 %v1268_v55, %v1782_v18 }
 0x6bf   : > { %v1318_v57 = vadd.f32 %v1591_v16, %v1274_v56 }
 0x6c0   : > { %v1255_v58 = vpop.f32.mrf.mxu1 }
 0x6c1   : > { %v1256_v14 = vadd.f32 %v1255_v58, %v1174_v13  ;;  %v1326_v61 = vpack.c.bf16 %v1318_v57, %v1318_v57 }
 0x6c3   : > { %v1270_v62 = vadd.f32 %v1269_v59, %v1256_v14  ;;  %1335 = vrot.lane.b32.xlu2 %v1326_v61, %s1615_s29 }
 0x6c5   : > { %v1277_v1 = vmul.f32 %v1270_v62, %v1782_v18 }
 0x6c7   : > { %v1321_v3 = vadd.f32 %v1597_v40, %v1277_v1 }
 0x6c9   : > { %v1328_v4 = vpack.c.bf16 %v1321_v3, %v1321_v3 }
 0x6cb   : > { %1339 = vrot.lane.b32.xlu0 %v1328_v4, %s1615_s29 }
 0x71a   : > { %v1334_v6 = vpop.permute.xlu0 %1333 }
 0x71b   : > { %v1341_v8 = vrot.slane %v1334_v6, 4 }
 0x71d   : > { %v1336_v7 = vpop.permute.xlu2 %1335  ;;  %v1343_v9 = vsel %vm472_vm11, %v1341_v8, %v1334_v6 }
 0x71e   : > { %v1344_v10 = vsel %vm472_vm11, %v1341_v8, %v1336_v7  ;;  %1351 = vst.msk [vmem:[%s2177_s6] sm:$0xff] %vm1794_vm12, %v1343_v9 }
 0x71f   : > { %1352 = vst.msk [vmem:[%s2177_s6 + $0x8] sm:$0xf] %vm485_vm13, %v1344_v10 }
 0x720   : > { %1356 = vst.msk [vmem:[%s2177_s6 + $0x8] sm:$0xf] %vm1355_vm15, %v1614_v38 }
 0x722   : > { %v1338_v18 = vpop.permute.xlu1 %1337 }
 0x723   : > { %v1342_v11 = vrot.slane %v1338_v18, 4 }
 0x725   : > { %v1345_v63 = vsel %vm472_vm11, %v1342_v11, %v1338_v18 }
 0x726   : > { %1353 = vst.msk [vmem:[%s2177_s6 + $0xc] sm:$0xff] %vm1794_vm12, %v1345_v63 }
 0x73d   : > { %v1340_v0 = vpop.permute.xlu0 %1339 }
 0x73e   : > { %v1346_v12 = vsel %vm472_vm11, %v1342_v11, %v1340_v0 }
 0x73f   : > { %1354 = vst.msk [vmem:[%s2177_s6 + $0x14] sm:$0xf] %vm485_vm13, %v1346_v12 }
 0x740   : > { %1357 = vst.msk [vmem:[%s2177_s6 + $0x14] sm:$0xf] %vm1355_vm15, %v1614_v38 }
 0x741 PF: > { %s14_s15 = sadd.s32 1, %s1604_s15  }
 0x742   : > { %p11_p4 = scmp.ge.s32.totalorder %s14_s15, 4  }
 0x744   :  { %13 = sbr.rel (!%p11_p4) target bundleno = 1 (0x1), region = 72 }

// kernel: unet_forward.14
= control target key start
LH: loop header
LB: loop body
LE: loop exit
PB: predicated region body
PF: predicated region fallthrough
CT: control target
= control target key end

     0   :  { %s579_s15 = smov 0   ;;  %s671_s0 = inlined_call_operand.vmem [shape: bf16[2,64,128], index: 0, kind: input, shape index: {}]   ;;  %s672_s1 = inlined_call_operand.vmem [shape: bf16[32,256], index: 1, kind: input, shape index: {}]   ;;  %s673_s2 = inlined_call_operand.vmem [shape: f32[32,1], index: 2, kind: input, shape index: {}]   ;;  %s674_s3 = inlined_call_operand.vmem [shape: f32[1,80], index: 3, kind: input, shape index: {}]   ;;  %s675_s4 = inlined_call_operand.vmem [shape: bf16[2,32,128], index: 4, kind: output, shape index: {}]  }
   0x1 LB: > { %s455_s16 = sadd.s32 4294967295, %s547_s15   ;;  %p459_p0 = scmp.ge.s32.totalorder %s547_s15, 1  ;;  %s547_s15 = sphi %s579_s15, %s14_s15  }
   0x2   : > { %p162_p1 = scmp.lt.s32.totalorder %s547_s15, 3 }
   0x4   : > { %p163_p2 = pnand %p459_p0, %p162_p1 }
   0x5   : > { %p188_p3 = scmp.lt.s32.totalorder (!%p163_p2), %s455_s16, 1  ;;  %s549_s21 = smov (!%p163_p2), 127  }
   0x6   : > { %166 = sbr.rel (%p163_p2) target bundleno = 429 (0x1ad), region = 36  ;;  %s550_s22 = smov (!%p163_p2), 117  }
   0x7   : > { %s551_s23 = smov (!%p163_p2), 118   ;;  %s553_s29 = smov (!%p163_p2), 11  }
   0xb   : > { %s677_s16 = smov (!%p188_p3, %s455_s16), 1  ;;  %v204_v9 = vld [vmem:[%s673_s2 + $0x8] sm:$0xff]  ;;  %v203_v10 = vld [vmem:[%s673_s2] sm:$0xff]  ;;  %v552_v11 = vmov 0   ;;  %v205_v12 = vld [vmem:[%s673_s2 + $0x10] sm:$0xff]  ;;  %vm365_vm0 = vcmask 84992  }
   0xc   : > { %s498_s17 = sshll.u32 %s677_s16, 5  ;;  %538 = vset.pattern.permute.xlu1 %v552_v11  ;;  %537 = vset.pattern.permute.xlu0 %v552_v11  ;;  %v206_v15 = vld [vmem:[%s673_s2 + $0x18] sm:$0xff]  ;;  %v482_v19 = vld [vmem:[%s672_s1] sm:$0xf]  ;;  %v501_v20 = vld [vmem:[%s672_s1 + $0x4] sm:$0xf0] }
   0xd   : > { %s192_s20 = scalar_lea.vmem %s671_s0, %s498_s17  ;;  %539 = vset.pattern.permute.xlu2 %v552_v11  ;;  %v490_v21 = vld [vmem:[%s672_s1 + $0x10] sm:$0xf]  ;;  %v503_v22 = vld [vmem:[%s672_s1 + $0x14] sm:$0xf0]  ;;  %v483_v24 = vor.u32 %v501_v20, %v482_v19  ;;  %v500_v26 = vld [vmem:[%s672_s1 + $0x4] sm:$0xf] }
   0xe   : > { %v507_v0 = vld [vmem:[%s192_s20 + $0x18] sm:$0xff]  ;;  %v506_v1 = vld [vmem:[%s192_s20 + $0x10] sm:$0xff]  ;;  %v505_v2 = vld [vmem:[%s192_s20 + $0x8] sm:$0xff]  ;;  %v491_v25 = vor.u32 %v503_v22, %v490_v21  ;;  %s499_s24 = sshll.u32 %s677_s16, 4  ;;  %vm390_vm1 = vcmask 740440   ;;  %vm395_vm2 = vcmask 1044184  }
   0xf   : > { %245 = vrot.lane.b32.xlu0 %v507_v0, %s549_s21  ;;  %243 = vrot.lane.b32.xlu1 %v506_v1, %s549_s21  ;;  %v593_v3 = vld [vmem:[%s192_s20] sm:$0xff]  ;;  %v484_v27 = vld [vmem:[%s672_s1 + $0x8] sm:$0xf0]  ;;  %s643_s27 = scalar_lea.vmem %s675_s4, %s499_s24 }
  0x10   : > { %241 = vrot.lane.b32.xlu2 %v505_v2, %s549_s21  ;;  %v502_v28 = vld [vmem:[%s672_s1 + $0x14] sm:$0xf]  ;;  %v492_v29 = vld [vmem:[%s672_s1 + $0x18] sm:$0xf0]  ;;  %v487_v31 = vor.u32 %v500_v26, %v484_v27  ;;  %366 = vst.msk [vmem:[%s643_s27] sm:$0xf] %vm365_vm0, %v552_v11 }
  0x11   : > { %v495_v32 = vor.u32 %v502_v28, %v492_v29  ;;  %367 = vst.msk [vmem:[%s643_s27 + $0x4] sm:$0xf] %vm365_vm0, %v552_v11  ;;  %v540_v39 = vld [vmem:[%s674_s3] ss:$0 sm:$0xff] }
  0x12   : > { %368 = vst.msk [vmem:[%s643_s27 + $0x8] sm:$0xf] %vm365_vm0, %v552_v11 }
  0x13   : > { %369 = vst.msk [vmem:[%s643_s27 + $0xc] sm:$0xf] %vm365_vm0, %v552_v11 }
  0x17   : > { %269 = vrot.lane.b32.xlu0 %v507_v0, %s550_s22  ;;  %267 = vrot.lane.b32.xlu1 %v506_v1, %s550_s22 }
  0x18   : > { %265 = vrot.lane.b32.xlu2 %v505_v2, %s550_s22 }
  0x1f   : > { %239 = vrot.lane.b32.xlu0 %v593_v3, %s549_s21  ;;  %263 = vrot.lane.b32.xlu1 %v593_v3, %s550_s22 }
  0x20   : > { %257 = vrot.lane.b32.xlu2 %v507_v0, %s551_s23 }
  0x27   : > { %255 = vrot.lane.b32.xlu0 %v506_v1, %s551_s23  ;;  %253 = vrot.lane.b32.xlu1 %v505_v2, %s551_s23 }
  0x28   : > { %251 = vrot.lane.b32.xlu2 %v593_v3, %s551_s23 }
  0x2f   : > { %282 = vperm.xlu1 %538, %v204_v9   ;;  %277 = vperm.xlu0 %537, %v203_v10  }
  0x30   : > { %287 = vperm.xlu2 %539, %v205_v12  }
  0x37   : > { %292 = vperm.xlu1 %538, %v206_v15  }
  0x6a   : > { %v242_v6 = vpop.permute.xlu2 %241 }
  0x72   : > { %v266_v13 = vpop.permute.xlu2 %265 }
  0x7a   : > { %v258_v17 = vpop.permute.xlu2 %257 }
  0x81   : > { %v246_v4 = vpop.permute.xlu0 %245  ;;  %v244_v5 = vpop.permute.xlu1 %243 }
  0x82   : > { %315 = vmatpush.bf16.msra.mxu0 %v246_v4  ;;  %508 = vmatpush.bf16.msra.mxu2 %v246_v4  ;;  %v252_v30 = vpop.permute.xlu2 %251 }
  0x86   : > { %316 = vmatpush.bf16.msra.mxu0 %v244_v5  ;;  %509 = vmatpush.bf16.msra.mxu2 %v244_v5 }
  0x89   : > { %v270_v7 = vpop.permute.xlu0 %269  ;;  %v268_v8 = vpop.permute.xlu1 %267 }
  0x8a   : > { %317 = vmatpush.bf16.msra.mxu0 %v242_v6  ;;  %510 = vmatpush.bf16.msra.mxu2 %v242_v6  ;;  %v288_v37 = vpop.permute.xlu2 %287 }
  0x8b   : > { %334 = vmatpush.bf16.msra.mxu1 %v270_v7  ;;  %516 = vmatpush.bf16.msra.mxu3 %v270_v7 }
  0x8f   : > { %335 = vmatpush.bf16.msra.mxu1 %v268_v8  ;;  %517 = vmatpush.bf16.msra.mxu3 %v268_v8 }
  0x91   : > { %v240_v14 = vpop.permute.xlu0 %239  ;;  %v264_v16 = vpop.permute.xlu1 %263 }
  0x92   : > { %318 = vmatpush.bf16.msra.mxu0 %v240_v14  ;;  %511 = vmatpush.bf16.msra.mxu2 %v240_v14 }
  0x93   : > { %336 = vmatpush.bf16.msra.mxu1 %v266_v13  ;;  %518 = vmatpush.bf16.msra.mxu3 %v266_v13 }
  0x96   : > { %319 = vmatpush.bf16.msra.mxu0 %v507_v0  ;;  %512 = vmatpush.bf16.msra.mxu2 %v507_v0 }
  0x97   : > { %337 = vmatpush.bf16.msra.mxu1 %v264_v16  ;;  %519 = vmatpush.bf16.msra.mxu3 %v264_v16 }
  0x99   : > { %v256_v18 = vpop.permute.xlu0 %255  ;;  %v254_v23 = vpop.permute.xlu1 %253 }
  0x9a   : > { %320 = vmatpush.bf16.msra.mxu0 %v506_v1  ;;  %513 = vmatpush.bf16.msra.mxu2 %v506_v1 }
  0x9b   : > { %338 = vmatpush.bf16.msra.mxu1 %v258_v17  ;;  %520 = vmatpush.bf16.msra.mxu3 %v258_v17 }
  0x9e   : > { %321 = vmatpush.bf16.msra.mxu0 %v505_v2  ;;  %514 = vmatpush.bf16.msra.mxu2 %v505_v2 }
  0x9f   : > { %339 = vmatpush.bf16.msra.mxu1 %v256_v18  ;;  %521 = vmatpush.bf16.msra.mxu3 %v256_v18 }
  0xa1   : > { %v278_v33 = vpop.permute.xlu0 %277  ;;  %v283_v41 = vpop.permute.xlu1 %282 }
  0xa2   : > { %322 = vmatpush.bf16.msra.mxu0 %v593_v3  ;;  %515 = vmatpush.bf16.msra.mxu2 %v593_v3 }
  0xa3   : > { %340 = vmatpush.bf16.msra.mxu1 %v254_v23  ;;  %522 = vmatpush.bf16.msra.mxu3 %v254_v23 }
  0xa5   : > { %323 = vmatmul.bf16.vlgmr.msra.gmra.mxu0 %v483_v24  ;;  %328 = vmatmul.bf16.vlgmr.msra.gmra.mxu2 %v491_v25 }
  0xa7   : > { %341 = vmatpush.bf16.msra.mxu1 %v252_v30  ;;  %523 = vmatpush.bf16.msra.mxu3 %v252_v30 }
  0xa9   : > { %v293_v56 = vpop.permute.xlu1 %292 }
  0xaa   : > { %342 = vmatmul.bf16.vlgmr.msra.gmra.mxu1 %v487_v31  ;;  %347 = vmatmul.bf16.vlgmr.msra.gmra.mxu3 %v495_v32 }
 0x122   : > { %v324_v34 = vpop.f32.mrf.mxu0 }
 0x123   : > { %v325_v35 = vadd.f32 %v324_v34, %v278_v33 }
 0x127   : > { %v343_v36 = vpop.f32.mrf.mxu1 }
 0x128   : > { %v344_v38 = vadd.f32 %v343_v36, %v325_v35  ;;  %v329_v40 = vpop.f32.mrf.mxu2 }
 0x129   : > { %v330_v43 = vadd.f32 %v329_v40, %v288_v37 }
 0x12a   : > { %v353_v42 = vmax.f32 %v344_v38, 0.0  ;;  %v326_v44 = vpop.f32.mrf.mxu0 }
 0x12b   : > { %v327_v48 = vadd.f32 %v326_v44, %v283_v41 }
 0x12c   : > { %v361_v45 = vmul.f32 %v540_v39, %v353_v42 }
 0x12d   : > { %v348_v46 = vpop.f32.mrf.mxu3 }
 0x12e   : > { %v370_v47 = vpack.c.bf16 %v361_v45, %v361_v45  ;;  %v349_v49 = vadd.f32 %v348_v46, %v330_v43 }
 0x12f   : > { %v345_v50 = vpop.f32.mrf.mxu1 }
 0x130   : > { %v355_v51 = vmax.f32 %v349_v49, 0.0  ;;  %v346_v52 = vadd.f32 %v345_v50, %v327_v48  ;;  %378 = vrot.lane.b32.xlu2 %v370_v47, %s553_s29  ;;  %v331_v53 = vpop.f32.mrf.mxu2 }
 0x131   : > { %v332_v59 = vadd.f32 %v331_v53, %v293_v56 }
 0x132   : > { %v363_v54 = vmul.f32 %v540_v39, %v355_v51  ;;  %v354_v55 = vmax.f32 %v346_v52, 0.0 }
 0x134   : > { %v372_v57 = vpack.c.bf16 %v363_v54, %v363_v54  ;;  %v362_v58 = vmul.f32 %v540_v39, %v354_v55 }
 0x135   : > { %v350_v60 = vpop.f32.mrf.mxu3 }
 0x136   : > { %v371_v61 = vpack.c.bf16 %v362_v58, %v362_v58  ;;  %v351_v62 = vadd.f32 %v350_v60, %v332_v59  ;;  %382 = vrot.lane.b32.xlu1 %v372_v57, %s553_s29 }
 0x138   : > { %v356_v63 = vmax.f32 %v351_v62, 0.0  ;;  %380 = vrot.lane.b32.xlu0 %v371_v61, %s553_s29 }
 0x13a   : > { %v364_v0 = vmul.f32 %v540_v39, %v356_v63 }
 0x13c   : > { %v373_v1 = vpack.c.bf16 %v364_v0, %v364_v0 }
 0x13e   : > { %384 = vrot.lane.b32.xlu2 %v373_v1, %s553_s29 }
 0x18a   : > { %v379_v2 = vpop.permute.xlu2 %378 }
 0x18b   : > { %391 = vst.msk [vmem:[%s643_s27] sm:$0xf] %vm390_vm1, %v379_v2 }
 0x18c   : > { %396 = vst.msk [vmem:[%s643_s27] sm:$0xf] %vm395_vm2, %v552_v11 }
 0x198   : > { %v385_v3 = vpop.permute.xlu2 %384 }
 0x199   : > { %394 = vst.msk [vmem:[%s643_s27 + $0xc] sm:$0xf] %vm390_vm1, %v385_v3 }
 0x19a   : > { %399 = vst.msk [vmem:[%s643_s27 + $0xc] sm:$0xf] %vm395_vm2, %v552_v11 }
 0x1a8   : > { %v383_v4 = vpop.permute.xlu1 %382 }
 0x1a9   : > { %393 = vst.msk [vmem:[%s643_s27 + $0x8] sm:$0xf] %vm390_vm1, %v383_v4 }
 0x1aa   : > { %398 = vst.msk [vmem:[%s643_s27 + $0x8] sm:$0xf] %vm395_vm2, %v552_v11  ;;  %v381_v5 = vpop.permute.xlu0 %380 }
 0x1ab   : > { %392 = vst.msk [vmem:[%s643_s27 + $0x4] sm:$0xf] %vm390_vm1, %v381_v5 }
 0x1ac   : > { %397 = vst.msk [vmem:[%s643_s27 + $0x4] sm:$0xf] %vm395_vm2, %v552_v11 }
 0x1ad PF: > { %s14_s15 = sadd.s32 1, %s547_s15  }
 0x1ae   : > { %p11_p4 = scmp.ge.s32.totalorder %s14_s15, 4  }
 0x1b0   :  { %13 = sbr.rel (!%p11_p4) target bundleno = 1 (0x1), region = 66 }

// kernel: unet_forward.15
= control target key start
LH: loop header
LB: loop body
LE: loop exit
PB: predicated region body
PF: predicated region fallthrough
CT: control target
= control target key end

     0   :  { %s1544_s15 = smov 0   ;;  %s1996_s0 = inlined_call_operand.vmem [shape: bf16[2,32,128], index: 0, kind: input, shape index: {}]   ;;  %s1997_s1 = inlined_call_operand.vmem [shape: bf16[4,32,288], index: 1, kind: input, shape index: {}]   ;;  %s1998_s2 = inlined_call_operand.vmem [shape: f32[4,32,1], index: 2, kind: input, shape index: {}]   ;;  %s1999_s3 = inlined_call_operand.vmem [shape: f32[1,80], index: 3, kind: input, shape index: {}]   ;;  %s2000_s4 = inlined_call_operand.vmem [shape: bf16[2,32,128], index: 4, kind: output, shape index: {}]  }
   0x1 LB: > { %s1216_s16 = sadd.s32 4294967295, %s1507_s15   ;;  %p1220_p0 = scmp.ge.s32.totalorder %s1507_s15, 1  ;;  %s1507_s15 = sphi %s1544_s15, %s14_s15  }
   0x2   : > { %p162_p1 = scmp.lt.s32.totalorder %s1507_s15, 3 }
   0x4   : > { %p163_p2 = pnand %p1220_p0, %p162_p1 }
   0x5   : > { %p188_p3 = scmp.lt.s32.totalorder (!%p163_p2), %s1216_s16, 1  ;;  %s1509_s21 = smov (!%p163_p2), 118  }
   0x6   : > { %166 = sbr.rel (%p163_p2) target bundleno = 1784 (0x6f8), region = 36  ;;  %s1510_s22 = smov (!%p163_p2), 126  }
   0x7   : > { %s1511_s23 = smov (!%p163_p2), 107   ;;  %s1512_s24 = smov (!%p163_p2), 108  }
   0x8   : > { %s1513_s25 = smov (!%p163_p2), 127   ;;  %s1514_s26 = smov (!%p163_p2), 116  }
   0x9   : > { %s1515_s27 = smov (!%p163_p2), 106   ;;  %s1516_s28 = smov (!%p163_p2), 117  }
   0xa   : > { %s1518_s9 = smov (!%p163_p2), 11  }
   0xb   : > { %s2002_s16 = smov (!%p188_p3, %s1216_s16), 1  ;;  %v218_v8 = vld [vmem:[%s1998_s2 + $0x10] sm:$0xff]  ;;  %v1517_v10 = vmov 0   ;;  %v216_v13 = vld [vmem:[%s1998_s2] sm:$0xff]  ;;  %v217_v14 = vld [vmem:[%s1998_s2 + $0x8] sm:$0xff]  ;;  %vm334_vm0 = vcmask 261120  }
   0xc   : > { %s1399_s17 = sshll.u32 %s2002_s16, 4  ;;  %1477 = vset.pattern.permute.xlu1 %v1517_v10  ;;  %199 = vst [vmem:[#allocation2] sm:$0xf] %v1517_v10  ;;  %1479 = vset.pattern.permute.xlu0 %v1517_v10  ;;  %v219_v18 = vld [vmem:[%s1998_s2 + $0x18] sm:$0xff]  ;;  %v1235_v19 = vld [vmem:[%s1997_s1] sm:$0xf] }
   0xd   : > { %s1560_s20 = scalar_lea.vmem %s1996_s0, %s1399_s17  ;;  %200 = vst [vmem:[#allocation2 + $0x4] sm:$0xf] %v1517_v10  ;;  %1478 = vset.pattern.permute.xlu2 %v1517_v10  ;;  %v1402_v20 = vld [vmem:[%s1997_s1 + $0x8] sm:$0xf0]  ;;  %v1243_v24 = vld [vmem:[%s1997_s1 + $0x8] sm:$0xf] }
   0xe   : > { %v1563_v0 = vld [vmem:[%s1560_s20 + $0x8] sm:$0xff]  ;;  %v1566_v1 = vld [vmem:[%s1560_s20] sm:$0xff]  ;;  %201 = vst [vmem:[#allocation2 + $0x8] sm:$0xf] %v1517_v10  ;;  %v1236_v22 = vor.u32 %v1402_v20, %v1235_v19  ;;  %v1403_v25 = vld [vmem:[%s1997_s1 + $0x10] sm:$0xf0] }
   0xf   : > { %250 = vrot.lane.b32.xlu0 %v1563_v0, %s1509_s21  ;;  %248 = vrot.lane.b32.xlu1 %v1566_v1, %s1509_s21  ;;  %202 = vst [vmem:[#allocation2 + $0xc] sm:$0xf] %v1517_v10  ;;  %v1244_v27 = vor.u32 %v1403_v25, %v1243_v24  ;;  %v1401_v28 = vld [vmem:[%s1997_s1 + $0x4] sm:$0xf]  ;;  %v1237_v29 = vld [vmem:[%s1997_s1 + $0xc] sm:$0xf0] }
  0x10   : > { %244 = vrot.lane.b32.xlu2 %v1563_v0, %s1510_s22  ;;  %203 = vst [vmem:[#allocation3] sm:$0xf] %v1517_v10  ;;  %v1240_v31 = vor.u32 %v1401_v28, %v1237_v29  ;;  %v1247_v32 = vld [vmem:[%s1997_s1 + $0x18] sm:$0xf]  ;;  %v1405_v33 = vld [vmem:[%s1997_s1 + $0x20] sm:$0xf0] }
  0x11   : > { %204 = vst [vmem:[#allocation3 + $0x4] sm:$0xf] %v1517_v10  ;;  %v1248_v34 = vor.u32 %v1405_v33, %v1247_v32  ;;  %v1255_v35 = vld [vmem:[%s1997_s1 + $0x20] sm:$0xf]  ;;  %v1406_v36 = vld [vmem:[%s1997_s1 + $0x28] sm:$0xf0] }
  0x12   : > { %205 = vst [vmem:[#allocation3 + $0x8] sm:$0xf] %v1517_v10  ;;  %v1256_v37 = vor.u32 %v1406_v36, %v1255_v35  ;;  %v1404_v38 = vld [vmem:[%s1997_s1 + $0x1c] sm:$0xf]  ;;  %v1249_v39 = vld [vmem:[%s1997_s1 + $0x24] sm:$0xf0] }
  0x13   : > { %206 = vst [vmem:[#allocation3 + $0xc] sm:$0xf] %v1517_v10  ;;  %v1252_v40 = vor.u32 %v1404_v38, %v1249_v39  ;;  %v1666_v55 = vld [vmem:[%s1999_s3] ss:$0 sm:$0xff]  ;;  %vm429_vm1 = vcmask 740440   ;;  %v1270_v29 = vld [vmem:[%s1998_s2 + $0x38] sm:$0xff] }
  0x14   : > { %v1267_v32 = vld [vmem:[%s1998_s2 + $0x20] sm:$0xff]  ;;  %vm1127_vm2 = vcmask 84992   ;;  %vm1156_vm3 = vcmask 1044184  }
  0x17   : > { %274 = vrot.lane.b32.xlu0 %v1563_v0, %s1511_s23  ;;  %272 = vrot.lane.b32.xlu1 %v1566_v1, %s1511_s23 }
  0x18   : > { %268 = vrot.lane.b32.xlu2 %v1563_v0, %s1512_s24 }
  0x1f   : > { %242 = vrot.lane.b32.xlu0 %v1566_v1, %s1510_s22  ;;  %266 = vrot.lane.b32.xlu1 %v1566_v1, %s1512_s24 }
  0x20   : > { %238 = vrot.lane.b32.xlu2 %v1563_v0, %s1513_s25 }
  0x27   : > { %262 = vrot.lane.b32.xlu0 %v1563_v0, %s1514_s26  ;;  %236 = vrot.lane.b32.xlu1 %v1566_v1, %s1513_s25 }
  0x28   : > { %260 = vrot.lane.b32.xlu2 %v1566_v1, %s1514_s26 }
  0x2f   : > { %280 = vrot.lane.b32.xlu0 %v1563_v0, %s1515_s27  ;;  %256 = vrot.lane.b32.xlu1 %v1563_v0, %s1516_s28 }
  0x30   : > { %278 = vrot.lane.b32.xlu2 %v1566_v1, %s1515_s27 }
  0x37   : > { %254 = vrot.lane.b32.xlu0 %v1566_v1, %s1516_s28  ;;  %296 = vperm.xlu1 %1477, %v218_v8  }
  0x38   : > { %301 = vperm.xlu2 %1478, %v219_v18  }
  0x3f   : > { %286 = vperm.xlu0 %1479, %v216_v13   ;;  %291 = vperm.xlu1 %1477, %v217_v14  }
  0x6a   : > { %v245_v2 = vpop.permute.xlu2 %244 }
  0x72   : > { %v269_v5 = vpop.permute.xlu2 %268 }
  0x7a   : > { %v239_v9 = vpop.permute.xlu2 %238 }
  0x81   : > { %v251_v3 = vpop.permute.xlu0 %250  ;;  %v249_v4 = vpop.permute.xlu1 %248 }
  0x82   : > { %341 = vmatpush.bf16.msra.mxu0 %v251_v3  ;;  %v261_v15 = vpop.permute.xlu2 %260 }
  0x86   : > { %342 = vmatpush.bf16.msra.mxu0 %v249_v4 }
  0x89   : > { %v275_v6 = vpop.permute.xlu0 %274  ;;  %v273_v7 = vpop.permute.xlu1 %272 }
  0x8a   : > { %343 = vmatpush.bf16.msra.mxu0 %v245_v2  ;;  %360 = vmatpush.bf16.msra.mxu1 %v275_v6  ;;  %v279_v26 = vpop.permute.xlu2 %278 }
  0x8e   : > { %361 = vmatpush.bf16.msra.mxu1 %v273_v7 }
  0x91   : > { %v243_v11 = vpop.permute.xlu0 %242  ;;  %v267_v12 = vpop.permute.xlu1 %266 }
  0x92   : > { %344 = vmatpush.bf16.msra.mxu0 %v243_v11  ;;  %362 = vmatpush.bf16.msra.mxu1 %v269_v5 }
  0x96   : > { %345 = vmatpush.bf16.msra.mxu0 %v239_v9  ;;  %363 = vmatpush.bf16.msra.mxu1 %v267_v12 }
  0x99   : > { %v263_v16 = vpop.permute.xlu0 %262  ;;  %v237_v17 = vpop.permute.xlu1 %236 }
  0x9a   : > { %346 = vmatpush.bf16.msra.mxu0 %v237_v17  ;;  %364 = vmatpush.bf16.msra.mxu1 %v263_v16 }
  0x9e   : > { %347 = vmatpush.bf16.msra.mxu0 %v1563_v0  ;;  %365 = vmatpush.bf16.msra.mxu1 %v261_v15 }
  0xa1   : > { %v281_v21 = vpop.permute.xlu0 %280  ;;  %v257_v23 = vpop.permute.xlu1 %256 }
  0xa2   : > { %348 = vmatpush.bf16.msra.mxu0 %v1566_v1  ;;  %385 = vmatpush.bf16.msra.mxu2 %v281_v21  ;;  %v302_v1 = vpop.permute.xlu2 %301 }
  0xa3   : > { %366 = vmatpush.bf16.msra.mxu1 %v257_v23 }
  0xa5   : > { %349 = vmatmul.bf16.vlgmr.msra.gmra.mxu0 %v1236_v22 }
  0xa6   : > { %386 = vmatpush.bf16.msra.mxu2 %v279_v26 }
  0xa9   : > { %1257 = vmatmul.msk.bf16.vlgmr.msra.gmra.mxu2 %vm334_vm0, %v1244_v27  ;;  %v255_v30 = vpop.permute.xlu0 %254  ;;  %v297_v42 = vpop.permute.xlu1 %296 }
  0xaa   : > { %367 = vmatpush.bf16.msra.mxu1 %v255_v30  ;;  %v1269_v30 = vld [vmem:[%s1998_s2 + $0x30] sm:$0xff] }
  0xad   : > { %368 = vmatmul.bf16.vlgmr.msra.gmra.mxu1 %v1240_v31  ;;  %v1268_v31 = vld [vmem:[%s1998_s2 + $0x28] sm:$0xff] }
  0xb1   : > { %v292_v46 = vpop.permute.xlu1 %291  ;;  %v287_v49 = vpop.permute.xlu0 %286 }
  0xb5   : > { %354 = vmatmul.bf16.gmra.mxu0 %v1248_v34 }
  0xb9   : > { %1258 = vmatmul.msk.bf16.gmra.mxu2 %vm334_vm0, %v1256_v37 }
  0xbd   : > { %373 = vmatmul.bf16.gmra.mxu1 %v1252_v40 }
 0x122   : > { %v350_v41 = vpop.f32.mrf.mxu0 }
 0x123   : > { %v351_v54 = vadd.f32 %v350_v41, %v287_v49 }
 0x12a   : > { %v352_v43 = vpop.f32.mrf.mxu0  ;;  %v369_v44 = vpop.f32.mrf.mxu1 }
 0x12b   : > { %v353_v47 = vadd.f32 %v352_v43, %v292_v46  ;;  %v370_v60 = vadd.f32 %v369_v44, %v351_v54  ;;  %v1434_v46 = vld [vmem:[%s1560_s20] sm:$0xff]  }
 0x12c   : > { %v388_v45 = vpop.f32.mrf.mxu2 }
 0x12d   : > { %v389_v3 = vadd.f32 %v388_v45, %v370_v60  ;;  %v1283_v60 = vld [vmem:[%s1997_s1 + $0x3c] sm:$0xf0] }
 0x12f   : > { %v398_v8 = vmax.f32 %v389_v3, 0.0  ;;  %v1293_v3 = vld [vmem:[%s1997_s1 + $0x48] sm:$0xf] }
 0x131   : > { %v405_v14 = vmul.f32 %v1666_v55, %v398_v8 }
 0x132   : > { %v371_v48 = vpop.f32.mrf.mxu1  ;;  %v355_v51 = vpop.f32.mrf.mxu0 }
 0x133   : > { %v372_v50 = vadd.f32 %v371_v48, %v353_v47  ;;  %v356_v56 = vadd.f32 %v355_v51, %v297_v42  ;;  %v409_v17 = vpack.c.bf16 %v405_v14, %v405_v14  ;;  %v1435_v47 = vunpack.c.l.bf16 %v1434_v46  ;;  %v1281_v51 = vld [vmem:[%s1997_s1 + $0x30] sm:$0xf] }
 0x134   : > { %v390_v52 = vpop.f32.mrf.mxu2  ;;  %v1436_v48 = vunpack.c.h.bf16 %v1434_v46 }
 0x135   : > { %v391_v53 = vadd.f32 %v390_v52, %v372_v50  ;;  %v1449_v50 = vld [vmem:[%s1560_s20 + $0x8] sm:$0xff]   ;;  %v1410_v52 = vld [vmem:[%s1997_s1 + $0x38] sm:$0xf0]  ;;  %s1959_s20 = scalar_lea.vmem %s2000_s4, %s1399_s17 }
 0x136   : > { %v1485_v49 = vpack.i.bf16 %v1436_v48, %v1435_v47  ;;  %v1440_v54 = vunpack.c.h.bf16 %v1449_v50  ;;  %1129 = vst.msk [vmem:[%s1959_s20 + $0x4] sm:$0xf] %vm1127_vm2, %v1517_v10 }
 0x137   : > { %v399_v57 = vmax.f32 %v391_v53, 0.0  ;;  %v1439_v53 = vunpack.c.l.bf16 %v1449_v50  ;;  %1128 = vst.msk [vmem:[%s1959_s20] sm:$0xf] %vm1127_vm2, %v1517_v10 }
 0x138   : > { %1130 = vst.msk [vmem:[%s1959_s20 + $0x8] sm:$0xf] %vm1127_vm2, %v1517_v10 }
 0x139   : > { %v406_v58 = vmul.f32 %v1666_v55, %v399_v57  ;;  %1131 = vst.msk [vmem:[%s1959_s20 + $0xc] sm:$0xf] %vm1127_vm2, %v1517_v10 }
 0x13a   : > { %v374_v59 = vpop.f32.mrf.mxu1  ;;  %v357_v2 = vpop.f32.mrf.mxu0 }
 0x13b   : > { %v410_v61 = vpack.c.bf16 %v406_v58, %v406_v58  ;;  %v375_v62 = vadd.f32 %v374_v59, %v356_v56  ;;  %v358_v5 = vadd.f32 %v357_v2, %v302_v1  ;;  %v1480_v56 = vpack.i.bf16 %v1440_v54, %v1439_v53  ;;  %v1409_v59 = vld [vmem:[%s1997_s1 + $0x34] sm:$0xf] }
 0x13c   : > { %v393_v63 = vpop.f32.mrf.mxu2  ;;  %v1282_v58 = vor.u32 %v1410_v52, %v1281_v51 }
 0x13d   : > { %v394_v0 = vadd.f32 %v393_v63, %v375_v62  ;;  %419 = vrot.lane.b32.xlu0 %v410_v61, %s1518_s9  ;;  %v1286_v62 = vor.u32 %v1409_v59, %v1283_v60  ;;  %v1289_v63 = vld [vmem:[%s1997_s1 + $0x38] sm:$0xf] }
 0x13f   : > { %v400_v4 = vmax.f32 %v394_v0, 0.0  ;;  %v1411_v0 = vld [vmem:[%s1997_s1 + $0x40] sm:$0xf0] }
 0x140   : > { %v1290_v2 = vor.u32 %v1411_v0, %v1289_v63 }
 0x141   : > { %v407_v6 = vmul.f32 %v1666_v55, %v400_v4  ;;  %v1413_v4 = vld [vmem:[%s1997_s1 + $0x50] sm:$0xf0] }
 0x142   : > { %v376_v7 = vpop.f32.mrf.mxu1 }
 0x143   : > { %v411_v9 = vpack.c.bf16 %v407_v6, %v407_v6  ;;  %v377_v11 = vadd.f32 %v376_v7, %v358_v5  ;;  %v1294_v5 = vor.u32 %v1413_v4, %v1293_v3  ;;  %v1412_v6 = vld [vmem:[%s1997_s1 + $0x4c] sm:$0xf]  ;;  %v1295_v7 = vld [vmem:[%s1997_s1 + $0x54] sm:$0xf0] }
 0x144   : > { %v395_v12 = vpop.f32.mrf.mxu2  ;;  %v1298_v8 = vor.u32 %v1412_v6, %v1295_v7  ;;  %v1316_v6 = vld [vmem:[%s1998_s2 + $0x58] sm:$0xff]  ;;  %v1315_v7 = vld [vmem:[%s1998_s2 + $0x50] sm:$0xff] }
 0x145   : > { %v396_v13 = vadd.f32 %v395_v12, %v377_v11  ;;  %421 = vrot.lane.b32.xlu2 %v411_v9, %s1518_s9  ;;  %v1301_v9 = vld [vmem:[%s1997_s1 + $0x50] sm:$0xf]  ;;  %v1414_v11 = vld [vmem:[%s1997_s1 + $0x58] sm:$0xf0] }
 0x146   : > { %v1302_v12 = vor.u32 %v1414_v11, %v1301_v9  ;;  %v1314_v9 = vld [vmem:[%s1998_s2 + $0x48] sm:$0xff] }
 0x147   : > { %v401_v15 = vmax.f32 %v396_v13, 0.0 }
 0x149   : > { %v408_v16 = vmul.f32 %v1666_v55, %v401_v15 }
 0x14b   : > { %v412_v18 = vpack.c.bf16 %v408_v16, %v408_v16 }
 0x14d   : > { %423 = vrot.lane.b32.xlu1 %v412_v18, %s1518_s9  ;;  %417 = vrot.lane.b32.xlu2 %v409_v17, %s1518_s9 }
 0x19f   : > { %v422_v19 = vpop.permute.xlu2 %421 }
 0x1a0   : > { %432 = vst.msk [vmem:[#allocation3 + $0x8] sm:$0xf] %vm429_vm1, %v422_v19 }
 0x1a7   : > { %v418_v20 = vpop.permute.xlu2 %417  ;;  %v1277_v26 = vld [vmem:[#allocation3 + $0x8] sm:$0xf] }
 0x1a8   : > { %430 = vst.msk [vmem:[#allocation3] sm:$0xf] %vm429_vm1, %v418_v20 }
 0x1af   : > { %v420_v21 = vpop.permute.xlu0 %419  ;;  %v1273_v22 = vld [vmem:[#allocation3] sm:$0xf] }
 0x1b0   : > { %431 = vst.msk [vmem:[#allocation3 + $0x4] sm:$0xf] %vm429_vm1, %v420_v21 }
 0x1b7   : > { %v1415_v23 = vld [vmem:[#allocation3] sm:$0xf0] }
 0x1b8   : > { %v1679_v24 = vor.u32 %v1415_v23, %v1273_v22 }
 0x1ba   : > { %476 = vrot.lane.b32.xlu0 %v1679_v24, %s1509_s21 }
 0x1bf   : > { %v424_v25 = vpop.permute.xlu1 %423 }
 0x1c0   : > { %433 = vst.msk [vmem:[#allocation3 + $0xc] sm:$0xf] %vm429_vm1, %v424_v25 }
 0x1c7   : > { %v1416_v27 = vld [vmem:[#allocation3 + $0x8] sm:$0xf0] }
 0x1c8   : > { %v1278_v28 = vor.u32 %v1416_v27, %v1277_v26 }
 0x1ca   : > { %496 = vrot.lane.b32.xlu0 %v1278_v28, %s1512_s24  ;;  %502 = vrot.lane.b32.xlu2 %v1278_v28, %s1511_s23 }
 0x1cb   : > { %478 = vrot.lane.b32.xlu1 %v1278_v28, %s1509_s21 }
 0x1d2   : > { %466 = vrot.lane.b32.xlu0 %v1278_v28, %s1513_s25  ;;  %472 = vrot.lane.b32.xlu2 %v1278_v28, %s1510_s22 }
 0x1d3   : > { %500 = vrot.lane.b32.xlu1 %v1679_v24, %s1511_s23 }
 0x1da   : > { %488 = vrot.lane.b32.xlu0 %v1679_v24, %s1514_s26  ;;  %494 = vrot.lane.b32.xlu2 %v1679_v24, %s1512_s24 }
 0x1db   : > { %470 = vrot.lane.b32.xlu1 %v1679_v24, %s1510_s22 }
 0x1e2   : > { %508 = vrot.lane.b32.xlu0 %v1278_v28, %s1515_s27  ;;  %464 = vrot.lane.b32.xlu2 %v1679_v24, %s1513_s25 }
 0x1e3   : > { %490 = vrot.lane.b32.xlu1 %v1278_v28, %s1514_s26 }
 0x1ea   : > { %529 = vperm.xlu0 %1479, %v1270_v29   ;;  %482 = vrot.lane.b32.xlu2 %v1679_v24, %s1516_s28 }
 0x1eb   : > { %484 = vrot.lane.b32.xlu1 %v1278_v28, %s1516_s28 }
 0x1f2   : > { %524 = vperm.xlu2 %1478, %v1269_v30   ;;  %1481 = vrot.lane.b32.xlu0 %v1480_v56, %s1516_s28 }
 0x1f3   : > { %506 = vrot.lane.b32.xlu1 %v1679_v24, %s1515_s27 }
 0x1fa   : > { %519 = vperm.xlu2 %1478, %v1268_v31  }
 0x1fb   : > { %514 = vperm.xlu1 %1477, %v1267_v32  }
 0x203   : > { %1486 = vrot.lane.b32.xlu1 %v1485_v49, %s1516_s28 }
 0x224   : > { %v503_v33 = vpop.permute.xlu2 %502 }
 0x225   : > { %587 = vmatpush.bf16.msrb.mxu2 %v503_v33 }
 0x22c   : > { %v477_v34 = vpop.permute.xlu0 %476  ;;  %v473_v37 = vpop.permute.xlu2 %472 }
 0x234   : > { %v495_v40 = vpop.permute.xlu2 %494 }
 0x23c   : > { %v497_v35 = vpop.permute.xlu0 %496  ;;  %v465_v44 = vpop.permute.xlu2 %464 }
 0x23d   : > { %v479_v36 = vpop.permute.xlu1 %478 }
 0x23e   : > { %568 = vmatpush.bf16.msra.mxu3 %v479_v36 }
 0x242   : > { %569 = vmatpush.bf16.msra.mxu3 %v477_v34 }
 0x244   : > { %v467_v38 = vpop.permute.xlu0 %466  ;;  %v483_v61 = vpop.permute.xlu2 %482 }
 0x245   : > { %v501_v39 = vpop.permute.xlu1 %500 }
 0x246   : > { %570 = vmatpush.bf16.msra.mxu3 %v473_v37  ;;  %588 = vmatpush.bf16.msrb.mxu2 %v501_v39 }
 0x24a   : > { %589 = vmatpush.bf16.msrb.mxu2 %v497_v35 }
 0x24c   : > { %v489_v41 = vpop.permute.xlu0 %488  ;;  %v525_v22 = vpop.permute.xlu2 %524 }
 0x24d   : > { %v471_v42 = vpop.permute.xlu1 %470 }
 0x24e   : > { %571 = vmatpush.bf16.msra.mxu3 %v471_v42  ;;  %590 = vmatpush.bf16.msrb.mxu2 %v495_v40 }
 0x252   : > { %572 = vmatpush.bf16.msra.mxu3 %v467_v38 }
 0x254   : > { %v509_v43 = vpop.permute.xlu0 %508  ;;  %v520_v31 = vpop.permute.xlu2 %519 }
 0x255   : > { %v491_v45 = vpop.permute.xlu1 %490  ;;  %612 = vmatpush.bf16.msrb.mxu0 %v509_v43 }
 0x256   : > { %573 = vmatpush.bf16.msra.mxu3 %v465_v44  ;;  %591 = vmatpush.bf16.msrb.mxu2 %v491_v45 }
 0x25a   : > { %574 = vmatpush.bf16.msra.mxu3 %v1278_v28  ;;  %592 = vmatpush.bf16.msrb.mxu2 %v489_v41 }
 0x25c   : > { %v530_v26 = vpop.permute.xlu0 %529 }
 0x25d   : > { %v485_v57 = vpop.permute.xlu1 %484 }
 0x25e   : > { %575 = vmatpush.bf16.msra.mxu3 %v1679_v24  ;;  %593 = vmatpush.bf16.msrb.mxu2 %v485_v57 }
 0x261   : > { %576 = vmatmul.bf16.vlgmr.msra.gmra.mxu3 %v1282_v58 }
 0x262   : > { %594 = vmatpush.bf16.msrb.mxu2 %v483_v61 }
 0x264   : > { %v1482_v34 = vpop.permute.xlu0 %1481 }
 0x265   : > { %595 = vmatmul.bf16.vlgmr.msrb.gmra.mxu2 %v1286_v62  ;;  %v507_v1 = vpop.permute.xlu1 %506  ;;  %v1483_v40 = vunpack.i.l.bf16 %v1482_v34  ;;  %v1484_v52 = vunpack.i.h.bf16 %v1482_v34 }
 0x266   : > { %613 = vmatpush.bf16.msrb.mxu0 %v507_v1 }
 0x269   : > { %1303 = vmatmul.msk.bf16.vlgmr.msrb.gmra.mxu0 %vm334_vm0, %v1290_v2 }
 0x26d   : > { %v515_v13 = vpop.permute.xlu1 %514 }
 0x271   : > { %581 = vmatmul.bf16.gmra.mxu3 %v1294_v5 }
 0x275   : > { %600 = vmatmul.bf16.gmra.mxu2 %v1298_v8  ;;  %v1487_v18 = vpop.permute.xlu1 %1486  ;;  %v1313_v8 = vld [vmem:[%s1998_s2 + $0x40] sm:$0xff] }
 0x276   : > { %v1488_v21 = vunpack.i.l.bf16 %v1487_v18  ;;  %v1489_v47 = vunpack.i.h.bf16 %v1487_v18 }
 0x279   : > { %1304 = vmatmul.msk.bf16.gmra.mxu0 %vm334_vm0, %v1302_v12 }
 0x2e4   : > { %v577_v14 = vpop.f32.mrf.mxu3 }
 0x2e5   : > { %v578_v16 = vadd.f32 %v577_v14, %v515_v13 }
 0x2e6   : > { %v615_v15 = vpop.f32.mrf.mxu0 }
 0x2e8   : > { %v596_v17 = vpop.f32.mrf.mxu2 }
 0x2e9   : > { %v597_v19 = vadd.f32 %v596_v17, %v578_v16 }
 0x2eb   : > { %v616_v20 = vadd.f32 %v615_v15, %v597_v19 }
 0x2ec   : > { %v579_v23 = vpop.f32.mrf.mxu3 }
 0x2ed   : > { %v625_v24 = vmul.f32 %v1666_v55, %v616_v20  ;;  %v580_v32 = vadd.f32 %v579_v23, %v520_v31 }
 0x2ee   : > { %v617_v25 = vpop.f32.mrf.mxu0 }
 0x2ef   : > { %v653_v27 = vadd.f32 %v1488_v21, %v625_v24  ;;  %v1327_v24 = vld [vmem:[%s1997_s1 + $0x60] sm:$0xf] }
 0x2f0   : > { %v598_v28 = vpop.f32.mrf.mxu2 }
 0x2f1   : > { %v657_v29 = vpack.c.bf16 %v653_v27, %v653_v27  ;;  %v599_v37 = vadd.f32 %v598_v28, %v580_v32  ;;  %v1329_v27 = vld [vmem:[%s1997_s1 + $0x6c] sm:$0xf0]  ;;  %v1335_v32 = vld [vmem:[%s1997_s1 + $0x68] sm:$0xf] }
 0x2f3   : > { %665 = vrot.lane.b32.xlu1 %v657_v29, %s1518_s9  ;;  %v618_v42 = vadd.f32 %v617_v25, %v599_v37  ;;  %v1418_v25 = vld [vmem:[%s1997_s1 + $0x68] sm:$0xf0]  ;;  %v1421_v37 = vld [vmem:[%s1997_s1 + $0x80] sm:$0xf0] }
 0x2f4   : > { %v582_v30 = vpop.f32.mrf.mxu3 }
 0x2f5   : > { %v583_v33 = vadd.f32 %v582_v30, %v525_v22  ;;  %v626_v48 = vmul.f32 %v1666_v55, %v618_v42  ;;  %v1328_v30 = vor.u32 %v1418_v25, %v1327_v24  ;;  %v1347_v42 = vld [vmem:[%s1997_s1 + $0x80] sm:$0xf] }
 0x2f6   : > { %v620_v35 = vpop.f32.mrf.mxu0 }
 0x2f7   : > { %v654_v56 = vadd.f32 %v1489_v47, %v626_v48 }
 0x2f8   : > { %v601_v36 = vpop.f32.mrf.mxu2 }
 0x2f9   : > { %v602_v38 = vadd.f32 %v601_v36, %v583_v33  ;;  %v658_v59 = vpack.c.bf16 %v654_v56, %v654_v56  ;;  %v1419_v33 = vld [vmem:[%s1997_s1 + $0x70] sm:$0xf0]  ;;  %v1339_v36 = vld [vmem:[%s1997_s1 + $0x78] sm:$0xf] }
 0x2fb   : > { %v621_v39 = vadd.f32 %v620_v35, %v602_v38  ;;  %v1336_v35 = vor.u32 %v1419_v33, %v1335_v32  ;;  %v1420_v38 = vld [vmem:[%s1997_s1 + $0x7c] sm:$0xf]  ;;  %v1359_v33 = vld [vmem:[%s1998_s2 + $0x60] sm:$0xff] }
 0x2fc   : > { %v584_v41 = vpop.f32.mrf.mxu3 }
 0x2fd   : > { %v627_v43 = vmul.f32 %v1666_v55, %v621_v39  ;;  %v585_v45 = vadd.f32 %v584_v41, %v530_v26  ;;  %v1417_v26 = vld [vmem:[%s1997_s1 + $0x64] sm:$0xf]  ;;  %v1341_v39 = vld [vmem:[%s1997_s1 + $0x84] sm:$0xf0] }
 0x2fe   : > { %v622_v51 = vpop.f32.mrf.mxu0  ;;  %v1332_v31 = vor.u32 %v1417_v26, %v1329_v27  ;;  %v1344_v41 = vor.u32 %v1420_v38, %v1341_v39 }
 0x2ff   : > { %v655_v44 = vadd.f32 %v1483_v40, %v627_v43  ;;  %v1340_v40 = vor.u32 %v1421_v37, %v1339_v36  ;;  %v1422_v43 = vld [vmem:[%s1997_s1 + $0x88] sm:$0xf0] }
 0x300   : > { %v603_v46 = vpop.f32.mrf.mxu2 }
 0x301   : > { %v604_v49 = vadd.f32 %v603_v46, %v585_v45  ;;  %v659_v50 = vpack.c.bf16 %v655_v44, %v655_v44  ;;  %v1348_v44 = vor.u32 %v1422_v43, %v1347_v42 }
 0x303   : > { %v623_v53 = vadd.f32 %v622_v51, %v604_v49  ;;  %669 = vrot.lane.b32.xlu2 %v659_v50, %s1518_s9 }
 0x305   : > { %v628_v54 = vmul.f32 %v1666_v55, %v623_v53 }
 0x307   : > { %v656_v57 = vadd.f32 %v1484_v52, %v628_v54 }
 0x309   : > { %v660_v58 = vpack.c.bf16 %v656_v57, %v656_v57 }
 0x30b   : > { %671 = vrot.lane.b32.xlu0 %v660_v58, %s1518_s9  ;;  %667 = vrot.lane.b32.xlu2 %v658_v59, %s1518_s9 }
 0x35d   : > { %v670_v60 = vpop.permute.xlu2 %669 }
 0x35e   : > { %679 = vst.msk [vmem:[#allocation2 + $0x8] sm:$0xf] %vm429_vm1, %v670_v60 }
 0x365   : > { %v668_v61 = vpop.permute.xlu2 %667  ;;  %v666_v62 = vpop.permute.xlu1 %665  ;;  %v1323_v3 = vld [vmem:[#allocation2 + $0x8] sm:$0xf] }
 0x366   : > { %678 = vst.msk [vmem:[#allocation2 + $0x4] sm:$0xf] %vm429_vm1, %v668_v61 }
 0x367   : > { %677 = vst.msk [vmem:[#allocation2] sm:$0xf] %vm429_vm1, %v666_v62 }
 0x36d   : > { %v1423_v63 = vld [vmem:[#allocation2] sm:$0xf0] }
 0x36e   : > { %v1319_v0 = vld [vmem:[#allocation2] sm:$0xf] }
 0x36f   : > { %v1772_v1 = vor.u32 %v1423_v63, %v1319_v0  ;;  %v1442_v36 = vld [vmem:[#allocation2] sm:$0xff]  }
 0x370   : > { %v1443_v37 = vunpack.c.l.bf16 %v1442_v36  ;;  %v1444_v38 = vunpack.c.h.bf16 %v1442_v36 }
 0x371   : > { %723 = vrot.lane.b32.xlu0 %v1772_v1, %s1509_s21  ;;  %747 = vrot.lane.b32.xlu2 %v1772_v1, %s1511_s23 }
 0x372   : > { %v1490_v39 = vpack.i.bf16 %v1444_v38, %v1443_v37 }
 0x37d   : > { %v672_v2 = vpop.permute.xlu0 %671 }
 0x37e   : > { %680 = vst.msk [vmem:[#allocation2 + $0xc] sm:$0xf] %vm429_vm1, %v672_v2 }
 0x385   : > { %v1424_v4 = vld [vmem:[#allocation2 + $0x8] sm:$0xf0] }
 0x386   : > { %v1324_v5 = vor.u32 %v1424_v4, %v1323_v3 }
 0x388   : > { %725 = vrot.lane.b32.xlu1 %v1324_v5, %s1509_s21  ;;  %749 = vrot.lane.b32.xlu0 %v1324_v5, %s1511_s23 }
 0x389   : > { %719 = vrot.lane.b32.xlu2 %v1324_v5, %s1510_s22 }
 0x390   : > { %743 = vrot.lane.b32.xlu1 %v1324_v5, %s1512_s24  ;;  %741 = vrot.lane.b32.xlu0 %v1772_v1, %s1512_s24 }
 0x391   : > { %737 = vrot.lane.b32.xlu2 %v1324_v5, %s1514_s26 }
 0x398   : > { %717 = vrot.lane.b32.xlu1 %v1772_v1, %s1510_s22  ;;  %713 = vrot.lane.b32.xlu0 %v1324_v5, %s1513_s25 }
 0x399   : > { %711 = vrot.lane.b32.xlu2 %v1772_v1, %s1513_s25 }
 0x3a0   : > { %735 = vrot.lane.b32.xlu1 %v1772_v1, %s1514_s26  ;;  %731 = vrot.lane.b32.xlu0 %v1324_v5, %s1516_s28 }
 0x3a1   : > { %729 = vrot.lane.b32.xlu2 %v1772_v1, %s1516_s28 }
 0x3a8   : > { %755 = vrot.lane.b32.xlu1 %v1324_v5, %s1515_s27  ;;  %753 = vrot.lane.b32.xlu0 %v1772_v1, %s1515_s27 }
 0x3a9   : > { %776 = vperm.xlu2 %1478, %v1316_v6  }
 0x3b0   : > { %771 = vperm.xlu1 %1477, %v1315_v7   ;;  %761 = vperm.xlu0 %1479, %v1313_v8  }
 0x3b8   : > { %766 = vperm.xlu1 %1477, %v1314_v9  }
 0x3cb   : > { %v748_v12 = vpop.permute.xlu2 %747 }
 0x3e3   : > { %v724_v11 = vpop.permute.xlu0 %723  ;;  %v720_v15 = vpop.permute.xlu2 %719 }
 0x3eb   : > { %v738_v18 = vpop.permute.xlu2 %737 }
 0x3f3   : > { %v712_v21 = vpop.permute.xlu2 %711 }
 0x3fa   : > { %v750_v13 = vpop.permute.xlu0 %749  ;;  %v726_v14 = vpop.permute.xlu1 %725 }
 0x3fb   : > { %815 = vmatpush.bf16.msrb.mxu1 %v726_v14  ;;  %834 = vmatpush.bf16.msrb.mxu3 %v750_v13  ;;  %v730_v28 = vpop.permute.xlu2 %729 }
 0x3ff   : > { %816 = vmatpush.bf16.msrb.mxu1 %v724_v11  ;;  %835 = vmatpush.bf16.msrb.mxu3 %v748_v12 }
 0x402   : > { %v742_v16 = vpop.permute.xlu0 %741  ;;  %v744_v17 = vpop.permute.xlu1 %743 }
 0x403   : > { %817 = vmatpush.bf16.msrb.mxu1 %v720_v15  ;;  %836 = vmatpush.bf16.msrb.mxu3 %v744_v17  ;;  %v777_v8 = vpop.permute.xlu2 %776 }
 0x407   : > { %837 = vmatpush.bf16.msrb.mxu3 %v742_v16 }
 0x40a   : > { %v718_v19 = vpop.permute.xlu1 %717  ;;  %v714_v20 = vpop.permute.xlu0 %713 }
 0x40b   : > { %818 = vmatpush.bf16.msrb.mxu1 %v718_v19  ;;  %838 = vmatpush.bf16.msrb.mxu3 %v738_v18 }
 0x40f   : > { %819 = vmatpush.bf16.msrb.mxu1 %v714_v20 }
 0x412   : > { %v736_v22 = vpop.permute.xlu1 %735  ;;  %v732_v23 = vpop.permute.xlu0 %731 }
 0x413   : > { %820 = vmatpush.bf16.msrb.mxu1 %v712_v21  ;;  %839 = vmatpush.bf16.msrb.mxu3 %v736_v22 }
 0x417   : > { %821 = vmatpush.bf16.msrb.mxu1 %v1324_v5  ;;  %840 = vmatpush.bf16.msrb.mxu3 %v732_v23 }
 0x41a   : > { %v756_v29 = vpop.permute.xlu1 %755  ;;  %v754_v34 = vpop.permute.xlu0 %753 }
 0x41b   : > { %822 = vmatpush.bf16.msrb.mxu1 %v1772_v1  ;;  %841 = vmatpush.bf16.msrb.mxu3 %v730_v28 }
 0x41c   : > { %859 = vmatpush.bf16.msra.mxu2 %v756_v29 }
 0x41e   : > { %823 = vmatmul.bf16.vlgmr.msrb.gmra.mxu1 %v1328_v30  ;;  %842 = vmatmul.bf16.vlgmr.msrb.gmra.mxu3 %v1332_v31 }
 0x420   : > { %860 = vmatpush.bf16.msra.mxu2 %v754_v34  ;;  %v1360_v34 = vld [vmem:[%s1998_s2 + $0x68] sm:$0xff] }
 0x422   : > { %v762_v47 = vpop.permute.xlu0 %761  ;;  %v772_v56 = vpop.permute.xlu1 %771 }
 0x423   : > { %1349 = vmatmul.msk.bf16.vlgmr.msra.gmra.mxu2 %vm334_vm0, %v1336_v35  ;;  %v1362_v35 = vld [vmem:[%s1998_s2 + $0x78] sm:$0xff] }
 0x42a   : > { %v767_v63 = vpop.permute.xlu1 %766 }
 0x42e   : > { %828 = vmatmul.bf16.gmra.mxu1 %v1340_v40  ;;  %847 = vmatmul.bf16.gmra.mxu3 %v1344_v41  ;;  %v1361_v40 = vld [vmem:[%s1998_s2 + $0x70] sm:$0xff]  ;;  %v1450_v41 = vld [vmem:[#allocation2 + $0x8] sm:$0xff]  }
 0x42f   : > { %v1447_v42 = vunpack.c.l.bf16 %v1450_v41  ;;  %v1448_v43 = vunpack.c.h.bf16 %v1450_v41 }
 0x433   : > { %1350 = vmatmul.msk.bf16.gmra.mxu2 %vm334_vm0, %v1348_v44  ;;  %v1495_v44 = vpack.i.bf16 %v1448_v43, %v1447_v42 }
 0x49b   : > { %v824_v45 = vpop.f32.mrf.mxu1 }
 0x49c   : > { %v825_v48 = vadd.f32 %v824_v45, %v762_v47 }
 0x4a1   : > { %v843_v46 = vpop.f32.mrf.mxu3 }
 0x4a2   : > { %v844_v50 = vadd.f32 %v843_v46, %v825_v48 }
 0x4a3   : > { %v826_v49 = vpop.f32.mrf.mxu1 }
 0x4a4   : > { %v827_v0 = vadd.f32 %v826_v49, %v767_v63  ;;  %v1430_v63 = vld [vmem:[%s1997_s1 + $0xb8] sm:$0xf0] }
 0x4a6   : > { %v862_v51 = vpop.f32.mrf.mxu2 }
 0x4a7   : > { %v863_v52 = vadd.f32 %v862_v51, %v844_v50 }
 0x4a9   : > { %v872_v53 = vmax.f32 %v863_v52, 0.0  ;;  %v845_v54 = vpop.f32.mrf.mxu3 }
 0x4aa   : > { %v846_v3 = vadd.f32 %v845_v54, %v827_v0  ;;  %v1427_v54 = vld [vmem:[%s1997_s1 + $0xa0] sm:$0xf0] }
 0x4ab   : > { %v876_v57 = vmul.f32 %v1666_v55, %v872_v53  ;;  %v829_v59 = vpop.f32.mrf.mxu1  ;;  %v1381_v53 = vld [vmem:[%s1997_s1 + $0x98] sm:$0xf] }
 0x4ac   : > { %v830_v62 = vadd.f32 %v829_v59, %v772_v56  ;;  %v1382_v59 = vor.u32 %v1427_v54, %v1381_v53 }
 0x4ad   : > { %v880_v58 = vpack.c.bf16 %v876_v57, %v876_v57 }
 0x4ae   : > { %v864_v60 = vpop.f32.mrf.mxu2 }
 0x4af   : > { %888 = vrot.lane.b32.xlu1 %v880_v58, %s1518_s9  ;;  %v865_v6 = vadd.f32 %v864_v60, %v846_v3  ;;  %v1425_v3 = vld [vmem:[%s1997_s1 + $0x94] sm:$0xf] }
 0x4b1   : > { %v848_v61 = vpop.f32.mrf.mxu3  ;;  %v873_v13 = vmax.f32 %v865_v6, 0.0 }
 0x4b2   : > { %v849_v1 = vadd.f32 %v848_v61, %v830_v62  ;;  %v1393_v62 = vld [vmem:[%s1997_s1 + $0xb0] sm:$0xf] }
 0x4b3   : > { %v831_v5 = vpop.f32.mrf.mxu1  ;;  %v877_v18 = vmul.f32 %v1666_v55, %v873_v13 }
 0x4b4   : > { %v832_v11 = vadd.f32 %v831_v5, %v777_v8  ;;  %v1426_v8 = vld [vmem:[%s1997_s1 + $0x98] sm:$0xf0] }
 0x4b5   : > { %v881_v21 = vpack.c.bf16 %v877_v18, %v877_v18 }
 0x4b6   : > { %v867_v2 = vpop.f32.mrf.mxu2 }
 0x4b7   : > { %v868_v4 = vadd.f32 %v867_v2, %v849_v1  ;;  %v1394_v1 = vor.u32 %v1430_v63, %v1393_v62 }
 0x4b9   : > { %v874_v7 = vmax.f32 %v868_v4, 0.0  ;;  %v850_v9 = vpop.f32.mrf.mxu3  ;;  %v1375_v4 = vld [vmem:[%s1997_s1 + $0x9c] sm:$0xf0] }
 0x4ba   : > { %v851_v15 = vadd.f32 %v850_v9, %v832_v11  ;;  %v1378_v6 = vor.u32 %v1425_v3, %v1375_v4  ;;  %v1385_v9 = vld [vmem:[%s1997_s1 + $0xa8] sm:$0xf]  ;;  %v1429_v11 = vld [vmem:[%s1997_s1 + $0xb0] sm:$0xf0] }
 0x4bb   : > { %v878_v12 = vmul.f32 %v1666_v55, %v874_v7  ;;  %v1373_v7 = vld [vmem:[%s1997_s1 + $0x90] sm:$0xf]  ;;  %v1386_v13 = vor.u32 %v1429_v11, %v1385_v9 }
 0x4bd   : > { %v882_v14 = vpack.c.bf16 %v878_v12, %v878_v12  ;;  %v1374_v12 = vor.u32 %v1426_v8, %v1373_v7 }
 0x4be   : > { %v869_v16 = vpop.f32.mrf.mxu2 }
 0x4bf   : > { %v870_v17 = vadd.f32 %v869_v16, %v851_v15  ;;  %892 = vrot.lane.b32.xlu2 %v882_v14, %s1518_s9  ;;  %v1428_v14 = vld [vmem:[%s1997_s1 + $0xac] sm:$0xf]  ;;  %v1387_v15 = vld [vmem:[%s1997_s1 + $0xb4] sm:$0xf0] }
 0x4c0   : > { %v1390_v16 = vor.u32 %v1428_v14, %v1387_v15 }
 0x4c1   : > { %v875_v19 = vmax.f32 %v870_v17, 0.0 }
 0x4c3   : > { %v879_v20 = vmul.f32 %v1666_v55, %v875_v19 }
 0x4c5   : > { %v883_v22 = vpack.c.bf16 %v879_v20, %v879_v20 }
 0x4c7   : > { %894 = vrot.lane.b32.xlu0 %v883_v22, %s1518_s9  ;;  %890 = vrot.lane.b32.xlu2 %v881_v21, %s1518_s9 }
 0x519   : > { %v893_v23 = vpop.permute.xlu2 %892 }
 0x51a   : > { %902 = vst.msk [vmem:[#allocation3 + $0x8] sm:$0xf] %vm429_vm1, %v893_v23 }
 0x521   : > { %v891_v24 = vpop.permute.xlu2 %890  ;;  %v889_v25 = vpop.permute.xlu1 %888  ;;  %v1369_v30 = vld [vmem:[#allocation3 + $0x8] sm:$0xf] }
 0x522   : > { %901 = vst.msk [vmem:[#allocation3 + $0x4] sm:$0xf] %vm429_vm1, %v891_v24 }
 0x523   : > { %900 = vst.msk [vmem:[#allocation3] sm:$0xf] %vm429_vm1, %v889_v25 }
 0x529   : > { %v1431_v26 = vld [vmem:[#allocation3] sm:$0xf0] }
 0x52a   : > { %v1365_v27 = vld [vmem:[#allocation3] sm:$0xf] }
 0x52b   : > { %v1861_v28 = vor.u32 %v1431_v26, %v1365_v27 }
 0x52d   : > { %964 = vrot.lane.b32.xlu2 %v1861_v28, %s1512_s24  ;;  %970 = vrot.lane.b32.xlu1 %v1861_v28, %s1511_s23 }
 0x535   : > { %946 = vrot.lane.b32.xlu1 %v1861_v28, %s1509_s21 }
 0x539   : > { %v895_v29 = vpop.permute.xlu0 %894 }
 0x53a   : > { %903 = vst.msk [vmem:[#allocation3 + $0xc] sm:$0xf] %vm429_vm1, %v895_v29 }
 0x541   : > { %v1432_v31 = vld [vmem:[#allocation3 + $0x8] sm:$0xf0] }
 0x542   : > { %v1870_v32 = vor.u32 %v1432_v31, %v1369_v30 }
 0x544   : > { %972 = vrot.lane.b32.xlu0 %v1870_v32, %s1511_s23  ;;  %948 = vrot.lane.b32.xlu2 %v1870_v32, %s1509_s21 }
 0x545   : > { %960 = vrot.lane.b32.xlu1 %v1870_v32, %s1514_s26 }
 0x54c   : > { %958 = vrot.lane.b32.xlu0 %v1861_v28, %s1514_s26  ;;  %940 = vrot.lane.b32.xlu2 %v1861_v28, %s1510_s22 }
 0x54d   : > { %978 = vrot.lane.b32.xlu1 %v1870_v32, %s1515_s27 }
 0x554   : > { %966 = vrot.lane.b32.xlu0 %v1870_v32, %s1512_s24  ;;  %936 = vrot.lane.b32.xlu2 %v1870_v32, %s1513_s25 }
 0x555   : > { %976 = vrot.lane.b32.xlu1 %v1861_v28, %s1515_s27 }
 0x55c   : > { %942 = vrot.lane.b32.xlu0 %v1870_v32, %s1510_s22  ;;  %934 = vrot.lane.b32.xlu2 %v1861_v28, %s1513_s25 }
 0x55d   : > { %984 = vperm.xlu1 %1477, %v1359_v33  }
 0x564   : > { %954 = vrot.lane.b32.xlu0 %v1870_v32, %s1516_s28  ;;  %989 = vperm.xlu2 %1478, %v1360_v34  }
 0x565   : > { %999 = vperm.xlu1 %1477, %v1362_v35  }
 0x56c   : > { %952 = vrot.lane.b32.xlu0 %v1861_v28, %s1516_s28  ;;  %1491 = vrot.lane.b32.xlu2 %v1490_v39, %s1516_s28 }
 0x574   : > { %994 = vperm.xlu0 %1479, %v1361_v40  }
 0x57c   : > { %1496 = vrot.lane.b32.xlu0 %v1495_v44, %s1516_s28 }
 0x587   : > { %v965_v45 = vpop.permute.xlu2 %964 }
 0x59e   : > { %v949_v46 = vpop.permute.xlu2 %948 }
 0x59f   : > { %v971_v47 = vpop.permute.xlu1 %970  ;;  %1038 = vmatpush.bf16.msra.mxu0 %v949_v46  ;;  %1451 = vmatpush.bf16.msrb.mxu2 %v949_v46 }
 0x5a6   : > { %v941_v56 = vpop.permute.xlu2 %940 }
 0x5a7   : > { %v947_v48 = vpop.permute.xlu1 %946 }
 0x5a8   : > { %1039 = vmatpush.bf16.msra.mxu0 %v947_v48  ;;  %1452 = vmatpush.bf16.msrb.mxu2 %v947_v48 }
 0x5ae   : > { %v937_v61 = vpop.permute.xlu2 %936 }
 0x5b6   : > { %v973_v49 = vpop.permute.xlu0 %972  ;;  %v935_v2 = vpop.permute.xlu2 %934 }
 0x5b7   : > { %v961_v50 = vpop.permute.xlu1 %960  ;;  %1057 = vmatpush.bf16.msra.mxu1 %v973_v49 }
 0x5bb   : > { %1058 = vmatpush.bf16.msra.mxu1 %v971_v47 }
 0x5be   : > { %v959_v51 = vpop.permute.xlu0 %958  ;;  %v990_v18 = vpop.permute.xlu2 %989 }
 0x5bf   : > { %v979_v52 = vpop.permute.xlu1 %978 }
 0x5c0   : > { %1082 = vmatpush.bf16.msra.mxu3 %v979_v52 }
 0x5c6   : > { %v967_v57 = vpop.permute.xlu0 %966  ;;  %v1492_v25 = vpop.permute.xlu2 %1491 }
 0x5c7   : > { %v977_v58 = vpop.permute.xlu1 %976  ;;  %1059 = vmatpush.bf16.msra.mxu1 %v967_v57  ;;  %v1493_v29 = vunpack.i.l.bf16 %v1492_v25  ;;  %v1494_v42 = vunpack.i.h.bf16 %v1492_v25 }
 0x5c8   : > { %1083 = vmatpush.bf16.msra.mxu3 %v977_v58 }
 0x5cb   : > { %1060 = vmatpush.bf16.msra.mxu1 %v965_v45  ;;  %1395 = vmatmul.msk.bf16.vlgmr.msra.gmra.mxu3 %vm334_vm0, %v1382_v59 }
 0x5ce   : > { %v943_v60 = vpop.permute.xlu0 %942 }
 0x5cf   : > { %1040 = vmatpush.bf16.msra.mxu0 %v943_v60  ;;  %1453 = vmatpush.bf16.msrb.mxu2 %v943_v60  ;;  %v985_v20 = vpop.permute.xlu1 %984 }
 0x5d0   : > { %1061 = vmatpush.bf16.msra.mxu1 %v961_v50 }
 0x5d3   : > { %1041 = vmatpush.bf16.msra.mxu0 %v941_v56  ;;  %1454 = vmatpush.bf16.msrb.mxu2 %v941_v56 }
 0x5d4   : > { %1062 = vmatpush.bf16.msra.mxu1 %v959_v51 }
 0x5d6   : > { %v955_v0 = vpop.permute.xlu0 %954 }
 0x5d7   : > { %1042 = vmatpush.bf16.msra.mxu0 %v937_v61  ;;  %1455 = vmatpush.bf16.msrb.mxu2 %v937_v61  ;;  %v1000_v50 = vpop.permute.xlu1 %999 }
 0x5d8   : > { %1063 = vmatpush.bf16.msra.mxu1 %v955_v0 }
 0x5db   : > { %1043 = vmatpush.bf16.msra.mxu0 %v935_v2  ;;  %1456 = vmatpush.bf16.msrb.mxu2 %v935_v2 }
 0x5dc   : > { %1396 = vmatmul.msk.bf16.gmra.mxu3 %vm334_vm0, %v1394_v1 }
 0x5de   : > { %v953_v5 = vpop.permute.xlu0 %952 }
 0x5df   : > { %1044 = vmatpush.bf16.msra.mxu0 %v1870_v32  ;;  %1457 = vmatpush.bf16.msrb.mxu2 %v1870_v32 }
 0x5e0   : > { %1064 = vmatpush.bf16.msra.mxu1 %v953_v5 }
 0x5e3   : > { %1065 = vmatmul.bf16.vlgmr.msra.gmra.mxu1 %v1378_v6  ;;  %1045 = vmatpush.bf16.msra.mxu0 %v1861_v28 }
 0x5e4   : > { %1458 = vmatpush.bf16.msrb.mxu2 %v1861_v28 }
 0x5e6   : > { %1046 = vmatmul.bf16.vlgmr.msra.gmra.mxu0 %v1374_v12  ;;  %v995_v26 = vpop.permute.xlu0 %994 }
 0x5e7   : > { %1051 = vmatmul.bf16.vlgmr.msrb.gmra.mxu2 %v1386_v13 }
 0x5ee   : > { %v1497_v43 = vpop.permute.xlu0 %1496 }
 0x5ef   : > { %v1498_v48 = vunpack.i.l.bf16 %v1497_v43  ;;  %v1499_v60 = vunpack.i.h.bf16 %v1497_v43 }
 0x5f3   : > { %1070 = vmatmul.bf16.gmra.mxu1 %v1390_v16 }
 0x64e   : > { %v1085_v17 = vpop.f32.mrf.mxu3 }
 0x656   : > { %v1087_v24 = vpop.f32.mrf.mxu3 }
 0x65f   : > { %v1090_v40 = vpop.f32.mrf.mxu3 }
 0x660   : > { %v1066_v19 = vpop.f32.mrf.mxu1 }
 0x663   : > { %v1047_v21 = vpop.f32.mrf.mxu0 }
 0x664   : > { %v1048_v22 = vadd.f32 %v1047_v21, %v985_v20 }
 0x666   : > { %v1067_v23 = vadd.f32 %v1066_v19, %v1048_v22 }
 0x667   : > { %v1092_v58 = vpop.f32.mrf.mxu3 }
 0x668   : > { %v1086_v27 = vadd.f32 %v1085_v17, %v1067_v23  ;;  %v1068_v28 = vpop.f32.mrf.mxu1 }
 0x66a   : > { %v1052_v30 = vpop.f32.mrf.mxu2  ;;  %v1095_v31 = vmul.f32 %v1666_v55, %v1086_v27 }
 0x66b   : > { %v1049_v32 = vpop.f32.mrf.mxu0  ;;  %v1053_v37 = vadd.f32 %v1052_v30, %v995_v26 }
 0x66c   : > { %v1050_v33 = vadd.f32 %v1049_v32, %v990_v18  ;;  %v1123_v34 = vadd.f32 %v1493_v29, %v1095_v31 }
 0x66e   : > { %v1069_v35 = vadd.f32 %v1068_v28, %v1050_v33  ;;  %v1132_v36 = vpack.c.bf16 %v1123_v34, %v1123_v34 }
 0x670   : > { %v1088_v38 = vadd.f32 %v1087_v24, %v1069_v35  ;;  %v1071_v39 = vpop.f32.mrf.mxu1  ;;  %1140 = vrot.lane.b32.xlu1 %v1132_v36, %s1518_s9 }
 0x671   : > { %v1072_v41 = vadd.f32 %v1071_v39, %v1053_v37 }
 0x672   : > { %v1096_v44 = vmul.f32 %v1666_v55, %v1088_v38  ;;  %v1054_v46 = vpop.f32.mrf.mxu2 }
 0x673   : > { %v1091_v45 = vadd.f32 %v1090_v40, %v1072_v41  ;;  %v1055_v52 = vadd.f32 %v1054_v46, %v1000_v50 }
 0x674   : > { %v1124_v47 = vadd.f32 %v1494_v42, %v1096_v44 }
 0x675   : > { %v1097_v49 = vmul.f32 %v1666_v55, %v1091_v45 }
 0x676   : > { %v1133_v51 = vpack.c.bf16 %v1124_v47, %v1124_v47 }
 0x677   : > { %v1125_v53 = vadd.f32 %v1498_v48, %v1097_v49 }
 0x678   : > { %v1073_v54 = vpop.f32.mrf.mxu1  ;;  %1142 = vrot.lane.b32.xlu2 %v1133_v51, %s1518_s9 }
 0x679   : > { %v1074_v56 = vadd.f32 %v1073_v54, %v1055_v52  ;;  %v1134_v57 = vpack.c.bf16 %v1125_v53, %v1125_v53 }
 0x67b   : > { %v1093_v59 = vadd.f32 %v1092_v58, %v1074_v56  ;;  %1144 = vrot.lane.b32.xlu0 %v1134_v57, %s1518_s9 }
 0x67d   : > { %v1098_v61 = vmul.f32 %v1666_v55, %v1093_v59 }
 0x67f   : > { %v1126_v62 = vadd.f32 %v1499_v60, %v1098_v61 }
 0x681   : > { %v1135_v63 = vpack.c.bf16 %v1126_v62, %v1126_v62 }
 0x683   : > { %1146 = vrot.lane.b32.xlu1 %v1135_v63, %s1518_s9 }
 0x6d2   : > { %v1143_v0 = vpop.permute.xlu2 %1142 }
 0x6d3   : > { %1153 = vst.msk [vmem:[%s1959_s20 + $0x4] sm:$0xf] %vm429_vm1, %v1143_v0 }
 0x6d4   : > { %1158 = vst.msk [vmem:[%s1959_s20 + $0x4] sm:$0xf] %vm1156_vm3, %v1517_v10 }
 0x6e2   : > { %v1141_v1 = vpop.permute.xlu1 %1140 }
 0x6e3   : > { %1152 = vst.msk [vmem:[%s1959_s20] sm:$0xf] %vm429_vm1, %v1141_v1 }
 0x6e4   : > { %1157 = vst.msk [vmem:[%s1959_s20] sm:$0xf] %vm1156_vm3, %v1517_v10 }
 0x6ed   : > { %v1145_v2 = vpop.permute.xlu0 %1144 }
 0x6ee   : > { %1154 = vst.msk [vmem:[%s1959_s20 + $0x8] sm:$0xf] %vm429_vm1, %v1145_v2 }
 0x6ef   : > { %1159 = vst.msk [vmem:[%s1959_s20 + $0x8] sm:$0xf] %vm1156_vm3, %v1517_v10 }
 0x6f5   : > { %v1147_v55 = vpop.permute.xlu1 %1146 }
 0x6f6   : > { %1155 = vst.msk [vmem:[%s1959_s20 + $0xc] sm:$0xf] %vm429_vm1, %v1147_v55 }
 0x6f7   : > { %1160 = vst.msk [vmem:[%s1959_s20 + $0xc] sm:$0xf] %vm1156_vm3, %v1517_v10 }
 0x6f8 PF: > { %s14_s15 = sadd.s32 1, %s1507_s15  }
 0x6f9   : > { %p11_p4 = scmp.ge.s32.totalorder %s14_s15, 4  }
 0x6fb   :  { %13 = sbr.rel (!%p11_p4) target bundleno = 1 (0x1), region = 72 }

// kernel: unet_forward.18
= control target key start
LH: loop header
LB: loop body
LE: loop exit
PB: predicated region body
PF: predicated region fallthrough
CT: control target
= control target key end

     0   :  { %s1340_s12 = smov 0   ;;  %s1801_s0 = inlined_call_operand.vmem [shape: bf16[2,64,128], index: 0, kind: input, shape index: {}]   ;;  %s1802_s1 = inlined_call_operand.vmem [shape: bf16[128,576], index: 1, kind: input, shape index: {}]   ;;  %s1803_s2 = inlined_call_operand.vmem [shape: f32[128,1], index: 2, kind: input, shape index: {}]   ;;  %s1804_s3 = inlined_call_operand.vmem [shape: bf16[2,128,24], index: 3, kind: output, shape index: {}]  }
   0x1 LB: > { %s1018_s13 = sadd.s32 4294967295, %s1309_s12   ;;  %p1022_p0 = scmp.ge.s32.totalorder %s1309_s12, 1  ;;  %s1309_s12 = sphi %s1340_s12, %s13_s12  }
   0x2   : > { %p137_p1 = scmp.lt.s32.totalorder %s1309_s12, 3 }
   0x4   : > { %p138_p2 = pnand %p1022_p0, %p137_p1 }
   0x5   : > { %p161_p3 = scmp.lt.s32.totalorder (!%p138_p2), %s1018_s13, 1  ;;  %s1311_s18 = smov (!%p138_p2), 127  }
   0x6   : > { %141 = sbr.rel (%p138_p2) target bundleno = 470 (0x1d6), region = 32  ;;  %s1312_s19 = smov (!%p138_p2), 120  }
   0x7   : > { %s1313_s20 = smov (!%p138_p2), 115   ;;  %s1314_s21 = smov (!%p138_p2), 122  }
   0x8   : > { %s1315_s22 = smov (!%p138_p2), 121   ;;  %s1316_s23 = smov (!%p138_p2), 116  }
   0x9   : > { %s1317_s24 = smov (!%p138_p2), 126   ;;  %s1318_s25 = smov (!%p138_p2), 114  }
   0xb   : > { %s1806_s13 = smov (!%p161_p3, %s1018_s13), 1  ;;  %v222_v9 = vld [vmem:[%s1803_s2 + $0x10] sm:$0xff]  ;;  %v1319_v10 = vmov 0   ;;  %v221_v14 = vld [vmem:[%s1803_s2 + $0x8] sm:$0xff]  ;;  %v224_v15 = vld [vmem:[%s1803_s2 + $0x20] sm:$0xff]  ;;  %vm644_vm0 = vcmask 523264  }
   0xc   : > { %s1213_s14 = sshll.u32 %s1806_s13, 5  ;;  %1302 = vset.pattern.permute.xlu1 %v1319_v10  ;;  %1301 = vset.pattern.permute.xlu0 %v1319_v10  ;;  %v226_v19 = vld [vmem:[%s1803_s2 + $0x30] sm:$0xff]  ;;  %v227_v20 = vld [vmem:[%s1803_s2 + $0x38] sm:$0xff]  ;;  %v229_v24 = vld [vmem:[%s1803_s2 + $0x48] sm:$0xff]  ;;  %vm946_vm1 = vcmask 191488  }
   0xd   : > { %s165_s17 = scalar_lea.vmem %s1801_s0, %s1213_s14  ;;  %1300 = vset.pattern.permute.xlu2 %v1319_v10  ;;  %v230_v25 = vld [vmem:[%s1803_s2 + $0x50] sm:$0xff]  ;;  %v1125_v26 = vld [vmem:[%s1802_s1 + $0xa0] sm:$0xf]  ;;  %v1227_v28 = vld [vmem:[%s1802_s1 + $0x60] sm:$0xf0] }
   0xe   : > { %v1354_v0 = vld [vmem:[%s165_s17 + $0x18] sm:$0xff]  ;;  %v1356_v1 = vld [vmem:[%s165_s17 + $0x8] sm:$0xff]  ;;  %v1361_v2 = vld [vmem:[%s165_s17 + $0x10] sm:$0xff] }
   0xf   : > { %274 = vrot.lane.b32.xlu0 %v1354_v0, %s1311_s18  ;;  %270 = vrot.lane.b32.xlu1 %v1356_v1, %s1311_s18  ;;  %v1363_v3 = vld [vmem:[%s165_s17] sm:$0xff]  ;;  %v1085_v27 = vld [vmem:[%s1802_s1 + $0x50] sm:$0xf] }
  0x10   : > { %322 = vrot.lane.b32.xlu2 %v1354_v0, %s1312_s19  ;;  %v1237_v29 = vld [vmem:[%s1802_s1 + $0xb0] sm:$0xf0]  ;;  %v1165_v30 = vld [vmem:[%s1802_s1 + $0xf0] sm:$0xf]  ;;  %v1247_v31 = vld [vmem:[%s1802_s1 + $0x100] sm:$0xf0]  ;;  %v1086_v36 = vor.u32 %v1227_v28, %v1085_v27 }
  0x11   : > { %v1045_v32 = vld [vmem:[%s1802_s1] sm:$0xf]  ;;  %v1217_v33 = vld [vmem:[%s1802_s1 + $0x10] sm:$0xf0]  ;;  %v1126_v37 = vor.u32 %v1237_v29, %v1125_v26  ;;  %v1166_v38 = vor.u32 %v1247_v31, %v1165_v30  ;;  %v233_v43 = vld [vmem:[%s1803_s2 + $0x68] sm:$0xff] }
  0x12   : > { %v1046_v39 = vor.u32 %v1217_v33, %v1045_v32  ;;  %v220_v41 = vld [vmem:[%s1803_s2] sm:$0xff]  ;;  %v223_v46 = vld [vmem:[%s1803_s2 + $0x18] sm:$0xff]  ;;  %v1145_v48 = vld [vmem:[%s1802_s1 + $0xc8] sm:$0xf] }
  0x13   : > { %v232_v42 = vld [vmem:[%s1803_s2 + $0x60] sm:$0xff]  ;;  %v1105_v49 = vld [vmem:[%s1802_s1 + $0x78] sm:$0xf]  ;;  %v1232_v50 = vld [vmem:[%s1802_s1 + $0x88] sm:$0xf0] }
  0x14   : > { %v1242_v51 = vld [vmem:[%s1802_s1 + $0xd8] sm:$0xf0]  ;;  %v1185_v52 = vld [vmem:[%s1802_s1 + $0x118] sm:$0xf]  ;;  %v1252_v53 = vld [vmem:[%s1802_s1 + $0x128] sm:$0xf0]  ;;  %v1106_v58 = vor.u32 %v1232_v50, %v1105_v49 }
  0x15   : > { %v1065_v54 = vld [vmem:[%s1802_s1 + $0x28] sm:$0xf]  ;;  %v1222_v55 = vld [vmem:[%s1802_s1 + $0x38] sm:$0xf0]  ;;  %v1146_v59 = vor.u32 %v1242_v51, %v1145_v48  ;;  %v1186_v60 = vor.u32 %v1252_v53, %v1185_v52  ;;  %v1047_v10 = vld [vmem:[%s1802_s1 + $0x14] sm:$0xf0] }
  0x16   : > { %v1066_v61 = vor.u32 %v1222_v55, %v1065_v54  ;;  %v225_v62 = vld [vmem:[%s1803_s2 + $0x28] sm:$0xff]  ;;  %v235_v63 = vld [vmem:[%s1803_s2 + $0x78] sm:$0xff]  ;;  %v1061_v26 = vld [vmem:[%s1802_s1 + $0x10] sm:$0xf] }
  0x17   : > { %272 = vrot.lane.b32.xlu0 %v1361_v2, %s1311_s18  ;;  %268 = vrot.lane.b32.xlu1 %v1363_v3, %s1311_s18  ;;  %v1219_v27 = vld [vmem:[%s1802_s1 + $0x20] sm:$0xf0]  ;;  %v1221_v31 = vld [vmem:[%s1802_s1 + $0x34] sm:$0xf]  ;;  %s1214_s18 = sshll.u32 %s1806_s13, 6 }
  0x18   : > { %346 = vrot.lane.b32.xlu2 %v1354_v0, %s1313_s20  ;;  %v1062_v30 = vor.u32 %v1219_v27, %v1061_v26  ;;  %v1075_v32 = vld [vmem:[%s1802_s1 + $0x44] sm:$0xf0]  ;;  %v1230_v48 = vld [vmem:[%s1802_s1 + $0x7c] sm:$0xf]  ;;  %v1107_v50 = vld [vmem:[%s1802_s1 + $0x8c] sm:$0xf0] }
  0x19   : > { %v1078_v33 = vor.u32 %v1221_v31, %v1075_v32  ;;  %v1101_v51 = vld [vmem:[%s1802_s1 + $0x60] sm:$0xf]  ;;  %v1229_v52 = vld [vmem:[%s1802_s1 + $0x70] sm:$0xf0]  ;;  %v1110_v53 = vor.u32 %v1230_v48, %v1107_v50  ;;  %v1231_v55 = vld [vmem:[%s1802_s1 + $0x84] sm:$0xf] }
  0x1a   : > { %v1102_v54 = vor.u32 %v1229_v52, %v1101_v51  ;;  %v1195_v48 = vld [vmem:[%s1802_s1 + $0x134] sm:$0xf0] }
  0x1f   : > { %298 = vrot.lane.b32.xlu0 %v1354_v0, %s1314_s21  ;;  %320 = vrot.lane.b32.xlu1 %v1361_v2, %s1312_s19 }
  0x20   : > { %344 = vrot.lane.b32.xlu2 %v1361_v2, %s1313_s20 }
  0x27   : > { %296 = vrot.lane.b32.xlu0 %v1361_v2, %s1314_s21  ;;  %318 = vrot.lane.b32.xlu1 %v1356_v1, %s1312_s19 }
  0x28   : > { %342 = vrot.lane.b32.xlu2 %v1356_v1, %s1313_s20 }
  0x2f   : > { %294 = vrot.lane.b32.xlu0 %v1356_v1, %s1314_s21  ;;  %316 = vrot.lane.b32.xlu1 %v1363_v3, %s1312_s19 }
  0x30   : > { %340 = vrot.lane.b32.xlu2 %v1363_v3, %s1313_s20 }
  0x37   : > { %292 = vrot.lane.b32.xlu0 %v1363_v3, %s1314_s21  ;;  %310 = vrot.lane.b32.xlu1 %v1354_v0, %s1315_s22  ;;  %s1752_s21 = scalar_lea.vmem %s1804_s3, %s1214_s18 }
  0x38   : > { %334 = vrot.lane.b32.xlu2 %v1354_v0, %s1316_s23 }
  0x3f   : > { %286 = vrot.lane.b32.xlu0 %v1354_v0, %s1317_s24  ;;  %308 = vrot.lane.b32.xlu1 %v1361_v2, %s1315_s22 }
  0x40   : > { %332 = vrot.lane.b32.xlu2 %v1361_v2, %s1316_s23 }
  0x47   : > { %284 = vrot.lane.b32.xlu0 %v1361_v2, %s1317_s24  ;;  %306 = vrot.lane.b32.xlu1 %v1356_v1, %s1315_s22 }
  0x48   : > { %330 = vrot.lane.b32.xlu2 %v1356_v1, %s1316_s23 }
  0x4f   : > { %358 = vrot.lane.b32.xlu0 %v1354_v0, %s1318_s25  ;;  %282 = vrot.lane.b32.xlu1 %v1356_v1, %s1317_s24 }
  0x50   : > { %304 = vrot.lane.b32.xlu2 %v1363_v3, %s1315_s22 }
  0x57   : > { %328 = vrot.lane.b32.xlu0 %v1363_v3, %s1316_s23  ;;  %356 = vrot.lane.b32.xlu1 %v1361_v2, %s1318_s25 }
  0x58   : > { %280 = vrot.lane.b32.xlu2 %v1363_v3, %s1317_s24 }
  0x5f   : > { %354 = vrot.lane.b32.xlu0 %v1356_v1, %s1318_s25  ;;  %352 = vrot.lane.b32.xlu1 %v1363_v3, %s1318_s25 }
  0x60   : > { %366 = vperm.xlu2 %1300, %v220_v41  }
  0x67   : > { %376 = vperm.xlu1 %1302, %v222_v9   ;;  %371 = vperm.xlu0 %1301, %v221_v14   ;;  %v1215_v9 = vld [vmem:[%s1802_s1 + $0x4] sm:$0xf]  ;;  %v1216_v14 = vld [vmem:[%s1802_s1 + $0xc] sm:$0xf] }
  0x68   : > { %381 = vperm.xlu2 %1300, %v223_v46   ;;  %v1113_v46 = vld [vmem:[%s1802_s1 + $0x80] sm:$0xf] }
  0x6a   : > { %v1394_v4 = vpop.permute.xlu2 %322 }
  0x6f   : > { %386 = vperm.xlu1 %1302, %v224_v15   ;;  %396 = vperm.xlu0 %1301, %v226_v19   ;;  %v1055_v15 = vld [vmem:[%s1802_s1 + $0x1c] sm:$0xf0]  ;;  %v234_v19 = vld [vmem:[%s1803_s2 + $0x70] sm:$0xff] }
  0x70   : > { %391 = vperm.xlu2 %1300, %v225_v62   ;;  %v1127_v62 = vld [vmem:[%s1802_s1 + $0xb4] sm:$0xf0] }
  0x72   : > { %v1396_v5 = vpop.permute.xlu2 %346 }
  0x77   : > { %401 = vperm.xlu1 %1302, %v227_v20   ;;  %411 = vperm.xlu0 %1301, %v229_v24   ;;  %v1073_v20 = vld [vmem:[%s1802_s1 + $0x30] sm:$0xf] }
  0x7a   : > { %v1398_v6 = vpop.permute.xlu2 %344 }
  0x7f   : > { %416 = vperm.xlu1 %1302, %v230_v25   ;;  %426 = vperm.xlu0 %1301, %v232_v42   ;;  %v1067_v25 = vld [vmem:[%s1802_s1 + $0x3c] sm:$0xf0] }
  0x81   : > { %v275_v7 = vpop.permute.xlu0 %274  ;;  %v271_v8 = vpop.permute.xlu1 %270 }
  0x82   : > { %669 = vmatpush.bf16.msra.mxu0 %v275_v7  ;;  %1259 = vmatpush.bf16.msra.mxu1 %v275_v7  ;;  %v1403_v11 = vpop.permute.xlu2 %342 }
  0x83   : > { %1260 = vmatpush.bf16.msra.mxu2 %v275_v7  ;;  %1261 = vmatpush.bf16.msra.mxu3 %v275_v7 }
  0x87   : > { %431 = vperm.xlu1 %1302, %v233_v43   ;;  %441 = vperm.xlu0 %1301, %v235_v63   ;;  %v1226_v43 = vld [vmem:[%s1802_s1 + $0x5c] sm:$0xf]  ;;  %v1121_v63 = vld [vmem:[%s1802_s1 + $0x88] sm:$0xf] }
  0x89   : > { %v273_v12 = vpop.permute.xlu0 %272  ;;  %v269_v13 = vpop.permute.xlu1 %268 }
  0x8a   : > { %670 = vmatpush.bf16.msra.mxu0 %v273_v12  ;;  %1262 = vmatpush.bf16.msra.mxu1 %v273_v12  ;;  %v1411_v16 = vpop.permute.xlu2 %340 }
  0x8b   : > { %1263 = vmatpush.bf16.msra.mxu2 %v273_v12  ;;  %1264 = vmatpush.bf16.msra.mxu3 %v273_v12  ;;  %v231_v12 = vld [vmem:[%s1803_s2 + $0x58] sm:$0xff] }
  0x8e   : > { %671 = vmatpush.bf16.msra.mxu0 %v271_v8  ;;  %1265 = vmatpush.bf16.msra.mxu1 %v271_v8 }
  0x8f   : > { %1266 = vmatpush.bf16.msra.mxu2 %v271_v8  ;;  %1267 = vmatpush.bf16.msra.mxu3 %v271_v8 }
  0x91   : > { %v299_v17 = vpop.permute.xlu0 %298  ;;  %v321_v18 = vpop.permute.xlu1 %320 }
  0x92   : > { %672 = vmatpush.bf16.msra.mxu0 %v269_v13  ;;  %1268 = vmatpush.bf16.msra.mxu1 %v269_v13  ;;  %v1424_v23 = vpop.permute.xlu2 %334 }
  0x93   : > { %1269 = vmatpush.bf16.msra.mxu2 %v269_v13  ;;  %1270 = vmatpush.bf16.msra.mxu3 %v269_v13  ;;  %v1050_v13 = vor.u32 %v1215_v9, %v1047_v10  ;;  %v1147_v10 = vld [vmem:[%s1802_s1 + $0xdc] sm:$0xf0] }
  0x96   : > { %1271 = vmatpush.bf16.msra.mxu1 %v1354_v0  ;;  %673 = vmatpush.bf16.msra.mxu0 %v1354_v0 }
  0x97   : > { %1272 = vmatpush.bf16.msra.mxu2 %v1354_v0  ;;  %1273 = vmatpush.bf16.msra.mxu3 %v1354_v0 }
  0x99   : > { %v297_v21 = vpop.permute.xlu0 %296  ;;  %v319_v22 = vpop.permute.xlu1 %318 }
  0x9a   : > { %1274 = vmatpush.bf16.msra.mxu1 %v1361_v2  ;;  %674 = vmatpush.bf16.msra.mxu0 %v1361_v2  ;;  %v333_v40 = vpop.permute.xlu2 %332 }
  0x9b   : > { %1275 = vmatpush.bf16.msra.mxu2 %v1361_v2  ;;  %1276 = vmatpush.bf16.msra.mxu3 %v1361_v2 }
  0x9e   : > { %1277 = vmatpush.bf16.msra.mxu1 %v1356_v1  ;;  %675 = vmatpush.bf16.msra.mxu0 %v1356_v1 }
  0x9f   : > { %1278 = vmatpush.bf16.msra.mxu2 %v1356_v1  ;;  %1279 = vmatpush.bf16.msra.mxu3 %v1356_v1 }
  0xa1   : > { %v295_v34 = vpop.permute.xlu0 %294  ;;  %v317_v35 = vpop.permute.xlu1 %316 }
  0xa2   : > { %1280 = vmatpush.bf16.msra.mxu1 %v1363_v3  ;;  %676 = vmatpush.bf16.msra.mxu0 %v1363_v3  ;;  %v331_v47 = vpop.permute.xlu2 %330 }
  0xa3   : > { %1281 = vmatpush.bf16.msra.mxu2 %v1363_v3  ;;  %1282 = vmatpush.bf16.msra.mxu3 %v1363_v3  ;;  %v228_v3 = vld [vmem:[%s1803_s2 + $0x40] sm:$0xff] }
  0xa4   : > { %406 = vperm.xlu2 %1300, %v228_v3   ;;  %v1236_v3 = vld [vmem:[%s1802_s1 + $0xac] sm:$0xf] }
  0xa5   : > { %687 = vmatmul.bf16.vlgmr.msra.gmra.mxu1 %v1086_v36  ;;  %677 = vmatmul.bf16.vlgmr.msra.gmra.mxu0 %v1046_v39  ;;  %v1225_v36 = vld [vmem:[%s1802_s1 + $0x54] sm:$0xf]  ;;  %v1081_v39 = vld [vmem:[%s1802_s1 + $0x38] sm:$0xf] }
  0xa6   : > { %718 = vmatpush.bf16.msrb.mxu1 %v299_v17  ;;  %697 = vmatmul.bf16.vlgmr.msra.gmra.mxu2 %v1126_v37 }
  0xa7   : > { %767 = vmatpush.bf16.msrb.mxu2 %v1394_v4  ;;  %816 = vmatpush.bf16.msrb.mxu3 %v1396_v5  ;;  %v1053_v4 = vld [vmem:[%s1802_s1 + $0x8] sm:$0xf]  ;;  %v1218_v5 = vld [vmem:[%s1802_s1 + $0x18] sm:$0xf0] }
  0xa8   : > { %707 = vmatmul.bf16.vlgmr.msra.gmra.mxu3 %v1166_v38  ;;  %v1054_v8 = vor.u32 %v1218_v5, %v1053_v4  ;;  %v1087_v38 = vld [vmem:[%s1802_s1 + $0x64] sm:$0xf0]  ;;  %v1135_v4 = vld [vmem:[%s1802_s1 + $0xbc] sm:$0xf0] }
  0xa9   : > { %v293_v44 = vpop.permute.xlu0 %292  ;;  %v311_v45 = vpop.permute.xlu1 %310  ;;  %v1090_v41 = vor.u32 %v1225_v36, %v1087_v38  ;;  %v1138_v5 = vor.u32 %v1236_v3, %v1135_v4  ;;  %v1250_v38 = vld [vmem:[%s1802_s1 + $0x11c] sm:$0xf] }
  0xaa   : > { %719 = vmatpush.bf16.msrb.mxu1 %v297_v21  ;;  %v305_v0 = vpop.permute.xlu2 %304  ;;  %v1223_v21 = vld [vmem:[%s1802_s1 + $0x40] sm:$0xf0] }
  0xab   : > { %768 = vmatpush.bf16.msrb.mxu2 %v321_v18  ;;  %817 = vmatpush.bf16.msrb.mxu3 %v1398_v6  ;;  %v1058_v18 = vor.u32 %v1216_v14, %v1055_v15  ;;  %v1074_v24 = vor.u32 %v1223_v21, %v1073_v20  ;;  %v1241_v15 = vld [vmem:[%s1802_s1 + $0xd4] sm:$0xf] }
  0xac   : > { %421 = vperm.xlu2 %1300, %v231_v12   ;;  %v1239_v12 = vld [vmem:[%s1802_s1 + $0xc0] sm:$0xf0]  ;;  %v1245_v20 = vld [vmem:[%s1802_s1 + $0xf4] sm:$0xf] }
  0xae   : > { %720 = vmatpush.bf16.msrb.mxu1 %v295_v34  ;;  %v1093_v34 = vld [vmem:[%s1802_s1 + $0x58] sm:$0xf] }
  0xaf   : > { %769 = vmatpush.bf16.msrb.mxu2 %v319_v22  ;;  %818 = vmatpush.bf16.msrb.mxu3 %v1403_v11 }
  0xb1   : > { %v287_v56 = vpop.permute.xlu0 %286  ;;  %v309_v57 = vpop.permute.xlu1 %308 }
  0xb2   : > { %721 = vmatpush.bf16.msrb.mxu1 %v293_v44  ;;  %v281_v11 = vpop.permute.xlu2 %280  ;;  %v1095_v44 = vld [vmem:[%s1802_s1 + $0x6c] sm:$0xf0] }
  0xb3   : > { %770 = vmatpush.bf16.msrb.mxu2 %v317_v35  ;;  %819 = vmatpush.bf16.msrb.mxu3 %v1411_v16  ;;  %v1228_v35 = vld [vmem:[%s1802_s1 + $0x68] sm:$0xf0] }
  0xb4   : > { %436 = vperm.xlu2 %1300, %v234_v19   ;;  %v1094_v37 = vor.u32 %v1228_v35, %v1093_v34  ;;  %v1248_v19 = vld [vmem:[%s1802_s1 + $0x108] sm:$0xf0]  ;;  %v1193_v34 = vld [vmem:[%s1802_s1 + $0x120] sm:$0xf]  ;;  %v1253_v35 = vld [vmem:[%s1802_s1 + $0x130] sm:$0xf0] }
  0xb5   : > { %692 = vmatmul.bf16.gmra.mxu1 %v1106_v58  ;;  %682 = vmatmul.bf16.gmra.mxu0 %v1066_v61  ;;  %v1133_v58 = vld [vmem:[%s1802_s1 + $0xa8] sm:$0xf] }
  0xb6   : > { %722 = vmatpush.bf16.msrb.mxu1 %v287_v56  ;;  %702 = vmatmul.bf16.gmra.mxu2 %v1146_v59  ;;  %v1115_v56 = vld [vmem:[%s1802_s1 + $0x94] sm:$0xf0]  ;;  %v1238_v59 = vld [vmem:[%s1802_s1 + $0xb8] sm:$0xf0] }
  0xb7   : > { %771 = vmatpush.bf16.msrb.mxu2 %v311_v45  ;;  %820 = vmatpush.bf16.msrb.mxu3 %v1424_v23  ;;  %v1220_v23 = vld [vmem:[%s1802_s1 + $0x2c] sm:$0xf]  ;;  %v1098_v45 = vor.u32 %v1226_v43, %v1095_v44  ;;  %v1134_v61 = vor.u32 %v1238_v59, %v1133_v58  ;;  %v1249_v43 = vld [vmem:[%s1802_s1 + $0x110] sm:$0xf0] }
  0xb8   : > { %712 = vmatmul.bf16.gmra.mxu3 %v1186_v60  ;;  %v1070_v29 = vor.u32 %v1220_v23, %v1067_v25  ;;  %v1235_v60 = vld [vmem:[%s1802_s1 + $0xa4] sm:$0xf]  ;;  %v1167_v23 = vld [vmem:[%s1802_s1 + $0x104] sm:$0xf0]  ;;  %v1244_v25 = vld [vmem:[%s1802_s1 + $0xe8] sm:$0xf0] }
  0xb9   : > { %v285_v1 = vpop.permute.xlu0 %284  ;;  %v307_v2 = vpop.permute.xlu1 %306  ;;  %v1170_v26 = vor.u32 %v1245_v20, %v1167_v23 }
  0xba   : > { %723 = vmatpush.bf16.msrb.mxu1 %v285_v1  ;;  %v1130_v1 = vor.u32 %v1235_v60, %v1127_v62  ;;  %v367_v62 = vpop.permute.xlu2 %366 }
  0xbb   : > { %772 = vmatpush.bf16.msrb.mxu2 %v309_v57  ;;  %821 = vmatpush.bf16.msrb.mxu3 %v333_v40  ;;  %v1224_v40 = vld [vmem:[%s1802_s1 + $0x48] sm:$0xf0]  ;;  %v1118_v57 = vor.u32 %v1231_v55, %v1115_v56  ;;  %v1201_v55 = vld [vmem:[%s1802_s1 + $0x128] sm:$0xf]  ;;  %v1254_v56 = vld [vmem:[%s1802_s1 + $0x138] sm:$0xf0] }
  0xbc   : > { %v1082_v42 = vor.u32 %v1224_v40, %v1081_v39  ;;  %v1194_v39 = vor.u32 %v1253_v35, %v1193_v34  ;;  %v1202_v58 = vor.u32 %v1254_v56, %v1201_v55 }
  0xbf   : > { %773 = vmatpush.bf16.msrb.mxu2 %v307_v2  ;;  %822 = vmatpush.bf16.msrb.mxu3 %v331_v47  ;;  %v1233_v47 = vld [vmem:[%s1802_s1 + $0x90] sm:$0xf0] }
  0xc0   : > { %v1114_v49 = vor.u32 %v1233_v47, %v1113_v46  ;;  %v1251_v47 = vld [vmem:[%s1802_s1 + $0x124] sm:$0xf] }
  0xc1   : > { %v359_v6 = vpop.permute.xlu0 %358  ;;  %v283_v7 = vpop.permute.xlu1 %282  ;;  %v1198_v50 = vor.u32 %v1251_v47, %v1195_v48 }
  0xc2   : > { %724 = vmatpush.bf16.msrb.mxu1 %v283_v7  ;;  %869 = vmatpush.bf16.msrb.mxu0 %v359_v6  ;;  %v1153_v6 = vld [vmem:[%s1802_s1 + $0xd0] sm:$0xf]  ;;  %v1243_v7 = vld [vmem:[%s1802_s1 + $0xe0] sm:$0xf0]  ;;  %v382_v34 = vpop.permute.xlu2 %381 }
  0xc3   : > { %774 = vmatpush.bf16.msrb.mxu2 %v305_v0  ;;  %v1234_v0 = vld [vmem:[%s1802_s1 + $0x98] sm:$0xf0]  ;;  %v1154_v9 = vor.u32 %v1243_v7, %v1153_v6 }
  0xc4   : > { %v1122_v2 = vor.u32 %v1234_v0, %v1121_v63 }
  0xc6   : > { %775 = vmatmul.bf16.vlgmr.msrb.gmra.mxu2 %v1054_v8  ;;  %725 = vmatpush.bf16.msrb.mxu1 %v281_v11  ;;  %v1240_v8 = vld [vmem:[%s1802_s1 + $0xcc] sm:$0xf]  ;;  %v1141_v11 = vld [vmem:[%s1802_s1 + $0xb0] sm:$0xf] }
  0xc7   : > { %v1142_v14 = vor.u32 %v1239_v12, %v1141_v11 }
  0xc9   : > { %v329_v16 = vpop.permute.xlu0 %328  ;;  %726 = vmatmul.bf16.vlgmr.msrb.gmra.mxu1 %v1050_v13  ;;  %v357_v17 = vpop.permute.xlu1 %356  ;;  %v1150_v13 = vor.u32 %v1240_v8, %v1147_v10 }
  0xca   : > { %823 = vmatpush.bf16.msrb.mxu3 %v329_v16  ;;  %870 = vmatpush.bf16.msrb.mxu0 %v357_v17  ;;  %v1155_v16 = vld [vmem:[%s1802_s1 + $0xe4] sm:$0xf0] }
  0xcb   : > { %v1158_v17 = vor.u32 %v1241_v15, %v1155_v16 }
  0xcd   : > { %824 = vmatmul.bf16.vlgmr.msrb.gmra.mxu3 %v1058_v18  ;;  %v1173_v18 = vld [vmem:[%s1802_s1 + $0xf8] sm:$0xf] }
  0xce   : > { %v1174_v21 = vor.u32 %v1248_v19, %v1173_v18 }
  0xd1   : > { %v355_v22 = vpop.permute.xlu0 %354  ;;  %v353_v28 = vpop.permute.xlu1 %352 }
  0xd2   : > { %871 = vmatpush.bf16.msrb.mxu0 %v355_v22 }
  0xd6   : > { %780 = vmatmul.bf16.gmra.mxu2 %v1074_v24  ;;  %872 = vmatpush.bf16.msrb.mxu0 %v353_v28  ;;  %v1161_v24 = vld [vmem:[%s1802_s1 + $0xd8] sm:$0xf]  ;;  %v1246_v28 = vld [vmem:[%s1802_s1 + $0xfc] sm:$0xf] }
  0xd7   : > { %v1162_v27 = vor.u32 %v1244_v25, %v1161_v24 }
  0xd9   : > { %731 = vmatmul.bf16.gmra.mxu1 %v1070_v29  ;;  %1203 = vmatmul.msk.bf16.vlgmr.msrb.gmra.mxu0 %vm644_vm0, %v1062_v30  ;;  %v1175_v29 = vld [vmem:[%s1802_s1 + $0x10c] sm:$0xf0]  ;;  %v372_v6 = vpop.permute.xlu0 %371  ;;  %v377_v18 = vpop.permute.xlu1 %376 }
  0xda   : > { %v1178_v31 = vor.u32 %v1246_v28, %v1175_v29 }
  0xdd   : > { %829 = vmatmul.bf16.gmra.mxu3 %v1078_v33 }
  0xe6   : > { %785 = vmatmul.bf16.gmra.mxu2 %v1094_v37 }
  0xe9   : > { %736 = vmatmul.bf16.gmra.mxu1 %v1090_v41  ;;  %1204 = vmatmul.msk.bf16.gmra.mxu0 %vm644_vm0, %v1082_v42  ;;  %v1187_v41 = vld [vmem:[%s1802_s1 + $0x12c] sm:$0xf0]  ;;  %v1181_v42 = vld [vmem:[%s1802_s1 + $0x100] sm:$0xf] }
  0xea   : > { %v1182_v46 = vor.u32 %v1249_v43, %v1181_v42 }
  0xed   : > { %834 = vmatmul.bf16.gmra.mxu3 %v1098_v45  ;;  %v1190_v45 = vor.u32 %v1250_v38, %v1187_v41 }
  0xf6   : > { %790 = vmatmul.bf16.gmra.mxu2 %v1114_v49 }
  0xf9   : > { %741 = vmatmul.bf16.gmra.mxu1 %v1110_v53  ;;  %1205 = vmatmul.msk.bf16.gmra.mxu0 %vm644_vm0, %v1102_v54 }
  0xfd   : > { %839 = vmatmul.bf16.gmra.mxu3 %v1118_v57 }
 0x106   : > { %795 = vmatmul.bf16.gmra.mxu2 %v1134_v61 }
 0x109   : > { %746 = vmatmul.bf16.gmra.mxu1 %v1130_v1  ;;  %1206 = vmatmul.msk.bf16.gmra.mxu0 %vm644_vm0, %v1122_v2 }
 0x10d   : > { %844 = vmatmul.bf16.gmra.mxu3 %v1138_v5 }
 0x116   : > { %800 = vmatmul.bf16.gmra.mxu2 %v1154_v9 }
 0x119   : > { %751 = vmatmul.bf16.gmra.mxu1 %v1150_v13  ;;  %1207 = vmatmul.msk.bf16.gmra.mxu0 %vm644_vm0, %v1142_v14 }
 0x11d   : > { %849 = vmatmul.bf16.gmra.mxu3 %v1158_v17 }
 0x122   : > { %v1676_v22 = vpop.f32.mrf.mxu1  ;;  %v678_v36 = vpop.f32.mrf.mxu0 }
 0x123   : > { %v679_v63 = vadd.f32 %v678_v36, %v367_v62 }
 0x126   : > { %805 = vmatmul.bf16.gmra.mxu2 %v1174_v21 }
 0x129   : > { %v1693_v30 = vpop.f32.mrf.mxu2  ;;  %756 = vmatmul.bf16.gmra.mxu1 %v1170_v26  ;;  %1208 = vmatmul.msk.bf16.gmra.mxu0 %vm644_vm0, %v1162_v27 }
 0x12a   : > { %v1696_v32 = vpop.f32.mrf.mxu1  ;;  %v680_v51 = vpop.f32.mrf.mxu0 }
 0x12b   : > { %v1698_v33 = vpop.f32.mrf.mxu3  ;;  %v681_v7 = vadd.f32 %v680_v51, %v372_v6 }
 0x12d   : > { %854 = vmatmul.bf16.gmra.mxu3 %v1178_v31 }
 0x131   : > { %v1706_v37 = vpop.f32.mrf.mxu2 }
 0x132   : > { %v1711_v40 = vpop.f32.mrf.mxu1  ;;  %v683_v57 = vpop.f32.mrf.mxu0 }
 0x133   : > { %v1722_v44 = vpop.f32.mrf.mxu3  ;;  %v684_v19 = vadd.f32 %v683_v57, %v377_v18 }
 0x136   : > { %810 = vmatmul.bf16.gmra.mxu2 %v1194_v39 }
 0x139   : > { %v1730_v49 = vpop.f32.mrf.mxu2  ;;  %761 = vmatmul.bf16.gmra.mxu1 %v1190_v45  ;;  %1209 = vmatmul.msk.bf16.gmra.mxu0 %vm644_vm0, %v1182_v46 }
 0x13a   : > { %v1733_v52 = vpop.f32.mrf.mxu1  ;;  %v685_v0 = vpop.f32.mrf.mxu0 }
 0x13b   : > { %v1735_v53 = vpop.f32.mrf.mxu3  ;;  %v686_v35 = vadd.f32 %v685_v0, %v382_v34 }
 0x13d   : > { %859 = vmatmul.bf16.gmra.mxu3 %v1198_v50  ;;  %v387_v50 = vpop.permute.xlu1 %386 }
 0x13e   : > { %v689_v51 = vadd.f32 %v1676_v22, %v387_v50 }
 0x141   : > { %v1737_v54 = vpop.f32.mrf.mxu2 }
 0x143   : > { %v1745_v60 = vpop.f32.mrf.mxu3 }
 0x146   : > { %v727_v59 = vpop.f32.mrf.mxu1 }
 0x147   : > { %v728_v2 = vadd.f32 %v727_v59, %v679_v63 }
 0x149   : > { %v776_v61 = vpop.f32.mrf.mxu2  ;;  %1210 = vmatmul.msk.bf16.gmra.mxu0 %vm644_vm0, %v1202_v58 }
 0x14a   : > { %v777_v5 = vadd.f32 %v776_v61, %v728_v2  ;;  %v392_v2 = vpop.permute.xlu2 %391 }
 0x14e   : > { %v729_v1 = vpop.f32.mrf.mxu1 }
 0x14f   : > { %v730_v11 = vadd.f32 %v729_v1, %v681_v7 }
 0x150   : > { %v825_v3 = vpop.f32.mrf.mxu3 }
 0x151   : > { %v778_v4 = vpop.f32.mrf.mxu2  ;;  %v826_v8 = vadd.f32 %v825_v3, %v777_v5  ;;  %v691_v3 = vadd.f32 %v1696_v32, %v392_v2 }
 0x152   : > { %v779_v16 = vadd.f32 %v778_v4, %v730_v11 }
 0x156   : > { %v732_v9 = vpop.f32.mrf.mxu1  ;;  %v874_v10 = vpop.f32.mrf.mxu0 }
 0x157   : > { %v875_v12 = vadd.f32 %v874_v10, %v826_v8  ;;  %v733_v24 = vadd.f32 %v732_v9, %v684_v19 }
 0x158   : > { %v827_v13 = vpop.f32.mrf.mxu3 }
 0x159   : > { %v914_v14 = vmax.f32 %v875_v12, 0.0  ;;  %v781_v15 = vpop.f32.mrf.mxu2  ;;  %v828_v20 = vadd.f32 %v827_v13, %v779_v16  ;;  %v397_v13 = vpop.permute.xlu0 %396 }
 0x15a   : > { %v782_v29 = vadd.f32 %v781_v15, %v733_v24 }
 0x15b   : > { %v930_v17 = vpack.c.bf16 %v914_v14, %v914_v14  ;;  %v694_v14 = vadd.f32 %v1711_v40, %v397_v13 }
 0x15d   : > { %947 = vst.msk [vmem:[%s1752_s21] sm:$0xf] %vm946_vm1, %v930_v17 }
 0x15e   : > { %v734_v21 = vpop.f32.mrf.mxu1  ;;  %v876_v23 = vpop.f32.mrf.mxu0 }
 0x15f   : > { %v877_v25 = vadd.f32 %v876_v23, %v828_v20  ;;  %v735_v41 = vadd.f32 %v734_v21, %v686_v35 }
 0x160   : > { %v830_v26 = vpop.f32.mrf.mxu3 }
 0x161   : > { %v915_v27 = vmax.f32 %v877_v25, 0.0  ;;  %v783_v28 = vpop.f32.mrf.mxu2  ;;  %v831_v36 = vadd.f32 %v830_v26, %v782_v29  ;;  %v402_v25 = vpop.permute.xlu1 %401 }
 0x162   : > { %v784_v47 = vadd.f32 %v783_v28, %v735_v41  ;;  %v696_v26 = vadd.f32 %v1733_v52, %v402_v25 }
 0x163   : > { %v931_v31 = vpack.c.bf16 %v915_v27, %v915_v27 }
 0x165   : > { %948 = vst.msk [vmem:[%s1752_s21 + $0x4] sm:$0xf] %vm946_vm1, %v931_v31 }
 0x166   : > { %v737_v38 = vpop.f32.mrf.mxu1  ;;  %v879_v39 = vpop.f32.mrf.mxu0 }
 0x167   : > { %v880_v42 = vadd.f32 %v879_v39, %v831_v36  ;;  %v738_v58 = vadd.f32 %v737_v38, %v689_v51  ;;  %v407_v38 = vpop.permute.xlu2 %406 }
 0x168   : > { %v832_v43 = vpop.f32.mrf.mxu3 }
 0x169   : > { %v916_v45 = vmax.f32 %v880_v42, 0.0  ;;  %v786_v46 = vpop.f32.mrf.mxu2  ;;  %v833_v55 = vadd.f32 %v832_v43, %v784_v47  ;;  %v699_v42 = vadd.f32 %v1693_v30, %v407_v38 }
 0x16a   : > { %v787_v0 = vadd.f32 %v786_v46, %v738_v58 }
 0x16b   : > { %v932_v48 = vpack.c.bf16 %v916_v45, %v916_v45 }
 0x16d   : > { %949 = vst.msk [vmem:[%s1752_s21 + $0x8] sm:$0xf] %vm946_vm1, %v932_v48 }
 0x16e   : > { %v739_v56 = vpop.f32.mrf.mxu1  ;;  %v881_v57 = vpop.f32.mrf.mxu0 }
 0x16f   : > { %v882_v59 = vadd.f32 %v881_v57, %v833_v55  ;;  %v740_v6 = vadd.f32 %v739_v56, %v691_v3  ;;  %v412_v57 = vpop.permute.xlu0 %411 }
 0x170   : > { %v835_v61 = vpop.f32.mrf.mxu3  ;;  %v701_v58 = vadd.f32 %v1706_v37, %v412_v57 }
 0x171   : > { %v917_v62 = vmax.f32 %v882_v59, 0.0  ;;  %v788_v63 = vpop.f32.mrf.mxu2  ;;  %v836_v4 = vadd.f32 %v835_v61, %v787_v0 }
 0x172   : > { %v789_v11 = vadd.f32 %v788_v63, %v740_v6 }
 0x173   : > { %v933_v1 = vpack.c.bf16 %v917_v62, %v917_v62 }
 0x175   : > { %950 = vst.msk [vmem:[%s1752_s21 + $0xc] sm:$0xf] %vm946_vm1, %v933_v1 }
 0x176   : > { %v742_v22 = vpop.f32.mrf.mxu1  ;;  %v884_v5 = vpop.f32.mrf.mxu0 }
 0x177   : > { %v885_v7 = vadd.f32 %v884_v5, %v836_v4  ;;  %v743_v17 = vadd.f32 %v742_v22, %v694_v14  ;;  %v417_v22 = vpop.permute.xlu1 %416 }
 0x178   : > { %v837_v8 = vpop.f32.mrf.mxu3  ;;  %v704_v5 = vadd.f32 %v1730_v49, %v417_v22 }
 0x179   : > { %v918_v9 = vmax.f32 %v885_v7, 0.0  ;;  %v791_v10 = vpop.f32.mrf.mxu2  ;;  %v838_v15 = vadd.f32 %v837_v8, %v789_v11 }
 0x17a   : > { %v792_v23 = vadd.f32 %v791_v10, %v743_v17 }
 0x17b   : > { %v934_v12 = vpack.c.bf16 %v918_v9, %v918_v9 }
 0x17d   : > { %951 = vst.msk [vmem:[%s1752_s21 + $0x10] sm:$0xf] %vm946_vm1, %v934_v12 }
 0x17e   : > { %v744_v32 = vpop.f32.mrf.mxu1  ;;  %v886_v16 = vpop.f32.mrf.mxu0 }
 0x17f   : > { %v887_v18 = vadd.f32 %v886_v16, %v838_v15  ;;  %v745_v29 = vadd.f32 %v744_v32, %v696_v26  ;;  %v422_v15 = vpop.permute.xlu2 %421 }
 0x180   : > { %v840_v19 = vpop.f32.mrf.mxu3  ;;  %v706_v32 = vadd.f32 %v1737_v54, %v422_v15 }
 0x181   : > { %v919_v20 = vmax.f32 %v887_v18, 0.0  ;;  %v793_v21 = vpop.f32.mrf.mxu2  ;;  %v841_v27 = vadd.f32 %v840_v19, %v792_v23  ;;  %v427_v23 = vpop.permute.xlu0 %426 }
 0x182   : > { %v794_v39 = vadd.f32 %v793_v21, %v745_v29 }
 0x183   : > { %v935_v24 = vpack.c.bf16 %v919_v20, %v919_v20 }
 0x185   : > { %952 = vst.msk [vmem:[%s1752_s21 + $0x14] sm:$0xf] %vm946_vm1, %v935_v24 }
 0x186   : > { %v747_v40 = vpop.f32.mrf.mxu1  ;;  %v889_v28 = vpop.f32.mrf.mxu0 }
 0x187   : > { %v890_v31 = vadd.f32 %v889_v28, %v841_v27  ;;  %v748_v46 = vadd.f32 %v747_v40, %v699_v42  ;;  %v709_v27 = vadd.f32 %v1698_v33, %v427_v23 }
 0x188   : > { %v842_v34 = vpop.f32.mrf.mxu3 }
 0x189   : > { %v920_v35 = vmax.f32 %v890_v31, 0.0  ;;  %v796_v36 = vpop.f32.mrf.mxu2  ;;  %v843_v43 = vadd.f32 %v842_v34, %v794_v39 }
 0x18a   : > { %v797_v55 = vadd.f32 %v796_v36, %v748_v46  ;;  %v432_v36 = vpop.permute.xlu1 %431 }
 0x18b   : > { %v936_v41 = vpack.c.bf16 %v920_v35, %v920_v35  ;;  %v711_v42 = vadd.f32 %v1722_v44, %v432_v36 }
 0x18d   : > { %953 = vst.msk [vmem:[%s1752_s21 + $0x18] sm:$0xf] %vm946_vm1, %v936_v41 }
 0x18e   : > { %v749_v52 = vpop.f32.mrf.mxu1  ;;  %v891_v45 = vpop.f32.mrf.mxu0 }
 0x18f   : > { %v892_v47 = vadd.f32 %v891_v45, %v843_v43  ;;  %v750_v62 = vadd.f32 %v749_v52, %v701_v58 }
 0x190   : > { %v845_v48 = vpop.f32.mrf.mxu3 }
 0x191   : > { %v921_v50 = vmax.f32 %v892_v47, 0.0  ;;  %v798_v51 = vpop.f32.mrf.mxu2  ;;  %v846_v59 = vadd.f32 %v845_v48, %v797_v55  ;;  %v437_v48 = vpop.permute.xlu2 %436 }
 0x192   : > { %v799_v3 = vadd.f32 %v798_v51, %v750_v62 }
 0x193   : > { %v937_v56 = vpack.c.bf16 %v921_v50, %v921_v50 }
 0x195   : > { %954 = vst.msk [vmem:[%s1752_s21 + $0x1c] sm:$0xf] %vm946_vm1, %v937_v56  ;;  %v714_v56 = vadd.f32 %v1735_v53, %v437_v48 }
 0x196   : > { %v752_v30 = vpop.f32.mrf.mxu1  ;;  %v894_v61 = vpop.f32.mrf.mxu0 }
 0x197   : > { %v895_v63 = vadd.f32 %v894_v61, %v846_v59  ;;  %v753_v8 = vadd.f32 %v752_v30, %v704_v5 }
 0x198   : > { %v847_v0 = vpop.f32.mrf.mxu3 }
 0x199   : > { %v922_v1 = vmax.f32 %v895_v63, 0.0  ;;  %v801_v2 = vpop.f32.mrf.mxu2  ;;  %v848_v6 = vadd.f32 %v847_v0, %v799_v3  ;;  %v442_v63 = vpop.permute.xlu0 %441 }
 0x19a   : > { %v802_v13 = vadd.f32 %v801_v2, %v753_v8  ;;  %v716_v3 = vadd.f32 %v1745_v60, %v442_v63 }
 0x19b   : > { %v938_v4 = vpack.c.bf16 %v922_v1, %v922_v1 }
 0x19d   : > { %955 = vst.msk [vmem:[%s1752_s21 + $0x20] sm:$0xf] %vm946_vm1, %v938_v4 }
 0x19e   : > { %v754_v37 = vpop.f32.mrf.mxu1  ;;  %v896_v7 = vpop.f32.mrf.mxu0 }
 0x19f   : > { %v897_v9 = vadd.f32 %v896_v7, %v848_v6  ;;  %v755_v18 = vadd.f32 %v754_v37, %v706_v32 }
 0x1a0   : > { %v850_v10 = vpop.f32.mrf.mxu3 }
 0x1a1   : > { %v923_v11 = vmax.f32 %v897_v9, 0.0  ;;  %v803_v12 = vpop.f32.mrf.mxu2  ;;  %v851_v16 = vadd.f32 %v850_v10, %v802_v13 }
 0x1a2   : > { %v804_v25 = vadd.f32 %v803_v12, %v755_v18 }
 0x1a3   : > { %v939_v14 = vpack.c.bf16 %v923_v11, %v923_v11 }
 0x1a5   : > { %956 = vst.msk [vmem:[%s1752_s21 + $0x24] sm:$0xf] %vm946_vm1, %v939_v14 }
 0x1a6   : > { %v757_v49 = vpop.f32.mrf.mxu1  ;;  %v899_v17 = vpop.f32.mrf.mxu0 }
 0x1a7   : > { %v900_v19 = vadd.f32 %v899_v17, %v851_v16  ;;  %v758_v28 = vadd.f32 %v757_v49, %v709_v27 }
 0x1a8   : > { %v852_v20 = vpop.f32.mrf.mxu3 }
 0x1a9   : > { %v924_v21 = vmax.f32 %v900_v19, 0.0  ;;  %v806_v24 = vpop.f32.mrf.mxu2  ;;  %v853_v40 = vadd.f32 %v852_v20, %v804_v25 }
 0x1aa   : > { %v807_v38 = vadd.f32 %v806_v24, %v758_v28 }
 0x1ab   : > { %v940_v26 = vpack.c.bf16 %v924_v21, %v924_v21 }
 0x1ad   : > { %957 = vst.msk [vmem:[%s1752_s21 + $0x28] sm:$0xf] %vm946_vm1, %v940_v26 }
 0x1ae   : > { %v901_v54 = vpop.f32.mrf.mxu0  ;;  %v759_v31 = vpop.f32.mrf.mxu1 }
 0x1af   : > { %v902_v29 = vadd.f32 %v901_v54, %v853_v40  ;;  %v760_v52 = vadd.f32 %v759_v31, %v711_v42 }
 0x1b0   : > { %v855_v34 = vpop.f32.mrf.mxu3 }
 0x1b1   : > { %v925_v35 = vmax.f32 %v902_v29, 0.0  ;;  %v808_v41 = vpop.f32.mrf.mxu2  ;;  %v856_v43 = vadd.f32 %v855_v34, %v807_v38 }
 0x1b2   : > { %v809_v51 = vadd.f32 %v808_v41, %v760_v52 }
 0x1b3   : > { %v941_v39 = vpack.c.bf16 %v925_v35, %v925_v35 }
 0x1b5   : > { %958 = vst.msk [vmem:[%s1752_s21 + $0x2c] sm:$0xf] %vm946_vm1, %v941_v39 }
 0x1b6   : > { %v904_v33 = vpop.f32.mrf.mxu0  ;;  %v762_v50 = vpop.f32.mrf.mxu1 }
 0x1b7   : > { %v905_v45 = vadd.f32 %v904_v33, %v856_v43  ;;  %v763_v59 = vadd.f32 %v762_v50, %v714_v56 }
 0x1b8   : > { %v857_v46 = vpop.f32.mrf.mxu3 }
 0x1b9   : > { %v926_v47 = vmax.f32 %v905_v45, 0.0  ;;  %v858_v57 = vadd.f32 %v857_v46, %v809_v51  ;;  %v811_v58 = vpop.f32.mrf.mxu2 }
 0x1ba   : > { %v812_v0 = vadd.f32 %v811_v58, %v763_v59 }
 0x1bb   : > { %v942_v55 = vpack.c.bf16 %v926_v47, %v926_v47 }
 0x1bd   : > { %959 = vst.msk [vmem:[%s1752_s21 + $0x30] sm:$0xf] %vm946_vm1, %v942_v55 }
 0x1be   : > { %v906_v44 = vpop.f32.mrf.mxu0  ;;  %v764_v2 = vpop.f32.mrf.mxu1 }
 0x1bf   : > { %v907_v30 = vadd.f32 %v906_v44, %v858_v57  ;;  %v765_v22 = vadd.f32 %v764_v2, %v716_v3 }
 0x1c0   : > { %v860_v61 = vpop.f32.mrf.mxu3 }
 0x1c1   : > { %v927_v62 = vmax.f32 %v907_v30, 0.0  ;;  %v861_v53 = vadd.f32 %v860_v61, %v812_v0  ;;  %v813_v6 = vpop.f32.mrf.mxu2 }
 0x1c2   : > { %v814_v8 = vadd.f32 %v813_v6, %v765_v22 }
 0x1c3   : > { %v943_v1 = vpack.c.bf16 %v927_v62, %v927_v62 }
 0x1c5   : > { %960 = vst.msk [vmem:[%s1752_s21 + $0x34] sm:$0xf] %vm946_vm1, %v943_v1 }
 0x1c6   : > { %v909_v4 = vpop.f32.mrf.mxu0 }
 0x1c7   : > { %v910_v5 = vadd.f32 %v909_v4, %v861_v53 }
 0x1c8   : > { %v862_v7 = vpop.f32.mrf.mxu3 }
 0x1c9   : > { %v928_v37 = vmax.f32 %v910_v5, 0.0  ;;  %v863_v10 = vadd.f32 %v862_v7, %v814_v8 }
 0x1cb   : > { %v944_v9 = vpack.c.bf16 %v928_v37, %v928_v37 }
 0x1cd   : > { %961 = vst.msk [vmem:[%s1752_s21 + $0x38] sm:$0xf] %vm946_vm1, %v944_v9 }
 0x1ce   : > { %v911_v11 = vpop.f32.mrf.mxu0 }
 0x1cf   : > { %v912_v12 = vadd.f32 %v911_v11, %v863_v10 }
 0x1d1   : > { %v929_v13 = vmax.f32 %v912_v12, 0.0 }
 0x1d3   : > { %v945_v14 = vpack.c.bf16 %v929_v13, %v929_v13 }
 0x1d5   : > { %962 = vst.msk [vmem:[%s1752_s21 + $0x3c] sm:$0xf] %vm946_vm1, %v945_v14 }
 0x1d6 PF: > { %s13_s12 = sadd.s32 1, %s1309_s12  }
 0x1d7   : > { %p10_p4 = scmp.ge.s32.totalorder %s13_s12, 4  }
 0x1d9   :  { %12 = sbr.rel (!%p10_p4) target bundleno = 1 (0x1), region = 62 }

// kernel: unet_forward.16
= control target key start
LH: loop header
LB: loop body
LE: loop exit
PB: predicated region body
PF: predicated region fallthrough
CT: control target
= control target key end

     0   :  { %s925_s15 = smov 0   ;;  %s1180_s0 = inlined_call_operand.vmem [shape: bf16[2,128,128], index: 0, kind: input, shape index: {}]   ;;  %s1181_s1 = inlined_call_operand.vmem [shape: bf16[64,512], index: 1, kind: input, shape index: {}]   ;;  %s1182_s2 = inlined_call_operand.vmem [shape: f32[64,1], index: 2, kind: input, shape index: {}]   ;;  %s1183_s3 = inlined_call_operand.vmem [shape: f32[1,24], index: 3, kind: input, shape index: {}]   ;;  %s1184_s4 = inlined_call_operand.vmem [shape: bf16[2,64,128], index: 4, kind: output, shape index: {}]  }
   0x1 LB: > { %s737_s16 = sadd.s32 4294967295, %s893_s15   ;;  %p741_p0 = scmp.ge.s32.totalorder %s893_s15, 1  ;;  %s893_s15 = sphi %s925_s15, %s14_s15  }
   0x2   : > { %p162_p1 = scmp.lt.s32.totalorder %s893_s15, 3 }
   0x4   : > { %p163_p2 = pnand %p741_p0, %p162_p1 }
   0x5   : > { %p188_p3 = scmp.lt.s32.totalorder (!%p163_p2), %s737_s16, 1  ;;  %s895_s21 = smov (!%p163_p2), 127  }
   0x6   : > { %166 = sbr.rel (%p163_p2) target bundleno = 504 (0x1f8), region = 36  ;;  %s896_s22 = smov (!%p163_p2), 122  }
   0x7   : > { %s897_s23 = smov (!%p163_p2), 121   ;;  %s899_s8 = smov (!%p163_p2), 7  }
   0xb   : > { %s1186_s16 = smov (!%p188_p3, %s737_s16), 1  ;;  %v780_v17 = vld [vmem:[%s1181_s1] sm:$0xf]  ;;  %v848_v18 = vld [vmem:[%s1181_s1 + $0xc] sm:$0xf0]  ;;  %v216_v29 = vld [vmem:[%s1182_s2 + $0x8] sm:$0xff] }
   0xc   : > { %s844_s17 = sshll.u32 %s1186_s16, 6  ;;  %v781_v19 = vor.u32 %v848_v18, %v780_v17  ;;  %v796_v26 = vld [vmem:[%s1181_s1 + $0x20] sm:$0xf]  ;;  %v852_v27 = vld [vmem:[%s1181_s1 + $0x2c] sm:$0xf0]  ;;  %v898_v30 = vmov 0  }
   0xd   : > { %s192_s20 = scalar_lea.vmem %s1180_s0, %s844_s17  ;;  %v797_v28 = vor.u32 %v852_v27, %v796_v26  ;;  %884 = vset.pattern.permute.xlu1 %v898_v30  ;;  %883 = vset.pattern.permute.xlu0 %v898_v30  ;;  %v215_v31 = vld [vmem:[%s1182_s2] sm:$0xff]  ;;  %v782_v33 = vld [vmem:[%s1181_s1 + $0x10] sm:$0xf0]  ;;  %v856_v41 = vld [vmem:[%s1181_s1 + $0x4c] sm:$0xf0]  ;;  %s845_s9 = sshll.u32 %s1186_s16, 5 }
   0xe   : > { %v869_v0 = vld [vmem:[%s192_s20 + $0x38] sm:$0xff]  ;;  %v868_v1 = vld [vmem:[%s192_s20 + $0x30] sm:$0xff]  ;;  %v867_v2 = vld [vmem:[%s192_s20 + $0x28] sm:$0xff]  ;;  %885 = vset.pattern.permute.xlu2 %v898_v30  ;;  %s1102_s12 = scalar_lea.vmem %s1184_s4, %s845_s9  ;;  %vm615_vm0 = vcmask 52224   ;;  %vm664_vm1 = vcmask 248888   ;;  %vm673_vm2 = vcmask 1043704  }
   0xf   : > { %301 = vrot.lane.b32.xlu1 %v869_v0, %s895_s21  ;;  %325 = vrot.lane.b32.xlu0 %v869_v0, %s896_s22  ;;  %v866_v3 = vld [vmem:[%s192_s20 + $0x20] sm:$0xff]  ;;  %v865_v4 = vld [vmem:[%s192_s20 + $0x18] sm:$0xff] }
  0x10   : > { %347 = vrot.lane.b32.xlu2 %v868_v1, %s897_s23  ;;  %479 = vmatpush.bf16.msra.mxu0 %v869_v0  ;;  %v864_v5 = vld [vmem:[%s192_s20 + $0x10] sm:$0xff]  ;;  %v863_v6 = vld [vmem:[%s192_s20 + $0x8] sm:$0xff]  ;;  %v862_v7 = vld [vmem:[%s192_s20] sm:$0xff] }
  0x11   : > { %v846_v32 = vld [vmem:[%s1181_s1 + $0x4] sm:$0xf]  ;;  %v812_v40 = vld [vmem:[%s1181_s1 + $0x40] sm:$0xf]  ;;  %v218_v43 = vld [vmem:[%s1182_s2 + $0x18] sm:$0xff] }
  0x12   : > { %v785_v37 = vor.u32 %v846_v32, %v782_v33  ;;  %v813_v42 = vor.u32 %v856_v41, %v812_v40  ;;  %v850_v44 = vld [vmem:[%s1181_s1 + $0x24] sm:$0xf]  ;;  %v798_v45 = vld [vmem:[%s1181_s1 + $0x30] sm:$0xf0]  ;;  %v788_v49 = vld [vmem:[%s1181_s1 + $0x8] sm:$0xf] }
  0x13   : > { %v801_v48 = vor.u32 %v850_v44, %v798_v45  ;;  %v849_v50 = vld [vmem:[%s1181_s1 + $0x14] sm:$0xf0]  ;;  %v847_v51 = vld [vmem:[%s1181_s1 + $0xc] sm:$0xf]  ;;  %v790_v52 = vld [vmem:[%s1181_s1 + $0x18] sm:$0xf0] }
  0x14   : > { %480 = vmatpush.bf16.msra.mxu0 %v868_v1  ;;  %v789_v55 = vor.u32 %v849_v50, %v788_v49  ;;  %v793_v56 = vor.u32 %v847_v51, %v790_v52  ;;  %v828_v57 = vld [vmem:[%s1181_s1 + $0x60] sm:$0xf]  ;;  %v860_v58 = vld [vmem:[%s1181_s1 + $0x6c] sm:$0xf0]  ;;  %v220_v60 = vld [vmem:[%s1182_s2 + $0x28] sm:$0xff] }
  0x15   : > { %v829_v59 = vor.u32 %v860_v58, %v828_v57  ;;  %v854_v61 = vld [vmem:[%s1181_s1 + $0x44] sm:$0xf]  ;;  %v814_v62 = vld [vmem:[%s1181_s1 + $0x50] sm:$0xf0]  ;;  %v222_v18 = vld [vmem:[%s1182_s2 + $0x38] sm:$0xff] }
  0x16   : > { %v817_v63 = vor.u32 %v854_v61, %v814_v62  ;;  %v1089_v41 = vld [vmem:[%s1183_s3] ss:$0 sm:$0xff]  ;;  %618 = vst.msk [vmem:[%s1102_s12 + $0x8] sm:$0xf] %vm615_vm0, %v898_v30 }
  0x17   : > { %349 = vrot.lane.b32.xlu0 %v869_v0, %s897_s23  ;;  %323 = vrot.lane.b32.xlu1 %v868_v1, %s896_s22  ;;  %v804_v0 = vld [vmem:[%s1181_s1 + $0x28] sm:$0xf]  ;;  %616 = vst.msk [vmem:[%s1102_s12] sm:$0xf] %vm615_vm0, %v898_v30 }
  0x18   : > { %299 = vrot.lane.b32.xlu2 %v868_v1, %s895_s21  ;;  %481 = vmatpush.bf16.msra.mxu0 %v867_v2  ;;  %v853_v1 = vld [vmem:[%s1181_s1 + $0x34] sm:$0xf0]  ;;  %617 = vst.msk [vmem:[%s1102_s12 + $0x4] sm:$0xf] %vm615_vm0, %v898_v30 }
  0x19   : > { %619 = vst.msk [vmem:[%s1102_s12 + $0xc] sm:$0xf] %vm615_vm0, %v898_v30 }
  0x1a   : > { %620 = vst.msk [vmem:[%s1102_s12 + $0x10] sm:$0xf] %vm615_vm0, %v898_v30 }
  0x1b   : > { %621 = vst.msk [vmem:[%s1102_s12 + $0x14] sm:$0xf] %vm615_vm0, %v898_v30 }
  0x1c   : > { %482 = vmatpush.bf16.msra.mxu0 %v866_v3  ;;  %622 = vst.msk [vmem:[%s1102_s12 + $0x18] sm:$0xf] %vm615_vm0, %v898_v30 }
  0x1d   : > { %623 = vst.msk [vmem:[%s1102_s12 + $0x1c] sm:$0xf] %vm615_vm0, %v898_v30 }
  0x1f   : > { %345 = vrot.lane.b32.xlu1 %v867_v2, %s897_s23  ;;  %321 = vrot.lane.b32.xlu0 %v867_v2, %s896_s22 }
  0x20   : > { %297 = vrot.lane.b32.xlu2 %v867_v2, %s895_s21  ;;  %483 = vmatpush.bf16.msra.mxu0 %v865_v4  ;;  %v851_v2 = vld [vmem:[%s1181_s1 + $0x2c] sm:$0xf] }
  0x24   : > { %484 = vmatpush.bf16.msra.mxu0 %v864_v5 }
  0x27   : > { %343 = vrot.lane.b32.xlu1 %v866_v3, %s897_s23  ;;  %319 = vrot.lane.b32.xlu0 %v866_v3, %s896_s22 }
  0x28   : > { %295 = vrot.lane.b32.xlu2 %v866_v3, %s895_s21  ;;  %485 = vmatpush.bf16.msra.mxu0 %v863_v6  ;;  %v806_v3 = vld [vmem:[%s1181_s1 + $0x38] sm:$0xf0] }
  0x2c   : > { %486 = vmatpush.bf16.msra.mxu0 %v862_v7 }
  0x2f   : > { %341 = vrot.lane.b32.xlu1 %v865_v4, %s897_s23  ;;  %317 = vrot.lane.b32.xlu0 %v865_v4, %s896_s22 }
  0x30   : > { %293 = vrot.lane.b32.xlu2 %v865_v4, %s895_s21  ;;  %487 = vmatmul.bf16.vlgmr.msra.gmra.mxu0 %v781_v19  ;;  %v805_v4 = vor.u32 %v853_v1, %v804_v0  ;;  %v836_v19 = vld [vmem:[%s1181_s1 + $0x68] sm:$0xf] }
  0x37   : > { %339 = vrot.lane.b32.xlu1 %v864_v5, %s897_s23  ;;  %315 = vrot.lane.b32.xlu0 %v864_v5, %s896_s22 }
  0x38   : > { %291 = vrot.lane.b32.xlu2 %v864_v5, %s895_s21  ;;  %v809_v5 = vor.u32 %v851_v2, %v806_v3 }
  0x3f   : > { %337 = vrot.lane.b32.xlu1 %v863_v6, %s897_s23  ;;  %313 = vrot.lane.b32.xlu0 %v863_v6, %s896_s22 }
  0x40   : > { %289 = vrot.lane.b32.xlu2 %v863_v6, %s895_s21  ;;  %492 = vmatmul.bf16.gmra.mxu0 %v797_v28  ;;  %v217_v6 = vld [vmem:[%s1182_s2 + $0x10] sm:$0xff] }
  0x47   : > { %335 = vrot.lane.b32.xlu1 %v862_v7, %s897_s23  ;;  %311 = vrot.lane.b32.xlu0 %v862_v7, %s896_s22 }
  0x48   : > { %287 = vrot.lane.b32.xlu2 %v862_v7, %s895_s21  ;;  %v221_v7 = vld [vmem:[%s1182_s2 + $0x30] sm:$0xff] }
  0x4f   : > { %366 = vperm.xlu1 %884, %v216_v29   ;;  %361 = vperm.xlu0 %883, %v215_v31  }
  0x50   : > { %497 = vmatmul.bf16.gmra.mxu0 %v813_v42  ;;  %371 = vperm.xlu2 %885, %v217_v6  }
  0x57   : > { %376 = vperm.xlu1 %884, %v218_v43   ;;  %386 = vperm.xlu0 %883, %v220_v60  }
  0x5f   : > { %391 = vperm.xlu1 %884, %v221_v7  }
  0x60   : > { %502 = vmatmul.bf16.gmra.mxu0 %v829_v59 }
  0x6a   : > { %v348_v8 = vpop.permute.xlu2 %347 }
  0x72   : > { %v300_v9 = vpop.permute.xlu2 %299 }
  0x7a   : > { %v298_v10 = vpop.permute.xlu2 %297 }
  0x81   : > { %v302_v11 = vpop.permute.xlu1 %301  ;;  %v326_v12 = vpop.permute.xlu0 %325 }
  0x82   : > { %537 = vmatpush.bf16.msra.mxu2 %v326_v12  ;;  %508 = vmatpush.bf16.msra.mxu1 %v302_v11  ;;  %v296_v13 = vpop.permute.xlu2 %295  ;;  %v219_v11 = vld [vmem:[%s1182_s2 + $0x20] sm:$0xff]  ;;  %v820_v12 = vld [vmem:[%s1181_s1 + $0x48] sm:$0xf] }
  0x83   : > { %381 = vperm.xlu2 %885, %v219_v11  }
  0x86   : > { %509 = vmatpush.bf16.msra.mxu1 %v300_v9  ;;  %v830_v9 = vld [vmem:[%s1181_s1 + $0x70] sm:$0xf0] }
  0x89   : > { %v350_v14 = vpop.permute.xlu0 %349  ;;  %v324_v15 = vpop.permute.xlu1 %323 }
  0x8a   : > { %566 = vmatpush.bf16.msra.mxu3 %v350_v14  ;;  %538 = vmatpush.bf16.msra.mxu2 %v324_v15  ;;  %v294_v16 = vpop.permute.xlu2 %293  ;;  %v855_v14 = vld [vmem:[%s1181_s1 + $0x4c] sm:$0xf]  ;;  %v822_v15 = vld [vmem:[%s1181_s1 + $0x58] sm:$0xf0] }
  0x8b   : > { %510 = vmatpush.bf16.msra.mxu1 %v298_v10  ;;  %v825_v17 = vor.u32 %v855_v14, %v822_v15  ;;  %396 = vperm.xlu2 %885, %v222_v18  }
  0x8e   : > { %567 = vmatpush.bf16.msra.mxu3 %v348_v8  ;;  %v858_v8 = vld [vmem:[%s1181_s1 + $0x64] sm:$0xf] }
  0x8f   : > { %511 = vmatpush.bf16.msra.mxu1 %v296_v13  ;;  %v833_v10 = vor.u32 %v858_v8, %v830_v9  ;;  %v857_v13 = vld [vmem:[%s1181_s1 + $0x54] sm:$0xf0] }
  0x91   : > { %v346_v20 = vpop.permute.xlu1 %345  ;;  %v322_v21 = vpop.permute.xlu0 %321 }
  0x92   : > { %539 = vmatpush.bf16.msra.mxu2 %v322_v21  ;;  %568 = vmatpush.bf16.msra.mxu3 %v346_v20  ;;  %v292_v22 = vpop.permute.xlu2 %291  ;;  %v861_v20 = vld [vmem:[%s1181_s1 + $0x74] sm:$0xf0]  ;;  %v859_v21 = vld [vmem:[%s1181_s1 + $0x6c] sm:$0xf] }
  0x93   : > { %512 = vmatpush.bf16.msra.mxu1 %v294_v16  ;;  %v821_v16 = vor.u32 %v857_v13, %v820_v12 }
  0x97   : > { %513 = vmatpush.bf16.msra.mxu1 %v292_v22  ;;  %v838_v22 = vld [vmem:[%s1181_s1 + $0x78] sm:$0xf0] }
  0x99   : > { %v344_v23 = vpop.permute.xlu1 %343  ;;  %v320_v24 = vpop.permute.xlu0 %319 }
  0x9a   : > { %540 = vmatpush.bf16.msra.mxu2 %v320_v24  ;;  %569 = vmatpush.bf16.msra.mxu3 %v344_v23  ;;  %v290_v25 = vpop.permute.xlu2 %289  ;;  %v837_v23 = vor.u32 %v861_v20, %v836_v19  ;;  %v841_v24 = vor.u32 %v859_v21, %v838_v22 }
  0x9b   : > { %514 = vmatpush.bf16.msra.mxu1 %v290_v25 }
  0xa1   : > { %v342_v34 = vpop.permute.xlu1 %341  ;;  %v318_v35 = vpop.permute.xlu0 %317 }
  0xa2   : > { %541 = vmatpush.bf16.msra.mxu2 %v318_v35  ;;  %570 = vmatpush.bf16.msra.mxu3 %v342_v34  ;;  %v288_v36 = vpop.permute.xlu2 %287 }
  0xa3   : > { %515 = vmatpush.bf16.msra.mxu1 %v288_v36 }
  0xa6   : > { %516 = vmatmul.bf16.vlgmr.msra.gmra.mxu1 %v785_v37 }
  0xa9   : > { %v340_v38 = vpop.permute.xlu1 %339  ;;  %v316_v39 = vpop.permute.xlu0 %315 }
  0xaa   : > { %542 = vmatpush.bf16.msra.mxu2 %v316_v39  ;;  %571 = vmatpush.bf16.msra.mxu3 %v340_v38  ;;  %v372_v43 = vpop.permute.xlu2 %371 }
  0xad   : > { %v488_v25 = vpop.f32.mrf.mxu0 }
  0xb1   : > { %v338_v46 = vpop.permute.xlu1 %337  ;;  %v314_v47 = vpop.permute.xlu0 %313 }
  0xb2   : > { %543 = vmatpush.bf16.msra.mxu2 %v314_v47  ;;  %572 = vmatpush.bf16.msra.mxu3 %v338_v46 }
  0xb5   : > { %v490_v27 = vpop.f32.mrf.mxu0 }
  0xb6   : > { %521 = vmatmul.bf16.gmra.mxu1 %v801_v48 }
  0xb9   : > { %v336_v53 = vpop.permute.xlu1 %335  ;;  %v312_v54 = vpop.permute.xlu0 %311 }
  0xba   : > { %544 = vmatpush.bf16.msra.mxu2 %v312_v54  ;;  %573 = vmatpush.bf16.msra.mxu3 %v336_v53 }
  0xbd   : > { %545 = vmatmul.bf16.vlgmr.msra.gmra.mxu2 %v789_v55  ;;  %574 = vmatmul.bf16.vlgmr.msra.gmra.mxu3 %v793_v56  ;;  %v493_v32 = vpop.f32.mrf.mxu0 }
  0xbe   : > { %v494_v51 = vadd.f32 %v493_v32, %v372_v43 }
  0xc1   : > { %v362_v28 = vpop.permute.xlu0 %361  ;;  %v367_v34 = vpop.permute.xlu1 %366 }
  0xc2   : > { %v489_v31 = vadd.f32 %v488_v25, %v362_v28  ;;  %v491_v39 = vadd.f32 %v490_v27, %v367_v34 }
  0xc5   : > { %v495_v45 = vpop.f32.mrf.mxu0 }
  0xc6   : > { %526 = vmatmul.bf16.gmra.mxu1 %v817_v63 }
  0xc9   : > { %v377_v57 = vpop.permute.xlu1 %376 }
  0xca   : > { %v496_v63 = vadd.f32 %v495_v45, %v377_v57 }
  0xcd   : > { %550 = vmatmul.bf16.gmra.mxu2 %v805_v4  ;;  %579 = vmatmul.bf16.gmra.mxu3 %v809_v5  ;;  %v498_v61 = vpop.f32.mrf.mxu0 }
  0xd1   : > { %v392_v27 = vpop.permute.xlu1 %391 }
  0xd5   : > { %v500_v11 = vpop.f32.mrf.mxu0 }
  0xd6   : > { %531 = vmatmul.bf16.gmra.mxu1 %v833_v10 }
  0xdd   : > { %555 = vmatmul.bf16.gmra.mxu2 %v821_v16  ;;  %584 = vmatmul.bf16.gmra.mxu3 %v825_v17  ;;  %v382_v3 = vpop.permute.xlu2 %381  ;;  %v387_v17 = vpop.permute.xlu0 %386 }
  0xde   : > { %v499_v10 = vadd.f32 %v498_v61, %v382_v3  ;;  %v501_v22 = vadd.f32 %v500_v11, %v387_v17 }
  0xed   : > { %560 = vmatmul.bf16.gmra.mxu2 %v837_v23  ;;  %589 = vmatmul.bf16.gmra.mxu3 %v841_v24  ;;  %v503_v24 = vpop.f32.mrf.mxu0 }
 0x123   : > { %v517_v26 = vpop.f32.mrf.mxu1 }
 0x124   : > { %v518_v33 = vadd.f32 %v517_v26, %v489_v31 }
 0x12b   : > { %v519_v29 = vpop.f32.mrf.mxu1 }
 0x12c   : > { %v520_v46 = vadd.f32 %v519_v29, %v491_v39  ;;  %v505_v39 = vpop.f32.mrf.mxu0 }
 0x133   : > { %v522_v37 = vpop.f32.mrf.mxu1 }
 0x134   : > { %v523_v55 = vadd.f32 %v522_v37, %v494_v51 }
 0x13b   : > { %v524_v52 = vpop.f32.mrf.mxu1 }
 0x13c   : > { %v525_v5 = vadd.f32 %v524_v52, %v496_v63 }
 0x140   : > { %v546_v35 = vpop.f32.mrf.mxu2  ;;  %v575_v36 = vpop.f32.mrf.mxu3 }
 0x141   : > { %v547_v38 = vadd.f32 %v546_v35, %v518_v33  ;;  %v504_v35 = vadd.f32 %v503_v24, %v392_v27 }
 0x143   : > { %v576_v40 = vadd.f32 %v575_v36, %v547_v38  ;;  %v527_v1 = vpop.f32.mrf.mxu1  ;;  %v397_v38 = vpop.permute.xlu2 %396 }
 0x144   : > { %v528_v14 = vadd.f32 %v527_v1, %v499_v10 }
 0x145   : > { %v595_v42 = vmax.f32 %v576_v40, 0.0 }
 0x147   : > { %v607_v44 = vmul.f32 %v1089_v41, %v595_v42 }
 0x148   : > { %v548_v47 = vpop.f32.mrf.mxu2  ;;  %v577_v48 = vpop.f32.mrf.mxu3 }
 0x149   : > { %v624_v49 = vpack.c.bf16 %v607_v44, %v607_v44  ;;  %v549_v50 = vadd.f32 %v548_v47, %v520_v46  ;;  %v506_v47 = vadd.f32 %v505_v39, %v397_v38 }
 0x14b   : > { %v578_v53 = vadd.f32 %v577_v48, %v549_v50  ;;  %640 = vrot.lane.b32.xlu0 %v624_v49, %s899_s8  ;;  %v529_v15 = vpop.f32.mrf.mxu1 }
 0x14c   : > { %v530_v28 = vadd.f32 %v529_v15, %v501_v22 }
 0x14d   : > { %v596_v54 = vmax.f32 %v578_v53, 0.0 }
 0x14f   : > { %v608_v56 = vmul.f32 %v1089_v41, %v596_v54 }
 0x150   : > { %v551_v58 = vpop.f32.mrf.mxu2  ;;  %v580_v59 = vpop.f32.mrf.mxu3 }
 0x151   : > { %v625_v60 = vpack.c.bf16 %v608_v56, %v608_v56  ;;  %v552_v62 = vadd.f32 %v551_v58, %v523_v55 }
 0x153   : > { %v581_v0 = vadd.f32 %v580_v59, %v552_v62  ;;  %642 = vrot.lane.b32.xlu1 %v625_v60, %s899_s8  ;;  %v532_v34 = vpop.f32.mrf.mxu1 }
 0x154   : > { %v533_v42 = vadd.f32 %v532_v34, %v504_v35 }
 0x155   : > { %v597_v2 = vmax.f32 %v581_v0, 0.0 }
 0x157   : > { %v609_v4 = vmul.f32 %v1089_v41, %v597_v2 }
 0x158   : > { %v553_v6 = vpop.f32.mrf.mxu2  ;;  %v582_v7 = vpop.f32.mrf.mxu3 }
 0x159   : > { %v626_v8 = vpack.c.bf16 %v609_v4, %v609_v4  ;;  %v554_v9 = vadd.f32 %v553_v6, %v525_v5 }
 0x15b   : > { %v583_v12 = vadd.f32 %v582_v7, %v554_v9  ;;  %644 = vrot.lane.b32.xlu2 %v626_v8, %s899_s8  ;;  %v534_v49 = vpop.f32.mrf.mxu1 }
 0x15c   : > { %v535_v51 = vadd.f32 %v534_v49, %v506_v47 }
 0x15d   : > { %v598_v13 = vmax.f32 %v583_v12, 0.0 }
 0x15f   : > { %v610_v16 = vmul.f32 %v1089_v41, %v598_v13 }
 0x160   : > { %v556_v18 = vpop.f32.mrf.mxu2  ;;  %v585_v19 = vpop.f32.mrf.mxu3 }
 0x161   : > { %v627_v20 = vpack.c.bf16 %v610_v16, %v610_v16  ;;  %v557_v21 = vadd.f32 %v556_v18, %v528_v14 }
 0x163   : > { %v586_v23 = vadd.f32 %v585_v19, %v557_v21  ;;  %646 = vrot.lane.b32.xlu0 %v627_v20, %s899_s8 }
 0x165   : > { %v599_v25 = vmax.f32 %v586_v23, 0.0 }
 0x167   : > { %v611_v26 = vmul.f32 %v1089_v41, %v599_v25 }
 0x168   : > { %v558_v29 = vpop.f32.mrf.mxu2  ;;  %v587_v31 = vpop.f32.mrf.mxu3 }
 0x169   : > { %v628_v32 = vpack.c.bf16 %v611_v26, %v611_v26  ;;  %v559_v33 = vadd.f32 %v558_v29, %v530_v28 }
 0x16b   : > { %v588_v36 = vadd.f32 %v587_v31, %v559_v33  ;;  %648 = vrot.lane.b32.xlu1 %v628_v32, %s899_s8 }
 0x16d   : > { %v600_v37 = vmax.f32 %v588_v36, 0.0 }
 0x16f   : > { %v612_v40 = vmul.f32 %v1089_v41, %v600_v37 }
 0x170   : > { %v561_v43 = vpop.f32.mrf.mxu2  ;;  %v590_v44 = vpop.f32.mrf.mxu3 }
 0x171   : > { %v629_v45 = vpack.c.bf16 %v612_v40, %v612_v40  ;;  %v562_v46 = vadd.f32 %v561_v43, %v533_v42 }
 0x173   : > { %v591_v48 = vadd.f32 %v590_v44, %v562_v46  ;;  %650 = vrot.lane.b32.xlu2 %v629_v45, %s899_s8 }
 0x175   : > { %v601_v50 = vmax.f32 %v591_v48, 0.0 }
 0x177   : > { %v613_v52 = vmul.f32 %v1089_v41, %v601_v50 }
 0x178   : > { %v563_v53 = vpop.f32.mrf.mxu2  ;;  %v592_v56 = vpop.f32.mrf.mxu3 }
 0x179   : > { %v630_v54 = vpack.c.bf16 %v613_v52, %v613_v52  ;;  %v564_v55 = vadd.f32 %v563_v53, %v535_v51 }
 0x17b   : > { %v593_v57 = vadd.f32 %v592_v56, %v564_v55  ;;  %652 = vrot.lane.b32.xlu0 %v630_v54, %s899_s8 }
 0x17d   : > { %v602_v58 = vmax.f32 %v593_v57, 0.0 }
 0x17f   : > { %v614_v59 = vmul.f32 %v1089_v41, %v602_v58 }
 0x181   : > { %v631_v60 = vpack.c.bf16 %v614_v59, %v614_v59 }
 0x183   : > { %654 = vrot.lane.b32.xlu1 %v631_v60, %s899_s8 }
 0x1b5   : > { %v645_v61 = vpop.permute.xlu2 %644 }
 0x1b6   : > { %667 = vst.msk [vmem:[%s1102_s12 + $0x8] sm:$0xf] %vm664_vm1, %v645_v61 }
 0x1b7   : > { %676 = vst.msk [vmem:[%s1102_s12 + $0x8] sm:$0xf] %vm673_vm2, %v898_v30 }
 0x1bd   : > { %v641_v62 = vpop.permute.xlu0 %640 }
 0x1be   : > { %665 = vst.msk [vmem:[%s1102_s12] sm:$0xf] %vm664_vm1, %v641_v62 }
 0x1bf   : > { %674 = vst.msk [vmem:[%s1102_s12] sm:$0xf] %vm673_vm2, %v898_v30 }
 0x1c5   : > { %v643_v41 = vpop.permute.xlu1 %642 }
 0x1c6   : > { %666 = vst.msk [vmem:[%s1102_s12 + $0x4] sm:$0xf] %vm664_vm1, %v643_v41 }
 0x1c7   : > { %675 = vst.msk [vmem:[%s1102_s12 + $0x4] sm:$0xf] %vm673_vm2, %v898_v30 }
 0x1cd   : > { %v651_v63 = vpop.permute.xlu2 %650 }
 0x1ce   : > { %670 = vst.msk [vmem:[%s1102_s12 + $0x14] sm:$0xf] %vm664_vm1, %v651_v63 }
 0x1cf   : > { %679 = vst.msk [vmem:[%s1102_s12 + $0x14] sm:$0xf] %vm673_vm2, %v898_v30 }
 0x1d5   : > { %v647_v0 = vpop.permute.xlu0 %646 }
 0x1d6   : > { %668 = vst.msk [vmem:[%s1102_s12 + $0xc] sm:$0xf] %vm664_vm1, %v647_v0 }
 0x1d7   : > { %677 = vst.msk [vmem:[%s1102_s12 + $0xc] sm:$0xf] %vm673_vm2, %v898_v30 }
 0x1dd   : > { %v649_v1 = vpop.permute.xlu1 %648 }
 0x1de   : > { %669 = vst.msk [vmem:[%s1102_s12 + $0x10] sm:$0xf] %vm664_vm1, %v649_v1 }
 0x1df   : > { %678 = vst.msk [vmem:[%s1102_s12 + $0x10] sm:$0xf] %vm673_vm2, %v898_v30 }
 0x1ed   : > { %v653_v2 = vpop.permute.xlu0 %652 }
 0x1ee   : > { %671 = vst.msk [vmem:[%s1102_s12 + $0x18] sm:$0xf] %vm664_vm1, %v653_v2 }
 0x1ef   : > { %680 = vst.msk [vmem:[%s1102_s12 + $0x18] sm:$0xf] %vm673_vm2, %v898_v30 }
 0x1f5   : > { %v655_v3 = vpop.permute.xlu1 %654 }
 0x1f6   : > { %672 = vst.msk [vmem:[%s1102_s12 + $0x1c] sm:$0xf] %vm664_vm1, %v655_v3 }
 0x1f7   : > { %681 = vst.msk [vmem:[%s1102_s12 + $0x1c] sm:$0xf] %vm673_vm2, %v898_v30 }
 0x1f8 PF: > { %s14_s15 = sadd.s32 1, %s893_s15  }
 0x1f9   : > { %p11_p4 = scmp.ge.s32.totalorder %s14_s15, 4  }
 0x1fb   :  { %13 = sbr.rel (!%p11_p4) target bundleno = 1 (0x1), region = 66 }

// kernel: unet_forward.17
= control target key start
LH: loop header
LB: loop body
LE: loop exit
PB: predicated region body
PF: predicated region fallthrough
CT: control target
= control target key end

     0   :  { %s3229_s15 = smov 0   ;;  %s4455_s0 = inlined_call_operand.vmem [shape: bf16[2,64,128], index: 0, kind: input, shape index: {}]   ;;  %s4456_s1 = inlined_call_operand.vmem [shape: bf16[4,64,576], index: 1, kind: input, shape index: {}]   ;;  %s4457_s2 = inlined_call_operand.vmem [shape: f32[4,64,1], index: 2, kind: input, shape index: {}]   ;;  %s4458_s3 = inlined_call_operand.vmem [shape: f32[1,24], index: 3, kind: input, shape index: {}]   ;;  %s4459_s4 = inlined_call_operand.vmem [shape: bf16[2,64,128], index: 4, kind: output, shape index: {}]  }
   0x1 LB: > { %s2480_s16 = sadd.s32 4294967295, %s3192_s15   ;;  %p2484_p0 = scmp.ge.s32.totalorder %s3192_s15, 1  ;;  %s3192_s15 = sphi %s3229_s15, %s14_s15  }
   0x2   : > { %p162_p1 = scmp.lt.s32.totalorder %s3192_s15, 3 }
   0x4   : > { %p163_p2 = pnand %p2484_p0, %p162_p1 }
   0x5   : > { %p188_p3 = scmp.lt.s32.totalorder (!%p163_p2), %s2480_s16, 1  ;;  %s3194_s21 = smov (!%p163_p2), 127  }
   0x6   : > { %166 = sbr.rel (%p163_p2) target bundleno = 2121 (0x849), region = 36  ;;  %s3195_s22 = smov (!%p163_p2), 120  }
   0x7   : > { %s3196_s23 = smov (!%p163_p2), 115   ;;  %s3197_s24 = smov (!%p163_p2), 122  }
   0x8   : > { %s3198_s25 = smov (!%p163_p2), 121   ;;  %s3199_s26 = smov (!%p163_p2), 116  }
   0x9   : > { %s3200_s27 = smov (!%p163_p2), 126   ;;  %s3201_s28 = smov (!%p163_p2), 114  }
   0xa   : > { %s3203_s29 = smov (!%p163_p2), 7  }
   0xb   : > { %s4461_s16 = smov (!%p188_p3, %s2480_s16), 1  ;;  %v247_v10 = vld [vmem:[%s4457_s2 + $0x38] sm:$0xff]  ;;  %v244_v11 = vld [vmem:[%s4457_s2 + $0x20] sm:$0xff]  ;;  %v3202_v12 = vmov 0   ;;  %v242_v17 = vld [vmem:[%s4457_s2 + $0x10] sm:$0xff]  ;;  %vm516_vm0 = vcmask 523264  }
   0xc   : > { %s2987_s17 = sshll.u32 %s4461_s16, 5  ;;  %3143 = vset.pattern.permute.xlu1 %v3202_v12  ;;  %199 = vst [vmem:[#allocation2] sm:$0xf] %v3202_v12  ;;  %3142 = vset.pattern.permute.xlu0 %v3202_v12  ;;  %v240_v16 = vld [vmem:[%s4457_s2] sm:$0xff]  ;;  %v241_v21 = vld [vmem:[%s4457_s2 + $0x8] sm:$0xff]  ;;  %v246_v33 = vld [vmem:[%s4457_s2 + $0x30] sm:$0xff] }
   0xd   : > { %s3245_s20 = scalar_lea.vmem %s4455_s0, %s2987_s17  ;;  %200 = vst [vmem:[#allocation2 + $0x4] sm:$0xf] %v3202_v12  ;;  %3141 = vset.pattern.permute.xlu2 %v3202_v12  ;;  %v2507_v25 = vld [vmem:[%s4456_s1] sm:$0xf]  ;;  %v2991_v26 = vld [vmem:[%s4456_s1 + $0x10] sm:$0xf0] }
   0xe   : > { %v3248_v0 = vld [vmem:[%s3245_s20 + $0x18] sm:$0xff]  ;;  %v3251_v1 = vld [vmem:[%s3245_s20 + $0x8] sm:$0xff]  ;;  %v3260_v2 = vld [vmem:[%s3245_s20 + $0x10] sm:$0xff]  ;;  %201 = vst [vmem:[#allocation2 + $0x8] sm:$0xf] %v3202_v12  ;;  %v2508_v29 = vor.u32 %v2991_v26, %v2507_v25  ;;  %vm733_vm1 = vcmask 248888  }
   0xf   : > { %286 = vrot.lane.b32.xlu0 %v3248_v0, %s3194_s21  ;;  %282 = vrot.lane.b32.xlu1 %v3251_v1, %s3194_s21  ;;  %v3263_v3 = vld [vmem:[%s3245_s20] sm:$0xff]  ;;  %202 = vst [vmem:[#allocation2 + $0xc] sm:$0xf] %v3202_v12  ;;  %v2527_v34 = vld [vmem:[%s4456_s1 + $0x28] sm:$0xf]  ;;  %vm2359_vm2 = vcmask 52224  }
  0x10   : > { %334 = vrot.lane.b32.xlu2 %v3248_v0, %s3195_s22  ;;  %203 = vst [vmem:[#allocation2 + $0x10] sm:$0xf] %v3202_v12  ;;  %v2996_v35 = vld [vmem:[%s4456_s1 + $0x38] sm:$0xf0]  ;;  %v245_v39 = vld [vmem:[%s4457_s2 + $0x28] sm:$0xff]  ;;  %vm2416_vm3 = vcmask 1043704  }
  0x11   : > { %204 = vst [vmem:[#allocation2 + $0x14] sm:$0xf] %v3202_v12  ;;  %v2528_v38 = vor.u32 %v2996_v35, %v2527_v34  ;;  %v2515_v43 = vld [vmem:[%s4456_s1 + $0x8] sm:$0xf]  ;;  %v2992_v44 = vld [vmem:[%s4456_s1 + $0x18] sm:$0xf0] }
  0x12   : > { %205 = vst [vmem:[#allocation2 + $0x18] sm:$0xf] %v3202_v12  ;;  %v2516_v45 = vor.u32 %v2992_v44, %v2515_v43  ;;  %v243_v46 = vld [vmem:[%s4457_s2 + $0x18] sm:$0xff]  ;;  %v2547_v47 = vld [vmem:[%s4456_s1 + $0x50] sm:$0xf] }
  0x13   : > { %206 = vst [vmem:[#allocation2 + $0x1c] sm:$0xf] %v3202_v12  ;;  %v3001_v48 = vld [vmem:[%s4456_s1 + $0x60] sm:$0xf0]  ;;  %v2509_v53 = vld [vmem:[%s4456_s1 + $0x14] sm:$0xf0] }
  0x14   : > { %207 = vst [vmem:[#allocation3] sm:$0xf] %v3202_v12  ;;  %v2548_v51 = vor.u32 %v3001_v48, %v2547_v47  ;;  %v2989_v52 = vld [vmem:[%s4456_s1 + $0x4] sm:$0xf]  ;;  %v2990_v56 = vld [vmem:[%s4456_s1 + $0xc] sm:$0xf] }
  0x15   : > { %208 = vst [vmem:[#allocation3 + $0x4] sm:$0xf] %v3202_v12  ;;  %v2512_v55 = vor.u32 %v2989_v52, %v2509_v53  ;;  %v2517_v57 = vld [vmem:[%s4456_s1 + $0x1c] sm:$0xf0]  ;;  %v2535_v61 = vld [vmem:[%s4456_s1 + $0x30] sm:$0xf] }
  0x16   : > { %209 = vst [vmem:[#allocation3 + $0x8] sm:$0xf] %v3202_v12  ;;  %v2520_v59 = vor.u32 %v2990_v56, %v2517_v57  ;;  %v2997_v62 = vld [vmem:[%s4456_s1 + $0x40] sm:$0xf0]  ;;  %v3007_v25 = vld [vmem:[%s4456_s1 + $0x90] sm:$0xf0] }
  0x17   : > { %284 = vrot.lane.b32.xlu0 %v3260_v2, %s3194_s21  ;;  %280 = vrot.lane.b32.xlu1 %v3263_v3, %s3194_s21  ;;  %210 = vst [vmem:[#allocation3 + $0xc] sm:$0xf] %v3202_v12  ;;  %v2536_v63 = vor.u32 %v2997_v62, %v2535_v61  ;;  %v2577_v34 = vld [vmem:[%s4456_s1 + $0x94] sm:$0xf0] }
  0x18   : > { %358 = vrot.lane.b32.xlu2 %v3248_v0, %s3196_s23  ;;  %211 = vst [vmem:[#allocation3 + $0x10] sm:$0xf] %v3202_v12 }
  0x19   : > { %212 = vst [vmem:[#allocation3 + $0x14] sm:$0xf] %v3202_v12 }
  0x1a   : > { %213 = vst [vmem:[#allocation3 + $0x18] sm:$0xf] %v3202_v12 }
  0x1b   : > { %214 = vst [vmem:[#allocation3 + $0x1c] sm:$0xf] %v3202_v12 }
  0x1f   : > { %310 = vrot.lane.b32.xlu0 %v3248_v0, %s3197_s24  ;;  %332 = vrot.lane.b32.xlu1 %v3260_v2, %s3195_s22 }
  0x20   : > { %356 = vrot.lane.b32.xlu2 %v3260_v2, %s3196_s23 }
  0x27   : > { %308 = vrot.lane.b32.xlu0 %v3260_v2, %s3197_s24  ;;  %330 = vrot.lane.b32.xlu1 %v3251_v1, %s3195_s22 }
  0x28   : > { %354 = vrot.lane.b32.xlu2 %v3251_v1, %s3196_s23 }
  0x2f   : > { %306 = vrot.lane.b32.xlu0 %v3251_v1, %s3197_s24  ;;  %328 = vrot.lane.b32.xlu1 %v3263_v3, %s3195_s22 }
  0x30   : > { %352 = vrot.lane.b32.xlu2 %v3263_v3, %s3196_s23 }
  0x37   : > { %304 = vrot.lane.b32.xlu0 %v3263_v3, %s3197_s24  ;;  %322 = vrot.lane.b32.xlu1 %v3248_v0, %s3198_s25 }
  0x38   : > { %346 = vrot.lane.b32.xlu2 %v3248_v0, %s3199_s26 }
  0x3f   : > { %298 = vrot.lane.b32.xlu0 %v3248_v0, %s3200_s27  ;;  %320 = vrot.lane.b32.xlu1 %v3260_v2, %s3198_s25 }
  0x40   : > { %344 = vrot.lane.b32.xlu2 %v3260_v2, %s3199_s26 }
  0x47   : > { %296 = vrot.lane.b32.xlu0 %v3260_v2, %s3200_s27  ;;  %318 = vrot.lane.b32.xlu1 %v3251_v1, %s3198_s25 }
  0x48   : > { %342 = vrot.lane.b32.xlu2 %v3251_v1, %s3199_s26 }
  0x4f   : > { %370 = vrot.lane.b32.xlu0 %v3248_v0, %s3201_s28  ;;  %294 = vrot.lane.b32.xlu1 %v3251_v1, %s3200_s27 }
  0x50   : > { %316 = vrot.lane.b32.xlu2 %v3263_v3, %s3198_s25 }
  0x57   : > { %340 = vrot.lane.b32.xlu0 %v3263_v3, %s3199_s26  ;;  %368 = vrot.lane.b32.xlu1 %v3260_v2, %s3201_s28 }
  0x58   : > { %292 = vrot.lane.b32.xlu2 %v3263_v3, %s3200_s27 }
  0x5f   : > { %366 = vrot.lane.b32.xlu0 %v3251_v1, %s3201_s28  ;;  %364 = vrot.lane.b32.xlu1 %v3263_v3, %s3201_s28 }
  0x60   : > { %408 = vperm.xlu2 %3141, %v246_v33   ;;  %v3005_v33 = vld [vmem:[%s4456_s1 + $0x84] sm:$0xf] }
  0x61   : > { %v2580_v35 = vor.u32 %v3005_v33, %v2577_v34 }
  0x67   : > { %413 = vperm.xlu0 %3142, %v247_v10   ;;  %398 = vperm.xlu1 %3143, %v244_v11   ;;  %v2555_v11 = vld [vmem:[%s4456_s1 + $0x58] sm:$0xf] }
  0x68   : > { %403 = vperm.xlu2 %3141, %v245_v39   ;;  %v2583_v39 = vld [vmem:[%s4456_s1 + $0x88] sm:$0xf] }
  0x6a   : > { %v335_v4 = vpop.permute.xlu2 %334 }
  0x6b   : > { %587 = vmatpush.bf16.msra.mxu2 %v335_v4  ;;  %v2994_v4 = vld [vmem:[%s4456_s1 + $0x2c] sm:$0xf] }
  0x6f   : > { %378 = vperm.xlu0 %3142, %v240_v16   ;;  %388 = vperm.xlu1 %3143, %v242_v17   ;;  %v2993_v16 = vld [vmem:[%s4456_s1 + $0x20] sm:$0xf0] }
  0x70   : > { %393 = vperm.xlu2 %3141, %v243_v46  }
  0x72   : > { %v359_v5 = vpop.permute.xlu2 %358 }
  0x73   : > { %616 = vmatpush.bf16.msra.mxu3 %v359_v5  ;;  %v2529_v5 = vld [vmem:[%s4456_s1 + $0x3c] sm:$0xf0] }
  0x77   : > { %383 = vperm.xlu1 %3143, %v241_v21   ;;  %v3000_v21 = vld [vmem:[%s4456_s1 + $0x5c] sm:$0xf] }
  0x7a   : > { %v357_v6 = vpop.permute.xlu2 %356 }
  0x7b   : > { %617 = vmatpush.bf16.msra.mxu3 %v357_v6 }
  0x81   : > { %v287_v7 = vpop.permute.xlu0 %286  ;;  %v283_v8 = vpop.permute.xlu1 %282 }
  0x82   : > { %529 = vmatpush.bf16.msra.mxu0 %v287_v7  ;;  %v355_v9 = vpop.permute.xlu2 %354  ;;  %v2532_v7 = vor.u32 %v2994_v4, %v2529_v5 }
  0x83   : > { %618 = vmatpush.bf16.msra.mxu3 %v355_v9  ;;  %v2537_v9 = vld [vmem:[%s4456_s1 + $0x44] sm:$0xf0] }
  0x89   : > { %v285_v13 = vpop.permute.xlu0 %284  ;;  %v281_v14 = vpop.permute.xlu1 %280 }
  0x8a   : > { %530 = vmatpush.bf16.msra.mxu0 %v285_v13  ;;  %v353_v15 = vpop.permute.xlu2 %352  ;;  %v3002_v13 = vld [vmem:[%s4456_s1 + $0x68] sm:$0xf0] }
  0x8b   : > { %619 = vmatpush.bf16.msra.mxu3 %v353_v15  ;;  %v2523_v15 = vld [vmem:[%s4456_s1 + $0x10] sm:$0xf] }
  0x8c   : > { %v2524_v17 = vor.u32 %v2993_v16, %v2523_v15 }
  0x8e   : > { %531 = vmatpush.bf16.msra.mxu0 %v283_v8  ;;  %v2995_v8 = vld [vmem:[%s4456_s1 + $0x34] sm:$0xf] }
  0x8f   : > { %v2540_v10 = vor.u32 %v2995_v8, %v2537_v9 }
  0x91   : > { %v311_v18 = vpop.permute.xlu0 %310  ;;  %v333_v19 = vpop.permute.xlu1 %332 }
  0x92   : > { %532 = vmatpush.bf16.msra.mxu0 %v281_v14  ;;  %558 = vmatpush.bf16.msra.mxu1 %v311_v18  ;;  %v347_v20 = vpop.permute.xlu2 %346  ;;  %v2556_v14 = vor.u32 %v3002_v13, %v2555_v11  ;;  %v2999_v18 = vld [vmem:[%s4456_s1 + $0x54] sm:$0xf] }
  0x93   : > { %588 = vmatpush.bf16.msra.mxu2 %v333_v19  ;;  %620 = vmatpush.bf16.msra.mxu3 %v347_v20  ;;  %v2549_v19 = vld [vmem:[%s4456_s1 + $0x64] sm:$0xf0] }
  0x94   : > { %v2552_v20 = vor.u32 %v2999_v18, %v2549_v19 }
  0x96   : > { %533 = vmatpush.bf16.msra.mxu0 %v3248_v0  ;;  %v2567_v0 = vld [vmem:[%s4456_s1 + $0x78] sm:$0xf] }
  0x99   : > { %v309_v22 = vpop.permute.xlu0 %308  ;;  %v331_v23 = vpop.permute.xlu1 %330 }
  0x9a   : > { %534 = vmatpush.bf16.msra.mxu0 %v3260_v2  ;;  %559 = vmatpush.bf16.msra.mxu1 %v309_v22  ;;  %v345_v24 = vpop.permute.xlu2 %344  ;;  %v2557_v22 = vld [vmem:[%s4456_s1 + $0x6c] sm:$0xf0] }
  0x9b   : > { %589 = vmatpush.bf16.msra.mxu2 %v331_v23  ;;  %621 = vmatpush.bf16.msra.mxu3 %v345_v24  ;;  %v2560_v23 = vor.u32 %v3000_v21, %v2557_v22  ;;  %v2575_v24 = vld [vmem:[%s4456_s1 + $0x80] sm:$0xf] }
  0x9c   : > { %v2576_v26 = vor.u32 %v3007_v25, %v2575_v24 }
  0x9e   : > { %535 = vmatpush.bf16.msra.mxu0 %v3251_v1  ;;  %v3006_v1 = vld [vmem:[%s4456_s1 + $0x88] sm:$0xf0] }
  0x9f   : > { %v2568_v2 = vor.u32 %v3006_v1, %v2567_v0 }
  0xa1   : > { %v307_v27 = vpop.permute.xlu0 %306  ;;  %v329_v28 = vpop.permute.xlu1 %328 }
  0xa2   : > { %536 = vmatpush.bf16.msra.mxu0 %v3263_v3  ;;  %560 = vmatpush.bf16.msra.mxu1 %v307_v27  ;;  %v343_v30 = vpop.permute.xlu2 %342  ;;  %v2543_v27 = vld [vmem:[%s4456_s1 + $0x38] sm:$0xf] }
  0xa3   : > { %590 = vmatpush.bf16.msra.mxu2 %v329_v28  ;;  %622 = vmatpush.bf16.msra.mxu3 %v343_v30  ;;  %v2998_v28 = vld [vmem:[%s4456_s1 + $0x48] sm:$0xf0]  ;;  %v3004_v30 = vld [vmem:[%s4456_s1 + $0x7c] sm:$0xf] }
  0xa5   : > { %537 = vmatmul.bf16.vlgmr.msra.gmra.mxu0 %v2508_v29  ;;  %v2544_v29 = vor.u32 %v2998_v28, %v2543_v27 }
  0xa9   : > { %v305_v31 = vpop.permute.xlu0 %304  ;;  %v323_v32 = vpop.permute.xlu1 %322 }
  0xaa   : > { %561 = vmatpush.bf16.msra.mxu1 %v305_v31  ;;  %591 = vmatpush.bf16.msra.mxu2 %v323_v32  ;;  %v317_v40 = vpop.permute.xlu2 %316  ;;  %v2569_v31 = vld [vmem:[%s4456_s1 + $0x8c] sm:$0xf0] }
  0xab   : > { %v2572_v32 = vor.u32 %v3004_v30, %v2569_v31  ;;  %v3519_v30 = vld [vmem:[%s4458_s3] ss:$0 sm:$0xff] }
  0xb1   : > { %v299_v36 = vpop.permute.xlu0 %298  ;;  %v321_v37 = vpop.permute.xlu1 %320 }
  0xb2   : > { %562 = vmatpush.bf16.msra.mxu1 %v299_v36  ;;  %592 = vmatpush.bf16.msra.mxu2 %v321_v37  ;;  %v293_v54 = vpop.permute.xlu2 %292  ;;  %v2563_v36 = vld [vmem:[%s4456_s1 + $0x60] sm:$0xf]  ;;  %v3003_v37 = vld [vmem:[%s4456_s1 + $0x70] sm:$0xf0] }
  0xb5   : > { %542 = vmatmul.bf16.gmra.mxu0 %v2528_v38  ;;  %v2564_v38 = vor.u32 %v3003_v37, %v2563_v36 }
  0xb9   : > { %v297_v41 = vpop.permute.xlu0 %296  ;;  %v319_v42 = vpop.permute.xlu1 %318 }
  0xba   : > { %563 = vmatpush.bf16.msra.mxu1 %v297_v41  ;;  %593 = vmatpush.bf16.msra.mxu2 %v319_v42 }
  0xbe   : > { %594 = vmatpush.bf16.msra.mxu2 %v317_v40  ;;  %v3008_v40 = vld [vmem:[%s4456_s1 + $0x98] sm:$0xf0] }
  0xbf   : > { %v2584_v41 = vor.u32 %v3008_v40, %v2583_v39 }
  0xc1   : > { %v371_v49 = vpop.permute.xlu0 %370  ;;  %v295_v50 = vpop.permute.xlu1 %294  ;;  %595 = vmatmul.bf16.vlgmr.msra.gmra.mxu2 %v2516_v45 }
  0xc2   : > { %564 = vmatpush.bf16.msra.mxu1 %v295_v50  ;;  %649 = vmatpush.bf16.msrb.mxu0 %v371_v49 }
  0xc5   : > { %547 = vmatmul.bf16.gmra.mxu0 %v2548_v51 }
  0xc6   : > { %565 = vmatpush.bf16.msra.mxu1 %v293_v54 }
  0xc9   : > { %v341_v58 = vpop.permute.xlu0 %340  ;;  %566 = vmatmul.bf16.vlgmr.msra.gmra.mxu1 %v2512_v55  ;;  %v369_v60 = vpop.permute.xlu1 %368 }
  0xca   : > { %623 = vmatpush.bf16.msra.mxu3 %v341_v58  ;;  %650 = vmatpush.bf16.msrb.mxu0 %v369_v60 }
  0xcd   : > { %624 = vmatmul.bf16.vlgmr.msra.gmra.mxu3 %v2520_v59 }
  0xd1   : > { %600 = vmatmul.bf16.gmra.mxu2 %v2536_v63  ;;  %v367_v3 = vpop.permute.xlu0 %366  ;;  %v365_v6 = vpop.permute.xlu1 %364 }
  0xd2   : > { %651 = vmatpush.bf16.msrb.mxu0 %v367_v3 }
  0xd5   : > { %552 = vmatmul.bf16.gmra.mxu0 %v2568_v2  ;;  %v409_v2 = vpop.permute.xlu2 %408 }
  0xd6   : > { %652 = vmatpush.bf16.msrb.mxu0 %v365_v6 }
  0xd9   : > { %571 = vmatmul.bf16.gmra.mxu1 %v2532_v7  ;;  %v3498_v45 = vpop.permute.xlu0 %413  ;;  %v399_v13 = vpop.permute.xlu1 %398 }
  0xdd   : > { %629 = vmatmul.bf16.gmra.mxu3 %v2540_v10  ;;  %v404_v7 = vpop.permute.xlu2 %403 }
  0xe1   : > { %605 = vmatmul.bf16.gmra.mxu2 %v2556_v14  ;;  %v379_v47 = vpop.permute.xlu0 %378 }
  0xe5   : > { %2585 = vmatmul.msk.bf16.vlgmr.msrb.gmra.mxu0 %vm516_vm0, %v2524_v17  ;;  %v394_v14 = vpop.permute.xlu2 %393 }
  0xe9   : > { %576 = vmatmul.bf16.gmra.mxu1 %v2552_v20 }
  0xed   : > { %634 = vmatmul.bf16.gmra.mxu3 %v2560_v23 }
  0xf1   : > { %610 = vmatmul.bf16.gmra.mxu2 %v2576_v26 }
  0xf5   : > { %2586 = vmatmul.msk.bf16.gmra.mxu0 %vm516_vm0, %v2544_v29 }
  0xf9   : > { %581 = vmatmul.bf16.gmra.mxu1 %v2572_v32 }
  0xfd   : > { %639 = vmatmul.bf16.gmra.mxu3 %v2580_v35 }
 0x105   : > { %2587 = vmatmul.msk.bf16.gmra.mxu0 %vm516_vm0, %v2564_v38 }
 0x115   : > { %2588 = vmatmul.msk.bf16.gmra.mxu0 %vm516_vm0, %v2584_v41 }
 0x122   : > { %v538_v42 = vpop.f32.mrf.mxu0 }
 0x123   : > { %v539_v49 = vadd.f32 %v538_v42, %v379_v47 }
 0x12a   : > { %v3494_v43 = vpop.f32.mrf.mxu0 }
 0x132   : > { %v3496_v44 = vpop.f32.mrf.mxu0 }
 0x13a   : > { %v545_v46 = vpop.f32.mrf.mxu0 }
 0x13b   : > { %v546_v18 = vadd.f32 %v545_v46, %v394_v14  ;;  %v389_v46 = vpop.permute.xlu1 %388 }
 0x142   : > { %v548_v48 = vpop.f32.mrf.mxu0 }
 0x143   : > { %v549_v16 = vadd.f32 %v548_v48, %v399_v13 }
 0x144   : > { %v596_v51 = vpop.f32.mrf.mxu2 }
 0x146   : > { %v567_v50 = vpop.f32.mrf.mxu1 }
 0x147   : > { %v568_v52 = vadd.f32 %v567_v50, %v539_v49 }
 0x149   : > { %v597_v53 = vadd.f32 %v596_v51, %v568_v52 }
 0x14a   : > { %v550_v54 = vpop.f32.mrf.mxu0 }
 0x14b   : > { %v551_v40 = vadd.f32 %v550_v54, %v404_v7 }
 0x14c   : > { %v3502_v59 = vpop.f32.mrf.mxu2 }
 0x14e   : > { %v3500_v58 = vpop.f32.mrf.mxu1 }
 0x150   : > { %v625_v55 = vpop.f32.mrf.mxu3 }
 0x151   : > { %v626_v56 = vadd.f32 %v625_v55, %v597_v53 }
 0x152   : > { %v553_v57 = vpop.f32.mrf.mxu0 }
 0x153   : > { %v554_v35 = vadd.f32 %v553_v57, %v409_v2  ;;  %v544_v57 = vadd.f32 %v3496_v44, %v389_v46 }
 0x154   : > { %v3506_v63 = vpop.f32.mrf.mxu2 }
 0x156   : > { %v572_v62 = vpop.f32.mrf.mxu1 }
 0x158   : > { %v3504_v60 = vpop.f32.mrf.mxu3 }
 0x15a   : > { %v555_v61 = vpop.f32.mrf.mxu0 }
 0x15b   : > { %v556_v51 = vadd.f32 %v555_v61, %v3498_v45 }
 0x15c   : > { %v603_v6 = vpop.f32.mrf.mxu2 }
 0x15e   : > { %v574_v4 = vpop.f32.mrf.mxu1 }
 0x15f   : > { %v575_v21 = vadd.f32 %v574_v4, %v546_v18 }
 0x160   : > { %v3510_v3 = vpop.f32.mrf.mxu3 }
 0x161   : > { %v604_v24 = vadd.f32 %v603_v6, %v575_v21  ;;  %v573_v6 = vadd.f32 %v572_v62, %v544_v57 }
 0x162   : > { %v654_v0 = vpop.f32.mrf.mxu0 }
 0x163   : > { %v3508_v1 = vadd.f32 %v654_v0, %v626_v56  ;;  %v602_v61 = vadd.f32 %v3506_v63, %v573_v6 }
 0x164   : > { %v606_v11 = vpop.f32.mrf.mxu2 }
 0x165   : > { %v631_v18 = vadd.f32 %v3510_v3, %v602_v61 }
 0x166   : > { %v577_v9 = vpop.f32.mrf.mxu1 }
 0x167   : > { %v578_v19 = vadd.f32 %v577_v9, %v549_v16 }
 0x168   : > { %v632_v8 = vpop.f32.mrf.mxu3 }
 0x169   : > { %v607_v22 = vadd.f32 %v606_v11, %v578_v19  ;;  %v633_v28 = vadd.f32 %v632_v8, %v604_v24  ;;  %v384_v11 = vpop.permute.xlu1 %383  ;;  %v674_v24 = vmax.f32 %v3508_v1, 0.0 }
 0x16a   : > { %v3512_v5 = vpop.f32.mrf.mxu0  ;;  %v541_v44 = vadd.f32 %v3494_v43, %v384_v11  ;;  %v2614_v11 = vld [vmem:[%s4457_s2 + $0x48] sm:$0xff] }
 0x16c   : > { %v608_v23 = vpop.f32.mrf.mxu2  ;;  %v570_v62 = vadd.f32 %v3500_v58, %v541_v44  ;;  %v685_v58 = vmul.f32 %v3519_v30, %v674_v24 }
 0x16e   : > { %v579_v20 = vpop.f32.mrf.mxu1 }
 0x16f   : > { %v580_v47 = vadd.f32 %v579_v20, %v551_v40 }
 0x170   : > { %v635_v15 = vpop.f32.mrf.mxu3 }
 0x171   : > { %v636_v25 = vadd.f32 %v635_v15, %v607_v22  ;;  %v609_v52 = vadd.f32 %v608_v23, %v580_v47  ;;  %v599_v23 = vadd.f32 %v3502_v59, %v570_v62  ;;  %v2639_v62 = vld [vmem:[%s4456_s1 + $0xa0] sm:$0xf] }
 0x172   : > { %v3514_v10 = vpop.f32.mrf.mxu0 }
 0x173   : > { %v660_v20 = vadd.f32 %v3514_v10, %v631_v18  ;;  %v628_v3 = vadd.f32 %v3504_v60, %v599_v23 }
 0x174   : > { %v611_v38 = vpop.f32.mrf.mxu2 }
 0x175   : > { %v676_v43 = vmax.f32 %v660_v20, 0.0  ;;  %v657_v10 = vadd.f32 %v3512_v5, %v628_v3  ;;  %v3015_v20 = vld [vmem:[%s4456_s1 + $0xb0] sm:$0xf0] }
 0x176   : > { %v582_v33 = vpop.f32.mrf.mxu1 }
 0x177   : > { %v583_v41 = vadd.f32 %v582_v33, %v554_v35 }
 0x178   : > { %v637_v26 = vpop.f32.mrf.mxu3 }
 0x179   : > { %v612_v49 = vadd.f32 %v611_v38, %v583_v41  ;;  %v638_v54 = vadd.f32 %v637_v26, %v609_v52 }
 0x17a   : > { %v661_v17 = vpop.f32.mrf.mxu0 }
 0x17b   : > { %v662_v31 = vadd.f32 %v661_v17, %v633_v28  ;;  %v693_v28 = vpack.c.bf16 %v685_v58, %v685_v58 }
 0x17c   : > { %v613_v4 = vpop.f32.mrf.mxu2 }
 0x17d   : > { %v677_v36 = vmax.f32 %v662_v31, 0.0 }
 0x17e   : > { %v584_v50 = vpop.f32.mrf.mxu1 }
 0x17f   : > { %v688_v48 = vmul.f32 %v3519_v30, %v677_v36  ;;  %v585_v0 = vadd.f32 %v584_v50, %v556_v51 }
 0x180   : > { %v640_v42 = vpop.f32.mrf.mxu3 }
 0x181   : > { %v641_v53 = vadd.f32 %v640_v42, %v612_v49  ;;  %v696_v55 = vpack.c.bf16 %v688_v48, %v688_v48  ;;  %v614_v13 = vadd.f32 %v613_v4, %v585_v0  ;;  %v2618_v4 = vld [vmem:[%s4457_s2 + $0x68] sm:$0xff] }
 0x182   : > { %v664_v27 = vpop.f32.mrf.mxu0 }
 0x183   : > { %v665_v29 = vadd.f32 %v664_v27, %v636_v25  ;;  %v687_v27 = vmul.f32 %v3519_v30, %v676_v43  ;;  %v2659_v43 = vld [vmem:[%s4456_s1 + $0xc8] sm:$0xf] }
 0x185   : > { %v678_v32 = vmax.f32 %v665_v29, 0.0  ;;  %v675_v29 = vmax.f32 %v657_v10, 0.0  ;;  %v695_v59 = vpack.c.bf16 %v687_v27, %v687_v27 }
 0x187   : > { %v689_v34 = vmul.f32 %v3519_v30, %v678_v32  ;;  %v686_v1 = vmul.f32 %v3519_v30, %v675_v29  ;;  %v3025_v29 = vld [vmem:[%s4456_s1 + $0x100] sm:$0xf0] }
 0x188   : > { %v642_v9 = vpop.f32.mrf.mxu3 }
 0x189   : > { %v697_v37 = vpack.c.bf16 %v689_v34, %v689_v34  ;;  %v643_v14 = vadd.f32 %v642_v9, %v614_v13  ;;  %v694_v60 = vpack.c.bf16 %v686_v1, %v686_v1 }
 0x18a   : > { %v666_v39 = vpop.f32.mrf.mxu0 }
 0x18b   : > { %717 = vrot.lane.b32.xlu1 %v697_v37, %s3203_s29  ;;  %v667_v7 = vadd.f32 %v666_v39, %v638_v54  ;;  %v2619_v54 = vld [vmem:[%s4457_s2 + $0x70] sm:$0xff] }
 0x18d   : > { %v679_v15 = vmax.f32 %v667_v7, 0.0  ;;  %v2615_v7 = vld [vmem:[%s4457_s2 + $0x50] sm:$0xff] }
 0x18f   : > { %v690_v21 = vmul.f32 %v3519_v30, %v679_v15 }
 0x191   : > { %v698_v26 = vpack.c.bf16 %v690_v21, %v690_v21 }
 0x192   : > { %v669_v56 = vpop.f32.mrf.mxu0 }
 0x193   : > { %v670_v2 = vadd.f32 %v669_v56, %v641_v53  ;;  %715 = vrot.lane.b32.xlu1 %v696_v55, %s3203_s29  ;;  %v2617_v53 = vld [vmem:[%s4457_s2 + $0x60] sm:$0xff]  ;;  %v2616_v56 = vld [vmem:[%s4457_s2 + $0x58] sm:$0xff] }
 0x195   : > { %v680_v8 = vmax.f32 %v670_v2, 0.0  ;;  %v2620_v2 = vld [vmem:[%s4457_s2 + $0x78] sm:$0xff] }
 0x197   : > { %v691_v45 = vmul.f32 %v3519_v30, %v680_v8  ;;  %v2613_v8 = vld [vmem:[%s4457_s2 + $0x40] sm:$0xff] }
 0x199   : > { %v699_v16 = vpack.c.bf16 %v691_v45, %v691_v45 }
 0x19a   : > { %v671_v17 = vpop.f32.mrf.mxu0 }
 0x19b   : > { %v672_v19 = vadd.f32 %v671_v17, %v643_v14  ;;  %721 = vrot.lane.b32.xlu2 %v699_v16, %s3203_s29 }
 0x19d   : > { %v681_v22 = vmax.f32 %v672_v19, 0.0 }
 0x19f   : > { %v692_v63 = vmul.f32 %v3519_v30, %v681_v22  ;;  %v2640_v22 = vor.u32 %v3015_v20, %v2639_v62 }
 0x1a1   : > { %v700_v25 = vpack.c.bf16 %v692_v63, %v692_v63 }
 0x1a3   : > { %723 = vrot.lane.b32.xlu0 %v700_v25, %s3203_s29  ;;  %719 = vrot.lane.b32.xlu2 %v698_v26, %s3203_s29  ;;  %v3020_v25 = vld [vmem:[%s4456_s1 + $0xd8] sm:$0xf0] }
 0x1a4   : > { %v2660_v3 = vor.u32 %v3020_v25, %v2659_v43  ;;  %v2675_v43 = vld [vmem:[%s4456_s1 + $0xd8] sm:$0xf]  ;;  %v3022_v25 = vld [vmem:[%s4456_s1 + $0xe8] sm:$0xf0] }
 0x1ab   : > { %709 = vrot.lane.b32.xlu2 %v693_v28, %s3203_s29  ;;  %713 = vrot.lane.b32.xlu0 %v695_v59, %s3203_s29  ;;  %v2679_v28 = vld [vmem:[%s4456_s1 + $0xf0] sm:$0xf] }
 0x1ac   : > { %v2680_v1 = vor.u32 %v3025_v29, %v2679_v28  ;;  %v2701_v28 = vld [vmem:[%s4456_s1 + $0x12c] sm:$0xf0] }
 0x1b3   : > { %711 = vrot.lane.b32.xlu0 %v694_v60, %s3203_s29 }
 0x1f5   : > { %v722_v31 = vpop.permute.xlu2 %721 }
 0x1f6   : > { %740 = vst.msk [vmem:[#allocation3 + $0x18] sm:$0xf] %vm733_vm1, %v722_v31  ;;  %v3013_v31 = vld [vmem:[%s4456_s1 + $0xa4] sm:$0xf] }
 0x1fd   : > { %v720_v32 = vpop.permute.xlu2 %719  ;;  %v718_v5 = vpop.permute.xlu1 %717  ;;  %v2635_v39 = vld [vmem:[#allocation3 + $0x18] sm:$0xf] }
 0x1fe   : > { %739 = vst.msk [vmem:[#allocation3 + $0x14] sm:$0xf] %vm733_vm1, %v720_v32  ;;  %v2641_v32 = vld [vmem:[%s4456_s1 + $0xb4] sm:$0xf0] }
 0x1ff   : > { %738 = vst.msk [vmem:[#allocation3 + $0x10] sm:$0xf] %vm733_vm1, %v718_v5  ;;  %v2644_v5 = vor.u32 %v3013_v31, %v2641_v32  ;;  %v2707_v31 = vld [vmem:[%s4456_s1 + $0x120] sm:$0xf]  ;;  %v3031_v32 = vld [vmem:[%s4456_s1 + $0x130] sm:$0xf0] }
 0x205   : > { %v3035_v33 = vld [vmem:[#allocation3 + $0x10] sm:$0xf0]  ;;  %v710_v34 = vpop.permute.xlu2 %709  ;;  %v716_v35 = vpop.permute.xlu1 %715 }
 0x206   : > { %v2631_v36 = vld [vmem:[#allocation3 + $0x10] sm:$0xf]  ;;  %734 = vst.msk [vmem:[#allocation3] sm:$0xf] %vm733_vm1, %v710_v34 }
 0x207   : > { %v3552_v37 = vor.u32 %v3035_v33, %v2631_v36  ;;  %737 = vst.msk [vmem:[#allocation3 + $0xc] sm:$0xf] %vm733_vm1, %v716_v35  ;;  %v2647_v35 = vld [vmem:[%s4456_s1 + $0xa8] sm:$0xf]  ;;  %v3016_v36 = vld [vmem:[%s4456_s1 + $0xb8] sm:$0xf0] }
 0x209   : > { %812 = vrot.lane.b32.xlu2 %v3552_v37, %s3194_s21 }
 0x20d   : > { %v2623_v50 = vld [vmem:[#allocation3] sm:$0xf] }
 0x20e   : > { %v3034_v46 = vld [vmem:[#allocation3 + $0x8] sm:$0xf0] }
 0x211   : > { %860 = vrot.lane.b32.xlu2 %v3552_v37, %s3195_s22 }
 0x215   : > { %v724_v38 = vpop.permute.xlu0 %723 }
 0x216   : > { %741 = vst.msk [vmem:[#allocation3 + $0x1c] sm:$0xf] %vm733_vm1, %v724_v38 }
 0x219   : > { %884 = vrot.lane.b32.xlu2 %v3552_v37, %s3196_s23 }
 0x21d   : > { %v3036_v40 = vld [vmem:[#allocation3 + $0x18] sm:$0xf0]  ;;  %v714_v41 = vpop.permute.xlu0 %713 }
 0x21e   : > { %v3562_v42 = vor.u32 %v3036_v40, %v2635_v39  ;;  %736 = vst.msk [vmem:[#allocation3 + $0x8] sm:$0xf] %vm733_vm1, %v714_v41  ;;  %v2699_v39 = vld [vmem:[%s4456_s1 + $0x118] sm:$0xf]  ;;  %v3030_v40 = vld [vmem:[%s4456_s1 + $0x128] sm:$0xf0] }
 0x220   : > { %814 = vrot.lane.b32.xlu1 %v3562_v42, %s3194_s21 }
 0x225   : > { %v2627_v47 = vld [vmem:[#allocation3 + $0x8] sm:$0xf]  ;;  %v712_v48 = vpop.permute.xlu0 %711 }
 0x226   : > { %v3567_v49 = vor.u32 %v3034_v46, %v2627_v47  ;;  %735 = vst.msk [vmem:[#allocation3 + $0x4] sm:$0xf] %vm733_vm1, %v712_v48  ;;  %v3018_v46 = vld [vmem:[%s4456_s1 + $0xcc] sm:$0xf]  ;;  %v2661_v47 = vld [vmem:[%s4456_s1 + $0xdc] sm:$0xf0] }
 0x228   : > { %882 = vrot.lane.b32.xlu2 %v3567_v49, %s3196_s23  ;;  %810 = vrot.lane.b32.xlu0 %v3567_v49, %s3194_s21 }
 0x22d   : > { %v3033_v51 = vld [vmem:[#allocation3] sm:$0xf0] }
 0x22e   : > { %v3574_v52 = vor.u32 %v3033_v51, %v2623_v50  ;;  %v3014_v50 = vld [vmem:[%s4456_s1 + $0xac] sm:$0xf]  ;;  %v2649_v51 = vld [vmem:[%s4456_s1 + $0xbc] sm:$0xf0] }
 0x230   : > { %808 = vrot.lane.b32.xlu1 %v3574_v52, %s3194_s21  ;;  %880 = vrot.lane.b32.xlu2 %v3574_v52, %s3196_s23 }
 0x231   : > { %834 = vrot.lane.b32.xlu0 %v3567_v49, %s3197_s24 }
 0x238   : > { %836 = vrot.lane.b32.xlu1 %v3552_v37, %s3197_s24  ;;  %838 = vrot.lane.b32.xlu2 %v3562_v42, %s3197_s24 }
 0x239   : > { %832 = vrot.lane.b32.xlu0 %v3574_v52, %s3197_s24 }
 0x240   : > { %886 = vrot.lane.b32.xlu2 %v3562_v42, %s3196_s23  ;;  %858 = vrot.lane.b32.xlu1 %v3567_v49, %s3195_s22 }
 0x241   : > { %824 = vrot.lane.b32.xlu0 %v3552_v37, %s3200_s27 }
 0x248   : > { %844 = vrot.lane.b32.xlu2 %v3574_v52, %s3198_s25  ;;  %856 = vrot.lane.b32.xlu1 %v3574_v52, %s3195_s22 }
 0x249   : > { %862 = vrot.lane.b32.xlu0 %v3562_v42, %s3195_s22 }
 0x250   : > { %874 = vrot.lane.b32.xlu2 %v3562_v42, %s3199_s26  ;;  %848 = vrot.lane.b32.xlu1 %v3552_v37, %s3198_s25 }
 0x251   : > { %822 = vrot.lane.b32.xlu0 %v3567_v49, %s3200_s27 }
 0x258   : > { %870 = vrot.lane.b32.xlu2 %v3567_v49, %s3199_s26  ;;  %846 = vrot.lane.b32.xlu1 %v3567_v49, %s3198_s25 }
 0x259   : > { %826 = vrot.lane.b32.xlu0 %v3562_v42, %s3200_s27 }
 0x260   : > { %892 = vrot.lane.b32.xlu2 %v3574_v52, %s3201_s28  ;;  %850 = vrot.lane.b32.xlu1 %v3562_v42, %s3198_s25 }
 0x261   : > { %820 = vrot.lane.b32.xlu0 %v3574_v52, %s3200_s27 }
 0x263   : > { %v813_v55 = vpop.permute.xlu2 %812 }
 0x268   : > { %926 = vperm.xlu2 %3141, %v2617_v53   ;;  %898 = vrot.lane.b32.xlu1 %v3562_v42, %s3201_s28  ;;  %v2652_v53 = vor.u32 %v3014_v50, %v2649_v51 }
 0x269   : > { %872 = vrot.lane.b32.xlu0 %v3552_v37, %s3199_s26 }
 0x26b   : > { %v861_v57 = vpop.permute.xlu2 %860 }
 0x270   : > { %921 = vperm.xlu2 %3141, %v2616_v56   ;;  %896 = vrot.lane.b32.xlu1 %v3552_v37, %s3201_s28  ;;  %v2667_v56 = vld [vmem:[%s4456_s1 + $0xd0] sm:$0xf] }
 0x271   : > { %894 = vrot.lane.b32.xlu0 %v3567_v49, %s3201_s28 }
 0x273   : > { %v885_v0 = vpop.permute.xlu2 %884 }
 0x278   : > { %868 = vrot.lane.b32.xlu1 %v3574_v52, %s3199_s26 }
 0x279   : > { %936 = vperm.xlu0 %3142, %v2619_v54  }
 0x280   : > { %941 = vperm.xlu1 %3143, %v2620_v2   ;;  %v3017_v2 = vld [vmem:[%s4456_s1 + $0xc0] sm:$0xf0] }
 0x281   : > { %931 = vperm.xlu0 %3142, %v2618_v4   ;;  %v3119_v4 = vld [vmem:[%s3245_s20 + $0x18] sm:$0xff]  }
 0x282   : > { %v883_v6 = vpop.permute.xlu2 %882 }
 0x288   : > { %916 = vperm.xlu1 %3143, %v2615_v7   ;;  %v3099_v7 = vunpack.c.l.bf16 %v3119_v4 }
 0x289   : > { %906 = vperm.xlu0 %3142, %v2613_v8   ;;  %v3100_v8 = vunpack.c.h.bf16 %v3119_v4 }
 0x28a   : > { %v881_v9 = vpop.permute.xlu2 %880 }
 0x290   : > { %911 = vperm.xlu1 %3143, %v2614_v11  }
 0x292   : > { %v839_v13 = vpop.permute.xlu2 %838  ;;  %v815_v45 = vpop.permute.xlu1 %814 }
 0x293   : > { %1056 = vmatpush.bf16.msrb.mxu1 %v815_v45  ;;  %1085 = vmatpush.bf16.msrb.mxu2 %v839_v13  ;;  %v3144_v45 = vpack.i.bf16 %v3100_v8, %v3099_v7 }
 0x295   : > { %3145 = vrot.lane.b32.xlu2 %v3144_v45, %s3198_s25 }
 0x297   : > { %1057 = vmatpush.bf16.msrb.mxu1 %v813_v55 }
 0x29a   : > { %v887_v61 = vpop.permute.xlu2 %886  ;;  %v811_v14 = vpop.permute.xlu0 %810 }
 0x29b   : > { %1058 = vmatpush.bf16.msrb.mxu1 %v811_v14  ;;  %1143 = vmatpush.bf16.msra.mxu0 %v887_v61  ;;  %v3023_v14 = vld [vmem:[%s4456_s1 + $0xf4] sm:$0xf] }
 0x29f   : > { %1144 = vmatpush.bf16.msra.mxu0 %v885_v0  ;;  %v2655_v0 = vld [vmem:[%s4456_s1 + $0xb0] sm:$0xf] }
 0x2a0   : > { %v2656_v13 = vor.u32 %v3017_v2, %v2655_v0 }
 0x2a2   : > { %v845_v15 = vpop.permute.xlu2 %844  ;;  %v809_v16 = vpop.permute.xlu1 %808 }
 0x2a3   : > { %v835_v44 = vpop.permute.xlu0 %834  ;;  %1059 = vmatpush.bf16.msrb.mxu1 %v809_v16  ;;  %1145 = vmatpush.bf16.msra.mxu0 %v883_v6  ;;  %v3117_v6 = vld [vmem:[%s3245_s20 + $0x8] sm:$0xff]   ;;  %v3086_v16 = vld [vmem:[%s3245_s20] sm:$0xff]  }
 0x2a4   : > { %v3092_v11 = vunpack.c.h.bf16 %v3117_v6  ;;  %v3088_v62 = vunpack.c.h.bf16 %v3086_v16 }
 0x2a7   : > { %1060 = vmatpush.bf16.msrb.mxu1 %v3562_v42  ;;  %1146 = vmatpush.bf16.msra.mxu0 %v881_v9  ;;  %v2700_v42 = vor.u32 %v3030_v40, %v2699_v39  ;;  %v3091_v9 = vunpack.c.l.bf16 %v3117_v6  ;;  %v2715_v39 = vld [vmem:[%s4456_s1 + $0x128] sm:$0xf]  ;;  %v3032_v40 = vld [vmem:[%s4456_s1 + $0x138] sm:$0xf0] }
 0x2a9   : > { %v3154_v61 = vpack.i.bf16 %v3092_v11, %v3091_v9 }
 0x2aa   : > { %v875_v17 = vpop.permute.xlu2 %874  ;;  %v837_v18 = vpop.permute.xlu1 %836 }
 0x2ab   : > { %v833_v19 = vpop.permute.xlu0 %832  ;;  %1061 = vmatpush.bf16.msrb.mxu1 %v3552_v37  ;;  %1086 = vmatpush.bf16.msrb.mxu2 %v837_v18  ;;  %v2648_v37 = vor.u32 %v3016_v36, %v2647_v35  ;;  %v2669_v18 = vld [vmem:[%s4456_s1 + $0xe4] sm:$0xf0]  ;;  %v3029_v36 = vld [vmem:[%s4456_s1 + $0x124] sm:$0xf] }
 0x2ac   : > { %1147 = vmatpush.bf16.msra.mxu0 %v875_v17  ;;  %3155 = vrot.lane.b32.xlu1 %v3154_v61, %s3198_s25  ;;  %v3019_v17 = vld [vmem:[%s4456_s1 + $0xd4] sm:$0xf] }
 0x2af   : > { %1062 = vmatpush.bf16.msrb.mxu1 %v3567_v49  ;;  %1087 = vmatpush.bf16.msrb.mxu2 %v835_v44  ;;  %v2664_v49 = vor.u32 %v3018_v46, %v2661_v47 }
 0x2b2   : > { %v859_v21 = vpop.permute.xlu1 %858  ;;  %v871_v38 = vpop.permute.xlu2 %870 }
 0x2b3   : > { %v825_v63 = vpop.permute.xlu0 %824  ;;  %1063 = vmatpush.bf16.msrb.mxu1 %v3574_v52  ;;  %1088 = vmatpush.bf16.msrb.mxu2 %v833_v19  ;;  %v3087_v19 = vunpack.c.l.bf16 %v3086_v16 }
 0x2b5   : > { %v3159_v20 = vpack.i.bf16 %v3088_v62, %v3087_v19 }
 0x2b6   : > { %1064 = vmatmul.bf16.vlgmr.msrb.gmra.mxu1 %v2640_v22  ;;  %v2687_v22 = vld [vmem:[%s4456_s1 + $0xf8] sm:$0xf] }
 0x2b7   : > { %3160 = vrot.lane.b32.xlu2 %v3159_v20, %s3198_s25 }
 0x2ba   : > { %v857_v23 = vpop.permute.xlu1 %856  ;;  %v893_v55 = vpop.permute.xlu2 %892 }
 0x2bb   : > { %v863_v24 = vpop.permute.xlu0 %862 }
 0x2bc   : > { %1114 = vmatpush.bf16.msrb.mxu3 %v863_v24  ;;  %v3118_v24 = vld [vmem:[%s3245_s20 + $0x10] sm:$0xff]  }
 0x2c0   : > { %1115 = vmatpush.bf16.msrb.mxu3 %v861_v57  ;;  %v3021_v57 = vld [vmem:[%s4456_s1 + $0xe0] sm:$0xf0] }
 0x2c1   : > { %v2668_v54 = vor.u32 %v3021_v57, %v2667_v56 }
 0x2c2   : > { %v849_v26 = vpop.permute.xlu1 %848 }
 0x2c3   : > { %v823_v58 = vpop.permute.xlu0 %822 }
 0x2c4   : > { %1116 = vmatpush.bf16.msrb.mxu3 %v859_v21  ;;  %v2672_v21 = vor.u32 %v3019_v17, %v2669_v18 }
 0x2c6   : > { %1069 = vmatmul.bf16.gmra.mxu1 %v2660_v3  ;;  %v3096_v3 = vunpack.c.h.bf16 %v3118_v24 }
 0x2c8   : > { %1117 = vmatpush.bf16.msrb.mxu3 %v857_v23 }
 0x2ca   : > { %v847_v10 = vpop.permute.xlu1 %846 }
 0x2cb   : > { %v827_v27 = vpop.permute.xlu0 %826 }
 0x2cc   : > { %1089 = vmatpush.bf16.msrb.mxu2 %v827_v27  ;;  %v3028_v27 = vld [vmem:[%s4456_s1 + $0x11c] sm:$0xf] }
 0x2cd   : > { %v2704_v29 = vor.u32 %v3028_v27, %v2701_v28 }
 0x2d0   : > { %1090 = vmatpush.bf16.msrb.mxu2 %v825_v63  ;;  %v3026_v63 = vld [vmem:[%s4456_s1 + $0x108] sm:$0xf0] }
 0x2d1   : > { %v2688_v23 = vor.u32 %v3026_v63, %v2687_v22 }
 0x2d2   : > { %v851_v59 = vpop.permute.xlu1 %850 }
 0x2d3   : > { %v821_v60 = vpop.permute.xlu0 %820  ;;  %1118 = vmatpush.bf16.msrb.mxu3 %v851_v59  ;;  %v3024_v59 = vld [vmem:[%s4456_s1 + $0xfc] sm:$0xf] }
 0x2d4   : > { %1091 = vmatpush.bf16.msrb.mxu2 %v823_v58 }
 0x2d6   : > { %1074 = vmatmul.bf16.gmra.mxu1 %v2680_v1  ;;  %v2689_v1 = vld [vmem:[%s4456_s1 + $0x10c] sm:$0xf0] }
 0x2d7   : > { %1119 = vmatpush.bf16.msrb.mxu3 %v849_v26  ;;  %v3095_v26 = vunpack.c.l.bf16 %v3118_v24  ;;  %v927_v24 = vpop.permute.xlu2 %926 }
 0x2d8   : > { %1092 = vmatpush.bf16.msrb.mxu2 %v821_v60  ;;  %v2692_v60 = vor.u32 %v3024_v59, %v2689_v1 }
 0x2d9   : > { %v3149_v58 = vpack.i.bf16 %v3096_v3, %v3095_v26 }
 0x2da   : > { %v899_v33 = vpop.permute.xlu1 %898 }
 0x2db   : > { %v873_v34 = vpop.permute.xlu0 %872  ;;  %1093 = vmatmul.bf16.vlgmr.msrb.gmra.mxu2 %v2644_v5  ;;  %1120 = vmatpush.bf16.msrb.mxu3 %v847_v10  ;;  %v2676_v10 = vor.u32 %v3022_v25, %v2675_v43  ;;  %v2708_v5 = vor.u32 %v3031_v32, %v2707_v31 }
 0x2dc   : > { %1148 = vmatpush.bf16.msra.mxu0 %v873_v34  ;;  %1176 = vmatpush.bf16.msra.mxu1 %v899_v33  ;;  %v2695_v33 = vld [vmem:[%s4456_s1 + $0x100] sm:$0xf]  ;;  %v3027_v34 = vld [vmem:[%s4456_s1 + $0x110] sm:$0xf0] }
 0x2dd   : > { %3150 = vrot.lane.b32.xlu0 %v3149_v58, %s3198_s25  ;;  %v2696_v35 = vor.u32 %v3027_v34, %v2695_v33 }
 0x2df   : > { %1121 = vmatpush.bf16.msrb.mxu3 %v845_v15  ;;  %v2681_v15 = vld [vmem:[%s4456_s1 + $0x104] sm:$0xf0]  ;;  %v922_v28 = vpop.permute.xlu2 %921 }
 0x2e0   : > { %1149 = vmatpush.bf16.msra.mxu0 %v871_v38  ;;  %v2684_v44 = vor.u32 %v3023_v14, %v2681_v15 }
 0x2e2   : > { %1122 = vmatmul.bf16.vlgmr.msrb.gmra.mxu3 %v2648_v37  ;;  %v897_v41 = vpop.permute.xlu1 %896  ;;  %v2709_v37 = vld [vmem:[%s4456_s1 + $0x134] sm:$0xf0] }
 0x2e3   : > { %1177 = vmatpush.bf16.msra.mxu1 %v897_v41  ;;  %v895_v48 = vpop.permute.xlu0 %894  ;;  %v2712_v38 = vor.u32 %v3029_v36, %v2709_v37  ;;  %v2716_v41 = vor.u32 %v3032_v40, %v2715_v39 }
 0x2e6   : > { %1079 = vmatmul.bf16.gmra.mxu1 %v2700_v42 }
 0x2e7   : > { %1178 = vmatpush.bf16.msra.mxu1 %v895_v48 }
 0x2ea   : > { %v869_v52 = vpop.permute.xlu1 %868 }
 0x2eb   : > { %1098 = vmatmul.bf16.gmra.mxu2 %v2664_v49  ;;  %1150 = vmatpush.bf16.msra.mxu0 %v869_v52  ;;  %v3790_v48 = vpop.permute.xlu0 %936 }
 0x2ec   : > { %1179 = vmatpush.bf16.msra.mxu1 %v893_v55 }
 0x2ee   : > { %1151 = vmatmul.bf16.vlgmr.msra.gmra.mxu0 %v2652_v53 }
 0x2f2   : > { %1127 = vmatmul.bf16.gmra.mxu3 %v2668_v54  ;;  %v3796_v56 = vpop.permute.xlu1 %941 }
 0x2f3   : > { %v3792_v50 = vpop.permute.xlu0 %931 }
 0x2f6   : > { %2717 = vmatmul.msk.bf16.vlgmr.msra.gmra.mxu1 %vm516_vm0, %v2656_v13 }
 0x2fa   : > { %v3798_v7 = vpop.permute.xlu1 %916 }
 0x2fb   : > { %1103 = vmatmul.bf16.gmra.mxu2 %v2684_v44  ;;  %v907_v53 = vpop.permute.xlu0 %906 }
 0x2fe   : > { %1156 = vmatmul.bf16.gmra.mxu0 %v2672_v21 }
 0x302   : > { %1132 = vmatmul.bf16.gmra.mxu3 %v2688_v23  ;;  %v912_v61 = vpop.permute.xlu1 %911 }
 0x306   : > { %2718 = vmatmul.msk.bf16.gmra.mxu1 %vm516_vm0, %v2676_v10 }
 0x30b   : > { %1108 = vmatmul.bf16.gmra.mxu2 %v2704_v29 }
 0x30e   : > { %1161 = vmatmul.bf16.gmra.mxu0 %v2692_v60 }
 0x312   : > { %1137 = vmatmul.bf16.gmra.mxu3 %v2708_v5 }
 0x316   : > { %2719 = vmatmul.msk.bf16.gmra.mxu1 %vm516_vm0, %v2696_v35 }
 0x31e   : > { %1166 = vmatmul.bf16.gmra.mxu0 %v2712_v38 }
 0x326   : > { %2720 = vmatmul.msk.bf16.gmra.mxu1 %vm516_vm0, %v2716_v41 }
 0x333   : > { %v1065_v42 = vpop.f32.mrf.mxu1 }
 0x334   : > { %v1066_v55 = vadd.f32 %v1065_v42, %v907_v53 }
 0x33b   : > { %v1067_v46 = vpop.f32.mrf.mxu1 }
 0x33c   : > { %v1068_v16 = vadd.f32 %v1067_v46, %v912_v61  ;;  %v3156_v46 = vpop.permute.xlu1 %3155 }
 0x343   : > { %v3788_v47 = vpop.f32.mrf.mxu1 }
 0x34b   : > { %v1072_v49 = vpop.f32.mrf.mxu1 }
 0x34c   : > { %v1073_v29 = vadd.f32 %v1072_v49, %v922_v28  ;;  %v3158_v49 = vunpack.i.h.bf16 %v3156_v46 }
 0x34f   : > { %v3151_v5 = vpop.permute.xlu0 %3150 }
 0x350   : > { %v3152_v39 = vunpack.i.l.bf16 %v3151_v5 }
 0x353   : > { %v1075_v51 = vpop.f32.mrf.mxu1 }
 0x354   : > { %v1076_v27 = vadd.f32 %v1075_v51, %v927_v24 }
 0x35b   : > { %v3794_v52 = vpop.f32.mrf.mxu1 }
 0x35e   : > { %v1094_v57 = vpop.f32.mrf.mxu2 }
 0x35f   : > { %v1095_v54 = vadd.f32 %v1094_v57, %v1066_v55 }
 0x363   : > { %v1080_v0 = vpop.f32.mrf.mxu1 }
 0x365   : > { %v1123_v2 = vpop.f32.mrf.mxu3 }
 0x366   : > { %v1096_v4 = vpop.f32.mrf.mxu2  ;;  %v1124_v6 = vadd.f32 %v1123_v2, %v1095_v54  ;;  %v1081_v2 = vadd.f32 %v1080_v0, %v3790_v48 }
 0x367   : > { %v1097_v18 = vadd.f32 %v1096_v4, %v1068_v16 }
 0x36b   : > { %v3800_v8 = vpop.f32.mrf.mxu1  ;;  %v1152_v9 = vpop.f32.mrf.mxu0 }
 0x36c   : > { %v1153_v11 = vadd.f32 %v1152_v9, %v1124_v6  ;;  %v1078_v6 = vadd.f32 %v3794_v52, %v3792_v50  ;;  %v1071_v50 = vadd.f32 %v3788_v47, %v3798_v7 }
 0x36d   : > { %v1125_v13 = vpop.f32.mrf.mxu3 }
 0x36e   : > { %v3802_v45 = vpop.f32.mrf.mxu2  ;;  %v1126_v19 = vadd.f32 %v1125_v13, %v1097_v18 }
 0x373   : > { %v1154_v14 = vpop.f32.mrf.mxu0  ;;  %v1181_v15 = vpop.f32.mrf.mxu1 }
 0x374   : > { %v3804_v44 = vadd.f32 %v1181_v15, %v1153_v11  ;;  %v1155_v62 = vadd.f32 %v1154_v14, %v1126_v19  ;;  %v3146_v14 = vpop.permute.xlu2 %3145 }
 0x375   : > { %v3806_v17 = vpop.f32.mrf.mxu3  ;;  %v3147_v48 = vunpack.i.l.bf16 %v3146_v14 }
 0x376   : > { %v1101_v20 = vpop.f32.mrf.mxu2 }
 0x377   : > { %v1102_v60 = vadd.f32 %v1101_v20, %v1073_v29  ;;  %v1083_v20 = vadd.f32 %v3800_v8, %v3796_v56  ;;  %v3153_v8 = vunpack.i.h.bf16 %v3151_v5  ;;  %v3157_v5 = vunpack.i.l.bf16 %v3156_v46 }
 0x37b   : > { %v3808_v21 = vpop.f32.mrf.mxu0  ;;  %v1183_v22 = vpop.f32.mrf.mxu1 }
 0x37c   : > { %v3810_v63 = vadd.f32 %v1183_v22, %v1155_v62 }
 0x37d   : > { %v1130_v23 = vpop.f32.mrf.mxu3 }
 0x37e   : > { %v1104_v26 = vpop.f32.mrf.mxu2  ;;  %v1131_v33 = vadd.f32 %v1130_v23, %v1102_v60  ;;  %v3161_v60 = vpop.permute.xlu2 %3160 }
 0x37f   : > { %v1105_v59 = vadd.f32 %v1104_v26, %v1076_v27  ;;  %v1100_v26 = vadd.f32 %v3802_v45, %v1071_v50  ;;  %v2747_v50 = vld [vmem:[%s4457_s2 + $0x90] sm:$0xff] }
 0x381   : > { %v1129_v56 = vadd.f32 %v3806_v17, %v1100_v26  ;;  %v3162_v17 = vunpack.i.l.bf16 %v3161_v60 }
 0x383   : > { %v1159_v43 = vpop.f32.mrf.mxu0  ;;  %v3812_v25 = vpop.f32.mrf.mxu1  ;;  %v1158_v47 = vadd.f32 %v3808_v21, %v1129_v56 }
 0x384   : > { %v1160_v37 = vadd.f32 %v1159_v43, %v1131_v33 }
 0x385   : > { %v1133_v3 = vpop.f32.mrf.mxu3  ;;  %v1187_v45 = vadd.f32 %v3812_v25, %v1158_v47  ;;  %v3163_v25 = vunpack.i.h.bf16 %v3161_v60  ;;  %v2771_v47 = vld [vmem:[%s4456_s1 + $0x140] sm:$0xf] }
 0x386   : > { %v1106_v1 = vpop.f32.mrf.mxu2  ;;  %v1134_v31 = vadd.f32 %v1133_v3, %v1105_v59 }
 0x387   : > { %v1107_v13 = vadd.f32 %v1106_v1, %v1078_v6  ;;  %v3148_v1 = vunpack.i.h.bf16 %v3146_v14 }
 0x38b   : > { %v1162_v58 = vpop.f32.mrf.mxu0  ;;  %v1188_v10 = vpop.f32.mrf.mxu1 }
 0x38c   : > { %v1163_v34 = vadd.f32 %v1162_v58, %v1134_v31  ;;  %v1189_v40 = vadd.f32 %v1188_v10, %v1160_v37 }
 0x38d   : > { %v1135_v32 = vpop.f32.mrf.mxu3 }
 0x38e   : > { %v1109_v51 = vpop.f32.mrf.mxu2  ;;  %v1204_v53 = vmul.f32 %v3519_v30, %v1189_v40  ;;  %v1136_v15 = vadd.f32 %v1135_v32, %v1107_v13 }
 0x38f   : > { %v1110_v9 = vadd.f32 %v1109_v51, %v1081_v2 }
 0x390   : > { %v1260_v11 = vadd.f32 %v3158_v49, %v1204_v53 }
 0x392   : > { %v1268_v18 = vpack.c.bf16 %v1260_v11, %v1260_v11 }
 0x393   : > { %v1164_v35 = vpop.f32.mrf.mxu0  ;;  %v1191_v36 = vpop.f32.mrf.mxu1 }
 0x394   : > { %v1192_v38 = vadd.f32 %v1191_v36, %v1163_v34  ;;  %v1165_v0 = vadd.f32 %v1164_v35, %v1136_v15  ;;  %v1201_v34 = vmul.f32 %v3519_v30, %v3804_v44  ;;  %v1203_v35 = vmul.f32 %v3519_v30, %v1187_v45 }
 0x395   : > { %v1138_v57 = vpop.f32.mrf.mxu3 }
 0x396   : > { %v1205_v41 = vmul.f32 %v3519_v30, %v1192_v38  ;;  %v1139_v61 = vadd.f32 %v1138_v57, %v1110_v9  ;;  %v1111_v19 = vpop.f32.mrf.mxu2  ;;  %v1257_v37 = vadd.f32 %v3162_v17, %v1201_v34  ;;  %v1259_v38 = vadd.f32 %v3157_v5, %v1203_v35  ;;  %v2791_v5 = vld [vmem:[%s4456_s1 + $0x168] sm:$0xf]  ;;  %v3044_v34 = vld [vmem:[%s4456_s1 + $0x178] sm:$0xf0] }
 0x397   : > { %v1112_v23 = vadd.f32 %v1111_v19, %v1083_v20  ;;  %v2749_v19 = vld [vmem:[%s4457_s2 + $0xa0] sm:$0xff]  ;;  %v2792_v35 = vor.u32 %v3044_v34, %v2791_v5 }
 0x398   : > { %v1261_v42 = vadd.f32 %v3152_v39, %v1205_v41  ;;  %v1202_v39 = vmul.f32 %v3519_v30, %v3810_v63  ;;  %v1265_v40 = vpack.c.bf16 %v1257_v37, %v1257_v37  ;;  %v1267_v41 = vpack.c.bf16 %v1259_v38, %v1259_v38  ;;  %v3053_v34 = vld [vmem:[%s4456_s1 + $0x1c4] sm:$0xf] }
 0x39a   : > { %v1269_v55 = vpack.c.bf16 %v1261_v42, %v1261_v42  ;;  %v1258_v44 = vadd.f32 %v3163_v25, %v1202_v39  ;;  %v2811_v39 = vld [vmem:[%s4456_s1 + $0x190] sm:$0xf] }
 0x39b   : > { %v1193_v54 = vpop.f32.mrf.mxu1  ;;  %v1167_v4 = vpop.f32.mrf.mxu0 }
 0x39c   : > { %1289 = vrot.lane.b32.xlu2 %v1269_v55, %s3203_s29  ;;  %v1168_v16 = vadd.f32 %v1167_v4, %v1139_v61  ;;  %v1194_v24 = vadd.f32 %v1193_v54, %v1165_v0  ;;  %v1266_v42 = vpack.c.bf16 %v1258_v44, %v1258_v44  ;;  %v2752_v0 = vld [vmem:[%s4457_s2 + $0xb8] sm:$0xff] }
 0x39d   : > { %v1140_v52 = vpop.f32.mrf.mxu3 }
 0x39e   : > { %v1141_v58 = vadd.f32 %v1140_v52, %v1112_v23  ;;  %v1206_v27 = vmul.f32 %v3519_v30, %v1194_v24  ;;  %v2745_v52 = vld [vmem:[%s4457_s2 + $0x80] sm:$0xff]  ;;  %v2746_v24 = vld [vmem:[%s4457_s2 + $0x88] sm:$0xff] }
 0x3a0   : > { %v1262_v32 = vadd.f32 %v3153_v8, %v1206_v27 }
 0x3a2   : > { %v1270_v36 = vpack.c.bf16 %v1262_v32, %v1262_v32 }
 0x3a3   : > { %v1196_v62 = vpop.f32.mrf.mxu1  ;;  %v1169_v3 = vpop.f32.mrf.mxu0 }
 0x3a4   : > { %v1197_v22 = vadd.f32 %v1196_v62, %v1168_v16  ;;  %1287 = vrot.lane.b32.xlu2 %v1268_v18, %s3203_s29  ;;  %v1170_v28 = vadd.f32 %v1169_v3, %v1141_v58  ;;  %v2751_v62 = vld [vmem:[%s4457_s2 + $0xb0] sm:$0xff] }
 0x3a6   : > { %v1207_v43 = vmul.f32 %v3519_v30, %v1197_v22  ;;  %v2750_v22 = vld [vmem:[%s4457_s2 + $0xa8] sm:$0xff] }
 0x3a8   : > { %v1263_v10 = vadd.f32 %v3147_v48, %v1207_v43  ;;  %v2748_v48 = vld [vmem:[%s4457_s2 + $0x98] sm:$0xff] }
 0x3aa   : > { %v1271_v29 = vpack.c.bf16 %v1263_v10, %v1263_v10 }
 0x3ab   : > { %v1198_v59 = vpop.f32.mrf.mxu1 }
 0x3ac   : > { %v1199_v7 = vadd.f32 %v1198_v59, %v1170_v28  ;;  %1293 = vrot.lane.b32.xlu0 %v1271_v29, %s3203_s29 }
 0x3ae   : > { %v1208_v31 = vmul.f32 %v3519_v30, %v1199_v7  ;;  %v3039_v7 = vld [vmem:[%s4456_s1 + $0x150] sm:$0xf0] }
 0x3b0   : > { %v1264_v33 = vadd.f32 %v3148_v1, %v1208_v31  ;;  %v2772_v1 = vor.u32 %v3039_v7, %v2771_v47  ;;  %v3048_v47 = vld [vmem:[%s4456_s1 + $0x19c] sm:$0xf]  ;;  %v2821_v7 = vld [vmem:[%s4456_s1 + $0x1ac] sm:$0xf0] }
 0x3b2   : > { %v1272_v21 = vpack.c.bf16 %v1264_v33, %v1264_v33 }
 0x3b4   : > { %1291 = vrot.lane.b32.xlu0 %v1270_v36, %s3203_s29  ;;  %1295 = vrot.lane.b32.xlu1 %v1272_v21, %s3203_s29 }
 0x3bc   : > { %1281 = vrot.lane.b32.xlu0 %v1265_v40, %s3203_s29  ;;  %1285 = vrot.lane.b32.xlu1 %v1267_v41, %s3203_s29  ;;  %v3049_v40 = vld [vmem:[%s4456_s1 + $0x1a0] sm:$0xf0] }
 0x3bd   : > { %v2812_v41 = vor.u32 %v3049_v40, %v2811_v39 }
 0x3c4   : > { %1283 = vrot.lane.b32.xlu1 %v1266_v42, %s3203_s29 }
 0x3f6   : > { %v1290_v46 = vpop.permute.xlu2 %1289 }
 0x3f7   : > { %1309 = vst.msk [vmem:[#allocation2 + $0x10] sm:$0xf] %vm733_vm1, %v1290_v46  ;;  %v3037_v46 = vld [vmem:[%s4456_s1 + $0x144] sm:$0xf] }
 0x3fe   : > { %v1288_v51 = vpop.permute.xlu2 %1287  ;;  %v2763_v53 = vld [vmem:[#allocation2 + $0x10] sm:$0xf] }
 0x3ff   : > { %1308 = vst.msk [vmem:[#allocation2 + $0xc] sm:$0xf] %vm733_vm1, %v1288_v51  ;;  %v2773_v51 = vld [vmem:[%s4456_s1 + $0x154] sm:$0xf0] }
 0x406   : > { %v3058_v13 = vld [vmem:[#allocation2 + $0x8] sm:$0xf0] }
 0x41e   : > { %v1294_v49 = vpop.permute.xlu0 %1293 }
 0x41f   : > { %1311 = vst.msk [vmem:[#allocation2 + $0x18] sm:$0xf] %vm733_vm1, %v1294_v49 }
 0x426   : > { %v1292_v30 = vpop.permute.xlu0 %1291  ;;  %v1296_v63 = vpop.permute.xlu1 %1295  ;;  %v2767_v2 = vld [vmem:[#allocation2 + $0x18] sm:$0xf] }
 0x427   : > { %1310 = vst.msk [vmem:[#allocation2 + $0x14] sm:$0xf] %vm733_vm1, %v1292_v30  ;;  %v2776_v30 = vor.u32 %v3037_v46, %v2773_v51 }
 0x428   : > { %1312 = vst.msk [vmem:[#allocation2 + $0x1c] sm:$0xf] %vm733_vm1, %v1296_v63 }
 0x42e   : > { %v3059_v55 = vld [vmem:[#allocation2 + $0x10] sm:$0xf0]  ;;  %v1282_v57 = vpop.permute.xlu0 %1281  ;;  %v1286_v54 = vpop.permute.xlu1 %1285 }
 0x42f   : > { %v3848_v4 = vor.u32 %v3059_v55, %v2763_v53  ;;  %v3060_v6 = vld [vmem:[#allocation2 + $0x18] sm:$0xf0]  ;;  %1305 = vst.msk [vmem:[#allocation2] sm:$0xf] %vm733_vm1, %v1282_v57  ;;  %v2831_v53 = vld [vmem:[%s4456_s1 + $0x1b8] sm:$0xf] }
 0x430   : > { %v3851_v9 = vor.u32 %v3060_v6, %v2767_v2  ;;  %1307 = vst.msk [vmem:[#allocation2 + $0x8] sm:$0xf] %vm733_vm1, %v1286_v54  ;;  %v3054_v55 = vld [vmem:[%s4456_s1 + $0x1c8] sm:$0xf0]  ;;  %v2779_v57 = vld [vmem:[%s4456_s1 + $0x148] sm:$0xf] }
 0x431   : > { %1383 = vrot.lane.b32.xlu0 %v3848_v4, %s3194_s21  ;;  %v3040_v54 = vld [vmem:[%s4456_s1 + $0x158] sm:$0xf0]  ;;  %v2832_v6 = vor.u32 %v3054_v55, %v2831_v53 }
 0x432   : > { %1385 = vrot.lane.b32.xlu2 %v3851_v9, %s3194_s21 }
 0x436   : > { %v1284_v11 = vpop.permute.xlu1 %1283  ;;  %v2755_v15 = vld [vmem:[#allocation2] sm:$0xf] }
 0x437   : > { %v2759_v61 = vld [vmem:[#allocation2 + $0x8] sm:$0xf]  ;;  %1306 = vst.msk [vmem:[#allocation2 + $0x4] sm:$0xf] %vm733_vm1, %v1284_v11 }
 0x438   : > { %v3859_v14 = vor.u32 %v3058_v13, %v2759_v61  ;;  %v3042_v13 = vld [vmem:[%s4456_s1 + $0x16c] sm:$0xf]  ;;  %v2793_v61 = vld [vmem:[%s4456_s1 + $0x17c] sm:$0xf0] }
 0x439   : > { %1431 = vrot.lane.b32.xlu0 %v3848_v4, %s3195_s22 }
 0x43a   : > { %1381 = vrot.lane.b32.xlu1 %v3859_v14, %s3194_s21 }
 0x43e   : > { %v3057_v16 = vld [vmem:[#allocation2] sm:$0xf0] }
 0x43f   : > { %v3865_v18 = vor.u32 %v3057_v16, %v2755_v15  ;;  %v2781_v15 = vld [vmem:[%s4456_s1 + $0x15c] sm:$0xf0]  ;;  %v2796_v16 = vor.u32 %v3042_v13, %v2793_v61 }
 0x441   : > { %1429 = vrot.lane.b32.xlu0 %v3859_v14, %s3195_s22  ;;  %1379 = vrot.lane.b32.xlu2 %v3865_v18, %s3194_s21 }
 0x442   : > { %1407 = vrot.lane.b32.xlu1 %v3848_v4, %s3197_s24 }
 0x449   : > { %1427 = vrot.lane.b32.xlu0 %v3865_v18, %s3195_s22  ;;  %1405 = vrot.lane.b32.xlu2 %v3859_v14, %s3197_s24 }
 0x44a   : > { %1455 = vrot.lane.b32.xlu1 %v3848_v4, %s3196_s23 }
 0x451   : > { %1393 = vrot.lane.b32.xlu0 %v3859_v14, %s3200_s27  ;;  %1403 = vrot.lane.b32.xlu2 %v3865_v18, %s3197_s24 }
 0x452   : > { %1453 = vrot.lane.b32.xlu1 %v3859_v14, %s3196_s23 }
 0x459   : > { %1409 = vrot.lane.b32.xlu0 %v3851_v9, %s3197_s24  ;;  %1395 = vrot.lane.b32.xlu2 %v3848_v4, %s3200_s27 }
 0x45a   : > { %1451 = vrot.lane.b32.xlu1 %v3865_v18, %s3196_s23 }
 0x461   : > { %1433 = vrot.lane.b32.xlu0 %v3851_v9, %s3195_s22  ;;  %1419 = vrot.lane.b32.xlu2 %v3848_v4, %s3198_s25 }
 0x462   : > { %1391 = vrot.lane.b32.xlu1 %v3865_v18, %s3200_s27 }
 0x469   : > { %1467 = vrot.lane.b32.xlu0 %v3848_v4, %s3201_s28  ;;  %1397 = vrot.lane.b32.xlu2 %v3851_v9, %s3200_s27 }
 0x46a   : > { %1457 = vrot.lane.b32.xlu1 %v3851_v9, %s3196_s23 }
 0x471   : > { %1443 = vrot.lane.b32.xlu0 %v3848_v4, %s3199_s26  ;;  %1469 = vrot.lane.b32.xlu2 %v3851_v9, %s3201_s28 }
 0x472   : > { %1421 = vrot.lane.b32.xlu1 %v3851_v9, %s3198_s25 }
 0x479   : > { %1441 = vrot.lane.b32.xlu0 %v3859_v14, %s3199_s26  ;;  %1445 = vrot.lane.b32.xlu2 %v3851_v9, %s3199_s26 }
 0x47a   : > { %1465 = vrot.lane.b32.xlu1 %v3859_v14, %s3201_s28 }
 0x481   : > { %1439 = vrot.lane.b32.xlu0 %v3865_v18, %s3199_s26  ;;  %1417 = vrot.lane.b32.xlu2 %v3859_v14, %s3198_s25 }
 0x482   : > { %1463 = vrot.lane.b32.xlu1 %v3865_v18, %s3201_s28 }
 0x489   : > { %1497 = vperm.xlu0 %3142, %v2749_v19   ;;  %1415 = vrot.lane.b32.xlu2 %v3865_v18, %s3198_s25 }
 0x48a   : > { %1507 = vperm.xlu1 %3143, %v2751_v62   ;;  %v2799_v62 = vld [vmem:[%s4456_s1 + $0x170] sm:$0xf] }
 0x48c   : > { %v1386_v20 = vpop.permute.xlu2 %1385 }
 0x48d   : > { %1627 = vmatpush.bf16.msra.mxu2 %v1386_v20  ;;  %v3045_v20 = vld [vmem:[%s4456_s1 + $0x180] sm:$0xf0] }
 0x491   : > { %1492 = vperm.xlu0 %3142, %v2748_v48   ;;  %1512 = vperm.xlu2 %3141, %v2752_v0   ;;  %v2787_v48 = vld [vmem:[%s4456_s1 + $0x150] sm:$0xf]  ;;  %v3041_v0 = vld [vmem:[%s4456_s1 + $0x160] sm:$0xf0] }
 0x492   : > { %1502 = vperm.xlu1 %3143, %v2750_v22   ;;  %v2800_v22 = vor.u32 %v3045_v20, %v2799_v62 }
 0x499   : > { %1487 = vperm.xlu2 %3141, %v2747_v50   ;;  %v2788_v50 = vor.u32 %v3041_v0, %v2787_v48 }
 0x49a   : > { %1477 = vperm.xlu1 %3143, %v2745_v52   ;;  %v3047_v52 = vld [vmem:[%s4456_s1 + $0x194] sm:$0xf] }
 0x49b   : > { %v1380_v23 = vpop.permute.xlu2 %1379 }
 0x4a1   : > { %1482 = vperm.xlu2 %3141, %v2746_v24   ;;  %v3043_v24 = vld [vmem:[%s4456_s1 + $0x174] sm:$0xf] }
 0x4a3   : > { %v1384_v43 = vpop.permute.xlu0 %1383  ;;  %v1406_v26 = vpop.permute.xlu2 %1405 }
 0x4a4   : > { %1628 = vmatpush.bf16.msra.mxu2 %v1384_v43  ;;  %v2801_v43 = vld [vmem:[%s4456_s1 + $0x184] sm:$0xf0] }
 0x4ab   : > { %v1432_v3 = vpop.permute.xlu0 %1431  ;;  %v1404_v58 = vpop.permute.xlu2 %1403 }
 0x4ac   : > { %v1382_v10 = vpop.permute.xlu1 %1381 }
 0x4ad   : > { %1629 = vmatpush.bf16.msra.mxu2 %v1382_v10  ;;  %v3050_v10 = vld [vmem:[%s4456_s1 + $0x1a8] sm:$0xf0] }
 0x4b1   : > { %1630 = vmatpush.bf16.msra.mxu2 %v1380_v23  ;;  %v2813_v23 = vld [vmem:[%s4456_s1 + $0x1a4] sm:$0xf0] }
 0x4b3   : > { %v1430_v56 = vpop.permute.xlu0 %1429  ;;  %v1396_v8 = vpop.permute.xlu2 %1395 }
 0x4b4   : > { %v1408_v27 = vpop.permute.xlu1 %1407 }
 0x4b5   : > { %1631 = vmatpush.bf16.msra.mxu2 %v3851_v9  ;;  %v2780_v9 = vor.u32 %v3040_v54, %v2779_v57 }
 0x4b9   : > { %1632 = vmatpush.bf16.msra.mxu2 %v3848_v4 }
 0x4bb   : > { %v1428_v28 = vpop.permute.xlu0 %1427  ;;  %v1420_v29 = vpop.permute.xlu2 %1419 }
 0x4bc   : > { %v1456_v59 = vpop.permute.xlu1 %1455 }
 0x4bd   : > { %1633 = vmatpush.bf16.msra.mxu2 %v3859_v14  ;;  %v3038_v14 = vld [vmem:[%s4456_s1 + $0x14c] sm:$0xf] }
 0x4be   : > { %v2784_v19 = vor.u32 %v3038_v14, %v2781_v15 }
 0x4c1   : > { %1634 = vmatpush.bf16.msra.mxu2 %v3865_v18 }
 0x4c3   : > { %v1394_v60 = vpop.permute.xlu0 %1393  ;;  %v1398_v45 = vpop.permute.xlu2 %1397 }
 0x4c4   : > { %1635 = vmatmul.bf16.vlgmr.msra.gmra.mxu2 %v2772_v1  ;;  %v1454_v31 = vpop.permute.xlu1 %1453 }
 0x4cb   : > { %v1410_v32 = vpop.permute.xlu0 %1409  ;;  %v1470_v33 = vpop.permute.xlu2 %1469 }
 0x4cc   : > { %v1452_v17 = vpop.permute.xlu1 %1451  ;;  %1656 = vmatpush.bf16.msra.mxu3 %v1410_v32  ;;  %1747 = vmatpush.bf16.msrb.mxu2 %v1470_v33  ;;  %v2827_v32 = vld [vmem:[%s4456_s1 + $0x1a0] sm:$0xf]  ;;  %v3051_v33 = vld [vmem:[%s4456_s1 + $0x1b0] sm:$0xf0] }
 0x4cd   : > { %v2828_v5 = vor.u32 %v3051_v33, %v2827_v32 }
 0x4d0   : > { %1657 = vmatpush.bf16.msra.mxu3 %v1408_v27 }
 0x4d3   : > { %v1434_v36 = vpop.permute.xlu0 %1433  ;;  %v1446_v38 = vpop.permute.xlu2 %1445 }
 0x4d4   : > { %1640 = vmatmul.bf16.gmra.mxu2 %v2792_v35  ;;  %v1392_v21 = vpop.permute.xlu1 %1391  ;;  %1658 = vmatpush.bf16.msra.mxu3 %v1406_v26  ;;  %v2816_v26 = vor.u32 %v3047_v52, %v2813_v23  ;;  %v2841_v35 = vld [vmem:[%s4456_s1 + $0x1d4] sm:$0xf0] }
 0x4d5   : > { %1685 = vmatpush.bf16.msrb.mxu0 %v1434_v36  ;;  %v2844_v36 = vor.u32 %v3053_v34, %v2841_v35 }
 0x4d8   : > { %1659 = vmatpush.bf16.msra.mxu3 %v1404_v58  ;;  %v2819_v58 = vld [vmem:[%s4456_s1 + $0x198] sm:$0xf] }
 0x4d9   : > { %1686 = vmatpush.bf16.msrb.mxu0 %v1432_v3  ;;  %v2804_v3 = vor.u32 %v3043_v24, %v2801_v43  ;;  %v2820_v27 = vor.u32 %v3050_v10, %v2819_v58 }
 0x4db   : > { %v1468_v37 = vpop.permute.xlu0 %1467  ;;  %v1418_v49 = vpop.permute.xlu2 %1417 }
 0x4dc   : > { %v1458_v25 = vpop.permute.xlu1 %1457  ;;  %1660 = vmatpush.bf16.msra.mxu3 %v1398_v45  ;;  %1748 = vmatpush.bf16.msrb.mxu2 %v1468_v37  ;;  %v2839_v45 = vld [vmem:[%s4456_s1 + $0x1c0] sm:$0xf]  ;;  %v3056_v37 = vld [vmem:[%s4456_s1 + $0x1d8] sm:$0xf0] }
 0x4dd   : > { %1687 = vmatpush.bf16.msrb.mxu0 %v1430_v56  ;;  %1714 = vmatpush.bf16.msrb.mxu1 %v1458_v25  ;;  %v2807_v56 = vld [vmem:[%s4456_s1 + $0x178] sm:$0xf] }
 0x4e0   : > { %1661 = vmatpush.bf16.msra.mxu3 %v1396_v8  ;;  %v3046_v8 = vld [vmem:[%s4456_s1 + $0x188] sm:$0xf0] }
 0x4e1   : > { %1688 = vmatpush.bf16.msrb.mxu0 %v1428_v28  ;;  %1715 = vmatpush.bf16.msrb.mxu1 %v1456_v59  ;;  %v2808_v28 = vor.u32 %v3046_v8, %v2807_v56  ;;  %v2833_v59 = vld [vmem:[%s4456_s1 + $0x1cc] sm:$0xf0] }
 0x4e3   : > { %v1444_v44 = vpop.permute.xlu0 %1443  ;;  %v1416_v4 = vpop.permute.xlu2 %1415 }
 0x4e4   : > { %1645 = vmatmul.bf16.gmra.mxu2 %v2812_v41  ;;  %v1422_v42 = vpop.permute.xlu1 %1421  ;;  %1662 = vmatpush.bf16.msra.mxu3 %v1394_v60  ;;  %v2824_v60 = vor.u32 %v3048_v47, %v2821_v7 }
 0x4e5   : > { %1689 = vmatpush.bf16.msrb.mxu0 %v1422_v42  ;;  %1716 = vmatpush.bf16.msrb.mxu1 %v1454_v31  ;;  %v3055_v31 = vld [vmem:[%s4456_s1 + $0x1d0] sm:$0xf0] }
 0x4e8   : > { %1663 = vmatpush.bf16.msra.mxu3 %v1392_v21  ;;  %v2847_v21 = vld [vmem:[%s4456_s1 + $0x1c8] sm:$0xf] }
 0x4e9   : > { %1690 = vmatpush.bf16.msrb.mxu0 %v1420_v29  ;;  %1717 = vmatpush.bf16.msrb.mxu1 %v1452_v17  ;;  %v3052_v29 = vld [vmem:[%s4456_s1 + $0x1bc] sm:$0xf]  ;;  %v2840_v17 = vor.u32 %v3055_v31, %v2839_v45 }
 0x4ea   : > { %v2836_v1 = vor.u32 %v3052_v29, %v2833_v59 }
 0x4eb   : > { %1664 = vmatmul.bf16.vlgmr.msra.gmra.mxu3 %v2776_v30  ;;  %v1442_v2 = vpop.permute.xlu0 %1441  ;;  %v4077_v42 = vpop.permute.xlu2 %1512 }
 0x4ec   : > { %v1466_v63 = vpop.permute.xlu1 %1465 }
 0x4ed   : > { %1691 = vmatpush.bf16.msrb.mxu0 %v1418_v49  ;;  %1718 = vmatpush.bf16.msrb.mxu1 %v1446_v38  ;;  %v2848_v38 = vor.u32 %v3056_v37, %v2847_v21  ;;  %v4092_v37 = vld [vmem:[%s4458_s3] ss:$0 sm:$0xff] }
 0x4ee   : > { %1749 = vmatpush.bf16.msrb.mxu2 %v1466_v63 }
 0x4f1   : > { %1692 = vmatpush.bf16.msrb.mxu0 %v1416_v4  ;;  %1719 = vmatpush.bf16.msrb.mxu1 %v1444_v44 }
 0x4f3   : > { %v1440_v18 = vpop.permute.xlu0 %1439  ;;  %v4079_v49 = vpop.permute.xlu2 %1487 }
 0x4f4   : > { %1650 = vmatmul.bf16.gmra.mxu2 %v2832_v6  ;;  %1693 = vmatmul.bf16.vlgmr.msrb.gmra.mxu0 %v2780_v9  ;;  %v1464_v11 = vpop.permute.xlu1 %1463 }
 0x4f5   : > { %1720 = vmatpush.bf16.msrb.mxu1 %v1442_v2  ;;  %1750 = vmatpush.bf16.msrb.mxu2 %v1464_v11 }
 0x4f9   : > { %1721 = vmatpush.bf16.msrb.mxu1 %v1440_v18 }
 0x4fb   : > { %1669 = vmatmul.bf16.gmra.mxu3 %v2796_v16  ;;  %v1483_v4 = vpop.permute.xlu2 %1482 }
 0x4fc   : > { %1722 = vmatmul.bf16.vlgmr.msrb.gmra.mxu1 %v2784_v19  ;;  %v1508_v41 = vpop.permute.xlu1 %1507 }
 0x504   : > { %1698 = vmatmul.bf16.gmra.mxu0 %v2800_v22  ;;  %2849 = vmatmul.msk.bf16.vlgmr.msrb.gmra.mxu2 %vm516_vm0, %v2788_v50  ;;  %v1503_v46 = vpop.permute.xlu1 %1502 }
 0x50b   : > { %1674 = vmatmul.bf16.gmra.mxu3 %v2816_v26 }
 0x50c   : > { %1727 = vmatmul.bf16.gmra.mxu1 %v2804_v3  ;;  %v1478_v30 = vpop.permute.xlu1 %1477  ;;  %v1498_v3 = vpop.permute.xlu0 %1497 }
 0x514   : > { %1703 = vmatmul.bf16.gmra.mxu0 %v2820_v27  ;;  %2850 = vmatmul.msk.bf16.gmra.mxu2 %vm516_vm0, %v2808_v28  ;;  %v1493_v28 = vpop.permute.xlu0 %1492 }
 0x51b   : > { %1679 = vmatmul.bf16.gmra.mxu3 %v2836_v1 }
 0x51c   : > { %1732 = vmatmul.bf16.gmra.mxu1 %v2824_v60 }
 0x524   : > { %1708 = vmatmul.bf16.gmra.mxu0 %v2840_v17  ;;  %2851 = vmatmul.msk.bf16.gmra.mxu2 %vm516_vm0, %v2828_v5 }
 0x52c   : > { %1737 = vmatmul.bf16.gmra.mxu1 %v2844_v36 }
 0x534   : > { %2852 = vmatmul.msk.bf16.gmra.mxu2 %vm516_vm0, %v2848_v38 }
 0x547   : > { %v1636_v25 = vpop.f32.mrf.mxu2 }
 0x548   : > { %v1637_v63 = vadd.f32 %v1636_v25, %v1478_v30 }
 0x54f   : > { %v1638_v39 = vpop.f32.mrf.mxu2 }
 0x550   : > { %v1639_v6 = vadd.f32 %v1638_v39, %v1483_v4 }
 0x557   : > { %v4075_v40 = vpop.f32.mrf.mxu2 }
 0x55f   : > { %v1643_v44 = vpop.f32.mrf.mxu2 }
 0x560   : > { %v1644_v59 = vadd.f32 %v1643_v44, %v1493_v28 }
 0x567   : > { %v1646_v51 = vpop.f32.mrf.mxu2 }
 0x568   : > { %v1647_v27 = vadd.f32 %v1646_v51, %v1498_v3 }
 0x56e   : > { %v1665_v53 = vpop.f32.mrf.mxu3 }
 0x56f   : > { %v1648_v55 = vpop.f32.mrf.mxu2  ;;  %v1666_v57 = vadd.f32 %v1665_v53, %v1637_v63 }
 0x570   : > { %v1649_v63 = vadd.f32 %v1648_v55, %v1503_v46 }
 0x571   : > { %v1694_v54 = vpop.f32.mrf.mxu0 }
 0x572   : > { %v1695_v2 = vadd.f32 %v1694_v54, %v1666_v57 }
 0x576   : > { %v1667_v9 = vpop.f32.mrf.mxu3 }
 0x577   : > { %v1651_v11 = vpop.f32.mrf.mxu2  ;;  %v1668_v13 = vadd.f32 %v1667_v9, %v1639_v6 }
 0x578   : > { %v1652_v25 = vadd.f32 %v1651_v11, %v1508_v41  ;;  %v1642_v11 = vadd.f32 %v4075_v40, %v4079_v49 }
 0x579   : > { %v1696_v61 = vpop.f32.mrf.mxu0  ;;  %v1723_v14 = vpop.f32.mrf.mxu1 }
 0x57a   : > { %v1697_v15 = vadd.f32 %v1696_v61, %v1668_v13  ;;  %v1724_v16 = vadd.f32 %v1723_v14, %v1695_v2 }
 0x57e   : > { %v1670_v20 = vpop.f32.mrf.mxu3 }
 0x57f   : > { %v1653_v18 = vpop.f32.mrf.mxu2 }
 0x580   : > { %v1654_v9 = vadd.f32 %v1653_v18, %v4077_v42 }
 0x581   : > { %v1725_v19 = vpop.f32.mrf.mxu1  ;;  %v4081_v48 = vpop.f32.mrf.mxu0 }
 0x582   : > { %v1726_v62 = vadd.f32 %v1725_v19, %v1697_v15  ;;  %v1671_v19 = vadd.f32 %v1670_v20, %v1642_v11  ;;  %v2881_v11 = vld [vmem:[%s4457_s2 + $0xe0] sm:$0xff] }
 0x584   : > { %v1700_v18 = vadd.f32 %v4081_v48, %v1671_v19 }
 0x586   : > { %v1672_v52 = vpop.f32.mrf.mxu3 }
 0x587   : > { %v1752_v0 = vpop.f32.mrf.mxu2  ;;  %v1673_v1 = vadd.f32 %v1672_v52, %v1644_v59 }
 0x588   : > { %v4083_v22 = vadd.f32 %v1752_v0, %v1724_v16 }
 0x589   : > { %v4085_v50 = vpop.f32.mrf.mxu1  ;;  %v1701_v43 = vpop.f32.mrf.mxu0 }
 0x58a   : > { %v1702_v31 = vadd.f32 %v1701_v43, %v1673_v1  ;;  %v1729_v40 = vadd.f32 %v4085_v50, %v1700_v18  ;;  %v1772_v28 = vmax.f32 %v4083_v22, 0.0 }
 0x58c   : > { %v1780_v50 = vmul.f32 %v4092_v37, %v1772_v28 }
 0x58e   : > { %v1675_v58 = vpop.f32.mrf.mxu3 }
 0x58f   : > { %v1754_v23 = vpop.f32.mrf.mxu2  ;;  %v1676_v47 = vadd.f32 %v1675_v58, %v1647_v27 }
 0x590   : > { %v4087_v24 = vadd.f32 %v1754_v23, %v1726_v62 }
 0x591   : > { %v1730_v26 = vpop.f32.mrf.mxu1  ;;  %v1704_v56 = vpop.f32.mrf.mxu0 }
 0x592   : > { %v1705_v60 = vadd.f32 %v1704_v56, %v1676_v47  ;;  %v1731_v5 = vadd.f32 %v1730_v26, %v1702_v31 }
 0x596   : > { %v1677_v7 = vpop.f32.mrf.mxu3 }
 0x597   : > { %v1757_v10 = vpop.f32.mrf.mxu2  ;;  %v1678_v54 = vadd.f32 %v1677_v7, %v1649_v63  ;;  %v1788_v7 = vpack.c.bf16 %v1780_v50, %v1780_v50 }
 0x598   : > { %v1758_v56 = vadd.f32 %v1757_v10, %v1729_v40  ;;  %v1773_v10 = vmax.f32 %v4087_v24, 0.0 }
 0x599   : > { %v1733_v8 = vpop.f32.mrf.mxu1  ;;  %v1706_v45 = vpop.f32.mrf.mxu0 }
 0x59a   : > { %v1734_v32 = vadd.f32 %v1733_v8, %v1705_v60  ;;  %v1707_v13 = vadd.f32 %v1706_v45, %v1678_v54  ;;  %v1781_v22 = vmul.f32 %v4092_v37, %v1773_v10  ;;  %v2879_v54 = vld [vmem:[%s4457_s2 + $0xd0] sm:$0xff] }
 0x59b   : > { %v3063_v10 = vld [vmem:[%s4456_s1 + $0x1f0] sm:$0xf0] }
 0x59c   : > { %v1789_v60 = vpack.c.bf16 %v1781_v22, %v1781_v22 }
 0x59e   : > { %v1680_v21 = vpop.f32.mrf.mxu3 }
 0x59f   : > { %v1759_v29 = vpop.f32.mrf.mxu2  ;;  %v1681_v53 = vadd.f32 %v1680_v21, %v1652_v25 }
 0x5a0   : > { %v1760_v35 = vadd.f32 %v1759_v29, %v1731_v5  ;;  %v1774_v29 = vmax.f32 %v1758_v56, 0.0 }
 0x5a1   : > { %v1735_v33 = vpop.f32.mrf.mxu1  ;;  %v1709_v51 = vpop.f32.mrf.mxu0 }
 0x5a2   : > { %v1775_v39 = vmax.f32 %v1760_v35, 0.0  ;;  %v1710_v4 = vadd.f32 %v1709_v51, %v1681_v53  ;;  %v1736_v15 = vadd.f32 %v1735_v33, %v1707_v13  ;;  %v1782_v47 = vmul.f32 %v4092_v37, %v1774_v29  ;;  %v2880_v13 = vld [vmem:[%s4457_s2 + $0xd8] sm:$0xff] }
 0x5a4   : > { %v1783_v2 = vmul.f32 %v4092_v37, %v1775_v39  ;;  %v1790_v1 = vpack.c.bf16 %v1782_v47, %v1782_v47 }
 0x5a6   : > { %v1682_v6 = vpop.f32.mrf.mxu3  ;;  %v1791_v61 = vpack.c.bf16 %v1783_v2, %v1783_v2  ;;  %v2877_v2 = vld [vmem:[%s4457_s2 + $0xc0] sm:$0xff] }
 0x5a7   : > { %v1762_v17 = vpop.f32.mrf.mxu2  ;;  %v1683_v46 = vadd.f32 %v1682_v6, %v1654_v9  ;;  %v2882_v6 = vld [vmem:[%s4457_s2 + $0xe8] sm:$0xff] }
 0x5a8   : > { %v1763_v34 = vadd.f32 %v1762_v17, %v1734_v32  ;;  %v2878_v9 = vld [vmem:[%s4457_s2 + $0xc8] sm:$0xff] }
 0x5a9   : > { %v1738_v57 = vpop.f32.mrf.mxu1  ;;  %v1711_v16 = vpop.f32.mrf.mxu0 }
 0x5aa   : > { %v1776_v36 = vmax.f32 %v1763_v34, 0.0  ;;  %v1739_v14 = vadd.f32 %v1738_v57, %v1710_v4  ;;  %v1712_v23 = vadd.f32 %v1711_v16, %v1683_v46  ;;  %v3120_v16 = vld [vmem:[#allocation2 + $0x8] sm:$0xff]  }
 0x5ac   : > { %v1784_v38 = vmul.f32 %v4092_v37, %v1776_v36 }
 0x5ae   : > { %v1792_v44 = vpack.c.bf16 %v1784_v38, %v1784_v38 }
 0x5af   : > { %v1764_v30 = vpop.f32.mrf.mxu2 }
 0x5b0   : > { %1812 = vrot.lane.b32.xlu2 %v1792_v44, %s3203_s29  ;;  %v1765_v62 = vadd.f32 %v1764_v30, %v1736_v15  ;;  %v2883_v15 = vld [vmem:[%s4457_s2 + $0xf0] sm:$0xff] }
 0x5b1   : > { %v1740_v52 = vpop.f32.mrf.mxu1 }
 0x5b2   : > { %v1777_v43 = vmax.f32 %v1765_v62, 0.0  ;;  %v1741_v26 = vadd.f32 %v1740_v52, %v1712_v23  ;;  %v3107_v52 = vunpack.c.l.bf16 %v3120_v16  ;;  %v3108_v23 = vunpack.c.h.bf16 %v3120_v16 }
 0x5b4   : > { %v1785_v20 = vmul.f32 %v4092_v37, %v1777_v43  ;;  %v3169_v43 = vpack.i.bf16 %v3108_v23, %v3107_v52  ;;  %v2919_v23 = vld [vmem:[%s4456_s1 + $0x1f0] sm:$0xf] }
 0x5b6   : > { %v1793_v59 = vpack.c.bf16 %v1785_v20, %v1785_v20 }
 0x5b7   : > { %v1767_v41 = vpop.f32.mrf.mxu2 }
 0x5b8   : > { %v1768_v55 = vadd.f32 %v1767_v41, %v1739_v14  ;;  %1810 = vrot.lane.b32.xlu2 %v1791_v61, %s3203_s29  ;;  %v3102_v61 = vld [vmem:[#allocation2] sm:$0xff]  }
 0x5b9   : > { %v3103_v14 = vunpack.c.l.bf16 %v3102_v61  ;;  %v3104_v41 = vunpack.c.h.bf16 %v3102_v61 }
 0x5ba   : > { %v1778_v0 = vmax.f32 %v1768_v55, 0.0  ;;  %v3122_v55 = vld [vmem:[#allocation2 + $0x18] sm:$0xff]  }
 0x5bb   : > { %v3164_v46 = vpack.i.bf16 %v3104_v41, %v3103_v14  ;;  %v3115_v62 = vunpack.c.l.bf16 %v3122_v55  ;;  %v2911_v14 = vld [vmem:[%s4456_s1 + $0x1e8] sm:$0xf]  ;;  %v3064_v41 = vld [vmem:[%s4456_s1 + $0x1f8] sm:$0xf0] }
 0x5bc   : > { %v1786_v42 = vmul.f32 %v4092_v37, %v1778_v0  ;;  %v3116_v0 = vunpack.c.h.bf16 %v3122_v55  ;;  %v2912_v55 = vor.u32 %v3064_v41, %v2911_v14 }
 0x5be   : > { %v1794_v3 = vpack.c.bf16 %v1786_v42, %v1786_v42  ;;  %v2884_v42 = vld [vmem:[%s4457_s2 + $0xf8] sm:$0xff]  ;;  %v3179_v18 = vpack.i.bf16 %v3116_v0, %v3115_v62  ;;  %v3067_v62 = vld [vmem:[%s4456_s1 + $0x214] sm:$0xf]  ;;  %v2933_v0 = vld [vmem:[%s4456_s1 + $0x224] sm:$0xf0] }
 0x5bf   : > { %v1769_v58 = vpop.f32.mrf.mxu2  ;;  %v2936_v52 = vor.u32 %v3067_v62, %v2933_v0 }
 0x5c0   : > { %v1770_v49 = vadd.f32 %v1769_v58, %v1741_v26  ;;  %1816 = vrot.lane.b32.xlu0 %v1794_v3, %s3203_s29  ;;  %v3121_v26 = vld [vmem:[#allocation2 + $0x10] sm:$0xff]  }
 0x5c1   : > { %v3111_v40 = vunpack.c.l.bf16 %v3121_v26 }
 0x5c2   : > { %v1779_v8 = vmax.f32 %v1770_v49, 0.0  ;;  %v3112_v49 = vunpack.c.h.bf16 %v3121_v26  ;;  %v3069_v26 = vld [vmem:[%s4456_s1 + $0x220] sm:$0xf0] }
 0x5c4   : > { %v1787_v27 = vmul.f32 %v4092_v37, %v1779_v8  ;;  %v3174_v56 = vpack.i.bf16 %v3112_v49, %v3111_v40 }
 0x5c6   : > { %v1795_v48 = vpack.c.bf16 %v1787_v27, %v1787_v27 }
 0x5c8   : > { %1818 = vrot.lane.b32.xlu1 %v1795_v48, %s3203_s29  ;;  %1814 = vrot.lane.b32.xlu0 %v1793_v59, %s3203_s29 }
 0x5d0   : > { %1808 = vrot.lane.b32.xlu1 %v1790_v1, %s3203_s29  ;;  %1804 = vrot.lane.b32.xlu0 %v1788_v7, %s3203_s29  ;;  %v2903_v7 = vld [vmem:[%s4456_s1 + $0x1e0] sm:$0xf] }
 0x5d1   : > { %v2904_v1 = vor.u32 %v3063_v10, %v2903_v7 }
 0x5d8   : > { %1806 = vrot.lane.b32.xlu1 %v1789_v60, %s3203_s29 }
 0x60a   : > { %v1813_v45 = vpop.permute.xlu2 %1812 }
 0x60b   : > { %1832 = vst.msk [vmem:[#allocation3 + $0x10] sm:$0xf] %vm733_vm1, %v1813_v45 }
 0x612   : > { %v1811_v31 = vpop.permute.xlu2 %1810  ;;  %v2895_v17 = vld [vmem:[#allocation3 + $0x10] sm:$0xf] }
 0x613   : > { %1831 = vst.msk [vmem:[#allocation3 + $0xc] sm:$0xf] %vm733_vm1, %v1811_v31 }
 0x61a   : > { %v3082_v44 = vld [vmem:[#allocation3 + $0x8] sm:$0xf0] }
 0x632   : > { %v1817_v32 = vpop.permute.xlu0 %1816 }
 0x633   : > { %1834 = vst.msk [vmem:[#allocation3 + $0x18] sm:$0xf] %vm733_vm1, %v1817_v32 }
 0x63a   : > { %v1815_v24 = vpop.permute.xlu0 %1814  ;;  %v1819_v33 = vpop.permute.xlu1 %1818  ;;  %v2899_v36 = vld [vmem:[#allocation3 + $0x18] sm:$0xf] }
 0x63b   : > { %1833 = vst.msk [vmem:[#allocation3 + $0x14] sm:$0xf] %vm733_vm1, %v1815_v24 }
 0x63c   : > { %1835 = vst.msk [vmem:[#allocation3 + $0x1c] sm:$0xf] %vm733_vm1, %v1819_v33  ;;  %v2923_v33 = vld [vmem:[%s4456_s1 + $0x208] sm:$0xf] }
 0x642   : > { %v3083_v5 = vld [vmem:[#allocation3 + $0x10] sm:$0xf0]  ;;  %v1805_v34 = vpop.permute.xlu0 %1804  ;;  %v1809_v35 = vpop.permute.xlu1 %1808 }
 0x643   : > { %v4122_v21 = vor.u32 %v3083_v5, %v2895_v17  ;;  %v3084_v38 = vld [vmem:[#allocation3 + $0x18] sm:$0xf0]  ;;  %1828 = vst.msk [vmem:[#allocation3] sm:$0xf] %vm733_vm1, %v1805_v34 }
 0x644   : > { %v4125_v25 = vor.u32 %v3084_v38, %v2899_v36  ;;  %1830 = vst.msk [vmem:[#allocation3 + $0x8] sm:$0xf] %vm733_vm1, %v1809_v35  ;;  %v3068_v17 = vld [vmem:[%s4456_s1 + $0x218] sm:$0xf0] }
 0x645   : > { %1906 = vrot.lane.b32.xlu0 %v4122_v21, %s3194_s21  ;;  %v2924_v5 = vor.u32 %v3068_v17, %v2923_v33  ;;  %v3079_v33 = vld [vmem:[%s4456_s1 + $0x270] sm:$0xf0]  ;;  %v3076_v17 = vld [vmem:[%s4456_s1 + $0x25c] sm:$0xf] }
 0x646   : > { %1908 = vrot.lane.b32.xlu2 %v4125_v25, %s3194_s21 }
 0x64a   : > { %v1807_v39 = vpop.permute.xlu1 %1806  ;;  %v2887_v63 = vld [vmem:[#allocation3] sm:$0xf] }
 0x64b   : > { %v2891_v51 = vld [vmem:[#allocation3 + $0x8] sm:$0xf]  ;;  %1829 = vst.msk [vmem:[#allocation3 + $0x4] sm:$0xf] %vm733_vm1, %v1807_v39  ;;  %v3073_v39 = vld [vmem:[%s4456_s1 + $0x240] sm:$0xf0] }
 0x64c   : > { %v4133_v30 = vor.u32 %v3082_v44, %v2891_v51 }
 0x64d   : > { %1978 = vrot.lane.b32.xlu0 %v4122_v21, %s3196_s23 }
 0x64e   : > { %1904 = vrot.lane.b32.xlu1 %v4133_v30, %s3194_s21 }
 0x652   : > { %v3081_v53 = vld [vmem:[#allocation3] sm:$0xf0] }
 0x653   : > { %v4139_v57 = vor.u32 %v3081_v53, %v2887_v63  ;;  %v3062_v53 = vld [vmem:[%s4456_s1 + $0x1ec] sm:$0xf] }
 0x655   : > { %1976 = vrot.lane.b32.xlu0 %v4133_v30, %s3196_s23  ;;  %1902 = vrot.lane.b32.xlu2 %v4139_v57, %s3194_s21 }
 0x656   : > { %1930 = vrot.lane.b32.xlu1 %v4122_v21, %s3197_s24 }
 0x65d   : > { %1974 = vrot.lane.b32.xlu0 %v4139_v57, %s3196_s23  ;;  %1954 = vrot.lane.b32.xlu2 %v4122_v21, %s3195_s22 }
 0x65e   : > { %1928 = vrot.lane.b32.xlu1 %v4133_v30, %s3197_s24 }
 0x665   : > { %1990 = vrot.lane.b32.xlu0 %v4122_v21, %s3201_s28  ;;  %1952 = vrot.lane.b32.xlu2 %v4133_v30, %s3195_s22 }
 0x666   : > { %1926 = vrot.lane.b32.xlu1 %v4139_v57, %s3197_s24 }
 0x66d   : > { %1980 = vrot.lane.b32.xlu0 %v4125_v25, %s3196_s23  ;;  %1950 = vrot.lane.b32.xlu2 %v4139_v57, %s3195_s22 }
 0x66e   : > { %1966 = vrot.lane.b32.xlu1 %v4122_v21, %s3199_s26 }
 0x675   : > { %1916 = vrot.lane.b32.xlu0 %v4133_v30, %s3200_s27  ;;  %1918 = vrot.lane.b32.xlu2 %v4122_v21, %s3200_s27 }
 0x676   : > { %1932 = vrot.lane.b32.xlu1 %v4125_v25, %s3197_s24 }
 0x67d   : > { %1968 = vrot.lane.b32.xlu0 %v4125_v25, %s3199_s26  ;;  %1956 = vrot.lane.b32.xlu2 %v4125_v25, %s3195_s22 }
 0x67e   : > { %1942 = vrot.lane.b32.xlu1 %v4122_v21, %s3198_s25 }
 0x685   : > { %1944 = vrot.lane.b32.xlu0 %v4125_v25, %s3198_s25  ;;  %1964 = vrot.lane.b32.xlu2 %v4133_v30, %s3199_s26 }
 0x686   : > { %1920 = vrot.lane.b32.xlu1 %v4125_v25, %s3200_s27 }
 0x68d   : > { %1962 = vrot.lane.b32.xlu0 %v4139_v57, %s3199_s26  ;;  %1992 = vrot.lane.b32.xlu2 %v4125_v25, %s3201_s28 }
 0x68e   : > { %1988 = vrot.lane.b32.xlu1 %v4133_v30, %s3201_s28 }
 0x695   : > { %1938 = vrot.lane.b32.xlu0 %v4139_v57, %s3198_s25  ;;  %1940 = vrot.lane.b32.xlu2 %v4133_v30, %s3198_s25 }
 0x696   : > { %1914 = vrot.lane.b32.xlu1 %v4139_v57, %s3200_s27 }
 0x69d   : > { %2010 = vperm.xlu0 %3142, %v2879_v54   ;;  %1986 = vrot.lane.b32.xlu2 %v4139_v57, %s3201_s28  ;;  %s4375_s28 = scalar_lea.vmem %s4459_s4, %s2987_s17 }
 0x69e   : > { %2000 = vperm.xlu1 %3143, %v2877_v2   ;;  %2361 = vst.msk [vmem:[%s4375_s28 + $0x4] sm:$0xf] %vm2359_vm2, %v3202_v12 }
 0x69f   : > { %2360 = vst.msk [vmem:[%s4375_s28] sm:$0xf] %vm2359_vm2, %v3202_v12 }
 0x6a0   : > { %v1909_v4 = vpop.permute.xlu2 %1908  ;;  %2362 = vst.msk [vmem:[%s4375_s28 + $0x8] sm:$0xf] %vm2359_vm2, %v3202_v12 }
 0x6a1   : > { %2150 = vmatpush.bf16.msrb.mxu3 %v1909_v4  ;;  %2363 = vst.msk [vmem:[%s4375_s28 + $0xc] sm:$0xf] %vm2359_vm2, %v3202_v12 }
 0x6a2   : > { %2364 = vst.msk [vmem:[%s4375_s28 + $0x10] sm:$0xf] %vm2359_vm2, %v3202_v12 }
 0x6a3   : > { %2365 = vst.msk [vmem:[%s4375_s28 + $0x14] sm:$0xf] %vm2359_vm2, %v3202_v12 }
 0x6a4   : > { %2366 = vst.msk [vmem:[%s4375_s28 + $0x18] sm:$0xf] %vm2359_vm2, %v3202_v12 }
 0x6a5   : > { %2025 = vperm.xlu0 %3142, %v2882_v6   ;;  %2005 = vperm.xlu2 %3141, %v2878_v9   ;;  %v2963_v6 = vld [vmem:[%s4456_s1 + $0x258] sm:$0xf]  ;;  %v3078_v9 = vld [vmem:[%s4456_s1 + $0x268] sm:$0xf0]  ;;  %2367 = vst.msk [vmem:[%s4375_s28 + $0x1c] sm:$0xf] %vm2359_vm2, %v3202_v12 }
 0x6a6   : > { %2015 = vperm.xlu1 %3143, %v2880_v13   ;;  %v2964_v61 = vor.u32 %v3078_v9, %v2963_v6 }
 0x6ad   : > { %3165 = vrot.lane.b32.xlu0 %v3164_v46, %s3198_s25  ;;  %2020 = vperm.xlu2 %3141, %v2881_v11   ;;  %v3061_v11 = vld [vmem:[%s4456_s1 + $0x1e4] sm:$0xf] }
 0x6ae   : > { %2030 = vperm.xlu1 %3143, %v2883_v15   ;;  %v2905_v15 = vld [vmem:[%s4456_s1 + $0x1f4] sm:$0xf0] }
 0x6af   : > { %v1903_v19 = vpop.permute.xlu2 %1902 }
 0x6b5   : > { %3180 = vrot.lane.b32.xlu0 %v3179_v18, %s3198_s25  ;;  %2035 = vperm.xlu2 %3141, %v2884_v42   ;;  %v3065_v42 = vld [vmem:[%s4456_s1 + $0x200] sm:$0xf0] }
 0x6b6   : > { %3170 = vrot.lane.b32.xlu1 %v3169_v43, %s3198_s25  ;;  %v2920_v18 = vor.u32 %v3065_v42, %v2919_v23  ;;  %v2931_v43 = vld [vmem:[%s4456_s1 + $0x210] sm:$0xf] }
 0x6b7   : > { %v1907_v3 = vpop.permute.xlu0 %1906  ;;  %v1955_v58 = vpop.permute.xlu2 %1954  ;;  %v2932_v40 = vor.u32 %v3069_v26, %v2931_v43 }
 0x6b8   : > { %2151 = vmatpush.bf16.msrb.mxu3 %v1907_v3  ;;  %v3066_v3 = vld [vmem:[%s4456_s1 + $0x20c] sm:$0xf] }
 0x6bd   : > { %3175 = vrot.lane.b32.xlu2 %v3174_v56, %s3198_s25  ;;  %v3072_v56 = vld [vmem:[%s4456_s1 + $0x23c] sm:$0xf] }
 0x6bf   : > { %v1979_v20 = vpop.permute.xlu0 %1978  ;;  %v1953_v8 = vpop.permute.xlu2 %1952 }
 0x6c0   : > { %v1905_v27 = vpop.permute.xlu1 %1904 }
 0x6c1   : > { %2152 = vmatpush.bf16.msrb.mxu3 %v1905_v27  ;;  %v2939_v27 = vld [vmem:[%s4456_s1 + $0x218] sm:$0xf] }
 0x6c5   : > { %2153 = vmatpush.bf16.msrb.mxu3 %v1903_v19  ;;  %v2908_v19 = vor.u32 %v3061_v11, %v2905_v15 }
 0x6c7   : > { %v1977_v28 = vpop.permute.xlu0 %1976  ;;  %v1951_v29 = vpop.permute.xlu2 %1950 }
 0x6c8   : > { %v1931_v59 = vpop.permute.xlu1 %1930 }
 0x6c9   : > { %2154 = vmatpush.bf16.msrb.mxu3 %v4125_v25  ;;  %v2943_v25 = vld [vmem:[%s4456_s1 + $0x230] sm:$0xf] }
 0x6ca   : > { %v2944_v44 = vor.u32 %v3073_v39, %v2943_v25 }
 0x6cd   : > { %2155 = vmatpush.bf16.msrb.mxu3 %v4122_v21 }
 0x6cf   : > { %v1975_v48 = vpop.permute.xlu0 %1974  ;;  %v1919_v50 = vpop.permute.xlu2 %1918 }
 0x6d0   : > { %v1929_v47 = vpop.permute.xlu1 %1928 }
 0x6d1   : > { %2156 = vmatpush.bf16.msrb.mxu3 %v4133_v30 }
 0x6d5   : > { %2157 = vmatpush.bf16.msrb.mxu3 %v4139_v57  ;;  %v2913_v57 = vld [vmem:[%s4456_s1 + $0x1fc] sm:$0xf0] }
 0x6d6   : > { %v2916_v2 = vor.u32 %v3062_v53, %v2913_v57 }
 0x6d7   : > { %v1991_v22 = vpop.permute.xlu0 %1990  ;;  %v1957_v60 = vpop.permute.xlu2 %1956 }
 0x6d8   : > { %2158 = vmatmul.bf16.vlgmr.msrb.gmra.mxu3 %v2904_v1  ;;  %v1927_v45 = vpop.permute.xlu1 %1926  ;;  %2208 = vmatpush.bf16.msra.mxu1 %v1957_v60  ;;  %v3077_v1 = vld [vmem:[%s4456_s1 + $0x264] sm:$0xf] }
 0x6dc   : > { %2209 = vmatpush.bf16.msra.mxu1 %v1955_v58  ;;  %v2925_v58 = vld [vmem:[%s4456_s1 + $0x21c] sm:$0xf0] }
 0x6dd   : > { %v2928_v49 = vor.u32 %v3066_v3, %v2925_v58 }
 0x6df   : > { %v1981_v31 = vpop.permute.xlu0 %1980  ;;  %v1965_v32 = vpop.permute.xlu2 %1964 }
 0x6e0   : > { %v1967_v24 = vpop.permute.xlu1 %1966  ;;  %2210 = vmatpush.bf16.msra.mxu1 %v1953_v8  ;;  %2237 = vmatpush.bf16.msra.mxu2 %v1981_v31  ;;  %v3075_v31 = vld [vmem:[%s4456_s1 + $0x250] sm:$0xf0] }
 0x6e4   : > { %2211 = vmatpush.bf16.msra.mxu1 %v1951_v29  ;;  %2238 = vmatpush.bf16.msra.mxu2 %v1979_v20  ;;  %v2953_v20 = vld [vmem:[%s4456_s1 + $0x24c] sm:$0xf0] }
 0x6e5   : > { %v2956_v8 = vor.u32 %v3072_v56, %v2953_v20 }
 0x6e7   : > { %v1917_v34 = vpop.permute.xlu0 %1916  ;;  %v1993_v35 = vpop.permute.xlu2 %1992 }
 0x6e8   : > { %2163 = vmatmul.bf16.gmra.mxu3 %v2924_v5  ;;  %v1933_v36 = vpop.permute.xlu1 %1932  ;;  %2239 = vmatpush.bf16.msra.mxu2 %v1977_v28  ;;  %v3070_v28 = vld [vmem:[%s4456_s1 + $0x228] sm:$0xf0]  ;;  %v2965_v5 = vld [vmem:[%s4456_s1 + $0x26c] sm:$0xf0] }
 0x6e9   : > { %2179 = vmatpush.bf16.msra.mxu0 %v1933_v36  ;;  %2270 = vmatpush.bf16.msra.mxu3 %v1993_v35  ;;  %v2940_v29 = vor.u32 %v3070_v28, %v2939_v27  ;;  %v2968_v35 = vor.u32 %v3076_v17, %v2965_v5  ;;  %v2979_v36 = vld [vmem:[%s4456_s1 + $0x268] sm:$0xf] }
 0x6ec   : > { %2240 = vmatpush.bf16.msra.mxu2 %v1975_v48  ;;  %v3074_v48 = vld [vmem:[%s4456_s1 + $0x248] sm:$0xf0] }
 0x6ed   : > { %2180 = vmatpush.bf16.msra.mxu0 %v1931_v59  ;;  %2271 = vmatpush.bf16.msra.mxu3 %v1991_v22  ;;  %v2951_v59 = vld [vmem:[%s4456_s1 + $0x238] sm:$0xf] }
 0x6ee   : > { %v2952_v7 = vor.u32 %v3074_v48, %v2951_v59  ;;  %v2973_v22 = vld [vmem:[%s4456_s1 + $0x274] sm:$0xf0] }
 0x6ef   : > { %v1969_v21 = vpop.permute.xlu0 %1968  ;;  %v1941_v63 = vpop.permute.xlu2 %1940  ;;  %v2976_v60 = vor.u32 %v3077_v1, %v2973_v22 }
 0x6f0   : > { %v1943_v38 = vpop.permute.xlu1 %1942  ;;  %2241 = vmatpush.bf16.msra.mxu2 %v1969_v21  ;;  %v3080_v21 = vld [vmem:[%s4456_s1 + $0x278] sm:$0xf0] }
 0x6f1   : > { %2181 = vmatpush.bf16.msra.mxu0 %v1929_v47  ;;  %v2945_v47 = vld [vmem:[%s4456_s1 + $0x244] sm:$0xf0] }
 0x6f4   : > { %2242 = vmatpush.bf16.msra.mxu2 %v1967_v24  ;;  %v2971_v24 = vld [vmem:[%s4456_s1 + $0x260] sm:$0xf] }
 0x6f5   : > { %2182 = vmatpush.bf16.msra.mxu0 %v1927_v45  ;;  %v2959_v45 = vld [vmem:[%s4456_s1 + $0x240] sm:$0xf] }
 0x6f7   : > { %v1945_v51 = vpop.permute.xlu0 %1944  ;;  %v1987_v13 = vpop.permute.xlu2 %1986 }
 0x6f8   : > { %2168 = vmatmul.bf16.gmra.mxu3 %v2944_v44  ;;  %v1921_v30 = vpop.permute.xlu1 %1920  ;;  %2212 = vmatpush.bf16.msra.mxu1 %v1945_v51 }
 0x6f9   : > { %2183 = vmatpush.bf16.msra.mxu0 %v1921_v30  ;;  %2243 = vmatpush.bf16.msra.mxu2 %v1965_v32  ;;  %v2960_v32 = vor.u32 %v3075_v31, %v2959_v45 }
 0x6fc   : > { %2213 = vmatpush.bf16.msra.mxu1 %v1943_v38  ;;  %v2980_v38 = vor.u32 %v3080_v21, %v2979_v36 }
 0x6fd   : > { %2184 = vmatpush.bf16.msra.mxu0 %v1919_v50  ;;  %v3071_v50 = vld [vmem:[%s4456_s1 + $0x234] sm:$0xf] }
 0x6fe   : > { %v2948_v10 = vor.u32 %v3071_v50, %v2945_v47 }
 0x6ff   : > { %v1963_v54 = vpop.permute.xlu0 %1962 }
 0x700   : > { %v1989_v4 = vpop.permute.xlu1 %1988  ;;  %2214 = vmatpush.bf16.msra.mxu1 %v1941_v63  ;;  %2244 = vmatpush.bf16.msra.mxu2 %v1963_v54 }
 0x701   : > { %2185 = vmatpush.bf16.msra.mxu0 %v1917_v34  ;;  %2272 = vmatpush.bf16.msra.mxu3 %v1989_v4  ;;  %v2972_v34 = vor.u32 %v3079_v33, %v2971_v24 }
 0x703   : > { %2245 = vmatmul.bf16.vlgmr.msra.gmra.mxu2 %v2916_v2 }
 0x705   : > { %2273 = vmatpush.bf16.msra.mxu3 %v1987_v13 }
 0x707   : > { %v1939_v46 = vpop.permute.xlu0 %1938 }
 0x708   : > { %2173 = vmatmul.bf16.gmra.mxu3 %v2964_v61  ;;  %v1915_v16 = vpop.permute.xlu1 %1914  ;;  %2215 = vmatpush.bf16.msra.mxu1 %v1939_v46 }
 0x709   : > { %2186 = vmatpush.bf16.msra.mxu0 %v1915_v16 }
 0x70b   : > { %2216 = vmatmul.bf16.vlgmr.msra.gmra.mxu1 %v2912_v55  ;;  %v2006_v55 = vpop.permute.xlu2 %2005 }
 0x70c   : > { %2187 = vmatmul.bf16.vlgmr.msra.gmra.mxu0 %v2908_v19 }
 0x70f   : > { %v2011_v53 = vpop.permute.xlu0 %2010 }
 0x710   : > { %v2001_v6 = vpop.permute.xlu1 %2000 }
 0x713   : > { %2250 = vmatmul.bf16.gmra.mxu2 %v2936_v52  ;;  %v2021_v47 = vpop.permute.xlu2 %2020 }
 0x717   : > { %v4357_v61 = vpop.permute.xlu0 %2025 }
 0x718   : > { %2981 = vmatmul.msk.bf16.vlgmr.msra.gmra.mxu3 %vm516_vm0, %v2920_v18  ;;  %v2016_v16 = vpop.permute.xlu1 %2015 }
 0x71b   : > { %2221 = vmatmul.bf16.gmra.mxu1 %v2932_v40 }
 0x71c   : > { %2192 = vmatmul.bf16.gmra.mxu0 %v2928_v49 }
 0x71f   : > { %v3166_v42 = vpop.permute.xlu0 %3165 }
 0x720   : > { %v3167_v3 = vunpack.i.l.bf16 %v3166_v42  ;;  %v2031_v20 = vpop.permute.xlu1 %2030 }
 0x723   : > { %2255 = vmatmul.bf16.gmra.mxu2 %v2956_v8 }
 0x728   : > { %2982 = vmatmul.msk.bf16.gmra.mxu3 %vm516_vm0, %v2940_v29  ;;  %v3171_v17 = vpop.permute.xlu1 %3170 }
 0x729   : > { %v3172_v36 = vunpack.i.l.bf16 %v3171_v17 }
 0x72b   : > { %2226 = vmatmul.bf16.gmra.mxu1 %v2952_v7  ;;  %v3168_v7 = vunpack.i.h.bf16 %v3166_v42 }
 0x72c   : > { %2197 = vmatmul.bf16.gmra.mxu0 %v2948_v10 }
 0x733   : > { %2260 = vmatmul.bf16.gmra.mxu2 %v2976_v60 }
 0x738   : > { %2983 = vmatmul.msk.bf16.gmra.mxu3 %vm516_vm0, %v2960_v32 }
 0x73b   : > { %2231 = vmatmul.bf16.gmra.mxu1 %v2972_v34 }
 0x73c   : > { %2202 = vmatmul.bf16.gmra.mxu0 %v2968_v35 }
 0x748   : > { %2984 = vmatmul.msk.bf16.gmra.mxu3 %vm516_vm0, %v2980_v38 }
 0x75b   : > { %v2159_v25 = vpop.f32.mrf.mxu3 }
 0x75c   : > { %v2160_v9 = vadd.f32 %v2159_v25, %v2001_v6  ;;  %v2036_v25 = vpop.permute.xlu2 %2035 }
 0x763   : > { %v2161_v39 = vpop.f32.mrf.mxu3 }
 0x764   : > { %v2162_v19 = vadd.f32 %v2161_v39, %v2006_v55  ;;  %v3176_v55 = vpop.permute.xlu2 %3175 }
 0x76b   : > { %v2164_v44 = vpop.f32.mrf.mxu3 }
 0x76c   : > { %v2165_v49 = vadd.f32 %v2164_v44, %v2011_v53 }
 0x773   : > { %v2166_v51 = vpop.f32.mrf.mxu3 }
 0x774   : > { %v2167_v60 = vadd.f32 %v2166_v51, %v2016_v16 }
 0x77b   : > { %v2169_v30 = vpop.f32.mrf.mxu3 }
 0x77c   : > { %v2170_v39 = vadd.f32 %v2169_v30, %v2021_v47 }
 0x783   : > { %v4353_v63 = vpop.f32.mrf.mxu3 }
 0x786   : > { %v2246_v2 = vpop.f32.mrf.mxu2 }
 0x788   : > { %v2217_v57 = vpop.f32.mrf.mxu1 }
 0x789   : > { %v2188_v54 = vpop.f32.mrf.mxu0 }
 0x78a   : > { %v2189_v41 = vadd.f32 %v2188_v54, %v2160_v9 }
 0x78b   : > { %v4355_v4 = vpop.f32.mrf.mxu3 }
 0x78c   : > { %v2218_v46 = vadd.f32 %v2217_v57, %v2189_v41 }
 0x78e   : > { %v2248_v15 = vpop.f32.mrf.mxu2  ;;  %v2247_v52 = vadd.f32 %v2246_v2, %v2218_v46  ;;  %v2172_v46 = vadd.f32 %v4353_v63, %v4357_v61  ;;  %v3177_v61 = vunpack.i.l.bf16 %v3176_v55 }
 0x790   : > { %v2219_v13 = vpop.f32.mrf.mxu1 }
 0x791   : > { %v2190_v14 = vpop.f32.mrf.mxu0 }
 0x792   : > { %v2191_v23 = vadd.f32 %v2190_v14, %v2162_v19 }
 0x793   : > { %v4359_v11 = vpop.f32.mrf.mxu3 }
 0x794   : > { %v2220_v58 = vadd.f32 %v2219_v13, %v2191_v23  ;;  %v3173_v13 = vunpack.i.h.bf16 %v3171_v17 }
 0x796   : > { %v2251_v26 = vpop.f32.mrf.mxu2  ;;  %v2249_v27 = vadd.f32 %v2248_v15, %v2220_v58 }
 0x798   : > { %v2222_v0 = vpop.f32.mrf.mxu1 }
 0x799   : > { %v2193_v62 = vpop.f32.mrf.mxu0 }
 0x79a   : > { %v2194_v28 = vadd.f32 %v2193_v62, %v2165_v49 }
 0x79b   : > { %v2275_v18 = vpop.f32.mrf.mxu3 }
 0x79c   : > { %v2276_v43 = vadd.f32 %v2275_v18, %v2247_v52  ;;  %v2223_v10 = vadd.f32 %v2222_v0, %v2194_v28 }
 0x79e   : > { %v2295_v40 = vmul.f32 %v4092_v37, %v2276_v43  ;;  %v2253_v22 = vpop.f32.mrf.mxu2  ;;  %v2252_v32 = vadd.f32 %v2251_v26, %v2223_v10  ;;  %v2175_v43 = vadd.f32 %v4355_v4, %v2031_v20  ;;  %v3178_v20 = vunpack.i.h.bf16 %v3176_v55 }
 0x7a0   : > { %v2351_v56 = vadd.f32 %v3167_v3, %v2295_v40  ;;  %v2224_v59 = vpop.f32.mrf.mxu1 }
 0x7a1   : > { %v2195_v8 = vpop.f32.mrf.mxu0 }
 0x7a2   : > { %v2368_v29 = vpack.c.bf16 %v2351_v56, %v2351_v56  ;;  %v2196_v24 = vadd.f32 %v2195_v8, %v2167_v60 }
 0x7a3   : > { %v2277_v48 = vpop.f32.mrf.mxu3 }
 0x7a4   : > { %v2278_v50 = vadd.f32 %v2277_v48, %v2249_v27  ;;  %2384 = vrot.lane.b32.xlu1 %v2368_v29, %s3203_s29  ;;  %v2225_v21 = vadd.f32 %v2224_v59, %v2196_v24  ;;  %v2177_v59 = vadd.f32 %v4359_v11, %v2036_v25 }
 0x7a6   : > { %v2296_v1 = vmul.f32 %v4092_v37, %v2278_v50  ;;  %v2256_v51 = vpop.f32.mrf.mxu2  ;;  %v2254_v53 = vadd.f32 %v2253_v22, %v2225_v21  ;;  %v3181_v50 = vpop.permute.xlu0 %3180 }
 0x7a8   : > { %v2352_v45 = vadd.f32 %v3168_v7, %v2296_v1  ;;  %v2227_v35 = vpop.f32.mrf.mxu1 }
 0x7a9   : > { %v2198_v31 = vpop.f32.mrf.mxu0 }
 0x7aa   : > { %v2369_v33 = vpack.c.bf16 %v2352_v45, %v2352_v45  ;;  %v2199_v57 = vadd.f32 %v2198_v31, %v2170_v39  ;;  %v3182_v45 = vunpack.i.l.bf16 %v3181_v50 }
 0x7ab   : > { %v2280_v5 = vpop.f32.mrf.mxu3 }
 0x7ac   : > { %v2281_v34 = vadd.f32 %v2280_v5, %v2252_v32  ;;  %2386 = vrot.lane.b32.xlu2 %v2369_v33, %s3203_s29  ;;  %v2228_v14 = vadd.f32 %v2227_v35, %v2199_v57  ;;  %v3183_v35 = vunpack.i.h.bf16 %v3181_v50 }
 0x7ae   : > { %v2297_v38 = vmul.f32 %v4092_v37, %v2281_v34  ;;  %v2257_v16 = vadd.f32 %v2256_v51, %v2228_v14  ;;  %v2258_v0 = vpop.f32.mrf.mxu2 }
 0x7b0   : > { %v2353_v44 = vadd.f32 %v3172_v36, %v2297_v38  ;;  %v2229_v15 = vpop.f32.mrf.mxu1 }
 0x7b1   : > { %v2200_v2 = vpop.f32.mrf.mxu0 }
 0x7b2   : > { %v2370_v54 = vpack.c.bf16 %v2353_v44, %v2353_v44  ;;  %v2201_v19 = vadd.f32 %v2200_v2, %v2172_v46 }
 0x7b3   : > { %v2282_v6 = vpop.f32.mrf.mxu3 }
 0x7b4   : > { %v2283_v9 = vadd.f32 %v2282_v6, %v2254_v53  ;;  %2388 = vrot.lane.b32.xlu0 %v2370_v54, %s3203_s29  ;;  %v2230_v42 = vadd.f32 %v2229_v15, %v2201_v19 }
 0x7b6   : > { %v2298_v41 = vmul.f32 %v4092_v37, %v2283_v9  ;;  %v2259_v58 = vadd.f32 %v2258_v0, %v2230_v42  ;;  %v2261_v4 = vpop.f32.mrf.mxu2 }
 0x7b8   : > { %v2354_v30 = vadd.f32 %v3173_v13, %v2298_v41  ;;  %v2232_v3 = vpop.f32.mrf.mxu1 }
 0x7b9   : > { %v2203_v63 = vpop.f32.mrf.mxu0 }
 0x7ba   : > { %v2371_v62 = vpack.c.bf16 %v2354_v30, %v2354_v30  ;;  %v2204_v40 = vadd.f32 %v2203_v63, %v2175_v43 }
 0x7bb   : > { %v2285_v52 = vpop.f32.mrf.mxu3 }
 0x7bc   : > { %v2286_v23 = vadd.f32 %v2285_v52, %v2257_v16  ;;  %2390 = vrot.lane.b32.xlu1 %v2371_v62, %s3203_s29  ;;  %v2233_v27 = vadd.f32 %v2232_v3, %v2204_v40 }
 0x7be   : > { %v2299_v18 = vmul.f32 %v4092_v37, %v2286_v23  ;;  %v2262_v47 = vadd.f32 %v2261_v4, %v2233_v27  ;;  %v2263_v24 = vpop.f32.mrf.mxu2 }
 0x7c0   : > { %v2355_v26 = vadd.f32 %v3177_v61, %v2299_v18  ;;  %v2234_v1 = vpop.f32.mrf.mxu1 }
 0x7c1   : > { %v2205_v29 = vpop.f32.mrf.mxu0 }
 0x7c2   : > { %v2372_v49 = vpack.c.bf16 %v2355_v26, %v2355_v26  ;;  %v2206_v7 = vadd.f32 %v2205_v29, %v2177_v59 }
 0x7c3   : > { %v2287_v56 = vpop.f32.mrf.mxu3 }
 0x7c4   : > { %v2288_v8 = vadd.f32 %v2287_v56, %v2259_v58  ;;  %2392 = vrot.lane.b32.xlu2 %v2372_v49, %s3203_s29  ;;  %v2235_v31 = vadd.f32 %v2234_v1, %v2206_v7 }
 0x7c6   : > { %v2300_v28 = vmul.f32 %v4092_v37, %v2288_v8  ;;  %v2264_v11 = vadd.f32 %v2263_v24, %v2235_v31 }
 0x7c8   : > { %v2356_v48 = vadd.f32 %v3178_v20, %v2300_v28 }
 0x7ca   : > { %v2373_v10 = vpack.c.bf16 %v2356_v48, %v2356_v48 }
 0x7cb   : > { %v2290_v22 = vpop.f32.mrf.mxu3 }
 0x7cc   : > { %v2291_v60 = vadd.f32 %v2290_v22, %v2262_v47  ;;  %2394 = vrot.lane.b32.xlu0 %v2373_v10, %s3203_s29 }
 0x7ce   : > { %v2301_v32 = vmul.f32 %v4092_v37, %v2291_v60 }
 0x7d0   : > { %v2357_v33 = vadd.f32 %v3182_v45, %v2301_v32 }
 0x7d2   : > { %v2374_v17 = vpack.c.bf16 %v2357_v33, %v2357_v33 }
 0x7d3   : > { %v2292_v5 = vpop.f32.mrf.mxu3 }
 0x7d4   : > { %v2293_v34 = vadd.f32 %v2292_v5, %v2264_v11  ;;  %2396 = vrot.lane.b32.xlu1 %v2374_v17, %s3203_s29 }
 0x7d6   : > { %v2302_v36 = vmul.f32 %v4092_v37, %v2293_v34 }
 0x7d8   : > { %v2358_v21 = vadd.f32 %v3183_v35, %v2302_v36 }
 0x7da   : > { %v2375_v38 = vpack.c.bf16 %v2358_v21, %v2358_v21 }
 0x7dc   : > { %2398 = vrot.lane.b32.xlu2 %v2375_v38, %s3203_s29 }
 0x806   : > { %v2387_v25 = vpop.permute.xlu2 %2386 }
 0x807   : > { %2409 = vst.msk [vmem:[%s4375_s28 + $0x4] sm:$0xf] %vm733_vm1, %v2387_v25 }
 0x808   : > { %2418 = vst.msk [vmem:[%s4375_s28 + $0x4] sm:$0xf] %vm2416_vm3, %v3202_v12 }
 0x816   : > { %v2385_v39 = vpop.permute.xlu1 %2384 }
 0x817   : > { %2408 = vst.msk [vmem:[%s4375_s28] sm:$0xf] %vm733_vm1, %v2385_v39 }
 0x818   : > { %2417 = vst.msk [vmem:[%s4375_s28] sm:$0xf] %vm2416_vm3, %v3202_v12 }
 0x81e   : > { %v2393_v37 = vpop.permute.xlu2 %2392 }
 0x81f   : > { %2412 = vst.msk [vmem:[%s4375_s28 + $0x10] sm:$0xf] %vm733_vm1, %v2393_v37 }
 0x820   : > { %2421 = vst.msk [vmem:[%s4375_s28 + $0x10] sm:$0xf] %vm2416_vm3, %v3202_v12 }
 0x826   : > { %v2389_v44 = vpop.permute.xlu0 %2388 }
 0x827   : > { %2410 = vst.msk [vmem:[%s4375_s28 + $0x8] sm:$0xf] %vm733_vm1, %v2389_v44 }
 0x828   : > { %2419 = vst.msk [vmem:[%s4375_s28 + $0x8] sm:$0xf] %vm2416_vm3, %v3202_v12 }
 0x82e   : > { %v2391_v51 = vpop.permute.xlu1 %2390 }
 0x82f   : > { %2411 = vst.msk [vmem:[%s4375_s28 + $0xc] sm:$0xf] %vm733_vm1, %v2391_v51 }
 0x830   : > { %2420 = vst.msk [vmem:[%s4375_s28 + $0xc] sm:$0xf] %vm2416_vm3, %v3202_v12 }
 0x836   : > { %v2399_v53 = vpop.permute.xlu2 %2398 }
 0x837   : > { %2415 = vst.msk [vmem:[%s4375_s28 + $0x1c] sm:$0xf] %vm733_vm1, %v2399_v53 }
 0x838   : > { %2424 = vst.msk [vmem:[%s4375_s28 + $0x1c] sm:$0xf] %vm2416_vm3, %v3202_v12 }
 0x83e   : > { %v2395_v57 = vpop.permute.xlu0 %2394 }
 0x83f   : > { %2413 = vst.msk [vmem:[%s4375_s28 + $0x14] sm:$0xf] %vm733_vm1, %v2395_v57 }
 0x840   : > { %2422 = vst.msk [vmem:[%s4375_s28 + $0x14] sm:$0xf] %vm2416_vm3, %v3202_v12 }
 0x846   : > { %v2397_v54 = vpop.permute.xlu1 %2396 }
 0x847   : > { %2414 = vst.msk [vmem:[%s4375_s28 + $0x18] sm:$0xf] %vm733_vm1, %v2397_v54 }
 0x848   : > { %2423 = vst.msk [vmem:[%s4375_s28 + $0x18] sm:$0xf] %vm2416_vm3, %v3202_v12 }
 0x849 PF: > { %s14_s15 = sadd.s32 1, %s3192_s15  }
 0x84a   : > { %p11_p4 = scmp.ge.s32.totalorder %s14_s15, 4  }
 0x84c   :  { %13 = sbr.rel (!%p11_p4) target bundleno = 1 (0x1), region = 72 }

// kernel: unet_forward.19
= control target key start
LH: loop header
LB: loop body
LE: loop exit
PB: predicated region body
PF: predicated region fallthrough
CT: control target
= control target key end

     0   :  { %s838_s18 = smov 0   ;;  %s1007_s0 = inlined_call_operand.vmem [shape: bf16[2,32,128], index: 0, kind: input, shape index: {}]   ;;  %s1008_s1 = inlined_call_operand.vmem [shape: bf16[2,32,128], index: 1, kind: input, shape index: {}]   ;;  %s1009_s2 = inlined_call_operand.vmem [shape: bf16[32,576], index: 2, kind: input, shape index: {}]   ;;  %s1010_s3 = inlined_call_operand.vmem [shape: f32[32,1], index: 3, kind: input, shape index: {}]   ;;  %s1011_s4 = inlined_call_operand.vmem [shape: f32[1,80], index: 4, kind: input, shape index: {}]   ;;  %s1012_s5 = inlined_call_operand.vmem [shape: bf16[2,32,128], index: 5, kind: output, shape index: {}]  }
   0x1 LB: > { %s676_s19 = sadd.s32 4294967295, %s796_s18   ;;  %p680_p0 = scmp.ge.s32.totalorder %s796_s18, 1  ;;  %s796_s18 = sphi %s838_s18, %s15_s18  }
   0x2   : > { %p197_p1 = scmp.lt.s32.totalorder %s796_s18, 3 }
   0x4   : > { %p198_p2 = pnand %p680_p0, %p197_p1 }
   0x5   : > { %p230_p3 = scmp.lt.s32.totalorder (!%p198_p2), %s676_s19, 1  ;;  %s798_s24 = smov (!%p198_p2), 127  }
   0x6   : > { %201 = sbr.rel (%p198_p2) target bundleno = 488 (0x1e8), region = 40  ;;  %s799_s25 = smov (!%p198_p2), 116  }
   0x7   : > { %s800_s29 = smov (!%p198_p2), 118   ;;  %s801_s30 = smov (!%p198_p2), 107  }
   0x8   : > { %s802_s6 = smov (!%p198_p2), 126   ;;  %s803_s7 = smov (!%p198_p2), 117  }
   0x9   : > { %s804_s8 = smov (!%p198_p2), 108   ;;  %s805_s9 = smov (!%p198_p2), 106  }
   0xa   : > { %s807_s16 = smov (!%p198_p2), 11  }
   0xb   : > { %s1014_s19 = smov (!%p230_p3, %s676_s19), 1  ;;  %v705_v22 = vld [vmem:[%s1009_s2] sm:$0xf]  ;;  %v752_v23 = vld [vmem:[%s1009_s2 + $0x10] sm:$0xf0]  ;;  %v806_v27 = vmov 0  }
   0xc   : > { %s846_s20 = sshll.u32 %s1014_s19, 4  ;;  %v706_v26 = vor.u32 %v752_v23, %v705_v22  ;;  %787 = vset.pattern.permute.xlu0 %v806_v27  ;;  %v259_v28 = vld [vmem:[%s1010_s3 + $0x8] sm:$0xff]  ;;  %788 = vset.pattern.permute.xlu1 %v806_v27  ;;  %v750_v31 = vld [vmem:[%s1009_s2 + $0x4] sm:$0xf]  ;;  %v707_v32 = vld [vmem:[%s1009_s2 + $0x14] sm:$0xf0] }
   0xd   : > { %s239_s23 = scalar_lea.vmem %s1008_s1, %s846_s20  ;;  %s234_s28 = scalar_lea.vmem %s1007_s0, %s846_s20  ;;  %786 = vset.pattern.permute.xlu2 %v806_v27  ;;  %v725_v33 = vld [vmem:[%s1009_s2 + $0x28] sm:$0xf]  ;;  %v757_v34 = vld [vmem:[%s1009_s2 + $0x38] sm:$0xf0]  ;;  %v710_v37 = vor.u32 %v750_v31, %v707_v32  ;;  %v260_v39 = vld [vmem:[%s1010_s3 + $0x10] sm:$0xff]  ;;  %vm460_vm0 = vcmask 523264  }
   0xe   : > { %v852_v0 = vld [vmem:[%s239_s23 + $0x8] sm:$0xff]  ;;  %v854_v1 = vld [vmem:[%s239_s23] sm:$0xff]  ;;  %v726_v38 = vor.u32 %v757_v34, %v725_v33  ;;  %v753_v45 = vld [vmem:[%s1009_s2 + $0x18] sm:$0xf0]  ;;  %s979_s14 = scalar_lea.vmem %s1012_s5, %s846_s20  ;;  %vm574_vm1 = vcmask 84992   ;;  %vm599_vm2 = vcmask 740440  }
   0xf   : > { %302 = vrot.lane.b32.xlu0 %v852_v0, %s798_s24  ;;  %300 = vrot.lane.b32.xlu1 %v854_v1, %s798_s24  ;;  %v863_v2 = vld [vmem:[%s234_s28 + $0x8] sm:$0xff]  ;;  %v871_v3 = vld [vmem:[%s234_s28] sm:$0xff]  ;;  %vm604_vm3 = vcmask 1044184  }
  0x10   : > { %350 = vrot.lane.b32.xlu2 %v852_v0, %s799_s25  ;;  %v258_v40 = vld [vmem:[%s1010_s3] sm:$0xff]  ;;  %v713_v44 = vld [vmem:[%s1009_s2 + $0x8] sm:$0xf]  ;;  %v261_v46 = vld [vmem:[%s1010_s3 + $0x18] sm:$0xff] }
  0x11   : > { %v714_v47 = vor.u32 %v753_v45, %v713_v44  ;;  %v751_v48 = vld [vmem:[%s1009_s2 + $0xc] sm:$0xf]  ;;  %v715_v49 = vld [vmem:[%s1009_s2 + $0x1c] sm:$0xf0]  ;;  %v733_v58 = vld [vmem:[%s1009_s2 + $0x30] sm:$0xf] }
  0x12   : > { %v755_v50 = vld [vmem:[%s1009_s2 + $0x2c] sm:$0xf]  ;;  %v727_v51 = vld [vmem:[%s1009_s2 + $0x3c] sm:$0xf0]  ;;  %v718_v54 = vor.u32 %v751_v48, %v715_v49  ;;  %v758_v59 = vld [vmem:[%s1009_s2 + $0x40] sm:$0xf0] }
  0x13   : > { %v730_v55 = vor.u32 %v755_v50, %v727_v51  ;;  %v721_v60 = vld [vmem:[%s1009_s2 + $0x10] sm:$0xf]  ;;  %v754_v61 = vld [vmem:[%s1009_s2 + $0x20] sm:$0xf0]  ;;  %v734_v63 = vor.u32 %v758_v59, %v733_v58  ;;  %576 = vst.msk [vmem:[%s979_s14 + $0x4] sm:$0xf] %vm574_vm1, %v806_v27 }
  0x14   : > { %575 = vst.msk [vmem:[%s979_s14] sm:$0xf] %vm574_vm1, %v806_v27 }
  0x15   : > { %577 = vst.msk [vmem:[%s979_s14 + $0x8] sm:$0xf] %vm574_vm1, %v806_v27 }
  0x16   : > { %578 = vst.msk [vmem:[%s979_s14 + $0xc] sm:$0xf] %vm574_vm1, %v806_v27 }
  0x17   : > { %326 = vrot.lane.b32.xlu0 %v852_v0, %s800_s29  ;;  %324 = vrot.lane.b32.xlu1 %v854_v1, %s800_s29 }
  0x18   : > { %296 = vrot.lane.b32.xlu2 %v863_v2, %s798_s24 }
  0x1f   : > { %374 = vrot.lane.b32.xlu1 %v852_v0, %s801_s30  ;;  %320 = vrot.lane.b32.xlu0 %v863_v2, %s800_s29 }
  0x20   : > { %348 = vrot.lane.b32.xlu2 %v854_v1, %s799_s25 }
  0x27   : > { %318 = vrot.lane.b32.xlu1 %v871_v3, %s800_s29  ;;  %294 = vrot.lane.b32.xlu0 %v871_v3, %s798_s24 }
  0x28   : > { %372 = vrot.lane.b32.xlu2 %v854_v1, %s801_s30 }
  0x2f   : > { %314 = vrot.lane.b32.xlu1 %v852_v0, %s802_s6  ;;  %344 = vrot.lane.b32.xlu0 %v863_v2, %s799_s25 }
  0x30   : > { %368 = vrot.lane.b32.xlu2 %v863_v2, %s801_s30 }
  0x37   : > { %312 = vrot.lane.b32.xlu1 %v854_v1, %s802_s6  ;;  %342 = vrot.lane.b32.xlu0 %v871_v3, %s799_s25 }
  0x38   : > { %366 = vrot.lane.b32.xlu2 %v871_v3, %s801_s30 }
  0x3f   : > { %308 = vrot.lane.b32.xlu1 %v863_v2, %s802_s6  ;;  %338 = vrot.lane.b32.xlu0 %v852_v0, %s803_s7 }
  0x40   : > { %362 = vrot.lane.b32.xlu2 %v852_v0, %s804_s8 }
  0x47   : > { %306 = vrot.lane.b32.xlu1 %v871_v3, %s802_s6  ;;  %336 = vrot.lane.b32.xlu0 %v854_v1, %s803_s7 }
  0x48   : > { %360 = vrot.lane.b32.xlu2 %v854_v1, %s804_s8 }
  0x4f   : > { %356 = vrot.lane.b32.xlu1 %v863_v2, %s804_s8  ;;  %332 = vrot.lane.b32.xlu0 %v863_v2, %s803_s7 }
  0x50   : > { %330 = vrot.lane.b32.xlu2 %v871_v3, %s803_s7 }
  0x57   : > { %384 = vrot.lane.b32.xlu1 %v852_v0, %s805_s9  ;;  %354 = vrot.lane.b32.xlu0 %v871_v3, %s804_s8 }
  0x58   : > { %382 = vrot.lane.b32.xlu2 %v854_v1, %s805_s9 }
  0x5f   : > { %380 = vrot.lane.b32.xlu0 %v863_v2, %s805_s9  ;;  %378 = vrot.lane.b32.xlu1 %v871_v3, %s805_s9 }
  0x60   : > { %392 = vperm.xlu2 %786, %v258_v40  }
  0x67   : > { %397 = vperm.xlu0 %787, %v259_v28   ;;  %402 = vperm.xlu1 %788, %v260_v39  }
  0x68   : > { %407 = vperm.xlu2 %786, %v261_v46  }
  0x6a   : > { %v351_v4 = vpop.permute.xlu2 %350 }
  0x6b   : > { %505 = vmatpush.bf16.msra.mxu2 %v351_v4  ;;  %v759_v4 = vld [vmem:[%s1009_s2 + $0x48] sm:$0xf0] }
  0x72   : > { %v297_v5 = vpop.permute.xlu2 %296 }
  0x7a   : > { %v349_v6 = vpop.permute.xlu2 %348 }
  0x7b   : > { %506 = vmatpush.bf16.msra.mxu2 %v349_v6 }
  0x81   : > { %v303_v7 = vpop.permute.xlu0 %302  ;;  %v301_v8 = vpop.permute.xlu1 %300 }
  0x82   : > { %467 = vmatpush.bf16.msra.mxu0 %v303_v7  ;;  %v373_v9 = vpop.permute.xlu2 %372 }
  0x86   : > { %468 = vmatpush.bf16.msra.mxu0 %v301_v8 }
  0x89   : > { %v327_v10 = vpop.permute.xlu0 %326  ;;  %v325_v11 = vpop.permute.xlu1 %324 }
  0x8a   : > { %486 = vmatpush.bf16.msra.mxu1 %v327_v10  ;;  %469 = vmatpush.bf16.msra.mxu0 %v297_v5  ;;  %v369_v12 = vpop.permute.xlu2 %368 }
  0x8e   : > { %487 = vmatpush.bf16.msra.mxu1 %v325_v11 }
  0x91   : > { %v375_v13 = vpop.permute.xlu1 %374  ;;  %v321_v14 = vpop.permute.xlu0 %320 }
  0x92   : > { %524 = vmatpush.bf16.msra.mxu3 %v375_v13  ;;  %488 = vmatpush.bf16.msra.mxu1 %v321_v14  ;;  %v367_v15 = vpop.permute.xlu2 %366 }
  0x96   : > { %525 = vmatpush.bf16.msra.mxu3 %v373_v9 }
  0x99   : > { %v319_v16 = vpop.permute.xlu1 %318  ;;  %v295_v17 = vpop.permute.xlu0 %294 }
  0x9a   : > { %489 = vmatpush.bf16.msra.mxu1 %v319_v16  ;;  %470 = vmatpush.bf16.msra.mxu0 %v295_v17  ;;  %v363_v18 = vpop.permute.xlu2 %362 }
  0x9b   : > { %526 = vmatpush.bf16.msra.mxu3 %v369_v12 }
  0x9e   : > { %471 = vmatpush.bf16.msra.mxu0 %v852_v0  ;;  %v722_v0 = vor.u32 %v754_v61, %v721_v60 }
  0x9f   : > { %527 = vmatpush.bf16.msra.mxu3 %v367_v15 }
  0xa1   : > { %v315_v19 = vpop.permute.xlu1 %314  ;;  %v345_v20 = vpop.permute.xlu0 %344 }
  0xa2   : > { %490 = vmatpush.bf16.msra.mxu1 %v315_v19  ;;  %507 = vmatpush.bf16.msra.mxu2 %v345_v20  ;;  %v361_v21 = vpop.permute.xlu2 %360 }
  0xa3   : > { %472 = vmatpush.bf16.msra.mxu0 %v854_v1  ;;  %528 = vmatpush.bf16.msra.mxu3 %v363_v18  ;;  %v756_v1 = vld [vmem:[%s1009_s2 + $0x34] sm:$0xf] }
  0xa7   : > { %473 = vmatpush.bf16.msra.mxu0 %v863_v2  ;;  %529 = vmatpush.bf16.msra.mxu3 %v361_v21  ;;  %v735_v2 = vld [vmem:[%s1009_s2 + $0x44] sm:$0xf0] }
  0xa8   : > { %v738_v5 = vor.u32 %v756_v1, %v735_v2 }
  0xa9   : > { %v313_v24 = vpop.permute.xlu1 %312  ;;  %v343_v25 = vpop.permute.xlu0 %342 }
  0xaa   : > { %491 = vmatpush.bf16.msra.mxu1 %v313_v24  ;;  %508 = vmatpush.bf16.msra.mxu2 %v343_v25  ;;  %v331_v41 = vpop.permute.xlu2 %330 }
  0xab   : > { %474 = vmatpush.bf16.msra.mxu0 %v871_v3  ;;  %v741_v3 = vld [vmem:[%s1009_s2 + $0x38] sm:$0xf] }
  0xac   : > { %v742_v6 = vor.u32 %v759_v4, %v741_v3 }
  0xae   : > { %475 = vmatmul.bf16.vlgmr.msra.gmra.mxu0 %v706_v26 }
  0xb1   : > { %v309_v29 = vpop.permute.xlu1 %308  ;;  %v339_v30 = vpop.permute.xlu0 %338 }
  0xb2   : > { %492 = vmatpush.bf16.msra.mxu1 %v309_v29  ;;  %509 = vmatpush.bf16.msra.mxu2 %v339_v30  ;;  %v383_v56 = vpop.permute.xlu2 %382  ;;  %v789_v29 = vld [vmem:[%s1011_s4] ss:$0 sm:$0xff] }
  0xb9   : > { %v307_v35 = vpop.permute.xlu1 %306  ;;  %v337_v36 = vpop.permute.xlu0 %336 }
  0xba   : > { %493 = vmatpush.bf16.msra.mxu1 %v307_v35  ;;  %510 = vmatpush.bf16.msra.mxu2 %v337_v36  ;;  %v393_v12 = vpop.permute.xlu2 %392 }
  0xbd   : > { %494 = vmatmul.bf16.vlgmr.msra.gmra.mxu1 %v710_v37 }
  0xbe   : > { %480 = vmatmul.bf16.gmra.mxu0 %v726_v38 }
  0xc1   : > { %v357_v42 = vpop.permute.xlu1 %356  ;;  %v333_v43 = vpop.permute.xlu0 %332 }
  0xc2   : > { %511 = vmatpush.bf16.msra.mxu2 %v333_v43  ;;  %530 = vmatpush.bf16.msra.mxu3 %v357_v42  ;;  %v408_v40 = vpop.permute.xlu2 %407 }
  0xc6   : > { %512 = vmatpush.bf16.msra.mxu2 %v331_v41 }
  0xc9   : > { %v385_v52 = vpop.permute.xlu1 %384  ;;  %513 = vmatmul.bf16.vlgmr.msra.gmra.mxu2 %v714_v47  ;;  %v355_v53 = vpop.permute.xlu0 %354 }
  0xca   : > { %531 = vmatpush.bf16.msra.mxu3 %v355_v53  ;;  %547 = vmatpush.bf16.msrb.mxu0 %v385_v52 }
  0xcb   : > { %764 = vmatpush.bf16.msrb.mxu1 %v385_v52 }
  0xcd   : > { %532 = vmatmul.bf16.vlgmr.msra.gmra.mxu3 %v718_v54  ;;  %499 = vmatmul.bf16.gmra.mxu1 %v730_v55 }
  0xce   : > { %548 = vmatpush.bf16.msrb.mxu0 %v383_v56 }
  0xcf   : > { %765 = vmatpush.bf16.msrb.mxu1 %v383_v56 }
  0xd1   : > { %v381_v57 = vpop.permute.xlu0 %380  ;;  %v379_v62 = vpop.permute.xlu1 %378 }
  0xd2   : > { %549 = vmatpush.bf16.msrb.mxu0 %v381_v57 }
  0xd3   : > { %766 = vmatpush.bf16.msrb.mxu1 %v381_v57 }
  0xd6   : > { %550 = vmatpush.bf16.msrb.mxu0 %v379_v62 }
  0xd7   : > { %767 = vmatpush.bf16.msrb.mxu1 %v379_v62 }
  0xd9   : > { %518 = vmatmul.bf16.gmra.mxu2 %v734_v63  ;;  %743 = vmatmul.msk.bf16.vlgmr.msrb.gmra.mxu0 %vm460_vm0, %v722_v0  ;;  %v398_v19 = vpop.permute.xlu0 %397  ;;  %v403_v24 = vpop.permute.xlu1 %402 }
  0xdd   : > { %537 = vmatmul.bf16.gmra.mxu3 %v738_v5  ;;  %744 = vmatmul.msk.bf16.vlgmr.msrb.gmra.mxu1 %vm460_vm0, %v742_v6 }
 0x12b   : > { %v476_v7 = vpop.f32.mrf.mxu0 }
 0x12c   : > { %v477_v16 = vadd.f32 %v476_v7, %v393_v12 }
 0x133   : > { %v478_v8 = vpop.f32.mrf.mxu0 }
 0x134   : > { %v479_v22 = vadd.f32 %v478_v8, %v398_v19 }
 0x13a   : > { %v495_v9 = vpop.f32.mrf.mxu1 }
 0x13b   : > { %v481_v10 = vpop.f32.mrf.mxu0  ;;  %v496_v18 = vadd.f32 %v495_v9, %v477_v16 }
 0x13c   : > { %v482_v32 = vadd.f32 %v481_v10, %v403_v24 }
 0x142   : > { %v497_v11 = vpop.f32.mrf.mxu1 }
 0x143   : > { %v483_v13 = vpop.f32.mrf.mxu0  ;;  %v498_v31 = vadd.f32 %v497_v11, %v479_v22 }
 0x144   : > { %v484_v46 = vadd.f32 %v483_v13, %v408_v40 }
 0x14a   : > { %v500_v15 = vpop.f32.mrf.mxu1 }
 0x14b   : > { %v501_v39 = vadd.f32 %v500_v15, %v482_v32 }
 0x14c   : > { %v514_v14 = vpop.f32.mrf.mxu2 }
 0x14d   : > { %v515_v20 = vadd.f32 %v514_v14, %v496_v18 }
 0x150   : > { %v533_v17 = vpop.f32.mrf.mxu3 }
 0x151   : > { %v534_v23 = vadd.f32 %v533_v17, %v515_v20 }
 0x152   : > { %v502_v26 = vpop.f32.mrf.mxu1 }
 0x153   : > { %v503_v52 = vadd.f32 %v502_v26, %v484_v46 }
 0x154   : > { %v516_v21 = vpop.f32.mrf.mxu2 }
 0x155   : > { %v517_v34 = vadd.f32 %v516_v21, %v498_v31 }
 0x156   : > { %v552_v25 = vpop.f32.mrf.mxu0 }
 0x157   : > { %v553_v28 = vadd.f32 %v552_v25, %v534_v23 }
 0x158   : > { %v535_v30 = vpop.f32.mrf.mxu3 }
 0x159   : > { %v562_v33 = vmax.f32 %v553_v28, 0.0  ;;  %v536_v38 = vadd.f32 %v535_v30, %v517_v34 }
 0x15a   : > { %v557_v44 = vpop.f32.mrf.mxu1 }
 0x15b   : > { %v570_v35 = vmul.f32 %v789_v29, %v562_v33 }
 0x15c   : > { %v519_v36 = vpop.f32.mrf.mxu2 }
 0x15d   : > { %v579_v37 = vpack.c.bf16 %v570_v35, %v570_v35  ;;  %v520_v42 = vadd.f32 %v519_v36, %v501_v39 }
 0x15e   : > { %v554_v41 = vpop.f32.mrf.mxu0 }
 0x15f   : > { %v555_v43 = vadd.f32 %v554_v41, %v536_v38  ;;  %587 = vrot.lane.b32.xlu1 %v579_v37, %s807_s16 }
 0x160   : > { %v538_v45 = vpop.f32.mrf.mxu3 }
 0x161   : > { %v563_v47 = vmax.f32 %v555_v43, 0.0  ;;  %v539_v48 = vadd.f32 %v538_v45, %v520_v42 }
 0x162   : > { %v559_v60 = vpop.f32.mrf.mxu1 }
 0x163   : > { %v571_v49 = vmul.f32 %v789_v29, %v563_v47  ;;  %v558_v50 = vadd.f32 %v557_v44, %v539_v48 }
 0x164   : > { %v521_v51 = vpop.f32.mrf.mxu2 }
 0x165   : > { %v580_v53 = vpack.c.bf16 %v571_v49, %v571_v49  ;;  %v564_v54 = vmax.f32 %v558_v50, 0.0  ;;  %v522_v55 = vadd.f32 %v521_v51, %v503_v52 }
 0x167   : > { %589 = vrot.lane.b32.xlu2 %v580_v53, %s807_s16  ;;  %v572_v56 = vmul.f32 %v789_v29, %v564_v54 }
 0x168   : > { %v540_v57 = vpop.f32.mrf.mxu3 }
 0x169   : > { %v541_v58 = vadd.f32 %v540_v57, %v522_v55  ;;  %v581_v59 = vpack.c.bf16 %v572_v56, %v572_v56 }
 0x16b   : > { %v560_v61 = vadd.f32 %v559_v60, %v541_v58  ;;  %591 = vrot.lane.b32.xlu0 %v581_v59, %s807_s16 }
 0x16d   : > { %v565_v62 = vmax.f32 %v560_v61, 0.0 }
 0x16f   : > { %v573_v63 = vmul.f32 %v789_v29, %v565_v62 }
 0x171   : > { %v582_v0 = vpack.c.bf16 %v573_v63, %v573_v63 }
 0x173   : > { %593 = vrot.lane.b32.xlu1 %v582_v0, %s807_s16 }
 0x1c1   : > { %v590_v1 = vpop.permute.xlu2 %589 }
 0x1c2   : > { %601 = vst.msk [vmem:[%s979_s14 + $0x4] sm:$0xf] %vm599_vm2, %v590_v1 }
 0x1c3   : > { %606 = vst.msk [vmem:[%s979_s14 + $0x4] sm:$0xf] %vm604_vm3, %v806_v27 }
 0x1d1   : > { %v588_v2 = vpop.permute.xlu1 %587 }
 0x1d2   : > { %600 = vst.msk [vmem:[%s979_s14] sm:$0xf] %vm599_vm2, %v588_v2 }
 0x1d3   : > { %605 = vst.msk [vmem:[%s979_s14] sm:$0xf] %vm604_vm3, %v806_v27 }
 0x1dd   : > { %v592_v3 = vpop.permute.xlu0 %591 }
 0x1de   : > { %602 = vst.msk [vmem:[%s979_s14 + $0x8] sm:$0xf] %vm599_vm2, %v592_v3 }
 0x1df   : > { %607 = vst.msk [vmem:[%s979_s14 + $0x8] sm:$0xf] %vm604_vm3, %v806_v27 }
 0x1e5   : > { %v594_v4 = vpop.permute.xlu1 %593 }
 0x1e6   : > { %603 = vst.msk [vmem:[%s979_s14 + $0xc] sm:$0xf] %vm599_vm2, %v594_v4 }
 0x1e7   : > { %608 = vst.msk [vmem:[%s979_s14 + $0xc] sm:$0xf] %vm604_vm3, %v806_v27 }
 0x1e8 PF: > { %s15_s18 = sadd.s32 1, %s796_s18  }
 0x1e9   : > { %p12_p4 = scmp.ge.s32.totalorder %s15_s18, 4  }
 0x1eb   :  { %14 = sbr.rel (!%p12_p4) target bundleno = 1 (0x1), region = 73 }

// kernel: unet_forward.21
= control target key start
LH: loop header
LB: loop body
LE: loop exit
PB: predicated region body
PF: predicated region fallthrough
CT: control target
= control target key end

     0   :  { %s700_s12 = smov 0   ;;  %s863_s0 = inlined_call_operand.vmem [shape: bf16[2,32,128], index: 0, kind: input, shape index: {}]   ;;  %s864_s1 = inlined_call_operand.vmem [shape: bf16[64,288], index: 1, kind: input, shape index: {}]   ;;  %s865_s2 = inlined_call_operand.vmem [shape: f32[64,1], index: 2, kind: input, shape index: {}]   ;;  %s866_s3 = inlined_call_operand.vmem [shape: bf16[2,64,80], index: 3, kind: output, shape index: {}]  }
   0x1 LB: > { %s540_s13 = sadd.s32 4294967295, %s669_s12   ;;  %p544_p0 = scmp.ge.s32.totalorder %s669_s12, 1  ;;  %s669_s12 = sphi %s700_s12, %s13_s12  }
   0x2   : > { %p137_p1 = scmp.lt.s32.totalorder %s669_s12, 3 }
   0x4   : > { %p138_p2 = pnand %p544_p0, %p137_p1 }
   0x5   : > { %p161_p3 = scmp.lt.s32.totalorder (!%p138_p2), %s540_s13, 1  ;;  %s671_s18 = smov (!%p138_p2), 126  }
   0x6   : > { %141 = sbr.rel (%p138_p2) target bundleno = 353 (0x161), region = 32  ;;  %s672_s19 = smov (!%p138_p2), 118  }
   0x7   : > { %s673_s20 = smov (!%p138_p2), 107   ;;  %s674_s21 = smov (!%p138_p2), 127  }
   0x8   : > { %s675_s22 = smov (!%p138_p2), 106   ;;  %s676_s23 = smov (!%p138_p2), 108  }
   0x9   : > { %s677_s24 = smov (!%p138_p2), 116   ;;  %s678_s25 = smov (!%p138_p2), 117  }
   0xb   : > { %s868_s13 = smov (!%p161_p3, %s540_s13), 1  ;;  %v679_v12 = vmov 0   ;;  %v188_v13 = vld [vmem:[%s865_s2] sm:$0xff]  ;;  %v567_v14 = vld [vmem:[%s864_s1 + $0x8] sm:$0xf]  ;;  %v190_v16 = vld [vmem:[%s865_s2 + $0x10] sm:$0xff] }
   0xc   : > { %s611_s14 = sshll.u32 %s868_s13, 4  ;;  %660 = vset.pattern.permute.xlu1 %v679_v12  ;;  %662 = vset.pattern.permute.xlu0 %v679_v12  ;;  %v615_v15 = vld [vmem:[%s864_s1 + $0x10] sm:$0xf0]  ;;  %vm360_vm0 = vcmask 261120   ;;  %v559_v20 = vld [vmem:[%s864_s1] sm:$0xf] }
   0xd   : > { %s165_s17 = scalar_lea.vmem %s863_s0, %s611_s14  ;;  %661 = vset.pattern.permute.xlu2 %v679_v12  ;;  %v568_v19 = vor.u32 %v615_v15, %v567_v14  ;;  %v614_v21 = vld [vmem:[%s864_s1 + $0x8] sm:$0xf0]  ;;  %v191_v22 = vld [vmem:[%s865_s2 + $0x18] sm:$0xff]  ;;  %v617_v24 = vld [vmem:[%s864_s1 + $0x20] sm:$0xf0]  ;;  %s612_s15 = sshll.u32 %s868_s13, 5 }
   0xe   : > { %v714_v0 = vld [vmem:[%s165_s17 + $0x8] sm:$0xff]  ;;  %v716_v1 = vld [vmem:[%s165_s17] sm:$0xff]  ;;  %v571_v23 = vld [vmem:[%s864_s1 + $0x18] sm:$0xf]  ;;  %v560_v26 = vor.u32 %v614_v21, %v559_v20  ;;  %vm476_vm1 = vcmask 650240  }
   0xf   : > { %220 = vrot.lane.b32.xlu1 %v714_v0, %s671_s18  ;;  %226 = vrot.lane.b32.xlu0 %v714_v0, %s672_s19  ;;  %v572_v27 = vor.u32 %v617_v24, %v571_v23  ;;  %v579_v30 = vld [vmem:[%s864_s1 + $0x20] sm:$0xf]  ;;  %v618_v31 = vld [vmem:[%s864_s1 + $0x28] sm:$0xf0] }
  0x10   : > { %218 = vrot.lane.b32.xlu2 %v716_v1, %s671_s18  ;;  %v580_v32 = vor.u32 %v618_v31, %v579_v30  ;;  %v616_v33 = vld [vmem:[%s864_s1 + $0x1c] sm:$0xf]  ;;  %v573_v34 = vld [vmem:[%s864_s1 + $0x24] sm:$0xf0]  ;;  %v583_v38 = vld [vmem:[%s864_s1 + $0x30] sm:$0xf]  ;;  %s842_s18 = scalar_lea.vmem %s866_s3, %s612_s15 }
  0x11   : > { %v576_v36 = vor.u32 %v616_v33, %v573_v34  ;;  %v193_v37 = vld [vmem:[%s865_s2 + $0x28] sm:$0xff]  ;;  %v620_v39 = vld [vmem:[%s864_s1 + $0x38] sm:$0xf0]  ;;  %v591_v43 = vld [vmem:[%s864_s1 + $0x38] sm:$0xf] }
  0x12   : > { %v189_v40 = vld [vmem:[%s865_s2 + $0x8] sm:$0xff]  ;;  %v195_v41 = vld [vmem:[%s865_s2 + $0x38] sm:$0xff]  ;;  %v584_v42 = vor.u32 %v620_v39, %v583_v38  ;;  %v621_v44 = vld [vmem:[%s864_s1 + $0x40] sm:$0xf0] }
  0x13   : > { %v192_v45 = vld [vmem:[%s865_s2 + $0x20] sm:$0xff]  ;;  %v592_v46 = vor.u32 %v621_v44, %v591_v43  ;;  %v619_v47 = vld [vmem:[%s864_s1 + $0x34] sm:$0xf]  ;;  %v561_v50 = vld [vmem:[%s864_s1 + $0xc] sm:$0xf0] }
  0x14   : > { %v585_v48 = vld [vmem:[%s864_s1 + $0x3c] sm:$0xf0]  ;;  %v613_v49 = vld [vmem:[%s864_s1 + $0x4] sm:$0xf]  ;;  %v595_v53 = vld [vmem:[%s864_s1 + $0x48] sm:$0xf] }
  0x15   : > { %v588_v51 = vor.u32 %v619_v47, %v585_v48  ;;  %v564_v52 = vor.u32 %v613_v49, %v561_v50  ;;  %v623_v54 = vld [vmem:[%s864_s1 + $0x50] sm:$0xf0]  ;;  %v603_v57 = vld [vmem:[%s864_s1 + $0x50] sm:$0xf]  ;;  %v624_v58 = vld [vmem:[%s864_s1 + $0x58] sm:$0xf0] }
  0x16   : > { %v194_v55 = vld [vmem:[%s865_s2 + $0x30] sm:$0xff]  ;;  %v596_v56 = vor.u32 %v623_v54, %v595_v53  ;;  %v604_v59 = vor.u32 %v624_v58, %v603_v57  ;;  %v622_v60 = vld [vmem:[%s864_s1 + $0x4c] sm:$0xf]  ;;  %v597_v61 = vld [vmem:[%s864_s1 + $0x54] sm:$0xf0] }
  0x17   : > { %250 = vrot.lane.b32.xlu1 %v714_v0, %s673_s20  ;;  %224 = vrot.lane.b32.xlu0 %v716_v1, %s672_s19  ;;  %v600_v62 = vor.u32 %v622_v60, %v597_v61 }
  0x18   : > { %248 = vrot.lane.b32.xlu2 %v716_v1, %s673_s20 }
  0x1f   : > { %214 = vrot.lane.b32.xlu1 %v714_v0, %s674_s21  ;;  %256 = vrot.lane.b32.xlu0 %v714_v0, %s675_s22 }
  0x20   : > { %244 = vrot.lane.b32.xlu2 %v714_v0, %s676_s23 }
  0x27   : > { %212 = vrot.lane.b32.xlu1 %v716_v1, %s674_s21  ;;  %254 = vrot.lane.b32.xlu0 %v716_v1, %s675_s22 }
  0x28   : > { %242 = vrot.lane.b32.xlu2 %v716_v1, %s676_s23 }
  0x2f   : > { %238 = vrot.lane.b32.xlu0 %v714_v0, %s677_s24  ;;  %236 = vrot.lane.b32.xlu1 %v716_v1, %s677_s24 }
  0x30   : > { %232 = vrot.lane.b32.xlu2 %v714_v0, %s678_s25 }
  0x37   : > { %230 = vrot.lane.b32.xlu0 %v716_v1, %s678_s25  ;;  %262 = vperm.xlu1 %660, %v188_v13  }
  0x38   : > { %267 = vperm.xlu2 %661, %v189_v40  }
  0x3f   : > { %272 = vperm.xlu0 %662, %v190_v16   ;;  %277 = vperm.xlu1 %660, %v191_v22  }
  0x40   : > { %282 = vperm.xlu2 %661, %v192_v45  }
  0x47   : > { %287 = vperm.xlu1 %660, %v193_v37   ;;  %297 = vperm.xlu0 %662, %v195_v41  }
  0x48   : > { %292 = vperm.xlu2 %661, %v194_v55  }
  0x6a   : > { %v219_v2 = vpop.permute.xlu2 %218 }
  0x72   : > { %v249_v3 = vpop.permute.xlu2 %248 }
  0x7a   : > { %v245_v8 = vpop.permute.xlu2 %244 }
  0x81   : > { %v221_v4 = vpop.permute.xlu1 %220  ;;  %v227_v5 = vpop.permute.xlu0 %226 }
  0x82   : > { %373 = vmatpush.bf16.msra.mxu0 %v227_v5  ;;  %627 = vmatpush.bf16.msra.mxu3 %v227_v5  ;;  %v243_v11 = vpop.permute.xlu2 %242 }
  0x89   : > { %v251_v6 = vpop.permute.xlu1 %250  ;;  %v225_v7 = vpop.permute.xlu0 %224 }
  0x8a   : > { %374 = vmatpush.bf16.msra.mxu0 %v225_v7  ;;  %628 = vmatpush.bf16.msra.mxu3 %v225_v7  ;;  %v233_v29 = vpop.permute.xlu2 %232 }
  0x8b   : > { %635 = vmatpush.bf16.msra.mxu1 %v251_v6 }
  0x8e   : > { %375 = vmatpush.bf16.msra.mxu0 %v221_v4  ;;  %629 = vmatpush.bf16.msra.mxu3 %v221_v4 }
  0x8f   : > { %636 = vmatpush.bf16.msra.mxu1 %v249_v3 }
  0x91   : > { %v215_v9 = vpop.permute.xlu1 %214  ;;  %v257_v10 = vpop.permute.xlu0 %256 }
  0x92   : > { %376 = vmatpush.bf16.msra.mxu0 %v219_v2  ;;  %630 = vmatpush.bf16.msra.mxu3 %v219_v2  ;;  %v268_v7 = vpop.permute.xlu2 %267 }
  0x93   : > { %437 = vmatpush.bf16.msra.mxu2 %v257_v10  ;;  %637 = vmatpush.bf16.msra.mxu1 %v245_v8 }
  0x96   : > { %377 = vmatpush.bf16.msra.mxu0 %v215_v9  ;;  %631 = vmatpush.bf16.msra.mxu3 %v215_v9 }
  0x97   : > { %638 = vmatpush.bf16.msra.mxu1 %v243_v11 }
  0x99   : > { %v213_v17 = vpop.permute.xlu1 %212  ;;  %v255_v18 = vpop.permute.xlu0 %254 }
  0x9a   : > { %378 = vmatpush.bf16.msra.mxu0 %v213_v17  ;;  %632 = vmatpush.bf16.msra.mxu3 %v213_v17 }
  0x9b   : > { %438 = vmatpush.bf16.msra.mxu2 %v255_v18 }
  0x9e   : > { %605 = vmatmul.msk.bf16.vlgmr.msra.gmra.mxu2 %vm360_vm0, %v568_v19  ;;  %379 = vmatpush.bf16.msra.mxu0 %v714_v0  ;;  %v283_v19 = vpop.permute.xlu2 %282 }
  0x9f   : > { %633 = vmatpush.bf16.msra.mxu3 %v714_v0 }
  0xa1   : > { %v239_v25 = vpop.permute.xlu0 %238  ;;  %v237_v28 = vpop.permute.xlu1 %236 }
  0xa2   : > { %380 = vmatpush.bf16.msra.mxu0 %v716_v1  ;;  %639 = vmatpush.bf16.msra.mxu1 %v239_v25 }
  0xa3   : > { %634 = vmatpush.bf16.msra.mxu3 %v716_v1 }
  0xa5   : > { %381 = vmatmul.bf16.vlgmr.msra.gmra.mxu0 %v560_v26 }
  0xa6   : > { %402 = vmatpush.bf16.msrb.mxu0 %v251_v6  ;;  %386 = vmatmul.bf16.vlgmr.msra.gmra.mxu3 %v572_v27  ;;  %v293_v50 = vpop.permute.xlu2 %292 }
  0xa7   : > { %640 = vmatpush.bf16.msra.mxu1 %v237_v28 }
  0xa9   : > { %v231_v35 = vpop.permute.xlu0 %230  ;;  %v263_v0 = vpop.permute.xlu1 %262 }
  0xaa   : > { %403 = vmatpush.bf16.msrb.mxu0 %v249_v3 }
  0xab   : > { %641 = vmatpush.bf16.msra.mxu1 %v233_v29 }
  0xae   : > { %404 = vmatpush.bf16.msrb.mxu0 %v245_v8  ;;  %606 = vmatmul.msk.bf16.gmra.mxu2 %vm360_vm0, %v580_v32 }
  0xaf   : > { %642 = vmatpush.bf16.msra.mxu1 %v231_v35 }
  0xb1   : > { %v273_v1 = vpop.permute.xlu0 %272 }
  0xb2   : > { %405 = vmatpush.bf16.msrb.mxu0 %v243_v11  ;;  %415 = vmatmul.bf16.vlgmr.msra.gmra.mxu1 %v576_v36  ;;  %v278_v11 = vpop.permute.xlu1 %277 }
  0xb6   : > { %406 = vmatpush.bf16.msrb.mxu0 %v239_v25  ;;  %391 = vmatmul.bf16.gmra.mxu3 %v584_v42 }
  0xb9   : > { %v298_v61 = vpop.permute.xlu0 %297 }
  0xba   : > { %407 = vmatpush.bf16.msrb.mxu0 %v237_v28  ;;  %v288_v34 = vpop.permute.xlu1 %287 }
  0xbe   : > { %408 = vmatpush.bf16.msrb.mxu0 %v233_v29  ;;  %607 = vmatmul.msk.bf16.gmra.mxu2 %vm360_vm0, %v592_v46 }
  0xc2   : > { %409 = vmatpush.bf16.msrb.mxu0 %v231_v35  ;;  %420 = vmatmul.bf16.gmra.mxu1 %v588_v51 }
  0xc5   : > { %410 = vmatmul.bf16.vlgmr.msrb.gmra.mxu0 %v564_v52 }
  0xc6   : > { %396 = vmatmul.bf16.gmra.mxu3 %v596_v56 }
  0xce   : > { %608 = vmatmul.msk.bf16.gmra.mxu2 %vm360_vm0, %v604_v59 }
  0xd2   : > { %425 = vmatmul.bf16.gmra.mxu1 %v600_v62 }
 0x121   : > { %v440_v63 = vpop.f32.mrf.mxu2 }
 0x122   : > { %v382_v5 = vpop.f32.mrf.mxu0 }
 0x123   : > { %v383_v24 = vadd.f32 %v382_v5, %v263_v0 }
 0x129   : > { %v387_v2 = vpop.f32.mrf.mxu3  ;;  %v442_v3 = vpop.f32.mrf.mxu2 }
 0x12a   : > { %v388_v4 = vadd.f32 %v387_v2, %v273_v1  ;;  %v384_v15 = vpop.f32.mrf.mxu0 }
 0x12b   : > { %v385_v39 = vadd.f32 %v384_v15, %v268_v7 }
 0x12f   : > { %v416_v6 = vpop.f32.mrf.mxu1 }
 0x130   : > { %v417_v8 = vadd.f32 %v416_v6, %v388_v4 }
 0x131   : > { %v389_v9 = vpop.f32.mrf.mxu3  ;;  %v445_v10 = vpop.f32.mrf.mxu2 }
 0x132   : > { %v446_v12 = vadd.f32 %v445_v10, %v417_v8  ;;  %v390_v14 = vadd.f32 %v389_v9, %v278_v11 }
 0x134   : > { %v462_v13 = vmax.f32 %v446_v12, 0.0 }
 0x136   : > { %v470_v16 = vpack.c.bf16 %v462_v13, %v462_v13 }
 0x137   : > { %v418_v17 = vpop.f32.mrf.mxu1 }
 0x138   : > { %v419_v18 = vadd.f32 %v418_v17, %v390_v14  ;;  %479 = vst.msk [vmem:[%s842_s18 + $0x8] sm:$0xf] %vm476_vm1, %v470_v16 }
 0x139   : > { %v392_v20 = vpop.f32.mrf.mxu3  ;;  %v447_v21 = vpop.f32.mrf.mxu2 }
 0x13a   : > { %v448_v22 = vadd.f32 %v447_v21, %v419_v18  ;;  %v393_v23 = vadd.f32 %v392_v20, %v283_v19 }
 0x13c   : > { %v463_v25 = vmax.f32 %v448_v22, 0.0 }
 0x13e   : > { %v471_v26 = vpack.c.bf16 %v463_v25, %v463_v25 }
 0x13f   : > { %v421_v27 = vpop.f32.mrf.mxu1 }
 0x140   : > { %v422_v28 = vadd.f32 %v421_v27, %v393_v23  ;;  %480 = vst.msk [vmem:[%s842_s18 + $0xc] sm:$0xf] %vm476_vm1, %v471_v26 }
 0x141   : > { %v394_v31 = vpop.f32.mrf.mxu3  ;;  %v450_v32 = vpop.f32.mrf.mxu2 }
 0x142   : > { %v411_v29 = vpop.f32.mrf.mxu0  ;;  %v451_v35 = vadd.f32 %v450_v32, %v422_v28  ;;  %v395_v38 = vadd.f32 %v394_v31, %v288_v34 }
 0x143   : > { %v412_v30 = vadd.f32 %v411_v29, %v383_v24 }
 0x144   : > { %v464_v37 = vmax.f32 %v451_v35, 0.0 }
 0x145   : > { %v441_v33 = vadd.f32 %v440_v63, %v412_v30 }
 0x146   : > { %v472_v41 = vpack.c.bf16 %v464_v37, %v464_v37 }
 0x147   : > { %v460_v36 = vmax.f32 %v441_v33, 0.0  ;;  %v423_v42 = vpop.f32.mrf.mxu1 }
 0x148   : > { %v424_v43 = vadd.f32 %v423_v42, %v395_v38  ;;  %481 = vst.msk [vmem:[%s842_s18 + $0x10] sm:$0xf] %vm476_vm1, %v472_v41 }
 0x149   : > { %v468_v40 = vpack.c.bf16 %v460_v36, %v460_v36  ;;  %v397_v46 = vpop.f32.mrf.mxu3  ;;  %v452_v47 = vpop.f32.mrf.mxu2 }
 0x14a   : > { %v413_v44 = vpop.f32.mrf.mxu0  ;;  %v453_v49 = vadd.f32 %v452_v47, %v424_v43  ;;  %v398_v53 = vadd.f32 %v397_v46, %v293_v50 }
 0x14b   : > { %477 = vst.msk [vmem:[%s842_s18] sm:$0xf] %vm476_vm1, %v468_v40  ;;  %v414_v45 = vadd.f32 %v413_v44, %v385_v39 }
 0x14c   : > { %v465_v52 = vmax.f32 %v453_v49, 0.0 }
 0x14d   : > { %v443_v48 = vadd.f32 %v442_v3, %v414_v45 }
 0x14e   : > { %v473_v55 = vpack.c.bf16 %v465_v52, %v465_v52 }
 0x14f   : > { %v461_v51 = vmax.f32 %v443_v48, 0.0  ;;  %v426_v56 = vpop.f32.mrf.mxu1 }
 0x150   : > { %v427_v57 = vadd.f32 %v426_v56, %v398_v53  ;;  %482 = vst.msk [vmem:[%s842_s18 + $0x14] sm:$0xf] %vm476_vm1, %v473_v55 }
 0x151   : > { %v469_v54 = vpack.c.bf16 %v461_v51, %v461_v51  ;;  %v455_v58 = vpop.f32.mrf.mxu2  ;;  %v399_v59 = vpop.f32.mrf.mxu3 }
 0x152   : > { %v456_v60 = vadd.f32 %v455_v58, %v427_v57  ;;  %v400_v63 = vadd.f32 %v399_v59, %v298_v61 }
 0x153   : > { %478 = vst.msk [vmem:[%s842_s18 + $0x4] sm:$0xf] %vm476_vm1, %v469_v54 }
 0x154   : > { %v466_v62 = vmax.f32 %v456_v60, 0.0 }
 0x156   : > { %v474_v0 = vpack.c.bf16 %v466_v62, %v466_v62 }
 0x157   : > { %v428_v1 = vpop.f32.mrf.mxu1 }
 0x158   : > { %v429_v2 = vadd.f32 %v428_v1, %v400_v63  ;;  %483 = vst.msk [vmem:[%s842_s18 + $0x18] sm:$0xf] %vm476_vm1, %v474_v0 }
 0x159   : > { %v457_v3 = vpop.f32.mrf.mxu2 }
 0x15a   : > { %v458_v4 = vadd.f32 %v457_v3, %v429_v2 }
 0x15c   : > { %v467_v5 = vmax.f32 %v458_v4, 0.0 }
 0x15e   : > { %v475_v6 = vpack.c.bf16 %v467_v5, %v467_v5 }
 0x160   : > { %484 = vst.msk [vmem:[%s842_s18 + $0x1c] sm:$0xf] %vm476_vm1, %v475_v6 }
 0x161 PF: > { %s13_s12 = sadd.s32 1, %s669_s12  }
 0x162   : > { %p10_p4 = scmp.ge.s32.totalorder %s13_s12, 4  }
 0x164   :  { %12 = sbr.rel (!%p10_p4) target bundleno = 1 (0x1), region = 62 }

// kernel: unet_forward.22
= control target key start
LH: loop header
LB: loop body
LE: loop exit
PB: predicated region body
PF: predicated region fallthrough
CT: control target
= control target key end

     0   :  { %s886_s18 = smov 0   ;;  %s1142_s0 = inlined_call_operand.vmem [shape: bf16[2,16,384], index: 0, kind: input, shape index: {}]   ;;  %s1143_s1 = inlined_call_operand.vmem [shape: bf16[2,16,384], index: 1, kind: input, shape index: {}]   ;;  %s1144_s2 = inlined_call_operand.vmem [shape: bf16[16,288], index: 2, kind: input, shape index: {}]   ;;  %s1145_s3 = inlined_call_operand.vmem [shape: f32[16,1], index: 3, kind: input, shape index: {}]   ;;  %s1146_s4 = inlined_call_operand.vmem [shape: f32[1,288], index: 4, kind: input, shape index: {}]   ;;  %s1147_s5 = inlined_call_operand.vmem [shape: bf16[2,16,384], index: 5, kind: output, shape index: {}]  }
   0x1 LB: > { %s759_s19 = sadd.s32 4294967295, %s844_s18   ;;  %p763_p0 = scmp.ge.s32.totalorder %s844_s18, 1  ;;  %s844_s18 = sphi %s886_s18, %s15_s18  }
   0x2   : > { %p197_p1 = scmp.lt.s32.totalorder %s844_s18, 3 }
   0x4   : > { %p198_p2 = pnand %p763_p0, %p197_p1 }
   0x5   : > { %p230_p3 = scmp.lt.s32.totalorder (!%p198_p2), %s759_s19, 1  ;;  %s846_s27 = smov (!%p198_p2), 91  }
   0x6   : > { %201 = sbr.rel (%p198_p2) target bundleno = 553 (0x229), region = 40  ;;  %s847_s28 = smov (!%p198_p2), 110  }
   0x7   : > { %s848_s29 = smov (!%p198_p2), 126   ;;  %s849_s30 = smov (!%p198_p2), 92  }
   0x8   : > { %s850_s6 = smov (!%p198_p2), 90   ;;  %s851_s7 = smov (!%p198_p2), 127  }
   0x9   : > { %s852_s8 = smov (!%p198_p2), 108   ;;  %s853_s9 = smov (!%p198_p2), 109  }
   0xb   : > { %s1149_s19 = smov (!%p230_p3, %s759_s19), 1  ;;  %vm344_vm0 = vcmask 900096   ;;  %vm436_vm1 = vcmask 744448   ;;  %vm321_vm2 = vcmask 1031168   ;;  %vm413_vm3 = vcmask 752640  }
   0xc   : > { %s894_s20 = smul.u32 24, %s1149_s19  ;;  %vm465_vm4 = vcmask 736256   ;;  %vm298_vm5 = vcmask 1039360   ;;  %vm501_vm6 = vcmask 261120   ;;  %vm390_vm7 = vcmask 883712  }
   0xd   : > { %vm367_vm8 = vcmask 891904   ;;  %vm651_vm9 = vcmask 150528   ;;  %vm681_vm10 = vcmask 1043608   ;;  %vm682_vm11 = vcmask 1047556  }
   0xe   : > { %s239_s23 = scalar_lea.vmem %s1143_s1, %s894_s20  ;;  %s904_s26 = scalar_lea.vmem %s1142_s0, %s894_s20  ;;  %vm672_vm12 = vcmask 154624   ;;  %vm683_vm13 = vmor %vm682_vm11, %vm681_vm10  ;;  %vm685_vm14 = vcmask 412672   ;;  %vm689_vm15 = vcmask 1043864  }
   0xf   : > { %v814_v0 = vld [vmem:[%s239_s23 + $0x4] sm:$0xf]  ;;  %v783_v1 = vld [vmem:[%s239_s23 + $0xc] sm:$0xf0]  ;;  %v789_v6 = vld [vmem:[%s239_s23 + $0x8] sm:$0xf] }
  0x10   : > { %v811_v2 = vld [vmem:[%s904_s26 + $0x4] sm:$0xf]  ;;  %v907_v3 = vor.u32 %v814_v0, %v783_v1  ;;  %v771_v4 = vld [vmem:[%s904_s26 + $0xc] sm:$0xf0]  ;;  %v816_v7 = vld [vmem:[%s239_s23 + $0x10] sm:$0xf0] }
  0x11   : > { %v910_v5 = vor.u32 %v811_v2, %v771_v4  ;;  %v777_v8 = vld [vmem:[%s904_s26 + $0x8] sm:$0xf]  ;;  %v813_v9 = vld [vmem:[%s904_s26 + $0x10] sm:$0xf0]  ;;  %v917_v10 = vor.u32 %v816_v7, %v789_v6  ;;  %v781_v12 = vld [vmem:[%s239_s23] sm:$0xf] }
  0x12   : > { %444 = vrot.lane.b32.xlu1 %v907_v3, %s846_s27  ;;  %352 = vrot.lane.b32.xlu0 %v907_v3, %s847_s28  ;;  %v919_v11 = vor.u32 %v813_v9, %v777_v8  ;;  %v815_v13 = vld [vmem:[%s239_s23 + $0x8] sm:$0xf0]  ;;  %v769_v15 = vld [vmem:[%s904_s26] sm:$0xf] }
  0x13   : > { %340 = vrot.lane.b32.xlu2 %v910_v5, %s847_s28  ;;  %v924_v14 = vor.u32 %v815_v13, %v781_v12  ;;  %v812_v16 = vld [vmem:[%s904_s26 + $0x8] sm:$0xf0]  ;;  %v801_v7 = vld [vmem:[%s1144_s2 + $0x8] sm:$0xf]  ;;  %v810_v8 = vld [vmem:[%s1144_s2 + $0x10] sm:$0xf0] }
  0x14   : > { %v934_v17 = vor.u32 %v812_v16, %v769_v15  ;;  %v1049_v9 = vor.u32 %v810_v8, %v801_v7 }
  0x1a   : > { %446 = vrot.lane.b32.xlu1 %v917_v10, %s846_s27  ;;  %354 = vrot.lane.b32.xlu0 %v917_v10, %s847_s28 }
  0x1b   : > { %342 = vrot.lane.b32.xlu2 %v919_v11, %s847_s28 }
  0x22   : > { %350 = vrot.lane.b32.xlu1 %v924_v14, %s847_s28  ;;  %442 = vrot.lane.b32.xlu0 %v924_v14, %s846_s27 }
  0x23   : > { %432 = vrot.lane.b32.xlu2 %v910_v5, %s846_s27 }
  0x2a   : > { %329 = vrot.lane.b32.xlu1 %v907_v3, %s848_s29  ;;  %434 = vrot.lane.b32.xlu0 %v919_v11, %s846_s27 }
  0x2b   : > { %331 = vrot.lane.b32.xlu2 %v917_v10, %s848_s29 }
  0x32   : > { %338 = vrot.lane.b32.xlu1 %v934_v17, %s847_s28  ;;  %430 = vrot.lane.b32.xlu0 %v934_v17, %s846_s27 }
  0x33   : > { %421 = vrot.lane.b32.xlu2 %v907_v3, %s849_s30 }
  0x3a   : > { %459 = vrot.lane.b32.xlu1 %v924_v14, %s850_s6  ;;  %423 = vrot.lane.b32.xlu0 %v917_v10, %s849_s30 }
  0x3b   : > { %461 = vrot.lane.b32.xlu2 %v907_v3, %s850_s6 }
  0x42   : > { %319 = vrot.lane.b32.xlu1 %v919_v11, %s848_s29  ;;  %317 = vrot.lane.b32.xlu0 %v910_v5, %s848_s29 }
  0x43   : > { %419 = vrot.lane.b32.xlu2 %v924_v14, %s849_s30 }
  0x4a   : > { %409 = vrot.lane.b32.xlu1 %v910_v5, %s849_s30  ;;  %327 = vrot.lane.b32.xlu0 %v924_v14, %s848_s29 }
  0x4b   : > { %411 = vrot.lane.b32.xlu2 %v919_v11, %s849_s30 }
  0x52   : > { %455 = vrot.lane.b32.xlu1 %v910_v5, %s850_s6  ;;  %453 = vrot.lane.b32.xlu0 %v934_v17, %s850_s6 }
  0x53   : > { %306 = vrot.lane.b32.xlu2 %v907_v3, %s851_s7 }
  0x5a   : > { %407 = vrot.lane.b32.xlu1 %v934_v17, %s849_s30  ;;  %308 = vrot.lane.b32.xlu0 %v917_v10, %s851_s7 }
  0x5b   : > { %315 = vrot.lane.b32.xlu2 %v934_v17, %s848_s29 }
  0x62   : > { %400 = vrot.lane.b32.xlu1 %v917_v10, %s852_s8  ;;  %398 = vrot.lane.b32.xlu0 %v907_v3, %s852_s8 }
  0x63   : > { %294 = vrot.lane.b32.xlu2 %v910_v5, %s851_s7 }
  0x6a   : > { %396 = vrot.lane.b32.xlu1 %v924_v14, %s852_s8  ;;  %296 = vrot.lane.b32.xlu0 %v919_v11, %s851_s7 }
  0x6b   : > { %304 = vrot.lane.b32.xlu2 %v924_v14, %s851_s7 }
  0x6d   : > { %v341_v18 = vpop.permute.xlu2 %340 }
  0x72   : > { %388 = vrot.lane.b32.xlu1 %v919_v11, %s852_s8  ;;  %386 = vrot.lane.b32.xlu0 %v910_v5, %s852_s8 }
  0x73   : > { %384 = vrot.lane.b32.xlu2 %v934_v17, %s852_s8  ;;  %s855_s8 = smov 19  }
  0x75   : > { %v967_v19 = vpop.permute.xlu2 %342 }
  0x76   : > { %v346_v28 = vsel %vm344_vm0, %v341_v18, %v967_v19 }
  0x7a   : > { %375 = vrot.lane.b32.xlu1 %v907_v3, %s853_s9  ;;  %292 = vrot.lane.b32.xlu0 %v934_v17, %s851_s7  ;;  %s1121_s7 = scalar_lea.vmem %s1147_s5, %s894_s20 }
  0x7b   : > { %377 = vrot.lane.b32.xlu2 %v917_v10, %s853_s9 }
  0x7d   : > { %v972_v20 = vpop.permute.xlu2 %432 }
  0x82   : > { %363 = vrot.lane.b32.xlu1 %v910_v5, %s853_s9  ;;  %373 = vrot.lane.b32.xlu0 %v924_v14, %s853_s9 }
  0x83   : > { %365 = vrot.lane.b32.xlu2 %v919_v11, %s853_s9 }
  0x84   : > { %v977_v21 = vpop.permute.xlu1 %444  ;;  %v353_v22 = vpop.permute.xlu0 %352 }
  0x85   : > { %v979_v23 = vpop.permute.xlu2 %331 }
  0x8a   : > { %463 = vrot.lane.b32.xlu1 %v917_v10, %s850_s6  ;;  %361 = vrot.lane.b32.xlu0 %v934_v17, %s853_s9 }
  0x8b   : > { %457 = vrot.lane.b32.xlu2 %v919_v11, %s850_s6 }
  0x8c   : > { %v986_v24 = vpop.permute.xlu1 %446  ;;  %v988_v25 = vpop.permute.xlu0 %354 }
  0x8d   : > { %v990_v26 = vpop.permute.xlu2 %421  ;;  %v357_v27 = vsel %vm344_vm0, %v353_v22, %v988_v25  ;;  %v449_v61 = vsel %vm436_vm1, %v977_v21, %v986_v24 }
  0x8e   : > { %547 = vmatpush.bf16.msra.mxu3 %v357_v27 }
  0x92   : > { %548 = vmatpush.bf16.msra.mxu3 %v346_v28 }
  0x94   : > { %v351_v29 = vpop.permute.xlu1 %350  ;;  %v443_v30 = vpop.permute.xlu0 %442 }
  0x95   : > { %v996_v31 = vpop.permute.xlu2 %461  ;;  %v356_v32 = vsel %vm344_vm0, %v351_v29, %v353_v22  ;;  %v448_v33 = vsel %vm436_vm1, %v443_v30, %v977_v21  ;;  %v793_v29 = vld [vmem:[%s1144_s2] sm:$0xf]  ;;  %v809_v30 = vld [vmem:[%s1144_s2 + $0x8] sm:$0xf0] }
  0x96   : > { %505 = vmatpush.bf16.msra.mxu0 %v356_v32  ;;  %519 = vmatpush.bf16.msra.mxu1 %v448_v33 }
  0x9c   : > { %v330_v34 = vpop.permute.xlu1 %329  ;;  %v1001_v35 = vpop.permute.xlu0 %434 }
  0x9d   : > { %v420_v36 = vpop.permute.xlu2 %419  ;;  %v334_v37 = vsel %vm321_vm2, %v330_v34, %v979_v23  ;;  %v438_v63 = vsel %vm436_vm1, %v972_v20, %v1001_v35 }
  0x9e   : > { %549 = vmatpush.bf16.msra.mxu3 %v334_v37  ;;  %v425_v43 = vsel %vm413_vm3, %v420_v36, %v990_v26  ;;  %v250_v37 = vld [vmem:[%s1145_s3] sm:$0xff] }
  0xa4   : > { %v339_v38 = vpop.permute.xlu1 %338  ;;  %v431_v39 = vpop.permute.xlu0 %430 }
  0xa5   : > { %v1005_v40 = vpop.permute.xlu2 %411  ;;  %v345_v41 = vsel %vm344_vm0, %v339_v38, %v341_v18  ;;  %v437_v42 = vsel %vm436_vm1, %v431_v39, %v972_v20 }
  0xa6   : > { %506 = vmatpush.bf16.msra.mxu0 %v345_v41  ;;  %520 = vmatpush.bf16.msra.mxu1 %v437_v42  ;;  %v251_v41 = vld [vmem:[%s1145_s3 + $0x8] sm:$0xff] }
  0xaa   : > { %521 = vmatpush.bf16.msra.mxu1 %v425_v43  ;;  %v795_v43 = vld [vmem:[%s1144_s2 + $0xc] sm:$0xf0] }
  0xac   : > { %v460_v44 = vpop.permute.xlu1 %459  ;;  %v1012_v45 = vpop.permute.xlu0 %423 }
  0xad   : > { %v307_v46 = vpop.permute.xlu2 %306  ;;  %v468_v47 = vsel %vm465_vm4, %v460_v44, %v996_v31  ;;  %v426_v6 = vsel %vm413_vm3, %v990_v26, %v1012_v45 }
  0xae   : > { %539 = vmatpush.bf16.msra.mxu2 %v468_v47 }
  0xb4   : > { %v1016_v48 = vpop.permute.xlu1 %319  ;;  %v318_v49 = vpop.permute.xlu0 %317 }
  0xb5   : > { %v316_v50 = vpop.permute.xlu2 %315  ;;  %v323_v51 = vsel %vm321_vm2, %v318_v49, %v1016_v48 }
  0xb6   : > { %550 = vmatpush.bf16.msra.mxu3 %v323_v51  ;;  %v322_v56 = vsel %vm321_vm2, %v316_v50, %v318_v49 }
  0xbc   : > { %v410_v52 = vpop.permute.xlu1 %409  ;;  %v328_v53 = vpop.permute.xlu0 %327 }
  0xbd   : > { %v1020_v54 = vpop.permute.xlu2 %294  ;;  %v333_v55 = vsel %vm321_vm2, %v328_v53, %v330_v34  ;;  %v415_v12 = vsel %vm413_vm3, %v410_v52, %v1005_v40  ;;  %v854_v34 = vmov 0  }
  0xbe   : > { %507 = vmatpush.bf16.msra.mxu0 %v333_v55  ;;  %836 = vset.pattern.permute.xlu0 %v854_v34  ;;  %652 = vst.msk [vmem:[%s1121_s7] sm:$0xf] %vm651_vm9, %v854_v34 }
  0xbf   : > { %837 = vset.pattern.permute.xlu1 %v854_v34  ;;  %478 = vperm.xlu0 %836, %v250_v37   ;;  %653 = vst.msk [vmem:[%s1121_s7 + $0xc] sm:$0xf] %vm651_vm9, %v854_v34 }
  0xc0   : > { %483 = vperm.xlu1 %837, %v251_v41  }
  0xc2   : > { %508 = vmatpush.bf16.msra.mxu0 %v322_v56 }
  0xc4   : > { %v1024_v57 = vpop.permute.xlu1 %455  ;;  %v454_v58 = vpop.permute.xlu0 %453 }
  0xc5   : > { %v305_v59 = vpop.permute.xlu2 %304  ;;  %v466_v60 = vsel %vm465_vm4, %v454_v58, %v1024_v57 }
  0xc6   : > { %540 = vmatpush.bf16.msra.mxu2 %v466_v60  ;;  %v310_v62 = vsel %vm298_vm5, %v305_v59, %v307_v46 }
  0xc7   : > { %509 = vmatpush.bf16.msra.mxu0 %v310_v62 }
  0xc9   : > { %803 = vmatmul.msk.bf16.vlgmr.msra.gmra.mxu2 %vm501_vm6, %v1049_v9 }
  0xca   : > { %561 = vmatpush.bf16.msrb.mxu2 %v449_v61 }
  0xcc   : > { %v408_v0 = vpop.permute.xlu1 %407  ;;  %v1035_v1 = vpop.permute.xlu0 %308 }
  0xcd   : > { %v414_v2 = vsel %vm413_vm3, %v408_v0, %v410_v52  ;;  %v311_v4 = vsel %vm298_vm5, %v307_v46, %v1035_v1  ;;  %v385_v26 = vpop.permute.xlu2 %384 }
  0xce   : > { %562 = vmatpush.bf16.msrb.mxu2 %v438_v63  ;;  %522 = vmatpush.bf16.msra.mxu1 %v414_v2 }
  0xcf   : > { %551 = vmatpush.bf16.msra.mxu3 %v311_v4 }
  0xd2   : > { %563 = vmatpush.bf16.msrb.mxu2 %v426_v6 }
  0xd4   : > { %v401_v13 = vpop.permute.xlu1 %400  ;;  %v399_v15 = vpop.permute.xlu0 %398 }
  0xd5   : > { %v403_v16 = vsel %vm390_vm7, %v399_v15, %v401_v13  ;;  %v378_v36 = vpop.permute.xlu2 %377 }
  0xd6   : > { %564 = vmatpush.bf16.msrb.mxu2 %v415_v12 }
  0xda   : > { %565 = vmatpush.bf16.msrb.mxu2 %v403_v16 }
  0xdc   : > { %v397_v18 = vpop.permute.xlu1 %396  ;;  %v1056_v20 = vpop.permute.xlu0 %296 }
  0xdd   : > { %v402_v21 = vsel %vm390_vm7, %v397_v18, %v399_v15  ;;  %v300_v22 = vsel %vm298_vm5, %v1020_v54, %v1056_v20  ;;  %v366_v42 = vpop.permute.xlu2 %365 }
  0xde   : > { %523 = vmatpush.bf16.msra.mxu1 %v402_v21  ;;  %552 = vmatpush.bf16.msra.mxu3 %v300_v22 }
  0xe2   : > { %553 = vmatpush.bf16.msra.mxu3 %v907_v3  ;;  %v794_v3 = vor.u32 %v809_v30, %v793_v29 }
  0xe4   : > { %v389_v27 = vpop.permute.xlu1 %388  ;;  %v387_v28 = vpop.permute.xlu0 %386 }
  0xe5   : > { %v391_v32 = vsel %vm390_vm7, %v385_v26, %v387_v28  ;;  %v392_v33 = vsel %vm390_vm7, %v387_v28, %v389_v27  ;;  %v458_v52 = vpop.permute.xlu2 %457 }
  0xe6   : > { %524 = vmatpush.bf16.msra.mxu1 %v391_v32  ;;  %554 = vmatpush.bf16.msra.mxu3 %v910_v5 }
  0xe7   : > { %566 = vmatpush.bf16.msrb.mxu2 %v392_v33 }
  0xe9   : > { %555 = vmatmul.bf16.vlgmr.msra.gmra.mxu3 %v794_v3 }
  0xea   : > { %603 = vmatpush.bf16.msrb.mxu3 %v986_v24 }
  0xec   : > { %v376_v5 = vpop.permute.xlu1 %375  ;;  %v293_v38 = vpop.permute.xlu0 %292 }
  0xed   : > { %v299_v24 = vsel %vm298_vm5, %v293_v38, %v1020_v54  ;;  %v380_v39 = vsel %vm367_vm8, %v376_v5, %v378_v36 }
  0xee   : > { %604 = vmatpush.bf16.msrb.mxu3 %v1001_v35  ;;  %510 = vmatpush.bf16.msra.mxu0 %v299_v24  ;;  %v808_v35 = vld [vmem:[%s1144_s2 + $0x4] sm:$0xf] }
  0xef   : > { %567 = vmatpush.bf16.msrb.mxu2 %v380_v39 }
  0xf2   : > { %605 = vmatpush.bf16.msrb.mxu3 %v1012_v45  ;;  %511 = vmatpush.bf16.msra.mxu0 %v924_v14  ;;  %v798_v14 = vor.u32 %v808_v35, %v795_v43 }
  0xf4   : > { %v364_v44 = vpop.permute.xlu1 %363  ;;  %v374_v45 = vpop.permute.xlu0 %373 }
  0xf5   : > { %v379_v46 = vsel %vm367_vm8, %v374_v45, %v376_v5  ;;  %v369_v47 = vsel %vm367_vm8, %v364_v44, %v366_v42 }
  0xf6   : > { %606 = vmatpush.bf16.msrb.mxu3 %v1005_v40  ;;  %512 = vmatpush.bf16.msra.mxu0 %v934_v17  ;;  %v467_v17 = vsel %vm465_vm4, %v1024_v57, %v458_v52 }
  0xf7   : > { %525 = vmatpush.bf16.msra.mxu1 %v379_v46  ;;  %568 = vmatpush.bf16.msrb.mxu2 %v369_v47 }
  0xf9   : > { %513 = vmatmul.bf16.vlgmr.msra.gmra.mxu0 %v794_v3 }
  0xfa   : > { %607 = vmatpush.bf16.msrb.mxu3 %v401_v13  ;;  %569 = vmatmul.bf16.vlgmr.msrb.gmra.mxu2 %v798_v14 }
  0xfc   : > { %v464_v40 = vpop.permute.xlu1 %463  ;;  %v362_v49 = vpop.permute.xlu0 %361 }
  0xfd   : > { %v368_v50 = vsel %vm367_vm8, %v362_v49, %v364_v44  ;;  %v469_v51 = vsel %vm465_vm4, %v996_v31, %v464_v40  ;;  %623 = vmatpush.bf16.msra.mxu2 %v464_v40 }
  0xfe   : > { %608 = vmatpush.bf16.msrb.mxu3 %v389_v27  ;;  %526 = vmatpush.bf16.msra.mxu1 %v368_v50 }
  0xff   : > { %581 = vmatpush.bf16.msrb.mxu0 %v469_v51 }
 0x101   : > { %527 = vmatmul.bf16.vlgmr.msra.gmra.mxu1 %v798_v14  ;;  %624 = vmatpush.bf16.msra.mxu2 %v458_v52 }
 0x102   : > { %589 = vmatpush.bf16.msrb.mxu1 %v988_v25  ;;  %609 = vmatpush.bf16.msrb.mxu3 %v378_v36 }
 0x103   : > { %582 = vmatpush.bf16.msrb.mxu0 %v467_v17 }
 0x106   : > { %590 = vmatpush.bf16.msrb.mxu1 %v967_v19  ;;  %610 = vmatpush.bf16.msrb.mxu3 %v366_v42 }
 0x109   : > { %611 = vmatmul.bf16.vlgmr.msrb.gmra.mxu3 %v798_v14  ;;  %804 = vmatmul.msk.bf16.vlgmr.msrb.gmra.mxu0 %vm501_vm6, %v1049_v9 }
 0x10a   : > { %591 = vmatpush.bf16.msrb.mxu1 %v979_v23  ;;  %805 = vmatmul.msk.bf16.vlgmr.msra.gmra.mxu2 %vm501_vm6, %v1049_v9 }
 0x10e   : > { %592 = vmatpush.bf16.msrb.mxu1 %v1016_v48 }
 0x112   : > { %593 = vmatpush.bf16.msrb.mxu1 %v1035_v1 }
 0x116   : > { %594 = vmatpush.bf16.msrb.mxu1 %v1056_v20 }
 0x11a   : > { %595 = vmatpush.bf16.msrb.mxu1 %v917_v10  ;;  %v637_v10 = vld [vmem:[%s1146_s4] sm:$0x7] }
 0x11b   : > { %v639_v63 = vperm.slane %v637_v10, 0  ;;  %v640_v2 = vperm.slane %v637_v10, 1  ;;  %v641_v38 = vperm.slane %v637_v10, 2 }
 0x11e   : > { %596 = vmatpush.bf16.msrb.mxu1 %v919_v11 }
 0x121   : > { %597 = vmatmul.bf16.vlgmr.msrb.gmra.mxu1 %v794_v3 }
 0x131   : > { %v479_v31 = vpop.permute.xlu0 %478 }
 0x132   : > { %v484_v59 = vpop.permute.xlu1 %483 }
 0x14c   : > { %v542_v19 = vpop.f32.mrf.mxu2 }
 0x154   : > { %v544_v25 = vpop.f32.mrf.mxu2 }
 0x16c   : > { %v556_v53 = vpop.f32.mrf.mxu3 }
 0x16d   : > { %v557_v48 = vadd.f32 %v556_v53, %v479_v31 }
 0x174   : > { %v558_v62 = vpop.f32.mrf.mxu3 }
 0x175   : > { %v559_v8 = vadd.f32 %v558_v62, %v484_v59 }
 0x176   : > { %v514_v23 = vpop.f32.mrf.mxu0 }
 0x177   : > { %v515_v54 = vadd.f32 %v514_v23, %v479_v31 }
 0x17d   : > { %v570_v55 = vpop.f32.mrf.mxu2 }
 0x17e   : > { %v516_v56 = vpop.f32.mrf.mxu0  ;;  %v528_v57 = vpop.f32.mrf.mxu1  ;;  %v571_v61 = vadd.f32 %v570_v55, %v557_v48 }
 0x17f   : > { %v529_v58 = vadd.f32 %v528_v57, %v515_v54  ;;  %v517_v11 = vadd.f32 %v516_v56, %v484_v59 }
 0x181   : > { %v543_v60 = vadd.f32 %v542_v19, %v529_v58 }
 0x183   : > { %v631_v4 = vmax.f32 %v543_v60, 0.0 }
 0x185   : > { %v572_v9 = vpop.f32.mrf.mxu2  ;;  %v645_v13 = vmul.f32 %v639_v63, %v631_v4 }
 0x186   : > { %v530_v0 = vpop.f32.mrf.mxu1  ;;  %v584_v1 = vpop.f32.mrf.mxu0  ;;  %v573_v18 = vadd.f32 %v572_v9, %v559_v8 }
 0x187   : > { %v531_v6 = vadd.f32 %v530_v0, %v517_v11  ;;  %v585_v7 = vadd.f32 %v584_v1, %v571_v61 }
 0x189   : > { %v632_v12 = vmax.f32 %v585_v7, 0.0  ;;  %v545_v15 = vadd.f32 %v544_v25, %v531_v6 }
 0x18b   : > { %v646_v16 = vmul.f32 %v640_v2, %v632_v12  ;;  %v634_v22 = vmax.f32 %v545_v15, 0.0 }
 0x18c   : > { %v612_v32 = vpop.f32.mrf.mxu3 }
 0x18d   : > { %v654_v20 = vpack.c.bf16 %v646_v16, %v645_v13  ;;  %v648_v28 = vmul.f32 %v639_v63, %v634_v22  ;;  %v626_v36 = vpop.f32.mrf.mxu2 }
 0x18e   : > { %v586_v21 = vpop.f32.mrf.mxu0 }
 0x18f   : > { %v587_v26 = vadd.f32 %v586_v21, %v573_v18  ;;  %662 = vrot.lane.b32.xlu2 %v654_v20, %s855_s8 }
 0x191   : > { %v635_v27 = vmax.f32 %v587_v26, 0.0 }
 0x193   : > { %v649_v29 = vmul.f32 %v640_v2, %v635_v27 }
 0x194   : > { %v614_v35 = vpop.f32.mrf.mxu3 }
 0x195   : > { %v656_v30 = vpack.c.bf16 %v649_v29, %v648_v28  ;;  %v628_v45 = vpop.f32.mrf.mxu2 }
 0x197   : > { %666 = vrot.lane.b32.xlu1 %v656_v30, %s855_s8 }
 0x19e   : > { %v598_v33 = vpop.f32.mrf.mxu1 }
 0x19f   : > { %v599_v3 = vadd.f32 %v598_v33, %v479_v31 }
 0x1a1   : > { %v613_v37 = vadd.f32 %v612_v32, %v599_v3 }
 0x1a3   : > { %v627_v5 = vadd.f32 %v626_v36, %v613_v37 }
 0x1a5   : > { %v633_v24 = vmax.f32 %v627_v5, 0.0 }
 0x1a6   : > { %v600_v39 = vpop.f32.mrf.mxu1 }
 0x1a7   : > { %v601_v41 = vadd.f32 %v600_v39, %v484_v59  ;;  %v647_v42 = vmul.f32 %v641_v38, %v633_v24 }
 0x1a9   : > { %v615_v43 = vadd.f32 %v614_v35, %v601_v41  ;;  %v655_v44 = vpack.c.bf16 %v647_v42, %v647_v42 }
 0x1ab   : > { %v629_v46 = vadd.f32 %v628_v45, %v615_v43  ;;  %664 = vrot.lane.b32.xlu2 %v655_v44, %s855_s8 }
 0x1ad   : > { %v636_v47 = vmax.f32 %v629_v46, 0.0 }
 0x1af   : > { %v650_v14 = vmul.f32 %v641_v38, %v636_v47 }
 0x1b1   : > { %v657_v40 = vpack.c.bf16 %v650_v14, %v650_v14 }
 0x1b3   : > { %668 = vrot.lane.b32.xlu0 %v657_v40, %s855_s8 }
 0x1e9   : > { %v663_v49 = vpop.permute.xlu2 %662 }
 0x1ea   : > { %v670_v50 = vrot.slane %v663_v49, 4 }
 0x1ec   : > { %v673_v51 = vsel %vm672_vm12, %v670_v50, %v663_v49 }
 0x1ed   : > { %684 = vst.msk [vmem:[%s1121_s7] sm:$0xff] %vm683_vm13, %v673_v51 }
 0x205   : > { %v665_v52 = vpop.permute.xlu2 %664 }
 0x206   : > { %v674_v17 = vsel %vm672_vm12, %v670_v50, %v665_v52 }
 0x207   : > { %686 = vst.msk [vmem:[%s1121_s7 + $0x8] sm:$0xf] %vm685_vm14, %v674_v17 }
 0x208   : > { %690 = vst.msk [vmem:[%s1121_s7 + $0x8] sm:$0xf] %vm689_vm15, %v854_v34 }
 0x209   : > { %v667_v19 = vpop.permute.xlu1 %666 }
 0x20a   : > { %v671_v25 = vrot.slane %v667_v19, 4 }
 0x20c   : > { %v675_v23 = vsel %vm672_vm12, %v671_v25, %v667_v19 }
 0x20d   : > { %687 = vst.msk [vmem:[%s1121_s7 + $0xc] sm:$0xff] %vm683_vm13, %v675_v23 }
 0x225   : > { %v669_v31 = vpop.permute.xlu0 %668 }
 0x226   : > { %v676_v53 = vsel %vm672_vm12, %v671_v25, %v669_v31 }
 0x227   : > { %688 = vst.msk [vmem:[%s1121_s7 + $0x14] sm:$0xf] %vm685_vm14, %v676_v53 }
 0x228   : > { %691 = vst.msk [vmem:[%s1121_s7 + $0x14] sm:$0xf] %vm689_vm15, %v854_v34 }
 0x229 PF: > { %s15_s18 = sadd.s32 1, %s844_s18  }
 0x22a   : > { %p12_p4 = scmp.ge.s32.totalorder %s15_s18, 4  }
 0x22c   :  { %14 = sbr.rel (!%p12_p4) target bundleno = 1 (0x1), region = 73 }

</bundles_post_ra>
